<compile_context>
chip_gen: v5e
topology: v5e:2x2
jax: 0.10.0
libtpu: 0.0.40
codegen_flags: <defaults>
</compile_context>

<pallas_src>
import functools

import jax
import jax.numpy as jnp
from jax.experimental import pallas as pl
from jax.experimental.pallas import tpu as pltpu

PAD = 0  # Constants.PAD

# v5e scoped default is 16 MiB, v7x physical is 64 MiB: pick an explicit
# budget that is valid on every generation and leaves headroom on v7x.
_VMEM_LIMIT_BYTES = 48 * 1024 * 1024

_MAX_TIME_CHUNK = 32   # unrolled recurrence steps per grid step (~600-cycle amortization)


# ----------------------------------------------------------------------------
# Small static helpers
# ----------------------------------------------------------------------------
def _row_tile(rows, max_tile=512):
    """Largest row tile <= max_tile dividing `rows`, preferring >=2 tiles so
    the 'parallel' grid axis can shard across v7x's two TensorCores."""
    limit = min(max_tile, max(16, rows // 2))
    for cand in (512, 256, 128, 64, 32, 16):
        if cand <= limit and rows % cand == 0:
            return cand
    return rows


def _batch_tile(Bp):
    """Batch tile for the recurrence grid (multiple of 8, >=2 tiles when the
    padded batch allows it, for v7x megacore)."""
    limit = max(8, Bp // 2)
    for cand in (128, 64, 32, 16, 8):
        if cand <= limit and Bp % cand == 0:
            return cand
    return Bp


def _time_chunks(T):
    """Split T into nc chunks of TC steps with minimal padding (TC <= 32)."""
    nc = -(-T // _MAX_TIME_CHUNK)
    TC = -(-T // nc)
    return TC, nc, TC * nc


# ----------------------------------------------------------------------------
# Single-buffered (Buffered(1)) constant blocks, with a capability probe
# ----------------------------------------------------------------------------
def _probe_kernel(x_ref, o_ref):
    o_ref[...] = x_ref[...] + 1.0


@functools.lru_cache(maxsize=1)
def _single_buffer_ok():
    """Probe whether BlockSpec(pipeline_mode=pl.Buffered(1)) is supported."""
    try:
        out = pl.pallas_call(
            _probe_kernel,
            out_shape=jax.ShapeDtypeStruct((16, 128), jnp.float32),
            grid=(2,),
            in_specs=[pl.BlockSpec((8, 128), lambda i: (0, 0),
                                   pipeline_mode=pl.Buffered(1))],
            out_specs=pl.BlockSpec((8, 128), lambda i: (i, 0)),
        )(jnp.zeros((8, 128), jnp.float32))
        jax.block_until_ready(out)
        return True
    except Exception:
        return False


def _block(shape, index_map, *, single=False):
    """BlockSpec; constant-index (weight/bias) blocks are single-buffered so
    the default 2-deep pipeline buffer does not waste VMEM."""
    if single and _single_buffer_ok():
        return pl.BlockSpec(shape, index_map, pipeline_mode=pl.Buffered(1))
    return pl.BlockSpec(shape, index_map)


# ----------------------------------------------------------------------------
# Pallas kernels
# ----------------------------------------------------------------------------
def _linear_bidir_kernel(xf_ref, xb_ref, wf_ref, wb_ref, b_ref, o_ref):
    """Final projection U(concat(fwd,bwd)) with the concat fused away.
    bf16 operands, f32 accumulation / output."""
    o_ref[...] = (jnp.dot(xf_ref[...], wf_ref[...], preferred_element_type=jnp.float32)
                  + jnp.dot(xb_ref[...], wb_ref[...], preferred_element_type=jnp.float32)
                  + b_ref[...]).astype(o_ref.dtype)


def _make_bigru_kernel(n_streams, TC, H, nc, T_real):
    """Fused fwd+bwd GRU over one (batch-tile, time-chunk) grid cell.

    The x->gates matmuls (with b_ih and the r/z half of b_hh folded in) are
    computed inside the kernel from the bf16 input stream chunks, so the
    (T,B,3H) gate tensor never touches HBM.  Only f32 gate math and the
    h@W_hh matmul are on the sequential h-dependence chain.  Padded time
    steps (T padded up to nc*TC) are masked in the backward direction so its
    hidden state stays zero until real data starts.
    """
    padded = (nc * TC) != T_real

    def kernel(*refs):
        idx = 0
        xs_f = refs[idx:idx + n_streams]; idx += n_streams       # fwd-order chunks
        xs_b = refs[idx:idx + n_streams]; idx += n_streams       # reversed-chunk order
        w_f_refs = refs[idx:idx + n_streams]; idx += n_streams   # x->gates weights, fwd dir
        w_b_refs = refs[idx:idx + n_streams]; idx += n_streams   # x->gates weights, bwd dir
        whf_ref, whb_ref = refs[idx], refs[idx + 1]; idx += 2
        bgf_ref, bgb_ref = refs[idx], refs[idx + 1]; idx += 2
        bnf_ref, bnb_ref = refs[idx], refs[idx + 1]; idx += 2
        of_ref, ob_ref = refs[idx], refs[idx + 1]; idx += 2
        hf_s, hb_s = refs[idx], refs[idx + 1]

        c = pl.program_id(1)

        @pl.when(c == 0)
        def _():
            hf_s[...] = jnp.zeros(hf_s.shape, hf_s.dtype)
            hb_s[...] = jnp.zeros(hb_s.shape, hb_s.dtype)

        BT = hf_s.shape[0]

        # Hoist loop-invariant loads / broadcasts out of the unrolled loop.
        w_f = [r[...] for r in w_f_refs]
        w_b = [r[...] for r in w_b_refs]
        whf = whf_ref[...]
        whb = whb_ref[...]
        bgf = bgf_ref[...]                                   # (1, 3H) f32
        bgb = bgb_ref[...]
        bnf = jnp.broadcast_to(bnf_ref[...], (BT, H))        # n-gate hidden bias
        bnb = jnp.broadcast_to(bnb_ref[...], (BT, H))

        def in_gates(x_refs, ws, bias, t):
            acc = None
            for x_ref, w in zip(x_refs, ws):
                d = jnp.dot(x_ref[t], w, preferred_element_type=jnp.float32)
                acc = d if acc is None else acc + d
            return acc + bias                                 # (BT, 3H) f32

        def gru_step(gx, gh, bn, h_prev):
            # PyTorch gate order: r, z, n.
            r = jax.nn.sigmoid(gx[:, 0:H] + gh[:, 0:H])
            z = jax.nn.sigmoid(gx[:, H:2 * H] + gh[:, H:2 * H])
            n = jnp.tanh(gx[:, 2 * H:3 * H] + r * (gh[:, 2 * H:3 * H] + bn))
            return (1.0 - z) * n + z * h_prev

        hf = hf_s[...]
        hb = hb_s[...]
        bwd_t0 = (nc - 1 - c) * TC        # global time of the bwd chunk's first row

        # Fully unrolled chunk loop (static TC) amortizes per-grid-step
        # overhead and keeps every index static.
        for i in range(TC):
            # forward direction: chunk-local step i
            gxf = in_gates(xs_f, w_f, bgf, i)
            ghf = jnp.dot(hf.astype(whf.dtype), whf, preferred_element_type=jnp.float32)
            hf = gru_step(gxf, ghf, bnf, hf)
            of_ref[i] = hf.astype(of_ref.dtype)

            # backward direction walks its (time-reversed) chunk back-to-front
            j = TC - 1 - i
            gxb = in_gates(xs_b, w_b, bgb, j)
            ghb = jnp.dot(hb.astype(whb.dtype), whb, preferred_element_type=jnp.float32)
            hb_new = gru_step(gxb, ghb, bnb, hb)
            if padded:
                # Padded (t >= T_real) steps are processed FIRST by the bwd
                # direction; keep its hidden state at zero through them.
                hb = jnp.where(bwd_t0 + j < T_real, hb_new, hb)
            else:
                hb = hb_new
            ob_ref[j] = hb.astype(ob_ref.dtype)

        hf_s[...] = hf
        hb_s[...] = hb

    return kernel


# ----------------------------------------------------------------------------
# Wrappers (pallas_call setup)
# ----------------------------------------------------------------------------
def bigru_layer(streams, w_in_f, w_in_b, w_hh_f, w_hh_b, bg_f, bg_b, bn_f, bn_b,
                *, TC, BT, T_real):
    """One fused bidirectional GRU layer.

    streams: tuple of bf16 input streams, each (Tp, Bp, Din_s).  Layer 0 has a
    single stream (the embeddings); deeper layers have (fwd_prev, bwd_prev) so
    the (T,B,2H) concat never materializes.  Returns (fwd, bwd) bf16 outputs.
    """
    Tp, Bp, _ = streams[0].shape
    H = w_hh_f.shape[0]
    G = 3 * H
    nc = Tp // TC
    nb = Bp // BT
    n_streams = len(streams)

    fwd_map = lambda b, c: (c, b, 0)
    bwd_map = lambda b, c: (nc - 1 - c, b, 0)   # bwd dir consumes reversed chunks
    const = lambda b, c: (0, 0)

    in_specs, args = [], []
    for x in streams:                                  # forward-ordered chunks
        in_specs.append(pl.BlockSpec((TC, BT, x.shape[-1]), fwd_map))
        args.append(x)
    for x in streams:                                  # reversed-chunk-order reads
        in_specs.append(pl.BlockSpec((TC, BT, x.shape[-1]), bwd_map))
        args.append(x)
    for w in w_in_f:
        in_specs.append(_block((w.shape[0], G), const, single=True)); args.append(w)
    for w in w_in_b:
        in_specs.append(_block((w.shape[0], G), const, single=True)); args.append(w)
    for w in (w_hh_f, w_hh_b):
        in_specs.append(_block((H, G), const, single=True)); args.append(w)
    for b in (bg_f, bg_b):
        in_specs.append(_block((1, G), const, single=True)); args.append(b)
    for b in (bn_f, bn_b):
        in_specs.append(_block((1, H), const, single=True)); args.append(b)

    kernel = _make_bigru_kernel(n_streams, TC, H, nc, T_real)

    return pl.pallas_call(
        kernel,
        out_shape=(jax.ShapeDtypeStruct((Tp, Bp, H), jnp.bfloat16),
                   jax.ShapeDtypeStruct((Tp, Bp, H), jnp.bfloat16)),
        grid_spec=pltpu.PrefetchScalarGridSpec(
            num_scalar_prefetch=0,
            grid=(nb, nc),
            in_specs=in_specs,
            out_specs=[pl.BlockSpec((TC, BT, H), fwd_map),
                       pl.BlockSpec((TC, BT, H), bwd_map)],
            scratch_shapes=[pltpu.VMEM((BT, H), jnp.float32),
                            pltpu.VMEM((BT, H), jnp.float32)],
        ),
        compiler_params=pltpu.CompilerParams(
            dimension_semantics=("parallel", "arbitrary"),
            vmem_limit_bytes=_VMEM_LIMIT_BYTES),
    )(*args)


def linear_bidir(xf2d, xb2d, wf, wb, b):
    """xf2d/xb2d: (rows, H) bf16.  wf/wb: (H, N) bf16.  b: (1, N) f32 -> (rows, N) f32."""
    rows, H = xf2d.shape
    N = wf.shape[1]
    TM = _row_tile(rows)
    return pl.pallas_call(
        _linear_bidir_kernel,
        out_shape=jax.ShapeDtypeStruct((rows, N), jnp.float32),
        grid=(rows // TM,),
        in_specs=[
            pl.BlockSpec((TM, H), lambda i: (i, 0)),
            pl.BlockSpec((TM, H), lambda i: (i, 0)),
            _block((H, N), lambda i: (0, 0), single=True),
            _block((H, N), lambda i: (0, 0), single=True),
            _block((1, N), lambda i: (0, 0), single=True),
        ],
        out_specs=pl.BlockSpec((TM, N), lambda i: (i, 0)),
        compiler_params=pltpu.CompilerParams(
            dimension_semantics=("parallel",),
            vmem_limit_bytes=_VMEM_LIMIT_BYTES),
    )(xf2d, xb2d, wf, wb, b)


# ----------------------------------------------------------------------------
# One-time parameter preparation (hoisted out of the forward pass)
# ----------------------------------------------------------------------------
def prepare_params(params):
    """bf16 weight casts, w_ih split into per-stream halves, b_ih + b_hh[:,:2H]
    folded into the precomputed gate bias, n-gate hidden bias extracted."""
    H = params["d_model"]
    prep = {
        "d_model": H,
        "emb": params["emb"].astype(jnp.bfloat16),
        "u_wf": params["u_w"][:H].astype(jnp.bfloat16),
        "u_wb": params["u_w"][H:].astype(jnp.bfloat16),
        "u_b": params["u_b"].astype(jnp.float32),
        "layers": [],
    }
    zeros_h = jnp.zeros((1, H), jnp.float32)
    for li, lp in enumerate(params["gru_layers"]):
        entry = {}
        for sfx in ("f", "b"):
            w_ih = lp[f"w_ih_{sfx}"]
            if li == 0:
                entry[f"w_in_{sfx}"] = (w_ih.astype(jnp.bfloat16),)
            else:  # [:H] multiplies the fwd stream, [H:] the bwd stream
                entry[f"w_in_{sfx}"] = (w_ih[:H].astype(jnp.bfloat16),
                                        w_ih[H:].astype(jnp.bfloat16))
            entry[f"w_hh_{sfx}"] = lp[f"w_hh_{sfx}"].astype(jnp.bfloat16)
            entry[f"bg_{sfx}"] = (lp[f"b_ih_{sfx}"] + jnp.concatenate(
                [lp[f"b_hh_{sfx}"][:, :2 * H], zeros_h], axis=1)).astype(jnp.float32)
            entry[f"bn_{sfx}"] = lp[f"b_hh_{sfx}"][:, 2 * H:].astype(jnp.float32)
        prep["layers"].append(entry)
    return prep


# ----------------------------------------------------------------------------
# Forward pass (RNNEncoder.forward semantics, onehot=False, eval mode)
# ----------------------------------------------------------------------------
def rnn_encoder_forward(prep, src_seq, adj=None, src_pos=None):
    del adj, src_pos
    H = prep["d_model"]
    B, T = src_seq.shape

    # Embedding gather (glue, plain JAX) produced time-major (T, B, D) bf16.
    x = jnp.take(prep["emb"], src_seq.T, axis=0)

    # Pad batch to a sublane multiple and time up to a chunk multiple (padded
    # time steps are masked in the backward recurrence; padded rows sliced off).
    TC, nc, Tp = _time_chunks(T)
    Bp = ((B + 7) // 8) * 8
    if (Tp, Bp) != (T, B):
        x = jnp.pad(x, ((0, Tp - T), (0, Bp - B), (0, 0)))
    BT = _batch_tile(Bp)

    streams = (x,)
    for layer in prep["layers"]:
        streams = bigru_layer(
            streams, layer["w_in_f"], layer["w_in_b"],
            layer["w_hh_f"], layer["w_hh_b"],
            layer["bg_f"], layer["bg_b"], layer["bn_f"], layer["bn_b"],
            TC=TC, BT=BT, T_real=T)
        # TODO(synk): inter-layer dropout (p=0.1) omitted — deterministic eval semantics.

    rows = Tp * Bp
    y = linear_bidir(streams[0].reshape(rows, H), streams[1].reshape(rows, H),
                     prep["u_wf"], prep["u_wb"], prep["u_b"])
    # TODO(synk): fold this time->batch-major transpose into the linear kernel's
    #             out BlockSpec (needs an in-kernel (TT,BB,H)->(BB,TT,H) relayout).
    y = y.reshape(Tp, Bp, H)[:T, :B].transpose(1, 0, 2)   # back to (B, T, H)
    return y, None


# ----------------------------------------------------------------------------
# Pure-JAX f32 reference (for correctness check)
# ----------------------------------------------------------------------------
def _gru_dir_ref(x_tbd, w_ih_t, w_hh_t, b_ih, b_hh, H, reverse):
    xs = x_tbd[::-1] if reverse else x_tbd

    def step(h, x_t):
        gx = x_t @ w_ih_t + b_ih
        gh = h @ w_hh_t + b_hh
        r = jax.nn.sigmoid(gx[:, :H] + gh[:, :H])
        z = jax.nn.sigmoid(gx[:, H:2 * H] + gh[:, H:2 * H])
        n = jnp.tanh(gx[:, 2 * H:] + r * gh[:, 2 * H:])
        h_new = (1.0 - z) * n + z * h
        return h_new, h_new

    h0 = jnp.zeros((x_tbd.shape[1], H), jnp.float32)
    _, ys = jax.lax.scan(step, h0, xs)
    return ys[::-1] if reverse else ys


def rnn_encoder_ref(params, src_seq):
    H = params["d_model"]
    x = jnp.take(params["emb"], src_seq, axis=0)
    x = jnp.transpose(x, (1, 0, 2)).astype(jnp.float32)
    for layer in params["gru_layers"]:
        fwd = _gru_dir_ref(x, layer["w_ih_f"], layer["w_hh_f"],
                           layer["b_ih_f"], layer["b_hh_f"], H, reverse=False)
        bwd = _gru_dir_ref(x, layer["w_ih_b"], layer["w_hh_b"],
                           layer["b_ih_b"], layer["b_hh_b"], H, reverse=True)
        x = jnp.concatenate([fwd, bwd], axis=-1)
    y = x @ params["u_w"] + params["u_b"]
    return jnp.transpose(y, (1, 0, 2))


# ----------------------------------------------------------------------------
# Deterministic parameter init (raw f32, used by the reference)
# ----------------------------------------------------------------------------
def init_params(key, n_src_vocab, d_word_vec, d_model, n_layers):
    keys = iter(jax.random.split(key, 4 + 8 * n_layers))
    scale = 0.1

    emb = scale * jax.random.normal(next(keys), (n_src_vocab, d_word_vec), jnp.float32)
    emb = emb.at[PAD].set(0.0)  # padding_idx=PAD

    H = d_model
    gru_layers = []
    for layer in range(n_layers):
        d_in = d_word_vec if layer == 0 else 2 * H
        lp = {}
        for suffix in ("f", "b"):
            # PyTorch weight_ih: (3H, d_in), weight_hh: (3H, H); stored transposed.
            lp[f"w_ih_{suffix}"] = scale * jax.random.normal(next(keys), (d_in, 3 * H), jnp.float32)
            lp[f"w_hh_{suffix}"] = scale * jax.random.normal(next(keys), (H, 3 * H), jnp.float32)
            lp[f"b_ih_{suffix}"] = scale * jax.random.normal(next(keys), (1, 3 * H), jnp.float32)
            lp[f"b_hh_{suffix}"] = scale * jax.random.normal(next(keys), (1, 3 * H), jnp.float32)
        gru_layers.append(lp)

    u_w = scale * jax.random.normal(next(keys), (2 * H, H), jnp.float32)  # U.weight.T
    u_b = scale * jax.random.normal(next(keys), (1, H), jnp.float32)

    return {"emb": emb, "gru_layers": gru_layers, "u_w": u_w, "u_b": u_b,
            "d_model": d_model}


# ----------------------------------------------------------------------------
if __name__ == "__main__":
    def run_case(key, B, T, n_src_vocab, d_word_vec, d_model, n_layers, tol):
        k_param, k_seq = jax.random.split(key)
        params = init_params(k_param, n_src_vocab, d_word_vec, d_model, n_layers)
        prep = prepare_params(params)
        src_seq = jax.random.randint(k_seq, (B, T), 0, n_src_vocab, dtype=jnp.int32)

        out, attns = rnn_encoder_forward(prep, src_seq, adj=None, src_pos=None)
        out = jax.block_until_ready(out)
        assert out.shape == (B, T, d_model)
        assert attns is None

        ref = jax.block_until_ready(rnn_encoder_ref(params, src_seq))
        err = float(jnp.max(jnp.abs(out - ref)))
        # bf16 matmul operands (f32 accumulation / gate math) vs. a pure-f32
        # reference: relaxed tolerance per the review's correctness note.
        if err > tol:
            raise AssertionError(f"Pallas kernel mismatch vs reference: max abs err {err}")

    root = jax.random.PRNGKey(0)
    k1, k2 = jax.random.split(root)
    # Even-divide path: no padding anywhere.
    run_case(k1, B=2, T=24, n_src_vocab=16, d_word_vec=32, d_model=32, n_layers=2, tol=2e-2)
    # Exercises batch padding, time padding and the backward-direction pad masking.
    run_case(k2, B=3, T=35, n_src_vocab=16, d_word_vec=32, d_model=32, n_layers=2, tol=2e-2)

    print("KERNEL_OK")
</pallas_src>

<mosaic_0001>
module attributes {stable_mosaic.version = 11 : i64} {
  func.func @_probe_kernel(%arg0: i32, %arg1: memref<8x128xf32, #tpu.memory_space<vmem>>, %arg2: memref<8x128xf32, #tpu.memory_space<vmem>>) attributes {dimension_semantics = [#tpu.dimension_semantics<arbitrary>], iteration_bounds = array<i64: 2>, scalar_prefetch = 0 : i64, scratch_operands = 0 : i64, tpu.core_type = #tpu.core_type<tc>, window_params = [{pipeline_mode = #tpu.pipeline_mode<synchronous>, transform_indices = @transform_0, window_bounds = array<i64: 8, 128>}, {transform_indices = @transform_1, window_bounds = array<i64: 8, 128>}]} {
    %c0 = arith.constant 0 : index
    %c0_0 = arith.constant 0 : index
    %0 = vector.load %arg1[%c0, %c0_0] : memref<8x128xf32, #tpu.memory_space<vmem>>, vector<8x128xf32>
    %cst = arith.constant 1.000000e+00 : f32
    %1 = vector.broadcast %cst : f32 to vector<8x128xf32>
    %2 = arith.addf %0, %1 : vector<8x128xf32>
    %c0_1 = arith.constant 0 : index
    %c0_2 = arith.constant 0 : index
    %3 = vector.load %arg2[%c0_1, %c0_2] : memref<8x128xf32, #tpu.memory_space<vmem>>, vector<8x128xf32>
    tpu.vector_store %arg2[%c0_1, %c0_2], %2 {strides = array<i32>} : memref<8x128xf32, #tpu.memory_space<vmem>>, vector<8x128xf32>,
    return
  }
  func.func @transform_0(%arg0: i32) -> (i32, i32) {
    %c0_i32 = arith.constant 0 : i32
    %c0_i32_0 = arith.constant 0 : i32
    %c0_i32_1 = arith.constant 0 : i32
    return %c0_i32, %c0_i32_0 : i32, i32
  }
  func.func @transform_1(%arg0: i32) -> (i32, i32) {
    %c0_i32 = arith.constant 0 : i32
    %c0_i32_0 = arith.constant 0 : i32
    return %arg0, %c0_i32 : i32, i32
  }
}

module attributes {stable_mosaic.version = 11 : i64} {
  func.func @kernel(%arg0: i32, %arg1: i32, %arg2: memref<24x8x32xbf16, #tpu.memory_space<vmem>>, %arg3: memref<24x8x32xbf16, #tpu.memory_space<vmem>>, %arg4: memref<32x96xbf16, #tpu.memory_space<vmem>>, %arg5: memref<32x96xbf16, #tpu.memory_space<vmem>>, %arg6: memref<32x96xbf16, #tpu.memory_space<vmem>>, %arg7: memref<32x96xbf16, #tpu.memory_space<vmem>>, %arg8: memref<1x96xf32, #tpu.memory_space<vmem>>, %arg9: memref<1x96xf32, #tpu.memory_space<vmem>>, %arg10: memref<1x32xf32, #tpu.memory_space<vmem>>, %arg11: memref<1x32xf32, #tpu.memory_space<vmem>>, %arg12: memref<24x8x32xbf16, #tpu.memory_space<vmem>>, %arg13: memref<24x8x32xbf16, #tpu.memory_space<vmem>>, %arg14: memref<8x32xf32, #tpu.memory_space<vmem>>, %arg15: memref<8x32xf32, #tpu.memory_space<vmem>>) attributes {dimension_semantics = [#tpu.dimension_semantics<parallel>, #tpu.dimension_semantics<arbitrary>], iteration_bounds = array<i64: 1, 1>, scalar_prefetch = 0 : i64, scratch_operands = 2 : i64, tpu.core_type = #tpu.core_type<tc>, window_params = [{transform_indices = @transform_0, window_bounds = array<i64: 24, 8, 32>}, {transform_indices = @transform_1, window_bounds = array<i64: 24, 8, 32>}, {pipeline_mode = #tpu.pipeline_mode<synchronous>, transform_indices = @transform_2, window_bounds = array<i64: 32, 96>}, {pipeline_mode = #tpu.pipeline_mode<synchronous>, transform_indices = @transform_3, window_bounds = array<i64: 32, 96>}, {pipeline_mode = #tpu.pipeline_mode<synchronous>, transform_indices = @transform_4, window_bounds = array<i64: 32, 96>}, {pipeline_mode = #tpu.pipeline_mode<synchronous>, transform_indices = @transform_5, window_bounds = array<i64: 32, 96>}, {pipeline_mode = #tpu.pipeline_mode<synchronous>, transform_indices = @transform_6, window_bounds = array<i64: 1, 96>}, {pipeline_mode = #tpu.pipeline_mode<synchronous>, transform_indices = @transform_7, window_bounds = array<i64: 1, 96>}, {pipeline_mode = #tpu.pipeline_mode<synchronous>, transform_indices = @transform_8, window_bounds = array<i64: 1, 32>}, {pipeline_mode = #tpu.pipeline_mode<synchronous>, transform_indices = @transform_9, window_bounds = array<i64: 1, 32>}, {transform_indices = @transform_10, window_bounds = array<i64: 24, 8, 32>}, {transform_indices = @transform_11, window_bounds = array<i64: 24, 8, 32>}]} {
    %c0_i32 = arith.constant 0 : i32
    %0 = arith.cmpi eq, %arg1, %c0_i32 : i32
    %1 = arith.extui %0 : i1 to i32
    %c0_i32_0 = arith.constant 0 : i32
    %2 = arith.cmpi ne, %1, %c0_i32_0 : i32
    scf.if %2 {
      %cst_528 = arith.constant 0.000000e+00 : f32
      %1843 = vector.broadcast %cst_528 : f32 to vector<8x32xf32>
      %c0_529 = arith.constant 0 : index
      %c0_530 = arith.constant 0 : index
      %1844 = vector.load %arg14[%c0_529, %c0_530] : memref<8x32xf32, #tpu.memory_space<vmem>>, vector<8x32xf32>
      tpu.vector_store %arg14[%c0_529, %c0_530], %1843 {strides = array<i32>} : memref<8x32xf32, #tpu.memory_space<vmem>>, vector<8x32xf32>,
      %cst_531 = arith.constant 0.000000e+00 : f32
      %1845 = vector.broadcast %cst_531 : f32 to vector<8x32xf32>
      %c0_532 = arith.constant 0 : index
      %c0_533 = arith.constant 0 : index
      %1846 = vector.load %arg15[%c0_532, %c0_533] : memref<8x32xf32, #tpu.memory_space<vmem>>, vector<8x32xf32>
      tpu.vector_store %arg15[%c0_532, %c0_533], %1845 {strides = array<i32>} : memref<8x32xf32, #tpu.memory_space<vmem>>, vector<8x32xf32>,
    } else {
    }
    %c0 = arith.constant 0 : index
    %c0_1 = arith.constant 0 : index
    %3 = vector.load %arg4[%c0, %c0_1] : memref<32x96xbf16, #tpu.memory_space<vmem>>, vector<32x96xbf16>
    %c0_2 = arith.constant 0 : index
    %c0_3 = arith.constant 0 : index
    %4 = vector.load %arg5[%c0_2, %c0_3] : memref<32x96xbf16, #tpu.memory_space<vmem>>, vector<32x96xbf16>
    %c0_4 = arith.constant 0 : index
    %c0_5 = arith.constant 0 : index
    %5 = vector.load %arg6[%c0_4, %c0_5] : memref<32x96xbf16, #tpu.memory_space<vmem>>, vector<32x96xbf16>
    %c0_6 = arith.constant 0 : index
    %c0_7 = arith.constant 0 : index
    %6 = vector.load %arg7[%c0_6, %c0_7] : memref<32x96xbf16, #tpu.memory_space<vmem>>, vector<32x96xbf16>
    %c0_8 = arith.constant 0 : index
    %c0_9 = arith.constant 0 : index
    %7 = vector.load %arg8[%c0_8, %c0_9] : memref<1x96xf32, #tpu.memory_space<vmem>>, vector<1x96xf32>
    %c0_10 = arith.constant 0 : index
    %c0_11 = arith.constant 0 : index
    %8 = vector.load %arg9[%c0_10, %c0_11] : memref<1x96xf32, #tpu.memory_space<vmem>>, vector<1x96xf32>
    %c0_12 = arith.constant 0 : index
    %c0_13 = arith.constant 0 : index
    %9 = vector.load %arg10[%c0_12, %c0_13] : memref<1x32xf32, #tpu.memory_space<vmem>>, vector<1x32xf32>
    %10 = vector.shape_cast %9 : vector<1x32xf32> to vector<1x32xf32>
    %11 = vector.broadcast %10 : vector<1x32xf32> to vector<8x32xf32>
    %c0_14 = arith.constant 0 : index
    %c0_15 = arith.constant 0 : index
    %12 = vector.load %arg11[%c0_14, %c0_15] : memref<1x32xf32, #tpu.memory_space<vmem>>, vector<1x32xf32>
    %13 = vector.shape_cast %12 : vector<1x32xf32> to vector<1x32xf32>
    %14 = vector.broadcast %13 : vector<1x32xf32> to vector<8x32xf32>
    %c0_16 = arith.constant 0 : index
    %c0_17 = arith.constant 0 : index
    %15 = vector.load %arg14[%c0_16, %c0_17] : memref<8x32xf32, #tpu.memory_space<vmem>>, vector<8x32xf32>
    %c0_18 = arith.constant 0 : index
    %c0_19 = arith.constant 0 : index
    %16 = vector.load %arg15[%c0_18, %c0_19] : memref<8x32xf32, #tpu.memory_space<vmem>>, vector<8x32xf32>
    %c0_20 = arith.constant 0 : index
    %c0_21 = arith.constant 0 : index
    %c0_22 = arith.constant 0 : index
    %17 = vector.load %arg2[%c0_20, %c0_21, %c0_22] : memref<24x8x32xbf16, #tpu.memory_space<vmem>>, vector<1x8x32xbf16>
    %18 = vector.shape_cast %17 : vector<1x8x32xbf16> to vector<8x32xbf16>
    %cst = arith.constant dense<0.000000e+00> : vector<8x96xf32>
    %19 = tpu.matmul %18, %3, %cst {dimension_numbers = #tpu.dot_dimension_numbers<[1], [0], [0], [1], [0, 0, 1, 1], [], []>} : vector<8x32xbf16>, vector<32x96xbf16>, vector<8x96xf32> -> vector<8x96xf32>
    %20 = vector.broadcast %7 : vector<1x96xf32> to vector<8x96xf32>
    %21 = arith.addf %19, %20 : vector<8x96xf32>
    %22 = arith.truncf %15 : vector<8x32xf32> to vector<8x32xbf16>
    %cst_23 = arith.constant dense<0.000000e+00> : vector<8x96xf32>
    %23 = tpu.matmul %22, %5, %cst_23 {dimension_numbers = #tpu.dot_dimension_numbers<[1], [0], [0], [1], [0, 0, 1, 1], [], []>} : vector<8x32xbf16>, vector<32x96xbf16>, vector<8x96xf32> -> vector<8x96xf32>
    %24 = vector.extract_strided_slice %21 {offsets = [0, 0], sizes = [8, 32], strides = [1, 1]} : vector<8x96xf32> to vector<8x32xf32>
    %25 = vector.extract_strided_slice %23 {offsets = [0, 0], sizes = [8, 32], strides = [1, 1]} : vector<8x96xf32> to vector<8x32xf32>
    %26 = arith.addf %24, %25 : vector<8x32xf32>
    %27 = arith.negf %26 : vector<8x32xf32>
    %28 = math.exp %27 : vector<8x32xf32>
    %cst_24 = arith.constant 1.000000e+00 : f32
    %29 = vector.broadcast %cst_24 : f32 to vector<8x32xf32>
    %30 = arith.addf %29, %28 : vector<8x32xf32>
    %31 = arith.divf %29, %30 : vector<8x32xf32>
    %32 = vector.extract_strided_slice %21 {offsets = [0, 32], sizes = [8, 32], strides = [1, 1]} : vector<8x96xf32> to vector<8x32xf32>
    %33 = vector.extract_strided_slice %23 {offsets = [0, 32], sizes = [8, 32], strides = [1, 1]} : vector<8x96xf32> to vector<8x32xf32>
    %34 = arith.addf %32, %33 : vector<8x32xf32>
    %35 = arith.negf %34 : vector<8x32xf32>
    %36 = math.exp %35 : vector<8x32xf32>
    %cst_25 = arith.constant 1.000000e+00 : f32
    %37 = vector.broadcast %cst_25 : f32 to vector<8x32xf32>
    %38 = arith.addf %37, %36 : vector<8x32xf32>
    %39 = arith.divf %37, %38 : vector<8x32xf32>
    %40 = vector.extract_strided_slice %21 {offsets = [0, 64], sizes = [8, 32], strides = [1, 1]} : vector<8x96xf32> to vector<8x32xf32>
    %41 = vector.extract_strided_slice %23 {offsets = [0, 64], sizes = [8, 32], strides = [1, 1]} : vector<8x96xf32> to vector<8x32xf32>
    %42 = arith.addf %41, %11 : vector<8x32xf32>
    %43 = arith.mulf %31, %42 : vector<8x32xf32>
    %44 = arith.addf %40, %43 : vector<8x32xf32>
    %45 = math.tanh %44 : vector<8x32xf32>
    %cst_26 = arith.constant 1.000000e+00 : f32
    %46 = vector.broadcast %cst_26 : f32 to vector<8x32xf32>
    %47 = arith.subf %46, %39 : vector<8x32xf32>
    %48 = arith.mulf %47, %45 : vector<8x32xf32>
    %49 = arith.mulf %39, %15 : vector<8x32xf32>
    %50 = arith.addf %48, %49 : vector<8x32xf32>
    %51 = arith.truncf %50 : vector<8x32xf32> to vector<8x32xbf16>
    %c0_27 = arith.constant 0 : index
    %c0_28 = arith.constant 0 : index
    %c0_29 = arith.constant 0 : index
    %52 = vector.load %arg12[%c0_27, %c0_28, %c0_29] : memref<24x8x32xbf16, #tpu.memory_space<vmem>>, vector<1x8x32xbf16>
    %53 = vector.shape_cast %52 : vector<1x8x32xbf16> to vector<8x32xbf16>
    %54 = vector.shape_cast %51 : vector<8x32xbf16> to vector<1x8x32xbf16>
    tpu.vector_store %arg12[%c0_27, %c0_28, %c0_29], %54 {strides = array<i32>} : memref<24x8x32xbf16, #tpu.memory_space<vmem>>, vector<1x8x32xbf16>,
    %c23 = arith.constant 23 : index
    %c0_30 = arith.constant 0 : index
    %c0_31 = arith.constant 0 : index
    %55 = vector.load %arg3[%c23, %c0_30, %c0_31] : memref<24x8x32xbf16, #tpu.memory_space<vmem>>, vector<1x8x32xbf16>
    %56 = vector.shape_cast %55 : vector<1x8x32xbf16> to vector<8x32xbf16>
    %cst_32 = arith.constant dense<0.000000e+00> : vector<8x96xf32>
    %57 = tpu.matmul %56, %4, %cst_32 {dimension_numbers = #tpu.dot_dimension_numbers<[1], [0], [0], [1], [0, 0, 1, 1], [], []>} : vector<8x32xbf16>, vector<32x96xbf16>, vector<8x96xf32> -> vector<8x96xf32>
    %58 = vector.broadcast %8 : vector<1x96xf32> to vector<8x96xf32>
    %59 = arith.addf %57, %58 : vector<8x96xf32>
    %60 = arith.truncf %16 : vector<8x32xf32> to vector<8x32xbf16>
    %cst_33 = arith.constant dense<0.000000e+00> : vector<8x96xf32>
    %61 = tpu.matmul %60, %6, %cst_33 {dimension_numbers = #tpu.dot_dimension_numbers<[1], [0], [0], [1], [0, 0, 1, 1], [], []>} : vector<8x32xbf16>, vector<32x96xbf16>, vector<8x96xf32> -> vector<8x96xf32>
    %62 = vector.extract_strided_slice %59 {offsets = [0, 0], sizes = [8, 32], strides = [1, 1]} : vector<8x96xf32> to vector<8x32xf32>
    %63 = vector.extract_strided_slice %61 {offsets = [0, 0], sizes = [8, 32], strides = [1, 1]} : vector<8x96xf32> to vector<8x32xf32>
    %64 = arith.addf %62, %63 : vector<8x32xf32>
    %65 = arith.negf %64 : vector<8x32xf32>
    %66 = math.exp %65 : vector<8x32xf32>
    %cst_34 = arith.constant 1.000000e+00 : f32
    %67 = vector.broadcast %cst_34 : f32 to vector<8x32xf32>
    %68 = arith.addf %67, %66 : vector<8x32xf32>
    %69 = arith.divf %67, %68 : vector<8x32xf32>
    %70 = vector.extract_strided_slice %59 {offsets = [0, 32], sizes = [8, 32], strides = [1, 1]} : vector<8x96xf32> to vector<8x32xf32>
    %71 = vector.extract_strided_slice %61 {offsets = [0, 32], sizes = [8, 32], strides = [1, 1]} : vector<8x96xf32> to vector<8x32xf32>
    %72 = arith.addf %70, %71 : vector<8x32xf32>
    %73 = arith.negf %72 : vector<8x32xf32>
    %74 = math.exp %73 : vector<8x32xf32>
    %cst_35 = arith.constant 1.000000e+00 : f32
    %75 = vector.broadcast %cst_35 : f32 to vector<8x32xf32>
    %76 = arith.addf %75, %74 : vector<8x32xf32>
    %77 = arith.divf %75, %76 : vector<8x32xf32>
    %78 = vector.extract_strided_slice %59 {offsets = [0, 64], sizes = [8, 32], strides = [1, 1]} : vector<8x96xf32> to vector<8x32xf32>
    %79 = vector.extract_strided_slice %61 {offsets = [0, 64], sizes = [8, 32], strides = [1, 1]} : vector<8x96xf32> to vector<8x32xf32>
    %80 = arith.addf %79, %14 : vector<8x32xf32>
    %81 = arith.mulf %69, %80 : vector<8x32xf32>
    %82 = arith.addf %78, %81 : vector<8x32xf32>
    %83 = math.tanh %82 : vector<8x32xf32>
    %cst_36 = arith.constant 1.000000e+00 : f32
    %84 = vector.broadcast %cst_36 : f32 to vector<8x32xf32>
    %85 = arith.subf %84, %77 : vector<8x32xf32>
    %86 = arith.mulf %85, %83 : vector<8x32xf32>
    %87 = arith.mulf %77, %16 : vector<8x32xf32>
    %88 = arith.addf %86, %87 : vector<8x32xf32>
    %89 = arith.truncf %88 : vector<8x32xf32> to vector<8x32xbf16>
    %c23_37 = arith.constant 23 : index
    %c0_38 = arith.constant 0 : index
    %c0_39 = arith.constant 0 : index
    %90 = vector.load %arg13[%c23_37, %c0_38, %c0_39] : memref<24x8x32xbf16, #tpu.memory_space<vmem>>, vector<1x8x32xbf16>
    %91 = vector.shape_cast %90 : vector<1x8x32xbf16> to vector<8x32xbf16>
    %92 = vector.shape_cast %89 : vector<8x32xbf16> to vector<1x8x32xbf16>
    tpu.vector_store %arg13[%c23_37, %c0_38, %c0_39], %92 {strides = array<i32>} : memref<24x8x32xbf16, #tpu.memory_space<vmem>>, vector<1x8x32xbf16>,
    %c1 = arith.constant 1 : index
    %c0_40 = arith.constant 0 : index
    %c0_41 = arith.constant 0 : index
    %93 = vector.load %arg2[%c1, %c0_40, %c0_41] : memref<24x8x32xbf16, #tpu.memory_space<vmem>>, vector<1x8x32xbf16>
    %94 = vector.shape_cast %93 : vector<1x8x32xbf16> to vector<8x32xbf16>
    %cst_42 = arith.constant dense<0.000000e+00> : vector<8x96xf32>
    %95 = tpu.matmul %94, %3, %cst_42 {dimension_numbers = #tpu.dot_dimension_numbers<[1], [0], [0], [1], [0, 0, 1, 1], [], []>} : vector<8x32xbf16>, vector<32x96xbf16>, vector<8x96xf32> -> vector<8x96xf32>
    %96 = vector.broadcast %7 : vector<1x96xf32> to vector<8x96xf32>
    %97 = arith.addf %95, %96 : vector<8x96xf32>
    %98 = arith.truncf %50 : vector<8x32xf32> to vector<8x32xbf16>
    %cst_43 = arith.constant dense<0.000000e+00> : vector<8x96xf32>
    %99 = tpu.matmul %98, %5, %cst_43 {dimension_numbers = #tpu.dot_dimension_numbers<[1], [0], [0], [1], [0, 0, 1, 1], [], []>} : vector<8x32xbf16>, vector<32x96xbf16>, vector<8x96xf32> -> vector<8x96xf32>
    %100 = vector.extract_strided_slice %97 {offsets = [0, 0], sizes = [8, 32], strides = [1, 1]} : vector<8x96xf32> to vector<8x32xf32>
    %101 = vector.extract_strided_slice %99 {offsets = [0, 0], sizes = [8, 32], strides = [1, 1]} : vector<8x96xf32> to vector<8x32xf32>
    %102 = arith.addf %100, %101 : vector<8x32xf32>
    %103 = arith.negf %102 : vector<8x32xf32>
    %104 = math.exp %103 : vector<8x32xf32>
    %cst_44 = arith.constant 1.000000e+00 : f32
    %105 = vector.broadcast %cst_44 : f32 to vector<8x32xf32>
    %106 = arith.addf %105, %104 : vector<8x32xf32>
    %107 = arith.divf %105, %106 : vector<8x32xf32>
    %108 = vector.extract_strided_slice %97 {offsets = [0, 32], sizes = [8, 32], strides = [1, 1]} : vector<8x96xf32> to vector<8x32xf32>
    %109 = vector.extract_strided_slice %99 {offsets = [0, 32], sizes = [8, 32], strides = [1, 1]} : vector<8x96xf32> to vector<8x32xf32>
    %110 = arith.addf %108, %109 : vector<8x32xf32>
    %111 = arith.negf %110 : vector<8x32xf32>
    %112 = math.exp %111 : vector<8x32xf32>
    %cst_45 = arith.constant 1.000000e+00 : f32
    %113 = vector.broadcast %cst_45 : f32 to vector<8x32xf32>
    %114 = arith.addf %113, %112 : vector<8x32xf32>
    %115 = arith.divf %113, %114 : vector<8x32xf32>
    %116 = vector.extract_strided_slice %97 {offsets = [0, 64], sizes = [8, 32], strides = [1, 1]} : vector<8x96xf32> to vector<8x32xf32>
    %117 = vector.extract_strided_slice %99 {offsets = [0, 64], sizes = [8, 32], strides = [1, 1]} : vector<8x96xf32> to vector<8x32xf32>
    %118 = arith.addf %117, %11 : vector<8x32xf32>
    %119 = arith.mulf %107, %118 : vector<8x32xf32>
    %120 = arith.addf %116, %119 : vector<8x32xf32>
    %121 = math.tanh %120 : vector<8x32xf32>
    %cst_46 = arith.constant 1.000000e+00 : f32
    %122 = vector.broadcast %cst_46 : f32 to vector<8x32xf32>
    %123 = arith.subf %122, %115 : vector<8x32xf32>
    %124 = arith.mulf %123, %121 : vector<8x32xf32>
    %125 = arith.mulf %115, %50 : vector<8x32xf32>
    %126 = arith.addf %124, %125 : vector<8x32xf32>
    %127 = arith.truncf %126 : vector<8x32xf32> to vector<8x32xbf16>
    %c1_47 = arith.constant 1 : index
    %c0_48 = arith.constant 0 : index
    %c0_49 = arith.constant 0 : index
    %128 = vector.load %arg12[%c1_47, %c0_48, %c0_49] : memref<24x8x32xbf16, #tpu.memory_space<vmem>>, vector<1x8x32xbf16>
    %129 = vector.shape_cast %128 : vector<1x8x32xbf16> to vector<8x32xbf16>
    %130 = vector.shape_cast %127 : vector<8x32xbf16> to vector<1x8x32xbf16>
    tpu.vector_store %arg12[%c1_47, %c0_48, %c0_49], %130 {strides = array<i32>} : memref<24x8x32xbf16, #tpu.memory_space<vmem>>, vector<1x8x32xbf16>,
    %c22 = arith.constant 22 : index
    %c0_50 = arith.constant 0 : index
    %c0_51 = arith.constant 0 : index
    %131 = vector.load %arg3[%c22, %c0_50, %c0_51] : memref<24x8x32xbf16, #tpu.memory_space<vmem>>, vector<1x8x32xbf16>
    %132 = vector.shape_cast %131 : vector<1x8x32xbf16> to vector<8x32xbf16>
    %cst_52 = arith.constant dense<0.000000e+00> : vector<8x96xf32>
    %133 = tpu.matmul %132, %4, %cst_52 {dimension_numbers = #tpu.dot_dimension_numbers<[1], [0], [0], [1], [0, 0, 1, 1], [], []>} : vector<8x32xbf16>, vector<32x96xbf16>, vector<8x96xf32> -> vector<8x96xf32>
    %134 = vector.broadcast %8 : vector<1x96xf32> to vector<8x96xf32>
    %135 = arith.addf %133, %134 : vector<8x96xf32>
    %136 = arith.truncf %88 : vector<8x32xf32> to vector<8x32xbf16>
    %cst_53 = arith.constant dense<0.000000e+00> : vector<8x96xf32>
    %137 = tpu.matmul %136, %6, %cst_53 {dimension_numbers = #tpu.dot_dimension_numbers<[1], [0], [0], [1], [0, 0, 1, 1], [], []>} : vector<8x32xbf16>, vector<32x96xbf16>, vector<8x96xf32> -> vector<8x96xf32>
    %138 = vector.extract_strided_slice %135 {offsets = [0, 0], sizes = [8, 32], strides = [1, 1]} : vector<8x96xf32> to vector<8x32xf32>
    %139 = vector.extract_strided_slice %137 {offsets = [0, 0], sizes = [8, 32], strides = [1, 1]} : vector<8x96xf32> to vector<8x32xf32>
    %140 = arith.addf %138, %139 : vector<8x32xf32>
    %141 = arith.negf %140 : vector<8x32xf32>
    %142 = math.exp %141 : vector<8x32xf32>
    %cst_54 = arith.constant 1.000000e+00 : f32
    %143 = vector.broadcast %cst_54 : f32 to vector<8x32xf32>
    %144 = arith.addf %143, %142 : vector<8x32xf32>
    %145 = arith.divf %143, %144 : vector<8x32xf32>
    %146 = vector.extract_strided_slice %135 {offsets = [0, 32], sizes = [8, 32], strides = [1, 1]} : vector<8x96xf32> to vector<8x32xf32>
    %147 = vector.extract_strided_slice %137 {offsets = [0, 32], sizes = [8, 32], strides = [1, 1]} : vector<8x96xf32> to vector<8x32xf32>
    %148 = arith.addf %146, %147 : vector<8x32xf32>
    %149 = arith.negf %148 : vector<8x32xf32>
    %150 = math.exp %149 : vector<8x32xf32>
    %cst_55 = arith.constant 1.000000e+00 : f32
    %151 = vector.broadcast %cst_55 : f32 to vector<8x32xf32>
    %152 = arith.addf %151, %150 : vector<8x32xf32>
    %153 = arith.divf %151, %152 : vector<8x32xf32>
    %154 = vector.extract_strided_slice %135 {offsets = [0, 64], sizes = [8, 32], strides = [1, 1]} : vector<8x96xf32> to vector<8x32xf32>
    %155 = vector.extract_strided_slice %137 {offsets = [0, 64], sizes = [8, 32], strides = [1, 1]} : vector<8x96xf32> to vector<8x32xf32>
    %156 = arith.addf %155, %14 : vector<8x32xf32>
    %157 = arith.mulf %145, %156 : vector<8x32xf32>
    %158 = arith.addf %154, %157 : vector<8x32xf32>
    %159 = math.tanh %158 : vector<8x32xf32>
    %cst_56 = arith.constant 1.000000e+00 : f32
    %160 = vector.broadcast %cst_56 : f32 to vector<8x32xf32>
    %161 = arith.subf %160, %153 : vector<8x32xf32>
    %162 = arith.mulf %161, %159 : vector<8x32xf32>
    %163 = arith.mulf %153, %88 : vector<8x32xf32>
    %164 = arith.addf %162, %163 : vector<8x32xf32>
    %165 = arith.truncf %164 : vector<8x32xf32> to vector<8x32xbf16>
    %c22_57 = arith.constant 22 : index
    %c0_58 = arith.constant 0 : index
    %c0_59 = arith.constant 0 : index
    %166 = vector.load %arg13[%c22_57, %c0_58, %c0_59] : memref<24x8x32xbf16, #tpu.memory_space<vmem>>, vector<1x8x32xbf16>
    %167 = vector.shape_cast %166 : vector<1x8x32xbf16> to vector<8x32xbf16>
    %168 = vector.shape_cast %165 : vector<8x32xbf16> to vector<1x8x32xbf16>
    tpu.vector_store %arg13[%c22_57, %c0_58, %c0_59], %168 {strides = array<i32>} : memref<24x8x32xbf16, #tpu.memory_space<vmem>>, vector<1x8x32xbf16>,
    %c2 = arith.constant 2 : index
    %c0_60 = arith.constant 0 : index
    %c0_61 = arith.constant 0 : index
    %169 = vector.load %arg2[%c2, %c0_60, %c0_61] : memref<24x8x32xbf16, #tpu.memory_space<vmem>>, vector<1x8x32xbf16>
    %170 = vector.shape_cast %169 : vector<1x8x32xbf16> to vector<8x32xbf16>
    %cst_62 = arith.constant dense<0.000000e+00> : vector<8x96xf32>
    %171 = tpu.matmul %170, %3, %cst_62 {dimension_numbers = #tpu.dot_dimension_numbers<[1], [0], [0], [1], [0, 0, 1, 1], [], []>} : vector<8x32xbf16>, vector<32x96xbf16>, vector<8x96xf32> -> vector<8x96xf32>
    %172 = vector.broadcast %7 : vector<1x96xf32> to vector<8x96xf32>
    %173 = arith.addf %171, %172 : vector<8x96xf32>
    %174 = arith.truncf %126 : vector<8x32xf32> to vector<8x32xbf16>
    %cst_63 = arith.constant dense<0.000000e+00> : vector<8x96xf32>
    %175 = tpu.matmul %174, %5, %cst_63 {dimension_numbers = #tpu.dot_dimension_numbers<[1], [0], [0], [1], [0, 0, 1, 1], [], []>} : vector<8x32xbf16>, vector<32x96xbf16>, vector<8x96xf32> -> vector<8x96xf32>
    %176 = vector.extract_strided_slice %173 {offsets = [0, 0], sizes = [8, 32], strides = [1, 1]} : vector<8x96xf32> to vector<8x32xf32>
    %177 = vector.extract_strided_slice %175 {offsets = [0, 0], sizes = [8, 32], strides = [1, 1]} : vector<8x96xf32> to vector<8x32xf32>
    %178 = arith.addf %176, %177 : vector<8x32xf32>
    %179 = arith.negf %178 : vector<8x32xf32>
    %180 = math.exp %179 : vector<8x32xf32>
    %cst_64 = arith.constant 1.000000e+00 : f32
    %181 = vector.broadcast %cst_64 : f32 to vector<8x32xf32>
    %182 = arith.addf %181, %180 : vector<8x32xf32>
    %183 = arith.divf %181, %182 : vector<8x32xf32>
    %184 = vector.extract_strided_slice %173 {offsets = [0, 32], sizes = [8, 32], strides = [1, 1]} : vector<8x96xf32> to vector<8x32xf32>
    %185 = vector.extract_strided_slice %175 {offsets = [0, 32], sizes = [8, 32], strides = [1, 1]} : vector<8x96xf32> to vector<8x32xf32>
    %186 = arith.addf %184, %185 : vector<8x32xf32>
    %187 = arith.negf %186 : vector<8x32xf32>
    %188 = math.exp %187 : vector<8x32xf32>
    %cst_65 = arith.constant 1.000000e+00 : f32
    %189 = vector.broadcast %cst_65 : f32 to vector<8x32xf32>
    %190 = arith.addf %189, %188 : vector<8x32xf32>
    %191 = arith.divf %189, %190 : vector<8x32xf32>
    %192 = vector.extract_strided_slice %173 {offsets = [0, 64], sizes = [8, 32], strides = [1, 1]} : vector<8x96xf32> to vector<8x32xf32>
    %193 = vector.extract_strided_slice %175 {offsets = [0, 64], sizes = [8, 32], strides = [1, 1]} : vector<8x96xf32> to vector<8x32xf32>
    %194 = arith.addf %193, %11 : vector<8x32xf32>
    %195 = arith.mulf %183, %194 : vector<8x32xf32>
    %196 = arith.addf %192, %195 : vector<8x32xf32>
    %197 = math.tanh %196 : vector<8x32xf32>
    %cst_66 = arith.constant 1.000000e+00 : f32
    %198 = vector.broadcast %cst_66 : f32 to vector<8x32xf32>
    %199 = arith.subf %198, %191 : vector<8x32xf32>
    %200 = arith.mulf %199, %197 : vector<8x32xf32>
    %201 = arith.mulf %191, %126 : vector<8x32xf32>
    %202 = arith.addf %200, %201 : vector<8x32xf32>
    %203 = arith.truncf %202 : vector<8x32xf32> to vector<8x32xbf16>
    %c2_67 = arith.constant 2 : index
    %c0_68 = arith.constant 0 : index
    %c0_69 = arith.constant 0 : index
    %204 = vector.load %arg12[%c2_67, %c0_68, %c0_69] : memref<24x8x32xbf16, #tpu.memory_space<vmem>>, vector<1x8x32xbf16>
    %205 = vector.shape_cast %204 : vector<1x8x32xbf16> to vector<8x32xbf16>
    %206 = vector.shape_cast %203 : vector<8x32xbf16> to vector<1x8x32xbf16>
    tpu.vector_store %arg12[%c2_67, %c0_68, %c0_69], %206 {strides = array<i32>} : memref<24x8x32xbf16, #tpu.memory_space<vmem>>, vector<1x8x32xbf16>,
    %c21 = arith.constant 21 : index
    %c0_70 = arith.constant 0 : index
    %c0_71 = arith.constant 0 : index
    %207 = vector.load %arg3[%c21, %c0_70, %c0_71] : memref<24x8x32xbf16, #tpu.memory_space<vmem>>, vector<1x8x32xbf16>
    %208 = vector.shape_cast %207 : vector<1x8x32xbf16> to vector<8x32xbf16>
    %cst_72 = arith.constant dense<0.000000e+00> : vector<8x96xf32>
    %209 = tpu.matmul %208, %4, %cst_72 {dimension_numbers = #tpu.dot_dimension_numbers<[1], [0], [0], [1], [0, 0, 1, 1], [], []>} : vector<8x32xbf16>, vector<32x96xbf16>, vector<8x96xf32> -> vector<8x96xf32>
    %210 = vector.broadcast %8 : vector<1x96xf32> to vector<8x96xf32>
    %211 = arith.addf %209, %210 : vector<8x96xf32>
    %212 = arith.truncf %164 : vector<8x32xf32> to vector<8x32xbf16>
    %cst_73 = arith.constant dense<0.000000e+00> : vector<8x96xf32>
    %213 = tpu.matmul %212, %6, %cst_73 {dimension_numbers = #tpu.dot_dimension_numbers<[1], [0], [0], [1], [0, 0, 1, 1], [], []>} : vector<8x32xbf16>, vector<32x96xbf16>, vector<8x96xf32> -> vector<8x96xf32>
    %214 = vector.extract_strided_slice %211 {offsets = [0, 0], sizes = [8, 32], strides = [1, 1]} : vector<8x96xf32> to vector<8x32xf32>
    %215 = vector.extract_strided_slice %213 {offsets = [0, 0], sizes = [8, 32], strides = [1, 1]} : vector<8x96xf32> to vector<8x32xf32>
    %216 = arith.addf %214, %215 : vector<8x32xf32>
    %217 = arith.negf %216 : vector<8x32xf32>
    %218 = math.exp %217 : vector<8x32xf32>
    %cst_74 = arith.constant 1.000000e+00 : f32
    %219 = vector.broadcast %cst_74 : f32 to vector<8x32xf32>
    %220 = arith.addf %219, %218 : vector<8x32xf32>
    %221 = arith.divf %219, %220 : vector<8x32xf32>
    %222 = vector.extract_strided_slice %211 {offsets = [0, 32], sizes = [8, 32], strides = [1, 1]} : vector<8x96xf32> to vector<8x32xf32>
    %223 = vector.extract_strided_slice %213 {offsets = [0, 32], sizes = [8, 32], strides = [1, 1]} : vector<8x96xf32> to vector<8x32xf32>
    %224 = arith.addf %222, %223 : vector<8x32xf32>
    %225 = arith.negf %224 : vector<8x32xf32>
    %226 = math.exp %225 : vector<8x32xf32>
    %cst_75 = arith.constant 1.000000e+00 : f32
    %227 = vector.broadcast %cst_75 : f32 to vector<8x32xf32>
    %228 = arith.addf %227, %226 : vector<8x32xf32>
    %229 = arith.divf %227, %228 : vector<8x32xf32>
    %230 = vector.extract_strided_slice %211 {offsets = [0, 64], sizes = [8, 32], strides = [1, 1]} : vector<8x96xf32> to vector<8x32xf32>
    %231 = vector.extract_strided_slice %213 {offsets = [0, 64], sizes = [8, 32], strides = [1, 1]} : vector<8x96xf32> to vector<8x32xf32>
    %232 = arith.addf %231, %14 : vector<8x32xf32>
    %233 = arith.mulf %221, %232 : vector<8x32xf32>
    %234 = arith.addf %230, %233 : vector<8x32xf32>
    %235 = math.tanh %234 : vector<8x32xf32>
    %cst_76 = arith.constant 1.000000e+00 : f32
    %236 = vector.broadcast %cst_76 : f32 to vector<8x32xf32>
    %237 = arith.subf %236, %229 : vector<8x32xf32>
    %238 = arith.mulf %237, %235 : vector<8x32xf32>
    %239 = arith.mulf %229, %164 : vector<8x32xf32>
    %240 = arith.addf %238, %239 : vector<8x32xf32>
    %241 = arith.truncf %240 : vector<8x32xf32> to vector<8x32xbf16>
    %c21_77 = arith.constant 21 : index
    %c0_78 = arith.constant 0 : index
    %c0_79 = arith.constant 0 : index
    %242 = vector.load %arg13[%c21_77, %c0_78, %c0_79] : memref<24x8x32xbf16, #tpu.memory_space<vmem>>, vector<1x8x32xbf16>
    %243 = vector.shape_cast %242 : vector<1x8x32xbf16> to vector<8x32xbf16>
    %244 = vector.shape_cast %241 : vector<8x32xbf16> to vector<1x8x32xbf16>
    tpu.vector_store %arg13[%c21_77, %c0_78, %c0_79], %244 {strides = array<i32>} : memref<24x8x32xbf16, #tpu.memory_space<vmem>>, vector<1x8x32xbf16>,
    %c3 = arith.constant 3 : index
    %c0_80 = arith.constant 0 : index
    %c0_81 = arith.constant 0 : index
    %245 = vector.load %arg2[%c3, %c0_80, %c0_81] : memref<24x8x32xbf16, #tpu.memory_space<vmem>>, vector<1x8x32xbf16>
    %246 = vector.shape_cast %245 : vector<1x8x32xbf16> to vector<8x32xbf16>
    %cst_82 = arith.constant dense<0.000000e+00> : vector<8x96xf32>
    %247 = tpu.matmul %246, %3, %cst_82 {dimension_numbers = #tpu.dot_dimension_numbers<[1], [0], [0], [1], [0, 0, 1, 1], [], []>} : vector<8x32xbf16>, vector<32x96xbf16>, vector<8x96xf32> -> vector<8x96xf32>
    %248 = vector.broadcast %7 : vector<1x96xf32> to vector<8x96xf32>
    %249 = arith.addf %247, %248 : vector<8x96xf32>
    %250 = arith.truncf %202 : vector<8x32xf32> to vector<8x32xbf16>
    %cst_83 = arith.constant dense<0.000000e+00> : vector<8x96xf32>
    %251 = tpu.matmul %250, %5, %cst_83 {dimension_numbers = #tpu.dot_dimension_numbers<[1], [0], [0], [1], [0, 0, 1, 1], [], []>} : vector<8x32xbf16>, vector<32x96xbf16>, vector<8x96xf32> -> vector<8x96xf32>
    %252 = vector.extract_strided_slice %249 {offsets = [0, 0], sizes = [8, 32], strides = [1, 1]} : vector<8x96xf32> to vector<8x32xf32>
    %253 = vector.extract_strided_slice %251 {offsets = [0, 0], sizes = [8, 32], strides = [1, 1]} : vector<8x96xf32> to vector<8x32xf32>
    %254 = arith.addf %252, %253 : vector<8x32xf32>
    %255 = arith.negf %254 : vector<8x32xf32>
    %256 = math.exp %255 : vector<8x32xf32>
    %cst_84 = arith.constant 1.000000e+00 : f32
    %257 = vector.broadcast %cst_84 : f32 to vector<8x32xf32>
    %258 = arith.addf %257, %256 : vector<8x32xf32>
    %259 = arith.divf %257, %258 : vector<8x32xf32>
    %260 = vector.extract_strided_slice %249 {offsets = [0, 32], sizes = [8, 32], strides = [1, 1]} : vector<8x96xf32> to vector<8x32xf32>
    %261 = vector.extract_strided_slice %251 {offsets = [0, 32], sizes = [8, 32], strides = [1, 1]} : vector<8x96xf32> to vector<8x32xf32>
    %262 = arith.addf %260, %261 : vector<8x32xf32>
    %263 = arith.negf %262 : vector<8x32xf32>
    %264 = math.exp %263 : vector<8x32xf32>
    %cst_85 = arith.constant 1.000000e+00 : f32
    %265 = vector.broadcast %cst_85 : f32 to vector<8x32xf32>
    %266 = arith.addf %265, %264 : vector<8x32xf32>
    %267 = arith.divf %265, %266 : vector<8x32xf32>
    %268 = vector.extract_strided_slice %249 {offsets = [0, 64], sizes = [8, 32], strides = [1, 1]} : vector<8x96xf32> to vector<8x32xf32>
    %269 = vector.extract_strided_slice %251 {offsets = [0, 64], sizes = [8, 32], strides = [1, 1]} : vector<8x96xf32> to vector<8x32xf32>
    %270 = arith.addf %269, %11 : vector<8x32xf32>
    %271 = arith.mulf %259, %270 : vector<8x32xf32>
    %272 = arith.addf %268, %271 : vector<8x32xf32>
    %273 = math.tanh %272 : vector<8x32xf32>
    %cst_86 = arith.constant 1.000000e+00 : f32
    %274 = vector.broadcast %cst_86 : f32 to vector<8x32xf32>
    %275 = arith.subf %274, %267 : vector<8x32xf32>
    %276 = arith.mulf %275, %273 : vector<8x32xf32>
    %277 = arith.mulf %267, %202 : vector<8x32xf32>
    %278 = arith.addf %276, %277 : vector<8x32xf32>
    %279 = arith.truncf %278 : vector<8x32xf32> to vector<8x32xbf16>
    %c3_87 = arith.constant 3 : index
    %c0_88 = arith.constant 0 : index
    %c0_89 = arith.constant 0 : index
    %280 = vector.load %arg12[%c3_87, %c0_88, %c0_89] : memref<24x8x32xbf16, #tpu.memory_space<vmem>>, vector<1x8x32xbf16>
    %281 = vector.shape_cast %280 : vector<1x8x32xbf16> to vector<8x32xbf16>
    %282 = vector.shape_cast %279 : vector<8x32xbf16> to vector<1x8x32xbf16>
    tpu.vector_store %arg12[%c3_87, %c0_88, %c0_89], %282 {strides = array<i32>} : memref<24x8x32xbf16, #tpu.memory_space<vmem>>, vector<1x8x32xbf16>,
    %c20 = arith.constant 20 : index
    %c0_90 = arith.constant 0 : index
    %c0_91 = arith.constant 0 : index
    %283 = vector.load %arg3[%c20, %c0_90, %c0_91] : memref<24x8x32xbf16, #tpu.memory_space<vmem>>, vector<1x8x32xbf16>
    %284 = vector.shape_cast %283 : vector<1x8x32xbf16> to vector<8x32xbf16>
    %cst_92 = arith.constant dense<0.000000e+00> : vector<8x96xf32>
    %285 = tpu.matmul %284, %4, %cst_92 {dimension_numbers = #tpu.dot_dimension_numbers<[1], [0], [0], [1], [0, 0, 1, 1], [], []>} : vector<8x32xbf16>, vector<32x96xbf16>, vector<8x96xf32> -> vector<8x96xf32>
    %286 = vector.broadcast %8 : vector<1x96xf32> to vector<8x96xf32>
    %287 = arith.addf %285, %286 : vector<8x96xf32>
    %288 = arith.truncf %240 : vector<8x32xf32> to vector<8x32xbf16>
    %cst_93 = arith.constant dense<0.000000e+00> : vector<8x96xf32>
    %289 = tpu.matmul %288, %6, %cst_93 {dimension_numbers = #tpu.dot_dimension_numbers<[1], [0], [0], [1], [0, 0, 1, 1], [], []>} : vector<8x32xbf16>, vector<32x96xbf16>, vector<8x96xf32> -> vector<8x96xf32>
    %290 = vector.extract_strided_slice %287 {offsets = [0, 0], sizes = [8, 32], strides = [1, 1]} : vector<8x96xf32> to vector<8x32xf32>
    %291 = vector.extract_strided_slice %289 {offsets = [0, 0], sizes = [8, 32], strides = [1, 1]} : vector<8x96xf32> to vector<8x32xf32>
    %292 = arith.addf %290, %291 : vector<8x32xf32>
    %293 = arith.negf %292 : vector<8x32xf32>
    %294 = math.exp %293 : vector<8x32xf32>
    %cst_94 = arith.constant 1.000000e+00 : f32
    %295 = vector.broadcast %cst_94 : f32 to vector<8x32xf32>
    %296 = arith.addf %295, %294 : vector<8x32xf32>
    %297 = arith.divf %295, %296 : vector<8x32xf32>
    %298 = vector.extract_strided_slice %287 {offsets = [0, 32], sizes = [8, 32], strides = [1, 1]} : vector<8x96xf32> to vector<8x32xf32>
    %299 = vector.extract_strided_slice %289 {offsets = [0, 32], sizes = [8, 32], strides = [1, 1]} : vector<8x96xf32> to vector<8x32xf32>
    %300 = arith.addf %298, %299 : vector<8x32xf32>
    %301 = arith.negf %300 : vector<8x32xf32>
    %302 = math.exp %301 : vector<8x32xf32>
    %cst_95 = arith.constant 1.000000e+00 : f32
    %303 = vector.broadcast %cst_95 : f32 to vector<8x32xf32>
    %304 = arith.addf %303, %302 : vector<8x32xf32>
    %305 = arith.divf %303, %304 : vector<8x32xf32>
    %306 = vector.extract_strided_slice %287 {offsets = [0, 64], sizes = [8, 32], strides = [1, 1]} : vector<8x96xf32> to vector<8x32xf32>
    %307 = vector.extract_strided_slice %289 {offsets = [0, 64], sizes = [8, 32], strides = [1, 1]} : vector<8x96xf32> to vector<8x32xf32>
    %308 = arith.addf %307, %14 : vector<8x32xf32>
    %309 = arith.mulf %297, %308 : vector<8x32xf32>
    %310 = arith.addf %306, %309 : vector<8x32xf32>
    %311 = math.tanh %310 : vector<8x32xf32>
    %cst_96 = arith.constant 1.000000e+00 : f32
    %312 = vector.broadcast %cst_96 : f32 to vector<8x32xf32>
    %313 = arith.subf %312, %305 : vector<8x32xf32>
    %314 = arith.mulf %313, %311 : vector<8x32xf32>
    %315 = arith.mulf %305, %240 : vector<8x32xf32>
    %316 = arith.addf %314, %315 : vector<8x32xf32>
    %317 = arith.truncf %316 : vector<8x32xf32> to vector<8x32xbf16>
    %c20_97 = arith.constant 20 : index
    %c0_98 = arith.constant 0 : index
    %c0_99 = arith.constant 0 : index
    %318 = vector.load %arg13[%c20_97, %c0_98, %c0_99] : memref<24x8x32xbf16, #tpu.memory_space<vmem>>, vector<1x8x32xbf16>
    %319 = vector.shape_cast %318 : vector<1x8x32xbf16> to vector<8x32xbf16>
    %320 = vector.shape_cast %317 : vector<8x32xbf16> to vector<1x8x32xbf16>
    tpu.vector_store %arg13[%c20_97, %c0_98, %c0_99], %320 {strides = array<i32>} : memref<24x8x32xbf16, #tpu.memory_space<vmem>>, vector<1x8x32xbf16>,
    %c4 = arith.constant 4 : index
    %c0_100 = arith.constant 0 : index
    %c0_101 = arith.constant 0 : index
    %321 = vector.load %arg2[%c4, %c0_100, %c0_101] : memref<24x8x32xbf16, #tpu.memory_space<vmem>>, vector<1x8x32xbf16>
    %322 = vector.shape_cast %321 : vector<1x8x32xbf16> to vector<8x32xbf16>
    %cst_102 = arith.constant dense<0.000000e+00> : vector<8x96xf32>
    %323 = tpu.matmul %322, %3, %cst_102 {dimension_numbers = #tpu.dot_dimension_numbers<[1], [0], [0], [1], [0, 0, 1, 1], [], []>} : vector<8x32xbf16>, vector<32x96xbf16>, vector<8x96xf32> -> vector<8x96xf32>
    %324 = vector.broadcast %7 : vector<1x96xf32> to vector<8x96xf32>
    %325 = arith.addf %323, %324 : vector<8x96xf32>
    %326 = arith.truncf %278 : vector<8x32xf32> to vector<8x32xbf16>
    %cst_103 = arith.constant dense<0.000000e+00> : vector<8x96xf32>
    %327 = tpu.matmul %326, %5, %cst_103 {dimension_numbers = #tpu.dot_dimension_numbers<[1], [0], [0], [1], [0, 0, 1, 1], [], []>} : vector<8x32xbf16>, vector<32x96xbf16>, vector<8x96xf32> -> vector<8x96xf32>
    %328 = vector.extract_strided_slice %325 {offsets = [0, 0], sizes = [8, 32], strides = [1, 1]} : vector<8x96xf32> to vector<8x32xf32>
    %329 = vector.extract_strided_slice %327 {offsets = [0, 0], sizes = [8, 32], strides = [1, 1]} : vector<8x96xf32> to vector<8x32xf32>
    %330 = arith.addf %328, %329 : vector<8x32xf32>
    %331 = arith.negf %330 : vector<8x32xf32>
    %332 = math.exp %331 : vector<8x32xf32>
    %cst_104 = arith.constant 1.000000e+00 : f32
    %333 = vector.broadcast %cst_104 : f32 to vector<8x32xf32>
    %334 = arith.addf %333, %332 : vector<8x32xf32>
    %335 = arith.divf %333, %334 : vector<8x32xf32>
    %336 = vector.extract_strided_slice %325 {offsets = [0, 32], sizes = [8, 32], strides = [1, 1]} : vector<8x96xf32> to vector<8x32xf32>
    %337 = vector.extract_strided_slice %327 {offsets = [0, 32], sizes = [8, 32], strides = [1, 1]} : vector<8x96xf32> to vector<8x32xf32>
    %338 = arith.addf %336, %337 : vector<8x32xf32>
    %339 = arith.negf %338 : vector<8x32xf32>
    %340 = math.exp %339 : vector<8x32xf32>
    %cst_105 = arith.constant 1.000000e+00 : f32
    %341 = vector.broadcast %cst_105 : f32 to vector<8x32xf32>
    %342 = arith.addf %341, %340 : vector<8x32xf32>
    %343 = arith.divf %341, %342 : vector<8x32xf32>
    %344 = vector.extract_strided_slice %325 {offsets = [0, 64], sizes = [8, 32], strides = [1, 1]} : vector<8x96xf32> to vector<8x32xf32>
    %345 = vector.extract_strided_slice %327 {offsets = [0, 64], sizes = [8, 32], strides = [1, 1]} : vector<8x96xf32> to vector<8x32xf32>
    %346 = arith.addf %345, %11 : vector<8x32xf32>
    %347 = arith.mulf %335, %346 : vector<8x32xf32>
    %348 = arith.addf %344, %347 : vector<8x32xf32>
    %349 = math.tanh %348 : vector<8x32xf32>
    %cst_106 = arith.constant 1.000000e+00 : f32
    %350 = vector.broadcast %cst_106 : f32 to vector<8x32xf32>
    %351 = arith.subf %350, %343 : vector<8x32xf32>
    %352 = arith.mulf %351, %349 : vector<8x32xf32>
    %353 = arith.mulf %343, %278 : vector<8x32xf32>
    %354 = arith.addf %352, %353 : vector<8x32xf32>
    %355 = arith.truncf %354 : vector<8x32xf32> to vector<8x32xbf16>
    %c4_107 = arith.constant 4 : index
    %c0_108 = arith.constant 0 : index
    %c0_109 = arith.constant 0 : index
    %356 = vector.load %arg12[%c4_107, %c0_108, %c0_109] : memref<24x8x32xbf16, #tpu.memory_space<vmem>>, vector<1x8x32xbf16>
    %357 = vector.shape_cast %356 : vector<1x8x32xbf16> to vector<8x32xbf16>
    %358 = vector.shape_cast %355 : vector<8x32xbf16> to vector<1x8x32xbf16>
    tpu.vector_store %arg12[%c4_107, %c0_108, %c0_109], %358 {strides = array<i32>} : memref<24x8x32xbf16, #tpu.memory_space<vmem>>, vector<1x8x32xbf16>,
    %c19 = arith.constant 19 : index
    %c0_110 = arith.constant 0 : index
    %c0_111 = arith.constant 0 : index
    %359 = vector.load %arg3[%c19, %c0_110, %c0_111] : memref<24x8x32xbf16, #tpu.memory_space<vmem>>, vector<1x8x32xbf16>
    %360 = vector.shape_cast %359 : vector<1x8x32xbf16> to vector<8x32xbf16>
    %cst_112 = arith.constant dense<0.000000e+00> : vector<8x96xf32>
    %361 = tpu.matmul %360, %4, %cst_112 {dimension_numbers = #tpu.dot_dimension_numbers<[1], [0], [0], [1], [0, 0, 1, 1], [], []>} : vector<8x32xbf16>, vector<32x96xbf16>, vector<8x96xf32> -> vector<8x96xf32>
    %362 = vector.broadcast %8 : vector<1x96xf32> to vector<8x96xf32>
    %363 = arith.addf %361, %362 : vector<8x96xf32>
    %364 = arith.truncf %316 : vector<8x32xf32> to vector<8x32xbf16>
    %cst_113 = arith.constant dense<0.000000e+00> : vector<8x96xf32>
    %365 = tpu.matmul %364, %6, %cst_113 {dimension_numbers = #tpu.dot_dimension_numbers<[1], [0], [0], [1], [0, 0, 1, 1], [], []>} : vector<8x32xbf16>, vector<32x96xbf16>, vector<8x96xf32> -> vector<8x96xf32>
    %366 = vector.extract_strided_slice %363 {offsets = [0, 0], sizes = [8, 32], strides = [1, 1]} : vector<8x96xf32> to vector<8x32xf32>
    %367 = vector.extract_strided_slice %365 {offsets = [0, 0], sizes = [8, 32], strides = [1, 1]} : vector<8x96xf32> to vector<8x32xf32>
    %368 = arith.addf %366, %367 : vector<8x32xf32>
    %369 = arith.negf %368 : vector<8x32xf32>
    %370 = math.exp %369 : vector<8x32xf32>
    %cst_114 = arith.constant 1.000000e+00 : f32
    %371 = vector.broadcast %cst_114 : f32 to vector<8x32xf32>
    %372 = arith.addf %371, %370 : vector<8x32xf32>
    %373 = arith.divf %371, %372 : vector<8x32xf32>
    %374 = vector.extract_strided_slice %363 {offsets = [0, 32], sizes = [8, 32], strides = [1, 1]} : vector<8x96xf32> to vector<8x32xf32>
    %375 = vector.extract_strided_slice %365 {offsets = [0, 32], sizes = [8, 32], strides = [1, 1]} : vector<8x96xf32> to vector<8x32xf32>
    %376 = arith.addf %374, %375 : vector<8x32xf32>
    %377 = arith.negf %376 : vector<8x32xf32>
    %378 = math.exp %377 : vector<8x32xf32>
    %cst_115 = arith.constant 1.000000e+00 : f32
    %379 = vector.broadcast %cst_115 : f32 to vector<8x32xf32>
    %380 = arith.addf %379, %378 : vector<8x32xf32>
    %381 = arith.divf %379, %380 : vector<8x32xf32>
    %382 = vector.extract_strided_slice %363 {offsets = [0, 64], sizes = [8, 32], strides = [1, 1]} : vector<8x96xf32> to vector<8x32xf32>
    %383 = vector.extract_strided_slice %365 {offsets = [0, 64], sizes = [8, 32], strides = [1, 1]} : vector<8x96xf32> to vector<8x32xf32>
    %384 = arith.addf %383, %14 : vector<8x32xf32>
    %385 = arith.mulf %373, %384 : vector<8x32xf32>
    %386 = arith.addf %382, %385 : vector<8x32xf32>
    %387 = math.tanh %386 : vector<8x32xf32>
    %cst_116 = arith.constant 1.000000e+00 : f32
    %388 = vector.broadcast %cst_116 : f32 to vector<8x32xf32>
    %389 = arith.subf %388, %381 : vector<8x32xf32>
    %390 = arith.mulf %389, %387 : vector<8x32xf32>
    %391 = arith.mulf %381, %316 : vector<8x32xf32>
    %392 = arith.addf %390, %391 : vector<8x32xf32>
    %393 = arith.truncf %392 : vector<8x32xf32> to vector<8x32xbf16>
    %c19_117 = arith.constant 19 : index
    %c0_118 = arith.constant 0 : index
    %c0_119 = arith.constant 0 : index
    %394 = vector.load %arg13[%c19_117, %c0_118, %c0_119] : memref<24x8x32xbf16, #tpu.memory_space<vmem>>, vector<1x8x32xbf16>
    %395 = vector.shape_cast %394 : vector<1x8x32xbf16> to vector<8x32xbf16>
    %396 = vector.shape_cast %393 : vector<8x32xbf16> to vector<1x8x32xbf16>
    tpu.vector_store %arg13[%c19_117, %c0_118, %c0_119], %396 {strides = array<i32>} : memref<24x8x32xbf16, #tpu.memory_space<vmem>>, vector<1x8x32xbf16>,
    %c5 = arith.constant 5 : index
    %c0_120 = arith.constant 0 : index
    %c0_121 = arith.constant 0 : index
    %397 = vector.load %arg2[%c5, %c0_120, %c0_121] : memref<24x8x32xbf16, #tpu.memory_space<vmem>>, vector<1x8x32xbf16>
    %398 = vector.shape_cast %397 : vector<1x8x32xbf16> to vector<8x32xbf16>
    %cst_122 = arith.constant dense<0.000000e+00> : vector<8x96xf32>
    %399 = tpu.matmul %398, %3, %cst_122 {dimension_numbers = #tpu.dot_dimension_numbers<[1], [0], [0], [1], [0, 0, 1, 1], [], []>} : vector<8x32xbf16>, vector<32x96xbf16>, vector<8x96xf32> -> vector<8x96xf32>
    %400 = vector.broadcast %7 : vector<1x96xf32> to vector<8x96xf32>
    %401 = arith.addf %399, %400 : vector<8x96xf32>
    %402 = arith.truncf %354 : vector<8x32xf32> to vector<8x32xbf16>
    %cst_123 = arith.constant dense<0.000000e+00> : vector<8x96xf32>
    %403 = tpu.matmul %402, %5, %cst_123 {dimension_numbers = #tpu.dot_dimension_numbers<[1], [0], [0], [1], [0, 0, 1, 1], [], []>} : vector<8x32xbf16>, vector<32x96xbf16>, vector<8x96xf32> -> vector<8x96xf32>
    %404 = vector.extract_strided_slice %401 {offsets = [0, 0], sizes = [8, 32], strides = [1, 1]} : vector<8x96xf32> to vector<8x32xf32>
    %405 = vector.extract_strided_slice %403 {offsets = [0, 0], sizes = [8, 32], strides = [1, 1]} : vector<8x96xf32> to vector<8x32xf32>
    %406 = arith.addf %404, %405 : vector<8x32xf32>
    %407 = arith.negf %406 : vector<8x32xf32>
    %408 = math.exp %407 : vector<8x32xf32>
    %cst_124 = arith.constant 1.000000e+00 : f32
    %409 = vector.broadcast %cst_124 : f32 to vector<8x32xf32>
    %410 = arith.addf %409, %408 : vector<8x32xf32>
    %411 = arith.divf %409, %410 : vector<8x32xf32>
    %412 = vector.extract_strided_slice %401 {offsets = [0, 32], sizes = [8, 32], strides = [1, 1]} : vector<8x96xf32> to vector<8x32xf32>
    %413 = vector.extract_strided_slice %403 {offsets = [0, 32], sizes = [8, 32], strides = [1, 1]} : vector<8x96xf32> to vector<8x32xf32>
    %414 = arith.addf %412, %413 : vector<8x32xf32>
    %415 = arith.negf %414 : vector<8x32xf32>
    %416 = math.exp %415 : vector<8x32xf32>
    %cst_125 = arith.constant 1.000000e+00 : f32
    %417 = vector.broadcast %cst_125 : f32 to vector<8x32xf32>
    %418 = arith.addf %417, %416 : vector<8x32xf32>
    %419 = arith.divf %417, %418 : vector<8x32xf32>
    %420 = vector.extract_strided_slice %401 {offsets = [0, 64], sizes = [8, 32], strides = [1, 1]} : vector<8x96xf32> to vector<8x32xf32>
    %421 = vector.extract_strided_slice %403 {offsets = [0, 64], sizes = [8, 32], strides = [1, 1]} : vector<8x96xf32> to vector<8x32xf32>
    %422 = arith.addf %421, %11 : vector<8x32xf32>
    %423 = arith.mulf %411, %422 : vector<8x32xf32>
    %424 = arith.addf %420, %423 : vector<8x32xf32>
    %425 = math.tanh %424 : vector<8x32xf32>
    %cst_126 = arith.constant 1.000000e+00 : f32
    %426 = vector.broadcast %cst_126 : f32 to vector<8x32xf32>
    %427 = arith.subf %426, %419 : vector<8x32xf32>
    %428 = arith.mulf %427, %425 : vector<8x32xf32>
    %429 = arith.mulf %419, %354 : vector<8x32xf32>
    %430 = arith.addf %428, %429 : vector<8x32xf32>
    %431 = arith.truncf %430 : vector<8x32xf32> to vector<8x32xbf16>
    %c5_127 = arith.constant 5 : index
    %c0_128 = arith.constant 0 : index
    %c0_129 = arith.constant 0 : index
    %432 = vector.load %arg12[%c5_127, %c0_128, %c0_129] : memref<24x8x32xbf16, #tpu.memory_space<vmem>>, vector<1x8x32xbf16>
    %433 = vector.shape_cast %432 : vector<1x8x32xbf16> to vector<8x32xbf16>
    %434 = vector.shape_cast %431 : vector<8x32xbf16> to vector<1x8x32xbf16>
    tpu.vector_store %arg12[%c5_127, %c0_128, %c0_129], %434 {strides = array<i32>} : memref<24x8x32xbf16, #tpu.memory_space<vmem>>, vector<1x8x32xbf16>,
    %c18 = arith.constant 18 : index
    %c0_130 = arith.constant 0 : index
    %c0_131 = arith.constant 0 : index
    %435 = vector.load %arg3[%c18, %c0_130, %c0_131] : memref<24x8x32xbf16, #tpu.memory_space<vmem>>, vector<1x8x32xbf16>
    %436 = vector.shape_cast %435 : vector<1x8x32xbf16> to vector<8x32xbf16>
    %cst_132 = arith.constant dense<0.000000e+00> : vector<8x96xf32>
    %437 = tpu.matmul %436, %4, %cst_132 {dimension_numbers = #tpu.dot_dimension_numbers<[1], [0], [0], [1], [0, 0, 1, 1], [], []>} : vector<8x32xbf16>, vector<32x96xbf16>, vector<8x96xf32> -> vector<8x96xf32>
    %438 = vector.broadcast %8 : vector<1x96xf32> to vector<8x96xf32>
    %439 = arith.addf %437, %438 : vector<8x96xf32>
    %440 = arith.truncf %392 : vector<8x32xf32> to vector<8x32xbf16>
    %cst_133 = arith.constant dense<0.000000e+00> : vector<8x96xf32>
    %441 = tpu.matmul %440, %6, %cst_133 {dimension_numbers = #tpu.dot_dimension_numbers<[1], [0], [0], [1], [0, 0, 1, 1], [], []>} : vector<8x32xbf16>, vector<32x96xbf16>, vector<8x96xf32> -> vector<8x96xf32>
    %442 = vector.extract_strided_slice %439 {offsets = [0, 0], sizes = [8, 32], strides = [1, 1]} : vector<8x96xf32> to vector<8x32xf32>
    %443 = vector.extract_strided_slice %441 {offsets = [0, 0], sizes = [8, 32], strides = [1, 1]} : vector<8x96xf32> to vector<8x32xf32>
    %444 = arith.addf %442, %443 : vector<8x32xf32>
    %445 = arith.negf %444 : vector<8x32xf32>
    %446 = math.exp %445 : vector<8x32xf32>
    %cst_134 = arith.constant 1.000000e+00 : f32
    %447 = vector.broadcast %cst_134 : f32 to vector<8x32xf32>
    %448 = arith.addf %447, %446 : vector<8x32xf32>
    %449 = arith.divf %447, %448 : vector<8x32xf32>
    %450 = vector.extract_strided_slice %439 {offsets = [0, 32], sizes = [8, 32], strides = [1, 1]} : vector<8x96xf32> to vector<8x32xf32>
    %451 = vector.extract_strided_slice %441 {offsets = [0, 32], sizes = [8, 32], strides = [1, 1]} : vector<8x96xf32> to vector<8x32xf32>
    %452 = arith.addf %450, %451 : vector<8x32xf32>
    %453 = arith.negf %452 : vector<8x32xf32>
    %454 = math.exp %453 : vector<8x32xf32>
    %cst_135 = arith.constant 1.000000e+00 : f32
    %455 = vector.broadcast %cst_135 : f32 to vector<8x32xf32>
    %456 = arith.addf %455, %454 : vector<8x32xf32>
    %457 = arith.divf %455, %456 : vector<8x32xf32>
    %458 = vector.extract_strided_slice %439 {offsets = [0, 64], sizes = [8, 32], strides = [1, 1]} : vector<8x96xf32> to vector<8x32xf32>
    %459 = vector.extract_strided_slice %441 {offsets = [0, 64], sizes = [8, 32], strides = [1, 1]} : vector<8x96xf32> to vector<8x32xf32>
    %460 = arith.addf %459, %14 : vector<8x32xf32>
    %461 = arith.mulf %449, %460 : vector<8x32xf32>
    %462 = arith.addf %458, %461 : vector<8x32xf32>
    %463 = math.tanh %462 : vector<8x32xf32>
    %cst_136 = arith.constant 1.000000e+00 : f32
    %464 = vector.broadcast %cst_136 : f32 to vector<8x32xf32>
    %465 = arith.subf %464, %457 : vector<8x32xf32>
    %466 = arith.mulf %465, %463 : vector<8x32xf32>
    %467 = arith.mulf %457, %392 : vector<8x32xf32>
    %468 = arith.addf %466, %467 : vector<8x32xf32>
    %469 = arith.truncf %468 : vector<8x32xf32> to vector<8x32xbf16>
    %c18_137 = arith.constant 18 : index
    %c0_138 = arith.constant 0 : index
    %c0_139 = arith.constant 0 : index
    %470 = vector.load %arg13[%c18_137, %c0_138, %c0_139] : memref<24x8x32xbf16, #tpu.memory_space<vmem>>, vector<1x8x32xbf16>
    %471 = vector.shape_cast %470 : vector<1x8x32xbf16> to vector<8x32xbf16>
    %472 = vector.shape_cast %469 : vector<8x32xbf16> to vector<1x8x32xbf16>
    tpu.vector_store %arg13[%c18_137, %c0_138, %c0_139], %472 {strides = array<i32>} : memref<24x8x32xbf16, #tpu.memory_space<vmem>>, vector<1x8x32xbf16>,
    %c6 = arith.constant 6 : index
    %c0_140 = arith.constant 0 : index
    %c0_141 = arith.constant 0 : index
    %473 = vector.load %arg2[%c6, %c0_140, %c0_141] : memref<24x8x32xbf16, #tpu.memory_space<vmem>>, vector<1x8x32xbf16>
    %474 = vector.shape_cast %473 : vector<1x8x32xbf16> to vector<8x32xbf16>
    %cst_142 = arith.constant dense<0.000000e+00> : vector<8x96xf32>
    %475 = tpu.matmul %474, %3, %cst_142 {dimension_numbers = #tpu.dot_dimension_numbers<[1], [0], [0], [1], [0, 0, 1, 1], [], []>} : vector<8x32xbf16>, vector<32x96xbf16>, vector<8x96xf32> -> vector<8x96xf32>
    %476 = vector.broadcast %7 : vector<1x96xf32> to vector<8x96xf32>
    %477 = arith.addf %475, %476 : vector<8x96xf32>
    %478 = arith.truncf %430 : vector<8x32xf32> to vector<8x32xbf16>
    %cst_143 = arith.constant dense<0.000000e+00> : vector<8x96xf32>
    %479 = tpu.matmul %478, %5, %cst_143 {dimension_numbers = #tpu.dot_dimension_numbers<[1], [0], [0], [1], [0, 0, 1, 1], [], []>} : vector<8x32xbf16>, vector<32x96xbf16>, vector<8x96xf32> -> vector<8x96xf32>
    %480 = vector.extract_strided_slice %477 {offsets = [0, 0], sizes = [8, 32], strides = [1, 1]} : vector<8x96xf32> to vector<8x32xf32>
    %481 = vector.extract_strided_slice %479 {offsets = [0, 0], sizes = [8, 32], strides = [1, 1]} : vector<8x96xf32> to vector<8x32xf32>
    %482 = arith.addf %480, %481 : vector<8x32xf32>
    %483 = arith.negf %482 : vector<8x32xf32>
    %484 = math.exp %483 : vector<8x32xf32>
    %cst_144 = arith.constant 1.000000e+00 : f32
    %485 = vector.broadcast %cst_144 : f32 to vector<8x32xf32>
    %486 = arith.addf %485, %484 : vector<8x32xf32>
    %487 = arith.divf %485, %486 : vector<8x32xf32>
    %488 = vector.extract_strided_slice %477 {offsets = [0, 32], sizes = [8, 32], strides = [1, 1]} : vector<8x96xf32> to vector<8x32xf32>
    %489 = vector.extract_strided_slice %479 {offsets = [0, 32], sizes = [8, 32], strides = [1, 1]} : vector<8x96xf32> to vector<8x32xf32>
    %490 = arith.addf %488, %489 : vector<8x32xf32>
    %491 = arith.negf %490 : vector<8x32xf32>
    %492 = math.exp %491 : vector<8x32xf32>
    %cst_145 = arith.constant 1.000000e+00 : f32
    %493 = vector.broadcast %cst_145 : f32 to vector<8x32xf32>
    %494 = arith.addf %493, %492 : vector<8x32xf32>
    %495 = arith.divf %493, %494 : vector<8x32xf32>
    %496 = vector.extract_strided_slice %477 {offsets = [0, 64], sizes = [8, 32], strides = [1, 1]} : vector<8x96xf32> to vector<8x32xf32>
    %497 = vector.extract_strided_slice %479 {offsets = [0, 64], sizes = [8, 32], strides = [1, 1]} : vector<8x96xf32> to vector<8x32xf32>
    %498 = arith.addf %497, %11 : vector<8x32xf32>
    %499 = arith.mulf %487, %498 : vector<8x32xf32>
    %500 = arith.addf %496, %499 : vector<8x32xf32>
    %501 = math.tanh %500 : vector<8x32xf32>
    %cst_146 = arith.constant 1.000000e+00 : f32
    %502 = vector.broadcast %cst_146 : f32 to vector<8x32xf32>
    %503 = arith.subf %502, %495 : vector<8x32xf32>
    %504 = arith.mulf %503, %501 : vector<8x32xf32>
    %505 = arith.mulf %495, %430 : vector<8x32xf32>
    %506 = arith.addf %504, %505 : vector<8x32xf32>
    %507 = arith.truncf %506 : vector<8x32xf32> to vector<8x32xbf16>
    %c6_147 = arith.constant 6 : index
    %c0_148 = arith.constant 0 : index
    %c0_149 = arith.constant 0 : index
    %508 = vector.load %arg12[%c6_147, %c0_148, %c0_149] : memref<24x8x32xbf16, #tpu.memory_space<vmem>>, vector<1x8x32xbf16>
    %509 = vector.shape_cast %508 : vector<1x8x32xbf16> to vector<8x32xbf16>
    %510 = vector.shape_cast %507 : vector<8x32xbf16> to vector<1x8x32xbf16>
    tpu.vector_store %arg12[%c6_147, %c0_148, %c0_149], %510 {strides = array<i32>} : memref<24x8x32xbf16, #tpu.memory_space<vmem>>, vector<1x8x32xbf16>,
    %c17 = arith.constant 17 : index
    %c0_150 = arith.constant 0 : index
    %c0_151 = arith.constant 0 : index
    %511 = vector.load %arg3[%c17, %c0_150, %c0_151] : memref<24x8x32xbf16, #tpu.memory_space<vmem>>, vector<1x8x32xbf16>
    %512 = vector.shape_cast %511 : vector<1x8x32xbf16> to vector<8x32xbf16>
    %cst_152 = arith.constant dense<0.000000e+00> : vector<8x96xf32>
    %513 = tpu.matmul %512, %4, %cst_152 {dimension_numbers = #tpu.dot_dimension_numbers<[1], [0], [0], [1], [0, 0, 1, 1], [], []>} : vector<8x32xbf16>, vector<32x96xbf16>, vector<8x96xf32> -> vector<8x96xf32>
    %514 = vector.broadcast %8 : vector<1x96xf32> to vector<8x96xf32>
    %515 = arith.addf %513, %514 : vector<8x96xf32>
    %516 = arith.truncf %468 : vector<8x32xf32> to vector<8x32xbf16>
    %cst_153 = arith.constant dense<0.000000e+00> : vector<8x96xf32>
    %517 = tpu.matmul %516, %6, %cst_153 {dimension_numbers = #tpu.dot_dimension_numbers<[1], [0], [0], [1], [0, 0, 1, 1], [], []>} : vector<8x32xbf16>, vector<32x96xbf16>, vector<8x96xf32> -> vector<8x96xf32>
    %518 = vector.extract_strided_slice %515 {offsets = [0, 0], sizes = [8, 32], strides = [1, 1]} : vector<8x96xf32> to vector<8x32xf32>
    %519 = vector.extract_strided_slice %517 {offsets = [0, 0], sizes = [8, 32], strides = [1, 1]} : vector<8x96xf32> to vector<8x32xf32>
    %520 = arith.addf %518, %519 : vector<8x32xf32>
    %521 = arith.negf %520 : vector<8x32xf32>
    %522 = math.exp %521 : vector<8x32xf32>
    %cst_154 = arith.constant 1.000000e+00 : f32
    %523 = vector.broadcast %cst_154 : f32 to vector<8x32xf32>
    %524 = arith.addf %523, %522 : vector<8x32xf32>
    %525 = arith.divf %523, %524 : vector<8x32xf32>
    %526 = vector.extract_strided_slice %515 {offsets = [0, 32], sizes = [8, 32], strides = [1, 1]} : vector<8x96xf32> to vector<8x32xf32>
    %527 = vector.extract_strided_slice %517 {offsets = [0, 32], sizes = [8, 32], strides = [1, 1]} : vector<8x96xf32> to vector<8x32xf32>
    %528 = arith.addf %526, %527 : vector<8x32xf32>
    %529 = arith.negf %528 : vector<8x32xf32>
    %530 = math.exp %529 : vector<8x32xf32>
    %cst_155 = arith.constant 1.000000e+00 : f32
    %531 = vector.broadcast %cst_155 : f32 to vector<8x32xf32>
    %532 = arith.addf %531, %530 : vector<8x32xf32>
    %533 = arith.divf %531, %532 : vector<8x32xf32>
    %534 = vector.extract_strided_slice %515 {offsets = [0, 64], sizes = [8, 32], strides = [1, 1]} : vector<8x96xf32> to vector<8x32xf32>
    %535 = vector.extract_strided_slice %517 {offsets = [0, 64], sizes = [8, 32], strides = [1, 1]} : vector<8x96xf32> to vector<8x32xf32>
    %536 = arith.addf %535, %14 : vector<8x32xf32>
    %537 = arith.mulf %525, %536 : vector<8x32xf32>
    %538 = arith.addf %534, %537 : vector<8x32xf32>
    %539 = math.tanh %538 : vector<8x32xf32>
    %cst_156 = arith.constant 1.000000e+00 : f32
    %540 = vector.broadcast %cst_156 : f32 to vector<8x32xf32>
    %541 = arith.subf %540, %533 : vector<8x32xf32>
    %542 = arith.mulf %541, %539 : vector<8x32xf32>
    %543 = arith.mulf %533, %468 : vector<8x32xf32>
    %544 = arith.addf %542, %543 : vector<8x32xf32>
    %545 = arith.truncf %544 : vector<8x32xf32> to vector<8x32xbf16>
    %c17_157 = arith.constant 17 : index
    %c0_158 = arith.constant 0 : index
    %c0_159 = arith.constant 0 : index
    %546 = vector.load %arg13[%c17_157, %c0_158, %c0_159] : memref<24x8x32xbf16, #tpu.memory_space<vmem>>, vector<1x8x32xbf16>
    %547 = vector.shape_cast %546 : vector<1x8x32xbf16> to vector<8x32xbf16>
    %548 = vector.shape_cast %545 : vector<8x32xbf16> to vector<1x8x32xbf16>
    tpu.vector_store %arg13[%c17_157, %c0_158, %c0_159], %548 {strides = array<i32>} : memref<24x8x32xbf16, #tpu.memory_space<vmem>>, vector<1x8x32xbf16>,
    %c7 = arith.constant 7 : index
    %c0_160 = arith.constant 0 : index
    %c0_161 = arith.constant 0 : index
    %549 = vector.load %arg2[%c7, %c0_160, %c0_161] : memref<24x8x32xbf16, #tpu.memory_space<vmem>>, vector<1x8x32xbf16>
    %550 = vector.shape_cast %549 : vector<1x8x32xbf16> to vector<8x32xbf16>
    %cst_162 = arith.constant dense<0.000000e+00> : vector<8x96xf32>
    %551 = tpu.matmul %550, %3, %cst_162 {dimension_numbers = #tpu.dot_dimension_numbers<[1], [0], [0], [1], [0, 0, 1, 1], [], []>} : vector<8x32xbf16>, vector<32x96xbf16>, vector<8x96xf32> -> vector<8x96xf32>
    %552 = vector.broadcast %7 : vector<1x96xf32> to vector<8x96xf32>
    %553 = arith.addf %551, %552 : vector<8x96xf32>
    %554 = arith.truncf %506 : vector<8x32xf32> to vector<8x32xbf16>
    %cst_163 = arith.constant dense<0.000000e+00> : vector<8x96xf32>
    %555 = tpu.matmul %554, %5, %cst_163 {dimension_numbers = #tpu.dot_dimension_numbers<[1], [0], [0], [1], [0, 0, 1, 1], [], []>} : vector<8x32xbf16>, vector<32x96xbf16>, vector<8x96xf32> -> vector<8x96xf32>
    %556 = vector.extract_strided_slice %553 {offsets = [0, 0], sizes = [8, 32], strides = [1, 1]} : vector<8x96xf32> to vector<8x32xf32>
    %557 = vector.extract_strided_slice %555 {offsets = [0, 0], sizes = [8, 32], strides = [1, 1]} : vector<8x96xf32> to vector<8x32xf32>
    %558 = arith.addf %556, %557 : vector<8x32xf32>
    %559 = arith.negf %558 : vector<8x32xf32>
    %560 = math.exp %559 : vector<8x32xf32>
    %cst_164 = arith.constant 1.000000e+00 : f32
    %561 = vector.broadcast %cst_164 : f32 to vector<8x32xf32>
    %562 = arith.addf %561, %560 : vector<8x32xf32>
    %563 = arith.divf %561, %562 : vector<8x32xf32>
    %564 = vector.extract_strided_slice %553 {offsets = [0, 32], sizes = [8, 32], strides = [1, 1]} : vector<8x96xf32> to vector<8x32xf32>
    %565 = vector.extract_strided_slice %555 {offsets = [0, 32], sizes = [8, 32], strides = [1, 1]} : vector<8x96xf32> to vector<8x32xf32>
    %566 = arith.addf %564, %565 : vector<8x32xf32>
    %567 = arith.negf %566 : vector<8x32xf32>
    %568 = math.exp %567 : vector<8x32xf32>
    %cst_165 = arith.constant 1.000000e+00 : f32
    %569 = vector.broadcast %cst_165 : f32 to vector<8x32xf32>
    %570 = arith.addf %569, %568 : vector<8x32xf32>
    %571 = arith.divf %569, %570 : vector<8x32xf32>
    %572 = vector.extract_strided_slice %553 {offsets = [0, 64], sizes = [8, 32], strides = [1, 1]} : vector<8x96xf32> to vector<8x32xf32>
    %573 = vector.extract_strided_slice %555 {offsets = [0, 64], sizes = [8, 32], strides = [1, 1]} : vector<8x96xf32> to vector<8x32xf32>
    %574 = arith.addf %573, %11 : vector<8x32xf32>
    %575 = arith.mulf %563, %574 : vector<8x32xf32>
    %576 = arith.addf %572, %575 : vector<8x32xf32>
    %577 = math.tanh %576 : vector<8x32xf32>
    %cst_166 = arith.constant 1.000000e+00 : f32
    %578 = vector.broadcast %cst_166 : f32 to vector<8x32xf32>
    %579 = arith.subf %578, %571 : vector<8x32xf32>
    %580 = arith.mulf %579, %577 : vector<8x32xf32>
    %581 = arith.mulf %571, %506 : vector<8x32xf32>
    %582 = arith.addf %580, %581 : vector<8x32xf32>
    %583 = arith.truncf %582 : vector<8x32xf32> to vector<8x32xbf16>
    %c7_167 = arith.constant 7 : index
    %c0_168 = arith.constant 0 : index
    %c0_169 = arith.constant 0 : index
    %584 = vector.load %arg12[%c7_167, %c0_168, %c0_169] : memref<24x8x32xbf16, #tpu.memory_space<vmem>>, vector<1x8x32xbf16>
    %585 = vector.shape_cast %584 : vector<1x8x32xbf16> to vector<8x32xbf16>
    %586 = vector.shape_cast %583 : vector<8x32xbf16> to vector<1x8x32xbf16>
    tpu.vector_store %arg12[%c7_167, %c0_168, %c0_169], %586 {strides = array<i32>} : memref<24x8x32xbf16, #tpu.memory_space<vmem>>, vector<1x8x32xbf16>,
    %c16 = arith.constant 16 : index
    %c0_170 = arith.constant 0 : index
    %c0_171 = arith.constant 0 : index
    %587 = vector.load %arg3[%c16, %c0_170, %c0_171] : memref<24x8x32xbf16, #tpu.memory_space<vmem>>, vector<1x8x32xbf16>
    %588 = vector.shape_cast %587 : vector<1x8x32xbf16> to vector<8x32xbf16>
    %cst_172 = arith.constant dense<0.000000e+00> : vector<8x96xf32>
    %589 = tpu.matmul %588, %4, %cst_172 {dimension_numbers = #tpu.dot_dimension_numbers<[1], [0], [0], [1], [0, 0, 1, 1], [], []>} : vector<8x32xbf16>, vector<32x96xbf16>, vector<8x96xf32> -> vector<8x96xf32>
    %590 = vector.broadcast %8 : vector<1x96xf32> to vector<8x96xf32>
    %591 = arith.addf %589, %590 : vector<8x96xf32>
    %592 = arith.truncf %544 : vector<8x32xf32> to vector<8x32xbf16>
    %cst_173 = arith.constant dense<0.000000e+00> : vector<8x96xf32>
    %593 = tpu.matmul %592, %6, %cst_173 {dimension_numbers = #tpu.dot_dimension_numbers<[1], [0], [0], [1], [0, 0, 1, 1], [], []>} : vector<8x32xbf16>, vector<32x96xbf16>, vector<8x96xf32> -> vector<8x96xf32>
    %594 = vector.extract_strided_slice %591 {offsets = [0, 0], sizes = [8, 32], strides = [1, 1]} : vector<8x96xf32> to vector<8x32xf32>
    %595 = vector.extract_strided_slice %593 {offsets = [0, 0], sizes = [8, 32], strides = [1, 1]} : vector<8x96xf32> to vector<8x32xf32>
    %596 = arith.addf %594, %595 : vector<8x32xf32>
    %597 = arith.negf %596 : vector<8x32xf32>
    %598 = math.exp %597 : vector<8x32xf32>
    %cst_174 = arith.constant 1.000000e+00 : f32
    %599 = vector.broadcast %cst_174 : f32 to vector<8x32xf32>
    %600 = arith.addf %599, %598 : vector<8x32xf32>
    %601 = arith.divf %599, %600 : vector<8x32xf32>
    %602 = vector.extract_strided_slice %591 {offsets = [0, 32], sizes = [8, 32], strides = [1, 1]} : vector<8x96xf32> to vector<8x32xf32>
    %603 = vector.extract_strided_slice %593 {offsets = [0, 32], sizes = [8, 32], strides = [1, 1]} : vector<8x96xf32> to vector<8x32xf32>
    %604 = arith.addf %602, %603 : vector<8x32xf32>
    %605 = arith.negf %604 : vector<8x32xf32>
    %606 = math.exp %605 : vector<8x32xf32>
    %cst_175 = arith.constant 1.000000e+00 : f32
    %607 = vector.broadcast %cst_175 : f32 to vector<8x32xf32>
    %608 = arith.addf %607, %606 : vector<8x32xf32>
    %609 = arith.divf %607, %608 : vector<8x32xf32>
    %610 = vector.extract_strided_slice %591 {offsets = [0, 64], sizes = [8, 32], strides = [1, 1]} : vector<8x96xf32> to vector<8x32xf32>
    %611 = vector.extract_strided_slice %593 {offsets = [0, 64], sizes = [8, 32], strides = [1, 1]} : vector<8x96xf32> to vector<8x32xf32>
    %612 = arith.addf %611, %14 : vector<8x32xf32>
    %613 = arith.mulf %601, %612 : vector<8x32xf32>
    %614 = arith.addf %610, %613 : vector<8x32xf32>
    %615 = math.tanh %614 : vector<8x32xf32>
    %cst_176 = arith.constant 1.000000e+00 : f32
    %616 = vector.broadcast %cst_176 : f32 to vector<8x32xf32>
    %617 = arith.subf %616, %609 : vector<8x32xf32>
    %618 = arith.mulf %617, %615 : vector<8x32xf32>
    %619 = arith.mulf %609, %544 : vector<8x32xf32>
    %620 = arith.addf %618, %619 : vector<8x32xf32>
    %621 = arith.truncf %620 : vector<8x32xf32> to vector<8x32xbf16>
    %c16_177 = arith.constant 16 : index
    %c0_178 = arith.constant 0 : index
    %c0_179 = arith.constant 0 : index
    %622 = vector.load %arg13[%c16_177, %c0_178, %c0_179] : memref<24x8x32xbf16, #tpu.memory_space<vmem>>, vector<1x8x32xbf16>
    %623 = vector.shape_cast %622 : vector<1x8x32xbf16> to vector<8x32xbf16>
    %624 = vector.shape_cast %621 : vector<8x32xbf16> to vector<1x8x32xbf16>
    tpu.vector_store %arg13[%c16_177, %c0_178, %c0_179], %624 {strides = array<i32>} : memref<24x8x32xbf16, #tpu.memory_space<vmem>>, vector<1x8x32xbf16>,
    %c8 = arith.constant 8 : index
    %c0_180 = arith.constant 0 : index
    %c0_181 = arith.constant 0 : index
    %625 = vector.load %arg2[%c8, %c0_180, %c0_181] : memref<24x8x32xbf16, #tpu.memory_space<vmem>>, vector<1x8x32xbf16>
    %626 = vector.shape_cast %625 : vector<1x8x32xbf16> to vector<8x32xbf16>
    %cst_182 = arith.constant dense<0.000000e+00> : vector<8x96xf32>
    %627 = tpu.matmul %626, %3, %cst_182 {dimension_numbers = #tpu.dot_dimension_numbers<[1], [0], [0], [1], [0, 0, 1, 1], [], []>} : vector<8x32xbf16>, vector<32x96xbf16>, vector<8x96xf32> -> vector<8x96xf32>
    %628 = vector.broadcast %7 : vector<1x96xf32> to vector<8x96xf32>
    %629 = arith.addf %627, %628 : vector<8x96xf32>
    %630 = arith.truncf %582 : vector<8x32xf32> to vector<8x32xbf16>
    %cst_183 = arith.constant dense<0.000000e+00> : vector<8x96xf32>
    %631 = tpu.matmul %630, %5, %cst_183 {dimension_numbers = #tpu.dot_dimension_numbers<[1], [0], [0], [1], [0, 0, 1, 1], [], []>} : vector<8x32xbf16>, vector<32x96xbf16>, vector<8x96xf32> -> vector<8x96xf32>
    %632 = vector.extract_strided_slice %629 {offsets = [0, 0], sizes = [8, 32], strides = [1, 1]} : vector<8x96xf32> to vector<8x32xf32>
    %633 = vector.extract_strided_slice %631 {offsets = [0, 0], sizes = [8, 32], strides = [1, 1]} : vector<8x96xf32> to vector<8x32xf32>
    %634 = arith.addf %632, %633 : vector<8x32xf32>
    %635 = arith.negf %634 : vector<8x32xf32>
    %636 = math.exp %635 : vector<8x32xf32>
    %cst_184 = arith.constant 1.000000e+00 : f32
    %637 = vector.broadcast %cst_184 : f32 to vector<8x32xf32>
    %638 = arith.addf %637, %636 : vector<8x32xf32>
    %639 = arith.divf %637, %638 : vector<8x32xf32>
    %640 = vector.extract_strided_slice %629 {offsets = [0, 32], sizes = [8, 32], strides = [1, 1]} : vector<8x96xf32> to vector<8x32xf32>
    %641 = vector.extract_strided_slice %631 {offsets = [0, 32], sizes = [8, 32], strides = [1, 1]} : vector<8x96xf32> to vector<8x32xf32>
    %642 = arith.addf %640, %641 : vector<8x32xf32>
    %643 = arith.negf %642 : vector<8x32xf32>
    %644 = math.exp %643 : vector<8x32xf32>
    %cst_185 = arith.constant 1.000000e+00 : f32
    %645 = vector.broadcast %cst_185 : f32 to vector<8x32xf32>
    %646 = arith.addf %645, %644 : vector<8x32xf32>
    %647 = arith.divf %645, %646 : vector<8x32xf32>
    %648 = vector.extract_strided_slice %629 {offsets = [0, 64], sizes = [8, 32], strides = [1, 1]} : vector<8x96xf32> to vector<8x32xf32>
    %649 = vector.extract_strided_slice %631 {offsets = [0, 64], sizes = [8, 32], strides = [1, 1]} : vector<8x96xf32> to vector<8x32xf32>
    %650 = arith.addf %649, %11 : vector<8x32xf32>
    %651 = arith.mulf %639, %650 : vector<8x32xf32>
    %652 = arith.addf %648, %651 : vector<8x32xf32>
    %653 = math.tanh %652 : vector<8x32xf32>
    %cst_186 = arith.constant 1.000000e+00 : f32
    %654 = vector.broadcast %cst_186 : f32 to vector<8x32xf32>
    %655 = arith.subf %654, %647 : vector<8x32xf32>
    %656 = arith.mulf %655, %653 : vector<8x32xf32>
    %657 = arith.mulf %647, %582 : vector<8x32xf32>
    %658 = arith.addf %656, %657 : vector<8x32xf32>
    %659 = arith.truncf %658 : vector<8x32xf32> to vector<8x32xbf16>
    %c8_187 = arith.constant 8 : index
    %c0_188 = arith.constant 0 : index
    %c0_189 = arith.constant 0 : index
    %660 = vector.load %arg12[%c8_187, %c0_188, %c0_189] : memref<24x8x32xbf16, #tpu.memory_space<vmem>>, vector<1x8x32xbf16>
    %661 = vector.shape_cast %660 : vector<1x8x32xbf16> to vector<8x32xbf16>
    %662 = vector.shape_cast %659 : vector<8x32xbf16> to vector<1x8x32xbf16>
    tpu.vector_store %arg12[%c8_187, %c0_188, %c0_189], %662 {strides = array<i32>} : memref<24x8x32xbf16, #tpu.memory_space<vmem>>, vector<1x8x32xbf16>,
    %c15 = arith.constant 15 : index
    %c0_190 = arith.constant 0 : index
    %c0_191 = arith.constant 0 : index
    %663 = vector.load %arg3[%c15, %c0_190, %c0_191] : memref<24x8x32xbf16, #tpu.memory_space<vmem>>, vector<1x8x32xbf16>
    %664 = vector.shape_cast %663 : vector<1x8x32xbf16> to vector<8x32xbf16>
    %cst_192 = arith.constant dense<0.000000e+00> : vector<8x96xf32>
    %665 = tpu.matmul %664, %4, %cst_192 {dimension_numbers = #tpu.dot_dimension_numbers<[1], [0], [0], [1], [0, 0, 1, 1], [], []>} : vector<8x32xbf16>, vector<32x96xbf16>, vector<8x96xf32> -> vector<8x96xf32>
    %666 = vector.broadcast %8 : vector<1x96xf32> to vector<8x96xf32>
    %667 = arith.addf %665, %666 : vector<8x96xf32>
    %668 = arith.truncf %620 : vector<8x32xf32> to vector<8x32xbf16>
    %cst_193 = arith.constant dense<0.000000e+00> : vector<8x96xf32>
    %669 = tpu.matmul %668, %6, %cst_193 {dimension_numbers = #tpu.dot_dimension_numbers<[1], [0], [0], [1], [0, 0, 1, 1], [], []>} : vector<8x32xbf16>, vector<32x96xbf16>, vector<8x96xf32> -> vector<8x96xf32>
    %670 = vector.extract_strided_slice %667 {offsets = [0, 0], sizes = [8, 32], strides = [1, 1]} : vector<8x96xf32> to vector<8x32xf32>
    %671 = vector.extract_strided_slice %669 {offsets = [0, 0], sizes = [8, 32], strides = [1, 1]} : vector<8x96xf32> to vector<8x32xf32>
    %672 = arith.addf %670, %671 : vector<8x32xf32>
    %673 = arith.negf %672 : vector<8x32xf32>
    %674 = math.exp %673 : vector<8x32xf32>
    %cst_194 = arith.constant 1.000000e+00 : f32
    %675 = vector.broadcast %cst_194 : f32 to vector<8x32xf32>
    %676 = arith.addf %675, %674 : vector<8x32xf32>
    %677 = arith.divf %675, %676 : vector<8x32xf32>
    %678 = vector.extract_strided_slice %667 {offsets = [0, 32], sizes = [8, 32], strides = [1, 1]} : vector<8x96xf32> to vector<8x32xf32>
    %679 = vector.extract_strided_slice %669 {offsets = [0, 32], sizes = [8, 32], strides = [1, 1]} : vector<8x96xf32> to vector<8x32xf32>
    %680 = arith.addf %678, %679 : vector<8x32xf32>
    %681 = arith.negf %680 : vector<8x32xf32>
    %682 = math.exp %681 : vector<8x32xf32>
    %cst_195 = arith.constant 1.000000e+00 : f32
    %683 = vector.broadcast %cst_195 : f32 to vector<8x32xf32>
    %684 = arith.addf %683, %682 : vector<8x32xf32>
    %685 = arith.divf %683, %684 : vector<8x32xf32>
    %686 = vector.extract_strided_slice %667 {offsets = [0, 64], sizes = [8, 32], strides = [1, 1]} : vector<8x96xf32> to vector<8x32xf32>
    %687 = vector.extract_strided_slice %669 {offsets = [0, 64], sizes = [8, 32], strides = [1, 1]} : vector<8x96xf32> to vector<8x32xf32>
    %688 = arith.addf %687, %14 : vector<8x32xf32>
    %689 = arith.mulf %677, %688 : vector<8x32xf32>
    %690 = arith.addf %686, %689 : vector<8x32xf32>
    %691 = math.tanh %690 : vector<8x32xf32>
    %cst_196 = arith.constant 1.000000e+00 : f32
    %692 = vector.broadcast %cst_196 : f32 to vector<8x32xf32>
    %693 = arith.subf %692, %685 : vector<8x32xf32>
    %694 = arith.mulf %693, %691 : vector<8x32xf32>
    %695 = arith.mulf %685, %620 : vector<8x32xf32>
    %696 = arith.addf %694, %695 : vector<8x32xf32>
    %697 = arith.truncf %696 : vector<8x32xf32> to vector<8x32xbf16>
    %c15_197 = arith.constant 15 : index
    %c0_198 = arith.constant 0 : index
    %c0_199 = arith.constant 0 : index
    %698 = vector.load %arg13[%c15_197, %c0_198, %c0_199] : memref<24x8x32xbf16, #tpu.memory_space<vmem>>, vector<1x8x32xbf16>
    %699 = vector.shape_cast %698 : vector<1x8x32xbf16> to vector<8x32xbf16>
    %700 = vector.shape_cast %697 : vector<8x32xbf16> to vector<1x8x32xbf16>
    tpu.vector_store %arg13[%c15_197, %c0_198, %c0_199], %700 {strides = array<i32>} : memref<24x8x32xbf16, #tpu.memory_space<vmem>>, vector<1x8x32xbf16>,
    %c9 = arith.constant 9 : index
    %c0_200 = arith.constant 0 : index
    %c0_201 = arith.constant 0 : index
    %701 = vector.load %arg2[%c9, %c0_200, %c0_201] : memref<24x8x32xbf16, #tpu.memory_space<vmem>>, vector<1x8x32xbf16>
    %702 = vector.shape_cast %701 : vector<1x8x32xbf16> to vector<8x32xbf16>
    %cst_202 = arith.constant dense<0.000000e+00> : vector<8x96xf32>
    %703 = tpu.matmul %702, %3, %cst_202 {dimension_numbers = #tpu.dot_dimension_numbers<[1], [0], [0], [1], [0, 0, 1, 1], [], []>} : vector<8x32xbf16>, vector<32x96xbf16>, vector<8x96xf32> -> vector<8x96xf32>
    %704 = vector.broadcast %7 : vector<1x96xf32> to vector<8x96xf32>
    %705 = arith.addf %703, %704 : vector<8x96xf32>
    %706 = arith.truncf %658 : vector<8x32xf32> to vector<8x32xbf16>
    %cst_203 = arith.constant dense<0.000000e+00> : vector<8x96xf32>
    %707 = tpu.matmul %706, %5, %cst_203 {dimension_numbers = #tpu.dot_dimension_numbers<[1], [0], [0], [1], [0, 0, 1, 1], [], []>} : vector<8x32xbf16>, vector<32x96xbf16>, vector<8x96xf32> -> vector<8x96xf32>
    %708 = vector.extract_strided_slice %705 {offsets = [0, 0], sizes = [8, 32], strides = [1, 1]} : vector<8x96xf32> to vector<8x32xf32>
    %709 = vector.extract_strided_slice %707 {offsets = [0, 0], sizes = [8, 32], strides = [1, 1]} : vector<8x96xf32> to vector<8x32xf32>
    %710 = arith.addf %708, %709 : vector<8x32xf32>
    %711 = arith.negf %710 : vector<8x32xf32>
    %712 = math.exp %711 : vector<8x32xf32>
    %cst_204 = arith.constant 1.000000e+00 : f32
    %713 = vector.broadcast %cst_204 : f32 to vector<8x32xf32>
    %714 = arith.addf %713, %712 : vector<8x32xf32>
    %715 = arith.divf %713, %714 : vector<8x32xf32>
    %716 = vector.extract_strided_slice %705 {offsets = [0, 32], sizes = [8, 32], strides = [1, 1]} : vector<8x96xf32> to vector<8x32xf32>
    %717 = vector.extract_strided_slice %707 {offsets = [0, 32], sizes = [8, 32], strides = [1, 1]} : vector<8x96xf32> to vector<8x32xf32>
    %718 = arith.addf %716, %717 : vector<8x32xf32>
    %719 = arith.negf %718 : vector<8x32xf32>
    %720 = math.exp %719 : vector<8x32xf32>
    %cst_205 = arith.constant 1.000000e+00 : f32
    %721 = vector.broadcast %cst_205 : f32 to vector<8x32xf32>
    %722 = arith.addf %721, %720 : vector<8x32xf32>
    %723 = arith.divf %721, %722 : vector<8x32xf32>
    %724 = vector.extract_strided_slice %705 {offsets = [0, 64], sizes = [8, 32], strides = [1, 1]} : vector<8x96xf32> to vector<8x32xf32>
    %725 = vector.extract_strided_slice %707 {offsets = [0, 64], sizes = [8, 32], strides = [1, 1]} : vector<8x96xf32> to vector<8x32xf32>
    %726 = arith.addf %725, %11 : vector<8x32xf32>
    %727 = arith.mulf %715, %726 : vector<8x32xf32>
    %728 = arith.addf %724, %727 : vector<8x32xf32>
    %729 = math.tanh %728 : vector<8x32xf32>
    %cst_206 = arith.constant 1.000000e+00 : f32
    %730 = vector.broadcast %cst_206 : f32 to vector<8x32xf32>
    %731 = arith.subf %730, %723 : vector<8x32xf32>
    %732 = arith.mulf %731, %729 : vector<8x32xf32>
    %733 = arith.mulf %723, %658 : vector<8x32xf32>
    %734 = arith.addf %732, %733 : vector<8x32xf32>
    %735 = arith.truncf %734 : vector<8x32xf32> to vector<8x32xbf16>
    %c9_207 = arith.constant 9 : index
    %c0_208 = arith.constant 0 : index
    %c0_209 = arith.constant 0 : index
    %736 = vector.load %arg12[%c9_207, %c0_208, %c0_209] : memref<24x8x32xbf16, #tpu.memory_space<vmem>>, vector<1x8x32xbf16>
    %737 = vector.shape_cast %736 : vector<1x8x32xbf16> to vector<8x32xbf16>
    %738 = vector.shape_cast %735 : vector<8x32xbf16> to vector<1x8x32xbf16>
    tpu.vector_store %arg12[%c9_207, %c0_208, %c0_209], %738 {strides = array<i32>} : memref<24x8x32xbf16, #tpu.memory_space<vmem>>, vector<1x8x32xbf16>,
    %c14 = arith.constant 14 : index
    %c0_210 = arith.constant 0 : index
    %c0_211 = arith.constant 0 : index
    %739 = vector.load %arg3[%c14, %c0_210, %c0_211] : memref<24x8x32xbf16, #tpu.memory_space<vmem>>, vector<1x8x32xbf16>
    %740 = vector.shape_cast %739 : vector<1x8x32xbf16> to vector<8x32xbf16>
    %cst_212 = arith.constant dense<0.000000e+00> : vector<8x96xf32>
    %741 = tpu.matmul %740, %4, %cst_212 {dimension_numbers = #tpu.dot_dimension_numbers<[1], [0], [0], [1], [0, 0, 1, 1], [], []>} : vector<8x32xbf16>, vector<32x96xbf16>, vector<8x96xf32> -> vector<8x96xf32>
    %742 = vector.broadcast %8 : vector<1x96xf32> to vector<8x96xf32>
    %743 = arith.addf %741, %742 : vector<8x96xf32>
    %744 = arith.truncf %696 : vector<8x32xf32> to vector<8x32xbf16>
    %cst_213 = arith.constant dense<0.000000e+00> : vector<8x96xf32>
    %745 = tpu.matmul %744, %6, %cst_213 {dimension_numbers = #tpu.dot_dimension_numbers<[1], [0], [0], [1], [0, 0, 1, 1], [], []>} : vector<8x32xbf16>, vector<32x96xbf16>, vector<8x96xf32> -> vector<8x96xf32>
    %746 = vector.extract_strided_slice %743 {offsets = [0, 0], sizes = [8, 32], strides = [1, 1]} : vector<8x96xf32> to vector<8x32xf32>
    %747 = vector.extract_strided_slice %745 {offsets = [0, 0], sizes = [8, 32], strides = [1, 1]} : vector<8x96xf32> to vector<8x32xf32>
    %748 = arith.addf %746, %747 : vector<8x32xf32>
    %749 = arith.negf %748 : vector<8x32xf32>
    %750 = math.exp %749 : vector<8x32xf32>
    %cst_214 = arith.constant 1.000000e+00 : f32
    %751 = vector.broadcast %cst_214 : f32 to vector<8x32xf32>
    %752 = arith.addf %751, %750 : vector<8x32xf32>
    %753 = arith.divf %751, %752 : vector<8x32xf32>
    %754 = vector.extract_strided_slice %743 {offsets = [0, 32], sizes = [8, 32], strides = [1, 1]} : vector<8x96xf32> to vector<8x32xf32>
    %755 = vector.extract_strided_slice %745 {offsets = [0, 32], sizes = [8, 32], strides = [1, 1]} : vector<8x96xf32> to vector<8x32xf32>
    %756 = arith.addf %754, %755 : vector<8x32xf32>
    %757 = arith.negf %756 : vector<8x32xf32>
    %758 = math.exp %757 : vector<8x32xf32>
    %cst_215 = arith.constant 1.000000e+00 : f32
    %759 = vector.broadcast %cst_215 : f32 to vector<8x32xf32>
    %760 = arith.addf %759, %758 : vector<8x32xf32>
    %761 = arith.divf %759, %760 : vector<8x32xf32>
    %762 = vector.extract_strided_slice %743 {offsets = [0, 64], sizes = [8, 32], strides = [1, 1]} : vector<8x96xf32> to vector<8x32xf32>
    %763 = vector.extract_strided_slice %745 {offsets = [0, 64], sizes = [8, 32], strides = [1, 1]} : vector<8x96xf32> to vector<8x32xf32>
    %764 = arith.addf %763, %14 : vector<8x32xf32>
    %765 = arith.mulf %753, %764 : vector<8x32xf32>
    %766 = arith.addf %762, %765 : vector<8x32xf32>
    %767 = math.tanh %766 : vector<8x32xf32>
    %cst_216 = arith.constant 1.000000e+00 : f32
    %768 = vector.broadcast %cst_216 : f32 to vector<8x32xf32>
    %769 = arith.subf %768, %761 : vector<8x32xf32>
    %770 = arith.mulf %769, %767 : vector<8x32xf32>
    %771 = arith.mulf %761, %696 : vector<8x32xf32>
    %772 = arith.addf %770, %771 : vector<8x32xf32>
    %773 = arith.truncf %772 : vector<8x32xf32> to vector<8x32xbf16>
    %c14_217 = arith.constant 14 : index
    %c0_218 = arith.constant 0 : index
    %c0_219 = arith.constant 0 : index
    %774 = vector.load %arg13[%c14_217, %c0_218, %c0_219] : memref<24x8x32xbf16, #tpu.memory_space<vmem>>, vector<1x8x32xbf16>
    %775 = vector.shape_cast %774 : vector<1x8x32xbf16> to vector<8x32xbf16>
    %776 = vector.shape_cast %773 : vector<8x32xbf16> to vector<1x8x32xbf16>
    tpu.vector_store %arg13[%c14_217, %c0_218, %c0_219], %776 {strides = array<i32>} : memref<24x8x32xbf16, #tpu.memory_space<vmem>>, vector<1x8x32xbf16>,
    %c10 = arith.constant 10 : index
    %c0_220 = arith.constant 0 : index
    %c0_221 = arith.constant 0 : index
    %777 = vector.load %arg2[%c10, %c0_220, %c0_221] : memref<24x8x32xbf16, #tpu.memory_space<vmem>>, vector<1x8x32xbf16>
    %778 = vector.shape_cast %777 : vector<1x8x32xbf16> to vector<8x32xbf16>
    %cst_222 = arith.constant dense<0.000000e+00> : vector<8x96xf32>
    %779 = tpu.matmul %778, %3, %cst_222 {dimension_numbers = #tpu.dot_dimension_numbers<[1], [0], [0], [1], [0, 0, 1, 1], [], []>} : vector<8x32xbf16>, vector<32x96xbf16>, vector<8x96xf32> -> vector<8x96xf32>
    %780 = vector.broadcast %7 : vector<1x96xf32> to vector<8x96xf32>
    %781 = arith.addf %779, %780 : vector<8x96xf32>
    %782 = arith.truncf %734 : vector<8x32xf32> to vector<8x32xbf16>
    %cst_223 = arith.constant dense<0.000000e+00> : vector<8x96xf32>
    %783 = tpu.matmul %782, %5, %cst_223 {dimension_numbers = #tpu.dot_dimension_numbers<[1], [0], [0], [1], [0, 0, 1, 1], [], []>} : vector<8x32xbf16>, vector<32x96xbf16>, vector<8x96xf32> -> vector<8x96xf32>
    %784 = vector.extract_strided_slice %781 {offsets = [0, 0], sizes = [8, 32], strides = [1, 1]} : vector<8x96xf32> to vector<8x32xf32>
    %785 = vector.extract_strided_slice %783 {offsets = [0, 0], sizes = [8, 32], strides = [1, 1]} : vector<8x96xf32> to vector<8x32xf32>
    %786 = arith.addf %784, %785 : vector<8x32xf32>
    %787 = arith.negf %786 : vector<8x32xf32>
    %788 = math.exp %787 : vector<8x32xf32>
    %cst_224 = arith.constant 1.000000e+00 : f32
    %789 = vector.broadcast %cst_224 : f32 to vector<8x32xf32>
    %790 = arith.addf %789, %788 : vector<8x32xf32>
    %791 = arith.divf %789, %790 : vector<8x32xf32>
    %792 = vector.extract_strided_slice %781 {offsets = [0, 32], sizes = [8, 32], strides = [1, 1]} : vector<8x96xf32> to vector<8x32xf32>
    %793 = vector.extract_strided_slice %783 {offsets = [0, 32], sizes = [8, 32], strides = [1, 1]} : vector<8x96xf32> to vector<8x32xf32>
    %794 = arith.addf %792, %793 : vector<8x32xf32>
    %795 = arith.negf %794 : vector<8x32xf32>
    %796 = math.exp %795 : vector<8x32xf32>
    %cst_225 = arith.constant 1.000000e+00 : f32
    %797 = vector.broadcast %cst_225 : f32 to vector<8x32xf32>
    %798 = arith.addf %797, %796 : vector<8x32xf32>
    %799 = arith.divf %797, %798 : vector<8x32xf32>
    %800 = vector.extract_strided_slice %781 {offsets = [0, 64], sizes = [8, 32], strides = [1, 1]} : vector<8x96xf32> to vector<8x32xf32>
    %801 = vector.extract_strided_slice %783 {offsets = [0, 64], sizes = [8, 32], strides = [1, 1]} : vector<8x96xf32> to vector<8x32xf32>
    %802 = arith.addf %801, %11 : vector<8x32xf32>
    %803 = arith.mulf %791, %802 : vector<8x32xf32>
    %804 = arith.addf %800, %803 : vector<8x32xf32>
    %805 = math.tanh %804 : vector<8x32xf32>
    %cst_226 = arith.constant 1.000000e+00 : f32
    %806 = vector.broadcast %cst_226 : f32 to vector<8x32xf32>
    %807 = arith.subf %806, %799 : vector<8x32xf32>
    %808 = arith.mulf %807, %805 : vector<8x32xf32>
    %809 = arith.mulf %799, %734 : vector<8x32xf32>
    %810 = arith.addf %808, %809 : vector<8x32xf32>
    %811 = arith.truncf %810 : vector<8x32xf32> to vector<8x32xbf16>
    %c10_227 = arith.constant 10 : index
    %c0_228 = arith.constant 0 : index
    %c0_229 = arith.constant 0 : index
    %812 = vector.load %arg12[%c10_227, %c0_228, %c0_229] : memref<24x8x32xbf16, #tpu.memory_space<vmem>>, vector<1x8x32xbf16>
    %813 = vector.shape_cast %812 : vector<1x8x32xbf16> to vector<8x32xbf16>
    %814 = vector.shape_cast %811 : vector<8x32xbf16> to vector<1x8x32xbf16>
    tpu.vector_store %arg12[%c10_227, %c0_228, %c0_229], %814 {strides = array<i32>} : memref<24x8x32xbf16, #tpu.memory_space<vmem>>, vector<1x8x32xbf16>,
    %c13 = arith.constant 13 : index
    %c0_230 = arith.constant 0 : index
    %c0_231 = arith.constant 0 : index
    %815 = vector.load %arg3[%c13, %c0_230, %c0_231] : memref<24x8x32xbf16, #tpu.memory_space<vmem>>, vector<1x8x32xbf16>
    %816 = vector.shape_cast %815 : vector<1x8x32xbf16> to vector<8x32xbf16>
    %cst_232 = arith.constant dense<0.000000e+00> : vector<8x96xf32>
    %817 = tpu.matmul %816, %4, %cst_232 {dimension_numbers = #tpu.dot_dimension_numbers<[1], [0], [0], [1], [0, 0, 1, 1], [], []>} : vector<8x32xbf16>, vector<32x96xbf16>, vector<8x96xf32> -> vector<8x96xf32>
    %818 = vector.broadcast %8 : vector<1x96xf32> to vector<8x96xf32>
    %819 = arith.addf %817, %818 : vector<8x96xf32>
    %820 = arith.truncf %772 : vector<8x32xf32> to vector<8x32xbf16>
    %cst_233 = arith.constant dense<0.000000e+00> : vector<8x96xf32>
    %821 = tpu.matmul %820, %6, %cst_233 {dimension_numbers = #tpu.dot_dimension_numbers<[1], [0], [0], [1], [0, 0, 1, 1], [], []>} : vector<8x32xbf16>, vector<32x96xbf16>, vector<8x96xf32> -> vector<8x96xf32>
    %822 = vector.extract_strided_slice %819 {offsets = [0, 0], sizes = [8, 32], strides = [1, 1]} : vector<8x96xf32> to vector<8x32xf32>
    %823 = vector.extract_strided_slice %821 {offsets = [0, 0], sizes = [8, 32], strides = [1, 1]} : vector<8x96xf32> to vector<8x32xf32>
    %824 = arith.addf %822, %823 : vector<8x32xf32>
    %825 = arith.negf %824 : vector<8x32xf32>
    %826 = math.exp %825 : vector<8x32xf32>
    %cst_234 = arith.constant 1.000000e+00 : f32
    %827 = vector.broadcast %cst_234 : f32 to vector<8x32xf32>
    %828 = arith.addf %827, %826 : vector<8x32xf32>
    %829 = arith.divf %827, %828 : vector<8x32xf32>
    %830 = vector.extract_strided_slice %819 {offsets = [0, 32], sizes = [8, 32], strides = [1, 1]} : vector<8x96xf32> to vector<8x32xf32>
    %831 = vector.extract_strided_slice %821 {offsets = [0, 32], sizes = [8, 32], strides = [1, 1]} : vector<8x96xf32> to vector<8x32xf32>
    %832 = arith.addf %830, %831 : vector<8x32xf32>
    %833 = arith.negf %832 : vector<8x32xf32>
    %834 = math.exp %833 : vector<8x32xf32>
    %cst_235 = arith.constant 1.000000e+00 : f32
    %835 = vector.broadcast %cst_235 : f32 to vector<8x32xf32>
    %836 = arith.addf %835, %834 : vector<8x32xf32>
    %837 = arith.divf %835, %836 : vector<8x32xf32>
    %838 = vector.extract_strided_slice %819 {offsets = [0, 64], sizes = [8, 32], strides = [1, 1]} : vector<8x96xf32> to vector<8x32xf32>
    %839 = vector.extract_strided_slice %821 {offsets = [0, 64], sizes = [8, 32], strides = [1, 1]} : vector<8x96xf32> to vector<8x32xf32>
    %840 = arith.addf %839, %14 : vector<8x32xf32>
    %841 = arith.mulf %829, %840 : vector<8x32xf32>
    %842 = arith.addf %838, %841 : vector<8x32xf32>
    %843 = math.tanh %842 : vector<8x32xf32>
    %cst_236 = arith.constant 1.000000e+00 : f32
    %844 = vector.broadcast %cst_236 : f32 to vector<8x32xf32>
    %845 = arith.subf %844, %837 : vector<8x32xf32>
    %846 = arith.mulf %845, %843 : vector<8x32xf32>
    %847 = arith.mulf %837, %772 : vector<8x32xf32>
    %848 = arith.addf %846, %847 : vector<8x32xf32>
    %849 = arith.truncf %848 : vector<8x32xf32> to vector<8x32xbf16>
    %c13_237 = arith.constant 13 : index
    %c0_238 = arith.constant 0 : index
    %c0_239 = arith.constant 0 : index
    %850 = vector.load %arg13[%c13_237, %c0_238, %c0_239] : memref<24x8x32xbf16, #tpu.memory_space<vmem>>, vector<1x8x32xbf16>
    %851 = vector.shape_cast %850 : vector<1x8x32xbf16> to vector<8x32xbf16>
    %852 = vector.shape_cast %849 : vector<8x32xbf16> to vector<1x8x32xbf16>
    tpu.vector_store %arg13[%c13_237, %c0_238, %c0_239], %852 {strides = array<i32>} : memref<24x8x32xbf16, #tpu.memory_space<vmem>>, vector<1x8x32xbf16>,
    %c11 = arith.constant 11 : index
    %c0_240 = arith.constant 0 : index
    %c0_241 = arith.constant 0 : index
    %853 = vector.load %arg2[%c11, %c0_240, %c0_241] : memref<24x8x32xbf16, #tpu.memory_space<vmem>>, vector<1x8x32xbf16>
    %854 = vector.shape_cast %853 : vector<1x8x32xbf16> to vector<8x32xbf16>
    %cst_242 = arith.constant dense<0.000000e+00> : vector<8x96xf32>
    %855 = tpu.matmul %854, %3, %cst_242 {dimension_numbers = #tpu.dot_dimension_numbers<[1], [0], [0], [1], [0, 0, 1, 1], [], []>} : vector<8x32xbf16>, vector<32x96xbf16>, vector<8x96xf32> -> vector<8x96xf32>
    %856 = vector.broadcast %7 : vector<1x96xf32> to vector<8x96xf32>
    %857 = arith.addf %855, %856 : vector<8x96xf32>
    %858 = arith.truncf %810 : vector<8x32xf32> to vector<8x32xbf16>
    %cst_243 = arith.constant dense<0.000000e+00> : vector<8x96xf32>
    %859 = tpu.matmul %858, %5, %cst_243 {dimension_numbers = #tpu.dot_dimension_numbers<[1], [0], [0], [1], [0, 0, 1, 1], [], []>} : vector<8x32xbf16>, vector<32x96xbf16>, vector<8x96xf32> -> vector<8x96xf32>
    %860 = vector.extract_strided_slice %857 {offsets = [0, 0], sizes = [8, 32], strides = [1, 1]} : vector<8x96xf32> to vector<8x32xf32>
    %861 = vector.extract_strided_slice %859 {offsets = [0, 0], sizes = [8, 32], strides = [1, 1]} : vector<8x96xf32> to vector<8x32xf32>
    %862 = arith.addf %860, %861 : vector<8x32xf32>
    %863 = arith.negf %862 : vector<8x32xf32>
    %864 = math.exp %863 : vector<8x32xf32>
    %cst_244 = arith.constant 1.000000e+00 : f32
    %865 = vector.broadcast %cst_244 : f32 to vector<8x32xf32>
    %866 = arith.addf %865, %864 : vector<8x32xf32>
    %867 = arith.divf %865, %866 : vector<8x32xf32>
    %868 = vector.extract_strided_slice %857 {offsets = [0, 32], sizes = [8, 32], strides = [1, 1]} : vector<8x96xf32> to vector<8x32xf32>
    %869 = vector.extract_strided_slice %859 {offsets = [0, 32], sizes = [8, 32], strides = [1, 1]} : vector<8x96xf32> to vector<8x32xf32>
    %870 = arith.addf %868, %869 : vector<8x32xf32>
    %871 = arith.negf %870 : vector<8x32xf32>
    %872 = math.exp %871 : vector<8x32xf32>
    %cst_245 = arith.constant 1.000000e+00 : f32
    %873 = vector.broadcast %cst_245 : f32 to vector<8x32xf32>
    %874 = arith.addf %873, %872 : vector<8x32xf32>
    %875 = arith.divf %873, %874 : vector<8x32xf32>
    %876 = vector.extract_strided_slice %857 {offsets = [0, 64], sizes = [8, 32], strides = [1, 1]} : vector<8x96xf32> to vector<8x32xf32>
    %877 = vector.extract_strided_slice %859 {offsets = [0, 64], sizes = [8, 32], strides = [1, 1]} : vector<8x96xf32> to vector<8x32xf32>
    %878 = arith.addf %877, %11 : vector<8x32xf32>
    %879 = arith.mulf %867, %878 : vector<8x32xf32>
    %880 = arith.addf %876, %879 : vector<8x32xf32>
    %881 = math.tanh %880 : vector<8x32xf32>
    %cst_246 = arith.constant 1.000000e+00 : f32
    %882 = vector.broadcast %cst_246 : f32 to vector<8x32xf32>
    %883 = arith.subf %882, %875 : vector<8x32xf32>
    %884 = arith.mulf %883, %881 : vector<8x32xf32>
    %885 = arith.mulf %875, %810 : vector<8x32xf32>
    %886 = arith.addf %884, %885 : vector<8x32xf32>
    %887 = arith.truncf %886 : vector<8x32xf32> to vector<8x32xbf16>
    %c11_247 = arith.constant 11 : index
    %c0_248 = arith.constant 0 : index
    %c0_249 = arith.constant 0 : index
    %888 = vector.load %arg12[%c11_247, %c0_248, %c0_249] : memref<24x8x32xbf16, #tpu.memory_space<vmem>>, vector<1x8x32xbf16>
    %889 = vector.shape_cast %888 : vector<1x8x32xbf16> to vector<8x32xbf16>
    %890 = vector.shape_cast %887 : vector<8x32xbf16> to vector<1x8x32xbf16>
    tpu.vector_store %arg12[%c11_247, %c0_248, %c0_249], %890 {strides = array<i32>} : memref<24x8x32xbf16, #tpu.memory_space<vmem>>, vector<1x8x32xbf16>,
    %c12 = arith.constant 12 : index
    %c0_250 = arith.constant 0 : index
    %c0_251 = arith.constant 0 : index
    %891 = vector.load %arg3[%c12, %c0_250, %c0_251] : memref<24x8x32xbf16, #tpu.memory_space<vmem>>, vector<1x8x32xbf16>
    %892 = vector.shape_cast %891 : vector<1x8x32xbf16> to vector<8x32xbf16>
    %cst_252 = arith.constant dense<0.000000e+00> : vector<8x96xf32>
    %893 = tpu.matmul %892, %4, %cst_252 {dimension_numbers = #tpu.dot_dimension_numbers<[1], [0], [0], [1], [0, 0, 1, 1], [], []>} : vector<8x32xbf16>, vector<32x96xbf16>, vector<8x96xf32> -> vector<8x96xf32>
    %894 = vector.broadcast %8 : vector<1x96xf32> to vector<8x96xf32>
    %895 = arith.addf %893, %894 : vector<8x96xf32>
    %896 = arith.truncf %848 : vector<8x32xf32> to vector<8x32xbf16>
    %cst_253 = arith.constant dense<0.000000e+00> : vector<8x96xf32>
    %897 = tpu.matmul %896, %6, %cst_253 {dimension_numbers = #tpu.dot_dimension_numbers<[1], [0], [0], [1], [0, 0, 1, 1], [], []>} : vector<8x32xbf16>, vector<32x96xbf16>, vector<8x96xf32> -> vector<8x96xf32>
    %898 = vector.extract_strided_slice %895 {offsets = [0, 0], sizes = [8, 32], strides = [1, 1]} : vector<8x96xf32> to vector<8x32xf32>
    %899 = vector.extract_strided_slice %897 {offsets = [0, 0], sizes = [8, 32], strides = [1, 1]} : vector<8x96xf32> to vector<8x32xf32>
    %900 = arith.addf %898, %899 : vector<8x32xf32>
    %901 = arith.negf %900 : vector<8x32xf32>
    %902 = math.exp %901 : vector<8x32xf32>
    %cst_254 = arith.constant 1.000000e+00 : f32
    %903 = vector.broadcast %cst_254 : f32 to vector<8x32xf32>
    %904 = arith.addf %903, %902 : vector<8x32xf32>
    %905 = arith.divf %903, %904 : vector<8x32xf32>
    %906 = vector.extract_strided_slice %895 {offsets = [0, 32], sizes = [8, 32], strides = [1, 1]} : vector<8x96xf32> to vector<8x32xf32>
    %907 = vector.extract_strided_slice %897 {offsets = [0, 32], sizes = [8, 32], strides = [1, 1]} : vector<8x96xf32> to vector<8x32xf32>
    %908 = arith.addf %906, %907 : vector<8x32xf32>
    %909 = arith.negf %908 : vector<8x32xf32>
    %910 = math.exp %909 : vector<8x32xf32>
    %cst_255 = arith.constant 1.000000e+00 : f32
    %911 = vector.broadcast %cst_255 : f32 to vector<8x32xf32>
    %912 = arith.addf %911, %910 : vector<8x32xf32>
    %913 = arith.divf %911, %912 : vector<8x32xf32>
    %914 = vector.extract_strided_slice %895 {offsets = [0, 64], sizes = [8, 32], strides = [1, 1]} : vector<8x96xf32> to vector<8x32xf32>
    %915 = vector.extract_strided_slice %897 {offsets = [0, 64], sizes = [8, 32], strides = [1, 1]} : vector<8x96xf32> to vector<8x32xf32>
    %916 = arith.addf %915, %14 : vector<8x32xf32>
    %917 = arith.mulf %905, %916 : vector<8x32xf32>
    %918 = arith.addf %914, %917 : vector<8x32xf32>
    %919 = math.tanh %918 : vector<8x32xf32>
    %cst_256 = arith.constant 1.000000e+00 : f32
    %920 = vector.broadcast %cst_256 : f32 to vector<8x32xf32>
    %921 = arith.subf %920, %913 : vector<8x32xf32>
    %922 = arith.mulf %921, %919 : vector<8x32xf32>
    %923 = arith.mulf %913, %848 : vector<8x32xf32>
    %924 = arith.addf %922, %923 : vector<8x32xf32>
    %925 = arith.truncf %924 : vector<8x32xf32> to vector<8x32xbf16>
    %c12_257 = arith.constant 12 : index
    %c0_258 = arith.constant 0 : index
    %c0_259 = arith.constant 0 : index
    %926 = vector.load %arg13[%c12_257, %c0_258, %c0_259] : memref<24x8x32xbf16, #tpu.memory_space<vmem>>, vector<1x8x32xbf16>
    %927 = vector.shape_cast %926 : vector<1x8x32xbf16> to vector<8x32xbf16>
    %928 = vector.shape_cast %925 : vector<8x32xbf16> to vector<1x8x32xbf16>
    tpu.vector_store %arg13[%c12_257, %c0_258, %c0_259], %928 {strides = array<i32>} : memref<24x8x32xbf16, #tpu.memory_space<vmem>>, vector<1x8x32xbf16>,
    %c12_260 = arith.constant 12 : index
    %c0_261 = arith.constant 0 : index
    %c0_262 = arith.constant 0 : index
    %929 = vector.load %arg2[%c12_260, %c0_261, %c0_262] : memref<24x8x32xbf16, #tpu.memory_space<vmem>>, vector<1x8x32xbf16>
    %930 = vector.shape_cast %929 : vector<1x8x32xbf16> to vector<8x32xbf16>
    %cst_263 = arith.constant dense<0.000000e+00> : vector<8x96xf32>
    %931 = tpu.matmul %930, %3, %cst_263 {dimension_numbers = #tpu.dot_dimension_numbers<[1], [0], [0], [1], [0, 0, 1, 1], [], []>} : vector<8x32xbf16>, vector<32x96xbf16>, vector<8x96xf32> -> vector<8x96xf32>
    %932 = vector.broadcast %7 : vector<1x96xf32> to vector<8x96xf32>
    %933 = arith.addf %931, %932 : vector<8x96xf32>
    %934 = arith.truncf %886 : vector<8x32xf32> to vector<8x32xbf16>
    %cst_264 = arith.constant dense<0.000000e+00> : vector<8x96xf32>
    %935 = tpu.matmul %934, %5, %cst_264 {dimension_numbers = #tpu.dot_dimension_numbers<[1], [0], [0], [1], [0, 0, 1, 1], [], []>} : vector<8x32xbf16>, vector<32x96xbf16>, vector<8x96xf32> -> vector<8x96xf32>
    %936 = vector.extract_strided_slice %933 {offsets = [0, 0], sizes = [8, 32], strides = [1, 1]} : vector<8x96xf32> to vector<8x32xf32>
    %937 = vector.extract_strided_slice %935 {offsets = [0, 0], sizes = [8, 32], strides = [1, 1]} : vector<8x96xf32> to vector<8x32xf32>
    %938 = arith.addf %936, %937 : vector<8x32xf32>
    %939 = arith.negf %938 : vector<8x32xf32>
    %940 = math.exp %939 : vector<8x32xf32>
    %cst_265 = arith.constant 1.000000e+00 : f32
    %941 = vector.broadcast %cst_265 : f32 to vector<8x32xf32>
    %942 = arith.addf %941, %940 : vector<8x32xf32>
    %943 = arith.divf %941, %942 : vector<8x32xf32>
    %944 = vector.extract_strided_slice %933 {offsets = [0, 32], sizes = [8, 32], strides = [1, 1]} : vector<8x96xf32> to vector<8x32xf32>
    %945 = vector.extract_strided_slice %935 {offsets = [0, 32], sizes = [8, 32], strides = [1, 1]} : vector<8x96xf32> to vector<8x32xf32>
    %946 = arith.addf %944, %945 : vector<8x32xf32>
    %947 = arith.negf %946 : vector<8x32xf32>
    %948 = math.exp %947 : vector<8x32xf32>
    %cst_266 = arith.constant 1.000000e+00 : f32
    %949 = vector.broadcast %cst_266 : f32 to vector<8x32xf32>
    %950 = arith.addf %949, %948 : vector<8x32xf32>
    %951 = arith.divf %949, %950 : vector<8x32xf32>
    %952 = vector.extract_strided_slice %933 {offsets = [0, 64], sizes = [8, 32], strides = [1, 1]} : vector<8x96xf32> to vector<8x32xf32>
    %953 = vector.extract_strided_slice %935 {offsets = [0, 64], sizes = [8, 32], strides = [1, 1]} : vector<8x96xf32> to vector<8x32xf32>
    %954 = arith.addf %953, %11 : vector<8x32xf32>
    %955 = arith.mulf %943, %954 : vector<8x32xf32>
    %956 = arith.addf %952, %955 : vector<8x32xf32>
    %957 = math.tanh %956 : vector<8x32xf32>
    %cst_267 = arith.constant 1.000000e+00 : f32
    %958 = vector.broadcast %cst_267 : f32 to vector<8x32xf32>
    %959 = arith.subf %958, %951 : vector<8x32xf32>
    %960 = arith.mulf %959, %957 : vector<8x32xf32>
    %961 = arith.mulf %951, %886 : vector<8x32xf32>
    %962 = arith.addf %960, %961 : vector<8x32xf32>
    %963 = arith.truncf %962 : vector<8x32xf32> to vector<8x32xbf16>
    %c12_268 = arith.constant 12 : index
    %c0_269 = arith.constant 0 : index
    %c0_270 = arith.constant 0 : index
    %964 = vector.load %arg12[%c12_268, %c0_269, %c0_270] : memref<24x8x32xbf16, #tpu.memory_space<vmem>>, vector<1x8x32xbf16>
    %965 = vector.shape_cast %964 : vector<1x8x32xbf16> to vector<8x32xbf16>
    %966 = vector.shape_cast %963 : vector<8x32xbf16> to vector<1x8x32xbf16>
    tpu.vector_store %arg12[%c12_268, %c0_269, %c0_270], %966 {strides = array<i32>} : memref<24x8x32xbf16, #tpu.memory_space<vmem>>, vector<1x8x32xbf16>,
    %c11_271 = arith.constant 11 : index
    %c0_272 = arith.constant 0 : index
    %c0_273 = arith.constant 0 : index
    %967 = vector.load %arg3[%c11_271, %c0_272, %c0_273] : memref<24x8x32xbf16, #tpu.memory_space<vmem>>, vector<1x8x32xbf16>
    %968 = vector.shape_cast %967 : vector<1x8x32xbf16> to vector<8x32xbf16>
    %cst_274 = arith.constant dense<0.000000e+00> : vector<8x96xf32>
    %969 = tpu.matmul %968, %4, %cst_274 {dimension_numbers = #tpu.dot_dimension_numbers<[1], [0], [0], [1], [0, 0, 1, 1], [], []>} : vector<8x32xbf16>, vector<32x96xbf16>, vector<8x96xf32> -> vector<8x96xf32>
    %970 = vector.broadcast %8 : vector<1x96xf32> to vector<8x96xf32>
    %971 = arith.addf %969, %970 : vector<8x96xf32>
    %972 = arith.truncf %924 : vector<8x32xf32> to vector<8x32xbf16>
    %cst_275 = arith.constant dense<0.000000e+00> : vector<8x96xf32>
    %973 = tpu.matmul %972, %6, %cst_275 {dimension_numbers = #tpu.dot_dimension_numbers<[1], [0], [0], [1], [0, 0, 1, 1], [], []>} : vector<8x32xbf16>, vector<32x96xbf16>, vector<8x96xf32> -> vector<8x96xf32>
    %974 = vector.extract_strided_slice %971 {offsets = [0, 0], sizes = [8, 32], strides = [1, 1]} : vector<8x96xf32> to vector<8x32xf32>
    %975 = vector.extract_strided_slice %973 {offsets = [0, 0], sizes = [8, 32], strides = [1, 1]} : vector<8x96xf32> to vector<8x32xf32>
    %976 = arith.addf %974, %975 : vector<8x32xf32>
    %977 = arith.negf %976 : vector<8x32xf32>
    %978 = math.exp %977 : vector<8x32xf32>
    %cst_276 = arith.constant 1.000000e+00 : f32
    %979 = vector.broadcast %cst_276 : f32 to vector<8x32xf32>
    %980 = arith.addf %979, %978 : vector<8x32xf32>
    %981 = arith.divf %979, %980 : vector<8x32xf32>
    %982 = vector.extract_strided_slice %971 {offsets = [0, 32], sizes = [8, 32], strides = [1, 1]} : vector<8x96xf32> to vector<8x32xf32>
    %983 = vector.extract_strided_slice %973 {offsets = [0, 32], sizes = [8, 32], strides = [1, 1]} : vector<8x96xf32> to vector<8x32xf32>
    %984 = arith.addf %982, %983 : vector<8x32xf32>
    %985 = arith.negf %984 : vector<8x32xf32>
    %986 = math.exp %985 : vector<8x32xf32>
    %cst_277 = arith.constant 1.000000e+00 : f32
    %987 = vector.broadcast %cst_277 : f32 to vector<8x32xf32>
    %988 = arith.addf %987, %986 : vector<8x32xf32>
    %989 = arith.divf %987, %988 : vector<8x32xf32>
    %990 = vector.extract_strided_slice %971 {offsets = [0, 64], sizes = [8, 32], strides = [1, 1]} : vector<8x96xf32> to vector<8x32xf32>
    %991 = vector.extract_strided_slice %973 {offsets = [0, 64], sizes = [8, 32], strides = [1, 1]} : vector<8x96xf32> to vector<8x32xf32>
    %992 = arith.addf %991, %14 : vector<8x32xf32>
    %993 = arith.mulf %981, %992 : vector<8x32xf32>
    %994 = arith.addf %990, %993 : vector<8x32xf32>
    %995 = math.tanh %994 : vector<8x32xf32>
    %cst_278 = arith.constant 1.000000e+00 : f32
    %996 = vector.broadcast %cst_278 : f32 to vector<8x32xf32>
    %997 = arith.subf %996, %989 : vector<8x32xf32>
    %998 = arith.mulf %997, %995 : vector<8x32xf32>
    %999 = arith.mulf %989, %924 : vector<8x32xf32>
    %1000 = arith.addf %998, %999 : vector<8x32xf32>
    %1001 = arith.truncf %1000 : vector<8x32xf32> to vector<8x32xbf16>
    %c11_279 = arith.constant 11 : index
    %c0_280 = arith.constant 0 : index
    %c0_281 = arith.constant 0 : index
    %1002 = vector.load %arg13[%c11_279, %c0_280, %c0_281] : memref<24x8x32xbf16, #tpu.memory_space<vmem>>, vector<1x8x32xbf16>
    %1003 = vector.shape_cast %1002 : vector<1x8x32xbf16> to vector<8x32xbf16>
    %1004 = vector.shape_cast %1001 : vector<8x32xbf16> to vector<1x8x32xbf16>
    tpu.vector_store %arg13[%c11_279, %c0_280, %c0_281], %1004 {strides = array<i32>} : memref<24x8x32xbf16, #tpu.memory_space<vmem>>, vector<1x8x32xbf16>,
    %c13_282 = arith.constant 13 : index
    %c0_283 = arith.constant 0 : index
    %c0_284 = arith.constant 0 : index
    %1005 = vector.load %arg2[%c13_282, %c0_283, %c0_284] : memref<24x8x32xbf16, #tpu.memory_space<vmem>>, vector<1x8x32xbf16>
    %1006 = vector.shape_cast %1005 : vector<1x8x32xbf16> to vector<8x32xbf16>
    %cst_285 = arith.constant dense<0.000000e+00> : vector<8x96xf32>
    %1007 = tpu.matmul %1006, %3, %cst_285 {dimension_numbers = #tpu.dot_dimension_numbers<[1], [0], [0], [1], [0, 0, 1, 1], [], []>} : vector<8x32xbf16>, vector<32x96xbf16>, vector<8x96xf32> -> vector<8x96xf32>
    %1008 = vector.broadcast %7 : vector<1x96xf32> to vector<8x96xf32>
    %1009 = arith.addf %1007, %1008 : vector<8x96xf32>
    %1010 = arith.truncf %962 : vector<8x32xf32> to vector<8x32xbf16>
    %cst_286 = arith.constant dense<0.000000e+00> : vector<8x96xf32>
    %1011 = tpu.matmul %1010, %5, %cst_286 {dimension_numbers = #tpu.dot_dimension_numbers<[1], [0], [0], [1], [0, 0, 1, 1], [], []>} : vector<8x32xbf16>, vector<32x96xbf16>, vector<8x96xf32> -> vector<8x96xf32>
    %1012 = vector.extract_strided_slice %1009 {offsets = [0, 0], sizes = [8, 32], strides = [1, 1]} : vector<8x96xf32> to vector<8x32xf32>
    %1013 = vector.extract_strided_slice %1011 {offsets = [0, 0], sizes = [8, 32], strides = [1, 1]} : vector<8x96xf32> to vector<8x32xf32>
    %1014 = arith.addf %1012, %1013 : vector<8x32xf32>
    %1015 = arith.negf %1014 : vector<8x32xf32>
    %1016 = math.exp %1015 : vector<8x32xf32>
    %cst_287 = arith.constant 1.000000e+00 : f32
    %1017 = vector.broadcast %cst_287 : f32 to vector<8x32xf32>
    %1018 = arith.addf %1017, %1016 : vector<8x32xf32>
    %1019 = arith.divf %1017, %1018 : vector<8x32xf32>
    %1020 = vector.extract_strided_slice %1009 {offsets = [0, 32], sizes = [8, 32], strides = [1, 1]} : vector<8x96xf32> to vector<8x32xf32>
    %1021 = vector.extract_strided_slice %1011 {offsets = [0, 32], sizes = [8, 32], strides = [1, 1]} : vector<8x96xf32> to vector<8x32xf32>
    %1022 = arith.addf %1020, %1021 : vector<8x32xf32>
    %1023 = arith.negf %1022 : vector<8x32xf32>
    %1024 = math.exp %1023 : vector<8x32xf32>
    %cst_288 = arith.constant 1.000000e+00 : f32
    %1025 = vector.broadcast %cst_288 : f32 to vector<8x32xf32>
    %1026 = arith.addf %1025, %1024 : vector<8x32xf32>
    %1027 = arith.divf %1025, %1026 : vector<8x32xf32>
    %1028 = vector.extract_strided_slice %1009 {offsets = [0, 64], sizes = [8, 32], strides = [1, 1]} : vector<8x96xf32> to vector<8x32xf32>
    %1029 = vector.extract_strided_slice %1011 {offsets = [0, 64], sizes = [8, 32], strides = [1, 1]} : vector<8x96xf32> to vector<8x32xf32>
    %1030 = arith.addf %1029, %11 : vector<8x32xf32>
    %1031 = arith.mulf %1019, %1030 : vector<8x32xf32>
    %1032 = arith.addf %1028, %1031 : vector<8x32xf32>
    %1033 = math.tanh %1032 : vector<8x32xf32>
    %cst_289 = arith.constant 1.000000e+00 : f32
    %1034 = vector.broadcast %cst_289 : f32 to vector<8x32xf32>
    %1035 = arith.subf %1034, %1027 : vector<8x32xf32>
    %1036 = arith.mulf %1035, %1033 : vector<8x32xf32>
    %1037 = arith.mulf %1027, %962 : vector<8x32xf32>
    %1038 = arith.addf %1036, %1037 : vector<8x32xf32>
    %1039 = arith.truncf %1038 : vector<8x32xf32> to vector<8x32xbf16>
    %c13_290 = arith.constant 13 : index
    %c0_291 = arith.constant 0 : index
    %c0_292 = arith.constant 0 : index
    %1040 = vector.load %arg12[%c13_290, %c0_291, %c0_292] : memref<24x8x32xbf16, #tpu.memory_space<vmem>>, vector<1x8x32xbf16>
    %1041 = vector.shape_cast %1040 : vector<1x8x32xbf16> to vector<8x32xbf16>
    %1042 = vector.shape_cast %1039 : vector<8x32xbf16> to vector<1x8x32xbf16>
    tpu.vector_store %arg12[%c13_290, %c0_291, %c0_292], %1042 {strides = array<i32>} : memref<24x8x32xbf16, #tpu.memory_space<vmem>>, vector<1x8x32xbf16>,
    %c10_293 = arith.constant 10 : index
    %c0_294 = arith.constant 0 : index
    %c0_295 = arith.constant 0 : index
    %1043 = vector.load %arg3[%c10_293, %c0_294, %c0_295] : memref<24x8x32xbf16, #tpu.memory_space<vmem>>, vector<1x8x32xbf16>
    %1044 = vector.shape_cast %1043 : vector<1x8x32xbf16> to vector<8x32xbf16>
    %cst_296 = arith.constant dense<0.000000e+00> : vector<8x96xf32>
    %1045 = tpu.matmul %1044, %4, %cst_296 {dimension_numbers = #tpu.dot_dimension_numbers<[1], [0], [0], [1], [0, 0, 1, 1], [], []>} : vector<8x32xbf16>, vector<32x96xbf16>, vector<8x96xf32> -> vector<8x96xf32>
    %1046 = vector.broadcast %8 : vector<1x96xf32> to vector<8x96xf32>
    %1047 = arith.addf %1045, %1046 : vector<8x96xf32>
    %1048 = arith.truncf %1000 : vector<8x32xf32> to vector<8x32xbf16>
    %cst_297 = arith.constant dense<0.000000e+00> : vector<8x96xf32>
    %1049 = tpu.matmul %1048, %6, %cst_297 {dimension_numbers = #tpu.dot_dimension_numbers<[1], [0], [0], [1], [0, 0, 1, 1], [], []>} : vector<8x32xbf16>, vector<32x96xbf16>, vector<8x96xf32> -> vector<8x96xf32>
    %1050 = vector.extract_strided_slice %1047 {offsets = [0, 0], sizes = [8, 32], strides = [1, 1]} : vector<8x96xf32> to vector<8x32xf32>
    %1051 = vector.extract_strided_slice %1049 {offsets = [0, 0], sizes = [8, 32], strides = [1, 1]} : vector<8x96xf32> to vector<8x32xf32>
    %1052 = arith.addf %1050, %1051 : vector<8x32xf32>
    %1053 = arith.negf %1052 : vector<8x32xf32>
    %1054 = math.exp %1053 : vector<8x32xf32>
    %cst_298 = arith.constant 1.000000e+00 : f32
    %1055 = vector.broadcast %cst_298 : f32 to vector<8x32xf32>
    %1056 = arith.addf %1055, %1054 : vector<8x32xf32>
    %1057 = arith.divf %1055, %1056 : vector<8x32xf32>
    %1058 = vector.extract_strided_slice %1047 {offsets = [0, 32], sizes = [8, 32], strides = [1, 1]} : vector<8x96xf32> to vector<8x32xf32>
    %1059 = vector.extract_strided_slice %1049 {offsets = [0, 32], sizes = [8, 32], strides = [1, 1]} : vector<8x96xf32> to vector<8x32xf32>
    %1060 = arith.addf %1058, %1059 : vector<8x32xf32>
    %1061 = arith.negf %1060 : vector<8x32xf32>
    %1062 = math.exp %1061 : vector<8x32xf32>
    %cst_299 = arith.constant 1.000000e+00 : f32
    %1063 = vector.broadcast %cst_299 : f32 to vector<8x32xf32>
    %1064 = arith.addf %1063, %1062 : vector<8x32xf32>
    %1065 = arith.divf %1063, %1064 : vector<8x32xf32>
    %1066 = vector.extract_strided_slice %1047 {offsets = [0, 64], sizes = [8, 32], strides = [1, 1]} : vector<8x96xf32> to vector<8x32xf32>
    %1067 = vector.extract_strided_slice %1049 {offsets = [0, 64], sizes = [8, 32], strides = [1, 1]} : vector<8x96xf32> to vector<8x32xf32>
    %1068 = arith.addf %1067, %14 : vector<8x32xf32>
    %1069 = arith.mulf %1057, %1068 : vector<8x32xf32>
    %1070 = arith.addf %1066, %1069 : vector<8x32xf32>
    %1071 = math.tanh %1070 : vector<8x32xf32>
    %cst_300 = arith.constant 1.000000e+00 : f32
    %1072 = vector.broadcast %cst_300 : f32 to vector<8x32xf32>
    %1073 = arith.subf %1072, %1065 : vector<8x32xf32>
    %1074 = arith.mulf %1073, %1071 : vector<8x32xf32>
    %1075 = arith.mulf %1065, %1000 : vector<8x32xf32>
    %1076 = arith.addf %1074, %1075 : vector<8x32xf32>
    %1077 = arith.truncf %1076 : vector<8x32xf32> to vector<8x32xbf16>
    %c10_301 = arith.constant 10 : index
    %c0_302 = arith.constant 0 : index
    %c0_303 = arith.constant 0 : index
    %1078 = vector.load %arg13[%c10_301, %c0_302, %c0_303] : memref<24x8x32xbf16, #tpu.memory_space<vmem>>, vector<1x8x32xbf16>
    %1079 = vector.shape_cast %1078 : vector<1x8x32xbf16> to vector<8x32xbf16>
    %1080 = vector.shape_cast %1077 : vector<8x32xbf16> to vector<1x8x32xbf16>
    tpu.vector_store %arg13[%c10_301, %c0_302, %c0_303], %1080 {strides = array<i32>} : memref<24x8x32xbf16, #tpu.memory_space<vmem>>, vector<1x8x32xbf16>,
    %c14_304 = arith.constant 14 : index
    %c0_305 = arith.constant 0 : index
    %c0_306 = arith.constant 0 : index
    %1081 = vector.load %arg2[%c14_304, %c0_305, %c0_306] : memref<24x8x32xbf16, #tpu.memory_space<vmem>>, vector<1x8x32xbf16>
    %1082 = vector.shape_cast %1081 : vector<1x8x32xbf16> to vector<8x32xbf16>
    %cst_307 = arith.constant dense<0.000000e+00> : vector<8x96xf32>
    %1083 = tpu.matmul %1082, %3, %cst_307 {dimension_numbers = #tpu.dot_dimension_numbers<[1], [0], [0], [1], [0, 0, 1, 1], [], []>} : vector<8x32xbf16>, vector<32x96xbf16>, vector<8x96xf32> -> vector<8x96xf32>
    %1084 = vector.broadcast %7 : vector<1x96xf32> to vector<8x96xf32>
    %1085 = arith.addf %1083, %1084 : vector<8x96xf32>
    %1086 = arith.truncf %1038 : vector<8x32xf32> to vector<8x32xbf16>
    %cst_308 = arith.constant dense<0.000000e+00> : vector<8x96xf32>
    %1087 = tpu.matmul %1086, %5, %cst_308 {dimension_numbers = #tpu.dot_dimension_numbers<[1], [0], [0], [1], [0, 0, 1, 1], [], []>} : vector<8x32xbf16>, vector<32x96xbf16>, vector<8x96xf32> -> vector<8x96xf32>
    %1088 = vector.extract_strided_slice %1085 {offsets = [0, 0], sizes = [8, 32], strides = [1, 1]} : vector<8x96xf32> to vector<8x32xf32>
    %1089 = vector.extract_strided_slice %1087 {offsets = [0, 0], sizes = [8, 32], strides = [1, 1]} : vector<8x96xf32> to vector<8x32xf32>
    %1090 = arith.addf %1088, %1089 : vector<8x32xf32>
    %1091 = arith.negf %1090 : vector<8x32xf32>
    %1092 = math.exp %1091 : vector<8x32xf32>
    %cst_309 = arith.constant 1.000000e+00 : f32
    %1093 = vector.broadcast %cst_309 : f32 to vector<8x32xf32>
    %1094 = arith.addf %1093, %1092 : vector<8x32xf32>
    %1095 = arith.divf %1093, %1094 : vector<8x32xf32>
    %1096 = vector.extract_strided_slice %1085 {offsets = [0, 32], sizes = [8, 32], strides = [1, 1]} : vector<8x96xf32> to vector<8x32xf32>
    %1097 = vector.extract_strided_slice %1087 {offsets = [0, 32], sizes = [8, 32], strides = [1, 1]} : vector<8x96xf32> to vector<8x32xf32>
    %1098 = arith.addf %1096, %1097 : vector<8x32xf32>
    %1099 = arith.negf %1098 : vector<8x32xf32>
    %1100 = math.exp %1099 : vector<8x32xf32>
    %cst_310 = arith.constant 1.000000e+00 : f32
    %1101 = vector.broadcast %cst_310 : f32 to vector<8x32xf32>
    %1102 = arith.addf %1101, %1100 : vector<8x32xf32>
    %1103 = arith.divf %1101, %1102 : vector<8x32xf32>
    %1104 = vector.extract_strided_slice %1085 {offsets = [0, 64], sizes = [8, 32], strides = [1, 1]} : vector<8x96xf32> to vector<8x32xf32>
    %1105 = vector.extract_strided_slice %1087 {offsets = [0, 64], sizes = [8, 32], strides = [1, 1]} : vector<8x96xf32> to vector<8x32xf32>
    %1106 = arith.addf %1105, %11 : vector<8x32xf32>
    %1107 = arith.mulf %1095, %1106 : vector<8x32xf32>
    %1108 = arith.addf %1104, %1107 : vector<8x32xf32>
    %1109 = math.tanh %1108 : vector<8x32xf32>
    %cst_311 = arith.constant 1.000000e+00 : f32
    %1110 = vector.broadcast %cst_311 : f32 to vector<8x32xf32>
    %1111 = arith.subf %1110, %1103 : vector<8x32xf32>
    %1112 = arith.mulf %1111, %1109 : vector<8x32xf32>
    %1113 = arith.mulf %1103, %1038 : vector<8x32xf32>
    %1114 = arith.addf %1112, %1113 : vector<8x32xf32>
    %1115 = arith.truncf %1114 : vector<8x32xf32> to vector<8x32xbf16>
    %c14_312 = arith.constant 14 : index
    %c0_313 = arith.constant 0 : index
    %c0_314 = arith.constant 0 : index
    %1116 = vector.load %arg12[%c14_312, %c0_313, %c0_314] : memref<24x8x32xbf16, #tpu.memory_space<vmem>>, vector<1x8x32xbf16>
    %1117 = vector.shape_cast %1116 : vector<1x8x32xbf16> to vector<8x32xbf16>
    %1118 = vector.shape_cast %1115 : vector<8x32xbf16> to vector<1x8x32xbf16>
    tpu.vector_store %arg12[%c14_312, %c0_313, %c0_314], %1118 {strides = array<i32>} : memref<24x8x32xbf16, #tpu.memory_space<vmem>>, vector<1x8x32xbf16>,
    %c9_315 = arith.constant 9 : index
    %c0_316 = arith.constant 0 : index
    %c0_317 = arith.constant 0 : index
    %1119 = vector.load %arg3[%c9_315, %c0_316, %c0_317] : memref<24x8x32xbf16, #tpu.memory_space<vmem>>, vector<1x8x32xbf16>
    %1120 = vector.shape_cast %1119 : vector<1x8x32xbf16> to vector<8x32xbf16>
    %cst_318 = arith.constant dense<0.000000e+00> : vector<8x96xf32>
    %1121 = tpu.matmul %1120, %4, %cst_318 {dimension_numbers = #tpu.dot_dimension_numbers<[1], [0], [0], [1], [0, 0, 1, 1], [], []>} : vector<8x32xbf16>, vector<32x96xbf16>, vector<8x96xf32> -> vector<8x96xf32>
    %1122 = vector.broadcast %8 : vector<1x96xf32> to vector<8x96xf32>
    %1123 = arith.addf %1121, %1122 : vector<8x96xf32>
    %1124 = arith.truncf %1076 : vector<8x32xf32> to vector<8x32xbf16>
    %cst_319 = arith.constant dense<0.000000e+00> : vector<8x96xf32>
    %1125 = tpu.matmul %1124, %6, %cst_319 {dimension_numbers = #tpu.dot_dimension_numbers<[1], [0], [0], [1], [0, 0, 1, 1], [], []>} : vector<8x32xbf16>, vector<32x96xbf16>, vector<8x96xf32> -> vector<8x96xf32>
    %1126 = vector.extract_strided_slice %1123 {offsets = [0, 0], sizes = [8, 32], strides = [1, 1]} : vector<8x96xf32> to vector<8x32xf32>
    %1127 = vector.extract_strided_slice %1125 {offsets = [0, 0], sizes = [8, 32], strides = [1, 1]} : vector<8x96xf32> to vector<8x32xf32>
    %1128 = arith.addf %1126, %1127 : vector<8x32xf32>
    %1129 = arith.negf %1128 : vector<8x32xf32>
    %1130 = math.exp %1129 : vector<8x32xf32>
    %cst_320 = arith.constant 1.000000e+00 : f32
    %1131 = vector.broadcast %cst_320 : f32 to vector<8x32xf32>
    %1132 = arith.addf %1131, %1130 : vector<8x32xf32>
    %1133 = arith.divf %1131, %1132 : vector<8x32xf32>
    %1134 = vector.extract_strided_slice %1123 {offsets = [0, 32], sizes = [8, 32], strides = [1, 1]} : vector<8x96xf32> to vector<8x32xf32>
    %1135 = vector.extract_strided_slice %1125 {offsets = [0, 32], sizes = [8, 32], strides = [1, 1]} : vector<8x96xf32> to vector<8x32xf32>
    %1136 = arith.addf %1134, %1135 : vector<8x32xf32>
    %1137 = arith.negf %1136 : vector<8x32xf32>
    %1138 = math.exp %1137 : vector<8x32xf32>
    %cst_321 = arith.constant 1.000000e+00 : f32
    %1139 = vector.broadcast %cst_321 : f32 to vector<8x32xf32>
    %1140 = arith.addf %1139, %1138 : vector<8x32xf32>
    %1141 = arith.divf %1139, %1140 : vector<8x32xf32>
    %1142 = vector.extract_strided_slice %1123 {offsets = [0, 64], sizes = [8, 32], strides = [1, 1]} : vector<8x96xf32> to vector<8x32xf32>
    %1143 = vector.extract_strided_slice %1125 {offsets = [0, 64], sizes = [8, 32], strides = [1, 1]} : vector<8x96xf32> to vector<8x32xf32>
    %1144 = arith.addf %1143, %14 : vector<8x32xf32>
    %1145 = arith.mulf %1133, %1144 : vector<8x32xf32>
    %1146 = arith.addf %1142, %1145 : vector<8x32xf32>
    %1147 = math.tanh %1146 : vector<8x32xf32>
    %cst_322 = arith.constant 1.000000e+00 : f32
    %1148 = vector.broadcast %cst_322 : f32 to vector<8x32xf32>
    %1149 = arith.subf %1148, %1141 : vector<8x32xf32>
    %1150 = arith.mulf %1149, %1147 : vector<8x32xf32>
    %1151 = arith.mulf %1141, %1076 : vector<8x32xf32>
    %1152 = arith.addf %1150, %1151 : vector<8x32xf32>
    %1153 = arith.truncf %1152 : vector<8x32xf32> to vector<8x32xbf16>
    %c9_323 = arith.constant 9 : index
    %c0_324 = arith.constant 0 : index
    %c0_325 = arith.constant 0 : index
    %1154 = vector.load %arg13[%c9_323, %c0_324, %c0_325] : memref<24x8x32xbf16, #tpu.memory_space<vmem>>, vector<1x8x32xbf16>
    %1155 = vector.shape_cast %1154 : vector<1x8x32xbf16> to vector<8x32xbf16>
    %1156 = vector.shape_cast %1153 : vector<8x32xbf16> to vector<1x8x32xbf16>
    tpu.vector_store %arg13[%c9_323, %c0_324, %c0_325], %1156 {strides = array<i32>} : memref<24x8x32xbf16, #tpu.memory_space<vmem>>, vector<1x8x32xbf16>,
    %c15_326 = arith.constant 15 : index
    %c0_327 = arith.constant 0 : index
    %c0_328 = arith.constant 0 : index
    %1157 = vector.load %arg2[%c15_326, %c0_327, %c0_328] : memref<24x8x32xbf16, #tpu.memory_space<vmem>>, vector<1x8x32xbf16>
    %1158 = vector.shape_cast %1157 : vector<1x8x32xbf16> to vector<8x32xbf16>
    %cst_329 = arith.constant dense<0.000000e+00> : vector<8x96xf32>
    %1159 = tpu.matmul %1158, %3, %cst_329 {dimension_numbers = #tpu.dot_dimension_numbers<[1], [0], [0], [1], [0, 0, 1, 1], [], []>} : vector<8x32xbf16>, vector<32x96xbf16>, vector<8x96xf32> -> vector<8x96xf32>
    %1160 = vector.broadcast %7 : vector<1x96xf32> to vector<8x96xf32>
    %1161 = arith.addf %1159, %1160 : vector<8x96xf32>
    %1162 = arith.truncf %1114 : vector<8x32xf32> to vector<8x32xbf16>
    %cst_330 = arith.constant dense<0.000000e+00> : vector<8x96xf32>
    %1163 = tpu.matmul %1162, %5, %cst_330 {dimension_numbers = #tpu.dot_dimension_numbers<[1], [0], [0], [1], [0, 0, 1, 1], [], []>} : vector<8x32xbf16>, vector<32x96xbf16>, vector<8x96xf32> -> vector<8x96xf32>
    %1164 = vector.extract_strided_slice %1161 {offsets = [0, 0], sizes = [8, 32], strides = [1, 1]} : vector<8x96xf32> to vector<8x32xf32>
    %1165 = vector.extract_strided_slice %1163 {offsets = [0, 0], sizes = [8, 32], strides = [1, 1]} : vector<8x96xf32> to vector<8x32xf32>
    %1166 = arith.addf %1164, %1165 : vector<8x32xf32>
    %1167 = arith.negf %1166 : vector<8x32xf32>
    %1168 = math.exp %1167 : vector<8x32xf32>
    %cst_331 = arith.constant 1.000000e+00 : f32
    %1169 = vector.broadcast %cst_331 : f32 to vector<8x32xf32>
    %1170 = arith.addf %1169, %1168 : vector<8x32xf32>
    %1171 = arith.divf %1169, %1170 : vector<8x32xf32>
    %1172 = vector.extract_strided_slice %1161 {offsets = [0, 32], sizes = [8, 32], strides = [1, 1]} : vector<8x96xf32> to vector<8x32xf32>
    %1173 = vector.extract_strided_slice %1163 {offsets = [0, 32], sizes = [8, 32], strides = [1, 1]} : vector<8x96xf32> to vector<8x32xf32>
    %1174 = arith.addf %1172, %1173 : vector<8x32xf32>
    %1175 = arith.negf %1174 : vector<8x32xf32>
    %1176 = math.exp %1175 : vector<8x32xf32>
    %cst_332 = arith.constant 1.000000e+00 : f32
    %1177 = vector.broadcast %cst_332 : f32 to vector<8x32xf32>
    %1178 = arith.addf %1177, %1176 : vector<8x32xf32>
    %1179 = arith.divf %1177, %1178 : vector<8x32xf32>
    %1180 = vector.extract_strided_slice %1161 {offsets = [0, 64], sizes = [8, 32], strides = [1, 1]} : vector<8x96xf32> to vector<8x32xf32>
    %1181 = vector.extract_strided_slice %1163 {offsets = [0, 64], sizes = [8, 32], strides = [1, 1]} : vector<8x96xf32> to vector<8x32xf32>
    %1182 = arith.addf %1181, %11 : vector<8x32xf32>
    %1183 = arith.mulf %1171, %1182 : vector<8x32xf32>
    %1184 = arith.addf %1180, %1183 : vector<8x32xf32>
    %1185 = math.tanh %1184 : vector<8x32xf32>
    %cst_333 = arith.constant 1.000000e+00 : f32
    %1186 = vector.broadcast %cst_333 : f32 to vector<8x32xf32>
    %1187 = arith.subf %1186, %1179 : vector<8x32xf32>
    %1188 = arith.mulf %1187, %1185 : vector<8x32xf32>
    %1189 = arith.mulf %1179, %1114 : vector<8x32xf32>
    %1190 = arith.addf %1188, %1189 : vector<8x32xf32>
    %1191 = arith.truncf %1190 : vector<8x32xf32> to vector<8x32xbf16>
    %c15_334 = arith.constant 15 : index
    %c0_335 = arith.constant 0 : index
    %c0_336 = arith.constant 0 : index
    %1192 = vector.load %arg12[%c15_334, %c0_335, %c0_336] : memref<24x8x32xbf16, #tpu.memory_space<vmem>>, vector<1x8x32xbf16>
    %1193 = vector.shape_cast %1192 : vector<1x8x32xbf16> to vector<8x32xbf16>
    %1194 = vector.shape_cast %1191 : vector<8x32xbf16> to vector<1x8x32xbf16>
    tpu.vector_store %arg12[%c15_334, %c0_335, %c0_336], %1194 {strides = array<i32>} : memref<24x8x32xbf16, #tpu.memory_space<vmem>>, vector<1x8x32xbf16>,
    %c8_337 = arith.constant 8 : index
    %c0_338 = arith.constant 0 : index
    %c0_339 = arith.constant 0 : index
    %1195 = vector.load %arg3[%c8_337, %c0_338, %c0_339] : memref<24x8x32xbf16, #tpu.memory_space<vmem>>, vector<1x8x32xbf16>
    %1196 = vector.shape_cast %1195 : vector<1x8x32xbf16> to vector<8x32xbf16>
    %cst_340 = arith.constant dense<0.000000e+00> : vector<8x96xf32>
    %1197 = tpu.matmul %1196, %4, %cst_340 {dimension_numbers = #tpu.dot_dimension_numbers<[1], [0], [0], [1], [0, 0, 1, 1], [], []>} : vector<8x32xbf16>, vector<32x96xbf16>, vector<8x96xf32> -> vector<8x96xf32>
    %1198 = vector.broadcast %8 : vector<1x96xf32> to vector<8x96xf32>
    %1199 = arith.addf %1197, %1198 : vector<8x96xf32>
    %1200 = arith.truncf %1152 : vector<8x32xf32> to vector<8x32xbf16>
    %cst_341 = arith.constant dense<0.000000e+00> : vector<8x96xf32>
    %1201 = tpu.matmul %1200, %6, %cst_341 {dimension_numbers = #tpu.dot_dimension_numbers<[1], [0], [0], [1], [0, 0, 1, 1], [], []>} : vector<8x32xbf16>, vector<32x96xbf16>, vector<8x96xf32> -> vector<8x96xf32>
    %1202 = vector.extract_strided_slice %1199 {offsets = [0, 0], sizes = [8, 32], strides = [1, 1]} : vector<8x96xf32> to vector<8x32xf32>
    %1203 = vector.extract_strided_slice %1201 {offsets = [0, 0], sizes = [8, 32], strides = [1, 1]} : vector<8x96xf32> to vector<8x32xf32>
    %1204 = arith.addf %1202, %1203 : vector<8x32xf32>
    %1205 = arith.negf %1204 : vector<8x32xf32>
    %1206 = math.exp %1205 : vector<8x32xf32>
    %cst_342 = arith.constant 1.000000e+00 : f32
    %1207 = vector.broadcast %cst_342 : f32 to vector<8x32xf32>
    %1208 = arith.addf %1207, %1206 : vector<8x32xf32>
    %1209 = arith.divf %1207, %1208 : vector<8x32xf32>
    %1210 = vector.extract_strided_slice %1199 {offsets = [0, 32], sizes = [8, 32], strides = [1, 1]} : vector<8x96xf32> to vector<8x32xf32>
    %1211 = vector.extract_strided_slice %1201 {offsets = [0, 32], sizes = [8, 32], strides = [1, 1]} : vector<8x96xf32> to vector<8x32xf32>
    %1212 = arith.addf %1210, %1211 : vector<8x32xf32>
    %1213 = arith.negf %1212 : vector<8x32xf32>
    %1214 = math.exp %1213 : vector<8x32xf32>
    %cst_343 = arith.constant 1.000000e+00 : f32
    %1215 = vector.broadcast %cst_343 : f32 to vector<8x32xf32>
    %1216 = arith.addf %1215, %1214 : vector<8x32xf32>
    %1217 = arith.divf %1215, %1216 : vector<8x32xf32>
    %1218 = vector.extract_strided_slice %1199 {offsets = [0, 64], sizes = [8, 32], strides = [1, 1]} : vector<8x96xf32> to vector<8x32xf32>
    %1219 = vector.extract_strided_slice %1201 {offsets = [0, 64], sizes = [8, 32], strides = [1, 1]} : vector<8x96xf32> to vector<8x32xf32>
    %1220 = arith.addf %1219, %14 : vector<8x32xf32>
    %1221 = arith.mulf %1209, %1220 : vector<8x32xf32>
    %1222 = arith.addf %1218, %1221 : vector<8x32xf32>
    %1223 = math.tanh %1222 : vector<8x32xf32>
    %cst_344 = arith.constant 1.000000e+00 : f32
    %1224 = vector.broadcast %cst_344 : f32 to vector<8x32xf32>
    %1225 = arith.subf %1224, %1217 : vector<8x32xf32>
    %1226 = arith.mulf %1225, %1223 : vector<8x32xf32>
    %1227 = arith.mulf %1217, %1152 : vector<8x32xf32>
    %1228 = arith.addf %1226, %1227 : vector<8x32xf32>
    %1229 = arith.truncf %1228 : vector<8x32xf32> to vector<8x32xbf16>
    %c8_345 = arith.constant 8 : index
    %c0_346 = arith.constant 0 : index
    %c0_347 = arith.constant 0 : index
    %1230 = vector.load %arg13[%c8_345, %c0_346, %c0_347] : memref<24x8x32xbf16, #tpu.memory_space<vmem>>, vector<1x8x32xbf16>
    %1231 = vector.shape_cast %1230 : vector<1x8x32xbf16> to vector<8x32xbf16>
    %1232 = vector.shape_cast %1229 : vector<8x32xbf16> to vector<1x8x32xbf16>
    tpu.vector_store %arg13[%c8_345, %c0_346, %c0_347], %1232 {strides = array<i32>} : memref<24x8x32xbf16, #tpu.memory_space<vmem>>, vector<1x8x32xbf16>,
    %c16_348 = arith.constant 16 : index
    %c0_349 = arith.constant 0 : index
    %c0_350 = arith.constant 0 : index
    %1233 = vector.load %arg2[%c16_348, %c0_349, %c0_350] : memref<24x8x32xbf16, #tpu.memory_space<vmem>>, vector<1x8x32xbf16>
    %1234 = vector.shape_cast %1233 : vector<1x8x32xbf16> to vector<8x32xbf16>
    %cst_351 = arith.constant dense<0.000000e+00> : vector<8x96xf32>
    %1235 = tpu.matmul %1234, %3, %cst_351 {dimension_numbers = #tpu.dot_dimension_numbers<[1], [0], [0], [1], [0, 0, 1, 1], [], []>} : vector<8x32xbf16>, vector<32x96xbf16>, vector<8x96xf32> -> vector<8x96xf32>
    %1236 = vector.broadcast %7 : vector<1x96xf32> to vector<8x96xf32>
    %1237 = arith.addf %1235, %1236 : vector<8x96xf32>
    %1238 = arith.truncf %1190 : vector<8x32xf32> to vector<8x32xbf16>
    %cst_352 = arith.constant dense<0.000000e+00> : vector<8x96xf32>
    %1239 = tpu.matmul %1238, %5, %cst_352 {dimension_numbers = #tpu.dot_dimension_numbers<[1], [0], [0], [1], [0, 0, 1, 1], [], []>} : vector<8x32xbf16>, vector<32x96xbf16>, vector<8x96xf32> -> vector<8x96xf32>
    %1240 = vector.extract_strided_slice %1237 {offsets = [0, 0], sizes = [8, 32], strides = [1, 1]} : vector<8x96xf32> to vector<8x32xf32>
    %1241 = vector.extract_strided_slice %1239 {offsets = [0, 0], sizes = [8, 32], strides = [1, 1]} : vector<8x96xf32> to vector<8x32xf32>
    %1242 = arith.addf %1240, %1241 : vector<8x32xf32>
    %1243 = arith.negf %1242 : vector<8x32xf32>
    %1244 = math.exp %1243 : vector<8x32xf32>
    %cst_353 = arith.constant 1.000000e+00 : f32
    %1245 = vector.broadcast %cst_353 : f32 to vector<8x32xf32>
    %1246 = arith.addf %1245, %1244 : vector<8x32xf32>
    %1247 = arith.divf %1245, %1246 : vector<8x32xf32>
    %1248 = vector.extract_strided_slice %1237 {offsets = [0, 32], sizes = [8, 32], strides = [1, 1]} : vector<8x96xf32> to vector<8x32xf32>
    %1249 = vector.extract_strided_slice %1239 {offsets = [0, 32], sizes = [8, 32], strides = [1, 1]} : vector<8x96xf32> to vector<8x32xf32>
    %1250 = arith.addf %1248, %1249 : vector<8x32xf32>
    %1251 = arith.negf %1250 : vector<8x32xf32>
    %1252 = math.exp %1251 : vector<8x32xf32>
    %cst_354 = arith.constant 1.000000e+00 : f32
    %1253 = vector.broadcast %cst_354 : f32 to vector<8x32xf32>
    %1254 = arith.addf %1253, %1252 : vector<8x32xf32>
    %1255 = arith.divf %1253, %1254 : vector<8x32xf32>
    %1256 = vector.extract_strided_slice %1237 {offsets = [0, 64], sizes = [8, 32], strides = [1, 1]} : vector<8x96xf32> to vector<8x32xf32>
    %1257 = vector.extract_strided_slice %1239 {offsets = [0, 64], sizes = [8, 32], strides = [1, 1]} : vector<8x96xf32> to vector<8x32xf32>
    %1258 = arith.addf %1257, %11 : vector<8x32xf32>
    %1259 = arith.mulf %1247, %1258 : vector<8x32xf32>
    %1260 = arith.addf %1256, %1259 : vector<8x32xf32>
    %1261 = math.tanh %1260 : vector<8x32xf32>
    %cst_355 = arith.constant 1.000000e+00 : f32
    %1262 = vector.broadcast %cst_355 : f32 to vector<8x32xf32>
    %1263 = arith.subf %1262, %1255 : vector<8x32xf32>
    %1264 = arith.mulf %1263, %1261 : vector<8x32xf32>
    %1265 = arith.mulf %1255, %1190 : vector<8x32xf32>
    %1266 = arith.addf %1264, %1265 : vector<8x32xf32>
    %1267 = arith.truncf %1266 : vector<8x32xf32> to vector<8x32xbf16>
    %c16_356 = arith.constant 16 : index
    %c0_357 = arith.constant 0 : index
    %c0_358 = arith.constant 0 : index
    %1268 = vector.load %arg12[%c16_356, %c0_357, %c0_358] : memref<24x8x32xbf16, #tpu.memory_space<vmem>>, vector<1x8x32xbf16>
    %1269 = vector.shape_cast %1268 : vector<1x8x32xbf16> to vector<8x32xbf16>
    %1270 = vector.shape_cast %1267 : vector<8x32xbf16> to vector<1x8x32xbf16>
    tpu.vector_store %arg12[%c16_356, %c0_357, %c0_358], %1270 {strides = array<i32>} : memref<24x8x32xbf16, #tpu.memory_space<vmem>>, vector<1x8x32xbf16>,
    %c7_359 = arith.constant 7 : index
    %c0_360 = arith.constant 0 : index
    %c0_361 = arith.constant 0 : index
    %1271 = vector.load %arg3[%c7_359, %c0_360, %c0_361] : memref<24x8x32xbf16, #tpu.memory_space<vmem>>, vector<1x8x32xbf16>
    %1272 = vector.shape_cast %1271 : vector<1x8x32xbf16> to vector<8x32xbf16>
    %cst_362 = arith.constant dense<0.000000e+00> : vector<8x96xf32>
    %1273 = tpu.matmul %1272, %4, %cst_362 {dimension_numbers = #tpu.dot_dimension_numbers<[1], [0], [0], [1], [0, 0, 1, 1], [], []>} : vector<8x32xbf16>, vector<32x96xbf16>, vector<8x96xf32> -> vector<8x96xf32>
    %1274 = vector.broadcast %8 : vector<1x96xf32> to vector<8x96xf32>
    %1275 = arith.addf %1273, %1274 : vector<8x96xf32>
    %1276 = arith.truncf %1228 : vector<8x32xf32> to vector<8x32xbf16>
    %cst_363 = arith.constant dense<0.000000e+00> : vector<8x96xf32>
    %1277 = tpu.matmul %1276, %6, %cst_363 {dimension_numbers = #tpu.dot_dimension_numbers<[1], [0], [0], [1], [0, 0, 1, 1], [], []>} : vector<8x32xbf16>, vector<32x96xbf16>, vector<8x96xf32> -> vector<8x96xf32>
    %1278 = vector.extract_strided_slice %1275 {offsets = [0, 0], sizes = [8, 32], strides = [1, 1]} : vector<8x96xf32> to vector<8x32xf32>
    %1279 = vector.extract_strided_slice %1277 {offsets = [0, 0], sizes = [8, 32], strides = [1, 1]} : vector<8x96xf32> to vector<8x32xf32>
    %1280 = arith.addf %1278, %1279 : vector<8x32xf32>
    %1281 = arith.negf %1280 : vector<8x32xf32>
    %1282 = math.exp %1281 : vector<8x32xf32>
    %cst_364 = arith.constant 1.000000e+00 : f32
    %1283 = vector.broadcast %cst_364 : f32 to vector<8x32xf32>
    %1284 = arith.addf %1283, %1282 : vector<8x32xf32>
    %1285 = arith.divf %1283, %1284 : vector<8x32xf32>
    %1286 = vector.extract_strided_slice %1275 {offsets = [0, 32], sizes = [8, 32], strides = [1, 1]} : vector<8x96xf32> to vector<8x32xf32>
    %1287 = vector.extract_strided_slice %1277 {offsets = [0, 32], sizes = [8, 32], strides = [1, 1]} : vector<8x96xf32> to vector<8x32xf32>
    %1288 = arith.addf %1286, %1287 : vector<8x32xf32>
    %1289 = arith.negf %1288 : vector<8x32xf32>
    %1290 = math.exp %1289 : vector<8x32xf32>
    %cst_365 = arith.constant 1.000000e+00 : f32
    %1291 = vector.broadcast %cst_365 : f32 to vector<8x32xf32>
    %1292 = arith.addf %1291, %1290 : vector<8x32xf32>
    %1293 = arith.divf %1291, %1292 : vector<8x32xf32>
    %1294 = vector.extract_strided_slice %1275 {offsets = [0, 64], sizes = [8, 32], strides = [1, 1]} : vector<8x96xf32> to vector<8x32xf32>
    %1295 = vector.extract_strided_slice %1277 {offsets = [0, 64], sizes = [8, 32], strides = [1, 1]} : vector<8x96xf32> to vector<8x32xf32>
    %1296 = arith.addf %1295, %14 : vector<8x32xf32>
    %1297 = arith.mulf %1285, %1296 : vector<8x32xf32>
    %1298 = arith.addf %1294, %1297 : vector<8x32xf32>
    %1299 = math.tanh %1298 : vector<8x32xf32>
    %cst_366 = arith.constant 1.000000e+00 : f32
    %1300 = vector.broadcast %cst_366 : f32 to vector<8x32xf32>
    %1301 = arith.subf %1300, %1293 : vector<8x32xf32>
    %1302 = arith.mulf %1301, %1299 : vector<8x32xf32>
    %1303 = arith.mulf %1293, %1228 : vector<8x32xf32>
    %1304 = arith.addf %1302, %1303 : vector<8x32xf32>
    %1305 = arith.truncf %1304 : vector<8x32xf32> to vector<8x32xbf16>
    %c7_367 = arith.constant 7 : index
    %c0_368 = arith.constant 0 : index
    %c0_369 = arith.constant 0 : index
    %1306 = vector.load %arg13[%c7_367, %c0_368, %c0_369] : memref<24x8x32xbf16, #tpu.memory_space<vmem>>, vector<1x8x32xbf16>
    %1307 = vector.shape_cast %1306 : vector<1x8x32xbf16> to vector<8x32xbf16>
    %1308 = vector.shape_cast %1305 : vector<8x32xbf16> to vector<1x8x32xbf16>
    tpu.vector_store %arg13[%c7_367, %c0_368, %c0_369], %1308 {strides = array<i32>} : memref<24x8x32xbf16, #tpu.memory_space<vmem>>, vector<1x8x32xbf16>,
    %c17_370 = arith.constant 17 : index
    %c0_371 = arith.constant 0 : index
    %c0_372 = arith.constant 0 : index
    %1309 = vector.load %arg2[%c17_370, %c0_371, %c0_372] : memref<24x8x32xbf16, #tpu.memory_space<vmem>>, vector<1x8x32xbf16>
    %1310 = vector.shape_cast %1309 : vector<1x8x32xbf16> to vector<8x32xbf16>
    %cst_373 = arith.constant dense<0.000000e+00> : vector<8x96xf32>
    %1311 = tpu.matmul %1310, %3, %cst_373 {dimension_numbers = #tpu.dot_dimension_numbers<[1], [0], [0], [1], [0, 0, 1, 1], [], []>} : vector<8x32xbf16>, vector<32x96xbf16>, vector<8x96xf32> -> vector<8x96xf32>
    %1312 = vector.broadcast %7 : vector<1x96xf32> to vector<8x96xf32>
    %1313 = arith.addf %1311, %1312 : vector<8x96xf32>
    %1314 = arith.truncf %1266 : vector<8x32xf32> to vector<8x32xbf16>
    %cst_374 = arith.constant dense<0.000000e+00> : vector<8x96xf32>
    %1315 = tpu.matmul %1314, %5, %cst_374 {dimension_numbers = #tpu.dot_dimension_numbers<[1], [0], [0], [1], [0, 0, 1, 1], [], []>} : vector<8x32xbf16>, vector<32x96xbf16>, vector<8x96xf32> -> vector<8x96xf32>
    %1316 = vector.extract_strided_slice %1313 {offsets = [0, 0], sizes = [8, 32], strides = [1, 1]} : vector<8x96xf32> to vector<8x32xf32>
    %1317 = vector.extract_strided_slice %1315 {offsets = [0, 0], sizes = [8, 32], strides = [1, 1]} : vector<8x96xf32> to vector<8x32xf32>
    %1318 = arith.addf %1316, %1317 : vector<8x32xf32>
    %1319 = arith.negf %1318 : vector<8x32xf32>
    %1320 = math.exp %1319 : vector<8x32xf32>
    %cst_375 = arith.constant 1.000000e+00 : f32
    %1321 = vector.broadcast %cst_375 : f32 to vector<8x32xf32>
    %1322 = arith.addf %1321, %1320 : vector<8x32xf32>
    %1323 = arith.divf %1321, %1322 : vector<8x32xf32>
    %1324 = vector.extract_strided_slice %1313 {offsets = [0, 32], sizes = [8, 32], strides = [1, 1]} : vector<8x96xf32> to vector<8x32xf32>
    %1325 = vector.extract_strided_slice %1315 {offsets = [0, 32], sizes = [8, 32], strides = [1, 1]} : vector<8x96xf32> to vector<8x32xf32>
    %1326 = arith.addf %1324, %1325 : vector<8x32xf32>
    %1327 = arith.negf %1326 : vector<8x32xf32>
    %1328 = math.exp %1327 : vector<8x32xf32>
    %cst_376 = arith.constant 1.000000e+00 : f32
    %1329 = vector.broadcast %cst_376 : f32 to vector<8x32xf32>
    %1330 = arith.addf %1329, %1328 : vector<8x32xf32>
    %1331 = arith.divf %1329, %1330 : vector<8x32xf32>
    %1332 = vector.extract_strided_slice %1313 {offsets = [0, 64], sizes = [8, 32], strides = [1, 1]} : vector<8x96xf32> to vector<8x32xf32>
    %1333 = vector.extract_strided_slice %1315 {offsets = [0, 64], sizes = [8, 32], strides = [1, 1]} : vector<8x96xf32> to vector<8x32xf32>
    %1334 = arith.addf %1333, %11 : vector<8x32xf32>
    %1335 = arith.mulf %1323, %1334 : vector<8x32xf32>
    %1336 = arith.addf %1332, %1335 : vector<8x32xf32>
    %1337 = math.tanh %1336 : vector<8x32xf32>
    %cst_377 = arith.constant 1.000000e+00 : f32
    %1338 = vector.broadcast %cst_377 : f32 to vector<8x32xf32>
    %1339 = arith.subf %1338, %1331 : vector<8x32xf32>
    %1340 = arith.mulf %1339, %1337 : vector<8x32xf32>
    %1341 = arith.mulf %1331, %1266 : vector<8x32xf32>
    %1342 = arith.addf %1340, %1341 : vector<8x32xf32>
    %1343 = arith.truncf %1342 : vector<8x32xf32> to vector<8x32xbf16>
    %c17_378 = arith.constant 17 : index
    %c0_379 = arith.constant 0 : index
    %c0_380 = arith.constant 0 : index
    %1344 = vector.load %arg12[%c17_378, %c0_379, %c0_380] : memref<24x8x32xbf16, #tpu.memory_space<vmem>>, vector<1x8x32xbf16>
    %1345 = vector.shape_cast %1344 : vector<1x8x32xbf16> to vector<8x32xbf16>
    %1346 = vector.shape_cast %1343 : vector<8x32xbf16> to vector<1x8x32xbf16>
    tpu.vector_store %arg12[%c17_378, %c0_379, %c0_380], %1346 {strides = array<i32>} : memref<24x8x32xbf16, #tpu.memory_space<vmem>>, vector<1x8x32xbf16>,
    %c6_381 = arith.constant 6 : index
    %c0_382 = arith.constant 0 : index
    %c0_383 = arith.constant 0 : index
    %1347 = vector.load %arg3[%c6_381, %c0_382, %c0_383] : memref<24x8x32xbf16, #tpu.memory_space<vmem>>, vector<1x8x32xbf16>
    %1348 = vector.shape_cast %1347 : vector<1x8x32xbf16> to vector<8x32xbf16>
    %cst_384 = arith.constant dense<0.000000e+00> : vector<8x96xf32>
    %1349 = tpu.matmul %1348, %4, %cst_384 {dimension_numbers = #tpu.dot_dimension_numbers<[1], [0], [0], [1], [0, 0, 1, 1], [], []>} : vector<8x32xbf16>, vector<32x96xbf16>, vector<8x96xf32> -> vector<8x96xf32>
    %1350 = vector.broadcast %8 : vector<1x96xf32> to vector<8x96xf32>
    %1351 = arith.addf %1349, %1350 : vector<8x96xf32>
    %1352 = arith.truncf %1304 : vector<8x32xf32> to vector<8x32xbf16>
    %cst_385 = arith.constant dense<0.000000e+00> : vector<8x96xf32>
    %1353 = tpu.matmul %1352, %6, %cst_385 {dimension_numbers = #tpu.dot_dimension_numbers<[1], [0], [0], [1], [0, 0, 1, 1], [], []>} : vector<8x32xbf16>, vector<32x96xbf16>, vector<8x96xf32> -> vector<8x96xf32>
    %1354 = vector.extract_strided_slice %1351 {offsets = [0, 0], sizes = [8, 32], strides = [1, 1]} : vector<8x96xf32> to vector<8x32xf32>
    %1355 = vector.extract_strided_slice %1353 {offsets = [0, 0], sizes = [8, 32], strides = [1, 1]} : vector<8x96xf32> to vector<8x32xf32>
    %1356 = arith.addf %1354, %1355 : vector<8x32xf32>
    %1357 = arith.negf %1356 : vector<8x32xf32>
    %1358 = math.exp %1357 : vector<8x32xf32>
    %cst_386 = arith.constant 1.000000e+00 : f32
    %1359 = vector.broadcast %cst_386 : f32 to vector<8x32xf32>
    %1360 = arith.addf %1359, %1358 : vector<8x32xf32>
    %1361 = arith.divf %1359, %1360 : vector<8x32xf32>
    %1362 = vector.extract_strided_slice %1351 {offsets = [0, 32], sizes = [8, 32], strides = [1, 1]} : vector<8x96xf32> to vector<8x32xf32>
    %1363 = vector.extract_strided_slice %1353 {offsets = [0, 32], sizes = [8, 32], strides = [1, 1]} : vector<8x96xf32> to vector<8x32xf32>
    %1364 = arith.addf %1362, %1363 : vector<8x32xf32>
    %1365 = arith.negf %1364 : vector<8x32xf32>
    %1366 = math.exp %1365 : vector<8x32xf32>
    %cst_387 = arith.constant 1.000000e+00 : f32
    %1367 = vector.broadcast %cst_387 : f32 to vector<8x32xf32>
    %1368 = arith.addf %1367, %1366 : vector<8x32xf32>
    %1369 = arith.divf %1367, %1368 : vector<8x32xf32>
    %1370 = vector.extract_strided_slice %1351 {offsets = [0, 64], sizes = [8, 32], strides = [1, 1]} : vector<8x96xf32> to vector<8x32xf32>
    %1371 = vector.extract_strided_slice %1353 {offsets = [0, 64], sizes = [8, 32], strides = [1, 1]} : vector<8x96xf32> to vector<8x32xf32>
    %1372 = arith.addf %1371, %14 : vector<8x32xf32>
    %1373 = arith.mulf %1361, %1372 : vector<8x32xf32>
    %1374 = arith.addf %1370, %1373 : vector<8x32xf32>
    %1375 = math.tanh %1374 : vector<8x32xf32>
    %cst_388 = arith.constant 1.000000e+00 : f32
    %1376 = vector.broadcast %cst_388 : f32 to vector<8x32xf32>
    %1377 = arith.subf %1376, %1369 : vector<8x32xf32>
    %1378 = arith.mulf %1377, %1375 : vector<8x32xf32>
    %1379 = arith.mulf %1369, %1304 : vector<8x32xf32>
    %1380 = arith.addf %1378, %1379 : vector<8x32xf32>
    %1381 = arith.truncf %1380 : vector<8x32xf32> to vector<8x32xbf16>
    %c6_389 = arith.constant 6 : index
    %c0_390 = arith.constant 0 : index
    %c0_391 = arith.constant 0 : index
    %1382 = vector.load %arg13[%c6_389, %c0_390, %c0_391] : memref<24x8x32xbf16, #tpu.memory_space<vmem>>, vector<1x8x32xbf16>
    %1383 = vector.shape_cast %1382 : vector<1x8x32xbf16> to vector<8x32xbf16>
    %1384 = vector.shape_cast %1381 : vector<8x32xbf16> to vector<1x8x32xbf16>
    tpu.vector_store %arg13[%c6_389, %c0_390, %c0_391], %1384 {strides = array<i32>} : memref<24x8x32xbf16, #tpu.memory_space<vmem>>, vector<1x8x32xbf16>,
    %c18_392 = arith.constant 18 : index
    %c0_393 = arith.constant 0 : index
    %c0_394 = arith.constant 0 : index
    %1385 = vector.load %arg2[%c18_392, %c0_393, %c0_394] : memref<24x8x32xbf16, #tpu.memory_space<vmem>>, vector<1x8x32xbf16>
    %1386 = vector.shape_cast %1385 : vector<1x8x32xbf16> to vector<8x32xbf16>
    %cst_395 = arith.constant dense<0.000000e+00> : vector<8x96xf32>
    %1387 = tpu.matmul %1386, %3, %cst_395 {dimension_numbers = #tpu.dot_dimension_numbers<[1], [0], [0], [1], [0, 0, 1, 1], [], []>} : vector<8x32xbf16>, vector<32x96xbf16>, vector<8x96xf32> -> vector<8x96xf32>
    %1388 = vector.broadcast %7 : vector<1x96xf32> to vector<8x96xf32>
    %1389 = arith.addf %1387, %1388 : vector<8x96xf32>
    %1390 = arith.truncf %1342 : vector<8x32xf32> to vector<8x32xbf16>
    %cst_396 = arith.constant dense<0.000000e+00> : vector<8x96xf32>
    %1391 = tpu.matmul %1390, %5, %cst_396 {dimension_numbers = #tpu.dot_dimension_numbers<[1], [0], [0], [1], [0, 0, 1, 1], [], []>} : vector<8x32xbf16>, vector<32x96xbf16>, vector<8x96xf32> -> vector<8x96xf32>
    %1392 = vector.extract_strided_slice %1389 {offsets = [0, 0], sizes = [8, 32], strides = [1, 1]} : vector<8x96xf32> to vector<8x32xf32>
    %1393 = vector.extract_strided_slice %1391 {offsets = [0, 0], sizes = [8, 32], strides = [1, 1]} : vector<8x96xf32> to vector<8x32xf32>
    %1394 = arith.addf %1392, %1393 : vector<8x32xf32>
    %1395 = arith.negf %1394 : vector<8x32xf32>
    %1396 = math.exp %1395 : vector<8x32xf32>
    %cst_397 = arith.constant 1.000000e+00 : f32
    %1397 = vector.broadcast %cst_397 : f32 to vector<8x32xf32>
    %1398 = arith.addf %1397, %1396 : vector<8x32xf32>
    %1399 = arith.divf %1397, %1398 : vector<8x32xf32>
    %1400 = vector.extract_strided_slice %1389 {offsets = [0, 32], sizes = [8, 32], strides = [1, 1]} : vector<8x96xf32> to vector<8x32xf32>
    %1401 = vector.extract_strided_slice %1391 {offsets = [0, 32], sizes = [8, 32], strides = [1, 1]} : vector<8x96xf32> to vector<8x32xf32>
    %1402 = arith.addf %1400, %1401 : vector<8x32xf32>
    %1403 = arith.negf %1402 : vector<8x32xf32>
    %1404 = math.exp %1403 : vector<8x32xf32>
    %cst_398 = arith.constant 1.000000e+00 : f32
    %1405 = vector.broadcast %cst_398 : f32 to vector<8x32xf32>
    %1406 = arith.addf %1405, %1404 : vector<8x32xf32>
    %1407 = arith.divf %1405, %1406 : vector<8x32xf32>
    %1408 = vector.extract_strided_slice %1389 {offsets = [0, 64], sizes = [8, 32], strides = [1, 1]} : vector<8x96xf32> to vector<8x32xf32>
    %1409 = vector.extract_strided_slice %1391 {offsets = [0, 64], sizes = [8, 32], strides = [1, 1]} : vector<8x96xf32> to vector<8x32xf32>
    %1410 = arith.addf %1409, %11 : vector<8x32xf32>
    %1411 = arith.mulf %1399, %1410 : vector<8x32xf32>
    %1412 = arith.addf %1408, %1411 : vector<8x32xf32>
    %1413 = math.tanh %1412 : vector<8x32xf32>
    %cst_399 = arith.constant 1.000000e+00 : f32
    %1414 = vector.broadcast %cst_399 : f32 to vector<8x32xf32>
    %1415 = arith.subf %1414, %1407 : vector<8x32xf32>
    %1416 = arith.mulf %1415, %1413 : vector<8x32xf32>
    %1417 = arith.mulf %1407, %1342 : vector<8x32xf32>
    %1418 = arith.addf %1416, %1417 : vector<8x32xf32>
    %1419 = arith.truncf %1418 : vector<8x32xf32> to vector<8x32xbf16>
    %c18_400 = arith.constant 18 : index
    %c0_401 = arith.constant 0 : index
    %c0_402 = arith.constant 0 : index
    %1420 = vector.load %arg12[%c18_400, %c0_401, %c0_402] : memref<24x8x32xbf16, #tpu.memory_space<vmem>>, vector<1x8x32xbf16>
    %1421 = vector.shape_cast %1420 : vector<1x8x32xbf16> to vector<8x32xbf16>
    %1422 = vector.shape_cast %1419 : vector<8x32xbf16> to vector<1x8x32xbf16>
    tpu.vector_store %arg12[%c18_400, %c0_401, %c0_402], %1422 {strides = array<i32>} : memref<24x8x32xbf16, #tpu.memory_space<vmem>>, vector<1x8x32xbf16>,
    %c5_403 = arith.constant 5 : index
    %c0_404 = arith.constant 0 : index
    %c0_405 = arith.constant 0 : index
    %1423 = vector.load %arg3[%c5_403, %c0_404, %c0_405] : memref<24x8x32xbf16, #tpu.memory_space<vmem>>, vector<1x8x32xbf16>
    %1424 = vector.shape_cast %1423 : vector<1x8x32xbf16> to vector<8x32xbf16>
    %cst_406 = arith.constant dense<0.000000e+00> : vector<8x96xf32>
    %1425 = tpu.matmul %1424, %4, %cst_406 {dimension_numbers = #tpu.dot_dimension_numbers<[1], [0], [0], [1], [0, 0, 1, 1], [], []>} : vector<8x32xbf16>, vector<32x96xbf16>, vector<8x96xf32> -> vector<8x96xf32>
    %1426 = vector.broadcast %8 : vector<1x96xf32> to vector<8x96xf32>
    %1427 = arith.addf %1425, %1426 : vector<8x96xf32>
    %1428 = arith.truncf %1380 : vector<8x32xf32> to vector<8x32xbf16>
    %cst_407 = arith.constant dense<0.000000e+00> : vector<8x96xf32>
    %1429 = tpu.matmul %1428, %6, %cst_407 {dimension_numbers = #tpu.dot_dimension_numbers<[1], [0], [0], [1], [0, 0, 1, 1], [], []>} : vector<8x32xbf16>, vector<32x96xbf16>, vector<8x96xf32> -> vector<8x96xf32>
    %1430 = vector.extract_strided_slice %1427 {offsets = [0, 0], sizes = [8, 32], strides = [1, 1]} : vector<8x96xf32> to vector<8x32xf32>
    %1431 = vector.extract_strided_slice %1429 {offsets = [0, 0], sizes = [8, 32], strides = [1, 1]} : vector<8x96xf32> to vector<8x32xf32>
    %1432 = arith.addf %1430, %1431 : vector<8x32xf32>
    %1433 = arith.negf %1432 : vector<8x32xf32>
    %1434 = math.exp %1433 : vector<8x32xf32>
    %cst_408 = arith.constant 1.000000e+00 : f32
    %1435 = vector.broadcast %cst_408 : f32 to vector<8x32xf32>
    %1436 = arith.addf %1435, %1434 : vector<8x32xf32>
    %1437 = arith.divf %1435, %1436 : vector<8x32xf32>
    %1438 = vector.extract_strided_slice %1427 {offsets = [0, 32], sizes = [8, 32], strides = [1, 1]} : vector<8x96xf32> to vector<8x32xf32>
    %1439 = vector.extract_strided_slice %1429 {offsets = [0, 32], sizes = [8, 32], strides = [1, 1]} : vector<8x96xf32> to vector<8x32xf32>
    %1440 = arith.addf %1438, %1439 : vector<8x32xf32>
    %1441 = arith.negf %1440 : vector<8x32xf32>
    %1442 = math.exp %1441 : vector<8x32xf32>
    %cst_409 = arith.constant 1.000000e+00 : f32
    %1443 = vector.broadcast %cst_409 : f32 to vector<8x32xf32>
    %1444 = arith.addf %1443, %1442 : vector<8x32xf32>
    %1445 = arith.divf %1443, %1444 : vector<8x32xf32>
    %1446 = vector.extract_strided_slice %1427 {offsets = [0, 64], sizes = [8, 32], strides = [1, 1]} : vector<8x96xf32> to vector<8x32xf32>
    %1447 = vector.extract_strided_slice %1429 {offsets = [0, 64], sizes = [8, 32], strides = [1, 1]} : vector<8x96xf32> to vector<8x32xf32>
    %1448 = arith.addf %1447, %14 : vector<8x32xf32>
    %1449 = arith.mulf %1437, %1448 : vector<8x32xf32>
    %1450 = arith.addf %1446, %1449 : vector<8x32xf32>
    %1451 = math.tanh %1450 : vector<8x32xf32>
    %cst_410 = arith.constant 1.000000e+00 : f32
    %1452 = vector.broadcast %cst_410 : f32 to vector<8x32xf32>
    %1453 = arith.subf %1452, %1445 : vector<8x32xf32>
    %1454 = arith.mulf %1453, %1451 : vector<8x32xf32>
    %1455 = arith.mulf %1445, %1380 : vector<8x32xf32>
    %1456 = arith.addf %1454, %1455 : vector<8x32xf32>
    %1457 = arith.truncf %1456 : vector<8x32xf32> to vector<8x32xbf16>
    %c5_411 = arith.constant 5 : index
    %c0_412 = arith.constant 0 : index
    %c0_413 = arith.constant 0 : index
    %1458 = vector.load %arg13[%c5_411, %c0_412, %c0_413] : memref<24x8x32xbf16, #tpu.memory_space<vmem>>, vector<1x8x32xbf16>
    %1459 = vector.shape_cast %1458 : vector<1x8x32xbf16> to vector<8x32xbf16>
    %1460 = vector.shape_cast %1457 : vector<8x32xbf16> to vector<1x8x32xbf16>
    tpu.vector_store %arg13[%c5_411, %c0_412, %c0_413], %1460 {strides = array<i32>} : memref<24x8x32xbf16, #tpu.memory_space<vmem>>, vector<1x8x32xbf16>,
    %c19_414 = arith.constant 19 : index
    %c0_415 = arith.constant 0 : index
    %c0_416 = arith.constant 0 : index
    %1461 = vector.load %arg2[%c19_414, %c0_415, %c0_416] : memref<24x8x32xbf16, #tpu.memory_space<vmem>>, vector<1x8x32xbf16>
    %1462 = vector.shape_cast %1461 : vector<1x8x32xbf16> to vector<8x32xbf16>
    %cst_417 = arith.constant dense<0.000000e+00> : vector<8x96xf32>
    %1463 = tpu.matmul %1462, %3, %cst_417 {dimension_numbers = #tpu.dot_dimension_numbers<[1], [0], [0], [1], [0, 0, 1, 1], [], []>} : vector<8x32xbf16>, vector<32x96xbf16>, vector<8x96xf32> -> vector<8x96xf32>
    %1464 = vector.broadcast %7 : vector<1x96xf32> to vector<8x96xf32>
    %1465 = arith.addf %1463, %1464 : vector<8x96xf32>
    %1466 = arith.truncf %1418 : vector<8x32xf32> to vector<8x32xbf16>
    %cst_418 = arith.constant dense<0.000000e+00> : vector<8x96xf32>
    %1467 = tpu.matmul %1466, %5, %cst_418 {dimension_numbers = #tpu.dot_dimension_numbers<[1], [0], [0], [1], [0, 0, 1, 1], [], []>} : vector<8x32xbf16>, vector<32x96xbf16>, vector<8x96xf32> -> vector<8x96xf32>
    %1468 = vector.extract_strided_slice %1465 {offsets = [0, 0], sizes = [8, 32], strides = [1, 1]} : vector<8x96xf32> to vector<8x32xf32>
    %1469 = vector.extract_strided_slice %1467 {offsets = [0, 0], sizes = [8, 32], strides = [1, 1]} : vector<8x96xf32> to vector<8x32xf32>
    %1470 = arith.addf %1468, %1469 : vector<8x32xf32>
    %1471 = arith.negf %1470 : vector<8x32xf32>
    %1472 = math.exp %1471 : vector<8x32xf32>
    %cst_419 = arith.constant 1.000000e+00 : f32
    %1473 = vector.broadcast %cst_419 : f32 to vector<8x32xf32>
    %1474 = arith.addf %1473, %1472 : vector<8x32xf32>
    %1475 = arith.divf %1473, %1474 : vector<8x32xf32>
    %1476 = vector.extract_strided_slice %1465 {offsets = [0, 32], sizes = [8, 32], strides = [1, 1]} : vector<8x96xf32> to vector<8x32xf32>
    %1477 = vector.extract_strided_slice %1467 {offsets = [0, 32], sizes = [8, 32], strides = [1, 1]} : vector<8x96xf32> to vector<8x32xf32>
    %1478 = arith.addf %1476, %1477 : vector<8x32xf32>
    %1479 = arith.negf %1478 : vector<8x32xf32>
    %1480 = math.exp %1479 : vector<8x32xf32>
    %cst_420 = arith.constant 1.000000e+00 : f32
    %1481 = vector.broadcast %cst_420 : f32 to vector<8x32xf32>
    %1482 = arith.addf %1481, %1480 : vector<8x32xf32>
    %1483 = arith.divf %1481, %1482 : vector<8x32xf32>
    %1484 = vector.extract_strided_slice %1465 {offsets = [0, 64], sizes = [8, 32], strides = [1, 1]} : vector<8x96xf32> to vector<8x32xf32>
    %1485 = vector.extract_strided_slice %1467 {offsets = [0, 64], sizes = [8, 32], strides = [1, 1]} : vector<8x96xf32> to vector<8x32xf32>
    %1486 = arith.addf %1485, %11 : vector<8x32xf32>
    %1487 = arith.mulf %1475, %1486 : vector<8x32xf32>
    %1488 = arith.addf %1484, %1487 : vector<8x32xf32>
    %1489 = math.tanh %1488 : vector<8x32xf32>
    %cst_421 = arith.constant 1.000000e+00 : f32
    %1490 = vector.broadcast %cst_421 : f32 to vector<8x32xf32>
    %1491 = arith.subf %1490, %1483 : vector<8x32xf32>
    %1492 = arith.mulf %1491, %1489 : vector<8x32xf32>
    %1493 = arith.mulf %1483, %1418 : vector<8x32xf32>
    %1494 = arith.addf %1492, %1493 : vector<8x32xf32>
    %1495 = arith.truncf %1494 : vector<8x32xf32> to vector<8x32xbf16>
    %c19_422 = arith.constant 19 : index
    %c0_423 = arith.constant 0 : index
    %c0_424 = arith.constant 0 : index
    %1496 = vector.load %arg12[%c19_422, %c0_423, %c0_424] : memref<24x8x32xbf16, #tpu.memory_space<vmem>>, vector<1x8x32xbf16>
    %1497 = vector.shape_cast %1496 : vector<1x8x32xbf16> to vector<8x32xbf16>
    %1498 = vector.shape_cast %1495 : vector<8x32xbf16> to vector<1x8x32xbf16>
    tpu.vector_store %arg12[%c19_422, %c0_423, %c0_424], %1498 {strides = array<i32>} : memref<24x8x32xbf16, #tpu.memory_space<vmem>>, vector<1x8x32xbf16>,
    %c4_425 = arith.constant 4 : index
    %c0_426 = arith.constant 0 : index
    %c0_427 = arith.constant 0 : index
    %1499 = vector.load %arg3[%c4_425, %c0_426, %c0_427] : memref<24x8x32xbf16, #tpu.memory_space<vmem>>, vector<1x8x32xbf16>
    %1500 = vector.shape_cast %1499 : vector<1x8x32xbf16> to vector<8x32xbf16>
    %cst_428 = arith.constant dense<0.000000e+00> : vector<8x96xf32>
    %1501 = tpu.matmul %1500, %4, %cst_428 {dimension_numbers = #tpu.dot_dimension_numbers<[1], [0], [0], [1], [0, 0, 1, 1], [], []>} : vector<8x32xbf16>, vector<32x96xbf16>, vector<8x96xf32> -> vector<8x96xf32>
    %1502 = vector.broadcast %8 : vector<1x96xf32> to vector<8x96xf32>
    %1503 = arith.addf %1501, %1502 : vector<8x96xf32>
    %1504 = arith.truncf %1456 : vector<8x32xf32> to vector<8x32xbf16>
    %cst_429 = arith.constant dense<0.000000e+00> : vector<8x96xf32>
    %1505 = tpu.matmul %1504, %6, %cst_429 {dimension_numbers = #tpu.dot_dimension_numbers<[1], [0], [0], [1], [0, 0, 1, 1], [], []>} : vector<8x32xbf16>, vector<32x96xbf16>, vector<8x96xf32> -> vector<8x96xf32>
    %1506 = vector.extract_strided_slice %1503 {offsets = [0, 0], sizes = [8, 32], strides = [1, 1]} : vector<8x96xf32> to vector<8x32xf32>
    %1507 = vector.extract_strided_slice %1505 {offsets = [0, 0], sizes = [8, 32], strides = [1, 1]} : vector<8x96xf32> to vector<8x32xf32>
    %1508 = arith.addf %1506, %1507 : vector<8x32xf32>
    %1509 = arith.negf %1508 : vector<8x32xf32>
    %1510 = math.exp %1509 : vector<8x32xf32>
    %cst_430 = arith.constant 1.000000e+00 : f32
    %1511 = vector.broadcast %cst_430 : f32 to vector<8x32xf32>
    %1512 = arith.addf %1511, %1510 : vector<8x32xf32>
    %1513 = arith.divf %1511, %1512 : vector<8x32xf32>
    %1514 = vector.extract_strided_slice %1503 {offsets = [0, 32], sizes = [8, 32], strides = [1, 1]} : vector<8x96xf32> to vector<8x32xf32>
    %1515 = vector.extract_strided_slice %1505 {offsets = [0, 32], sizes = [8, 32], strides = [1, 1]} : vector<8x96xf32> to vector<8x32xf32>
    %1516 = arith.addf %1514, %1515 : vector<8x32xf32>
    %1517 = arith.negf %1516 : vector<8x32xf32>
    %1518 = math.exp %1517 : vector<8x32xf32>
    %cst_431 = arith.constant 1.000000e+00 : f32
    %1519 = vector.broadcast %cst_431 : f32 to vector<8x32xf32>
    %1520 = arith.addf %1519, %1518 : vector<8x32xf32>
    %1521 = arith.divf %1519, %1520 : vector<8x32xf32>
    %1522 = vector.extract_strided_slice %1503 {offsets = [0, 64], sizes = [8, 32], strides = [1, 1]} : vector<8x96xf32> to vector<8x32xf32>
    %1523 = vector.extract_strided_slice %1505 {offsets = [0, 64], sizes = [8, 32], strides = [1, 1]} : vector<8x96xf32> to vector<8x32xf32>
    %1524 = arith.addf %1523, %14 : vector<8x32xf32>
    %1525 = arith.mulf %1513, %1524 : vector<8x32xf32>
    %1526 = arith.addf %1522, %1525 : vector<8x32xf32>
    %1527 = math.tanh %1526 : vector<8x32xf32>
    %cst_432 = arith.constant 1.000000e+00 : f32
    %1528 = vector.broadcast %cst_432 : f32 to vector<8x32xf32>
    %1529 = arith.subf %1528, %1521 : vector<8x32xf32>
    %1530 = arith.mulf %1529, %1527 : vector<8x32xf32>
    %1531 = arith.mulf %1521, %1456 : vector<8x32xf32>
    %1532 = arith.addf %1530, %1531 : vector<8x32xf32>
    %1533 = arith.truncf %1532 : vector<8x32xf32> to vector<8x32xbf16>
    %c4_433 = arith.constant 4 : index
    %c0_434 = arith.constant 0 : index
    %c0_435 = arith.constant 0 : index
    %1534 = vector.load %arg13[%c4_433, %c0_434, %c0_435] : memref<24x8x32xbf16, #tpu.memory_space<vmem>>, vector<1x8x32xbf16>
    %1535 = vector.shape_cast %1534 : vector<1x8x32xbf16> to vector<8x32xbf16>
    %1536 = vector.shape_cast %1533 : vector<8x32xbf16> to vector<1x8x32xbf16>
    tpu.vector_store %arg13[%c4_433, %c0_434, %c0_435], %1536 {strides = array<i32>} : memref<24x8x32xbf16, #tpu.memory_space<vmem>>, vector<1x8x32xbf16>,
    %c20_436 = arith.constant 20 : index
    %c0_437 = arith.constant 0 : index
    %c0_438 = arith.constant 0 : index
    %1537 = vector.load %arg2[%c20_436, %c0_437, %c0_438] : memref<24x8x32xbf16, #tpu.memory_space<vmem>>, vector<1x8x32xbf16>
    %1538 = vector.shape_cast %1537 : vector<1x8x32xbf16> to vector<8x32xbf16>
    %cst_439 = arith.constant dense<0.000000e+00> : vector<8x96xf32>
    %1539 = tpu.matmul %1538, %3, %cst_439 {dimension_numbers = #tpu.dot_dimension_numbers<[1], [0], [0], [1], [0, 0, 1, 1], [], []>} : vector<8x32xbf16>, vector<32x96xbf16>, vector<8x96xf32> -> vector<8x96xf32>
    %1540 = vector.broadcast %7 : vector<1x96xf32> to vector<8x96xf32>
    %1541 = arith.addf %1539, %1540 : vector<8x96xf32>
    %1542 = arith.truncf %1494 : vector<8x32xf32> to vector<8x32xbf16>
    %cst_440 = arith.constant dense<0.000000e+00> : vector<8x96xf32>
    %1543 = tpu.matmul %1542, %5, %cst_440 {dimension_numbers = #tpu.dot_dimension_numbers<[1], [0], [0], [1], [0, 0, 1, 1], [], []>} : vector<8x32xbf16>, vector<32x96xbf16>, vector<8x96xf32> -> vector<8x96xf32>
    %1544 = vector.extract_strided_slice %1541 {offsets = [0, 0], sizes = [8, 32], strides = [1, 1]} : vector<8x96xf32> to vector<8x32xf32>
    %1545 = vector.extract_strided_slice %1543 {offsets = [0, 0], sizes = [8, 32], strides = [1, 1]} : vector<8x96xf32> to vector<8x32xf32>
    %1546 = arith.addf %1544, %1545 : vector<8x32xf32>
    %1547 = arith.negf %1546 : vector<8x32xf32>
    %1548 = math.exp %1547 : vector<8x32xf32>
    %cst_441 = arith.constant 1.000000e+00 : f32
    %1549 = vector.broadcast %cst_441 : f32 to vector<8x32xf32>
    %1550 = arith.addf %1549, %1548 : vector<8x32xf32>
    %1551 = arith.divf %1549, %1550 : vector<8x32xf32>
    %1552 = vector.extract_strided_slice %1541 {offsets = [0, 32], sizes = [8, 32], strides = [1, 1]} : vector<8x96xf32> to vector<8x32xf32>
    %1553 = vector.extract_strided_slice %1543 {offsets = [0, 32], sizes = [8, 32], strides = [1, 1]} : vector<8x96xf32> to vector<8x32xf32>
    %1554 = arith.addf %1552, %1553 : vector<8x32xf32>
    %1555 = arith.negf %1554 : vector<8x32xf32>
    %1556 = math.exp %1555 : vector<8x32xf32>
    %cst_442 = arith.constant 1.000000e+00 : f32
    %1557 = vector.broadcast %cst_442 : f32 to vector<8x32xf32>
    %1558 = arith.addf %1557, %1556 : vector<8x32xf32>
    %1559 = arith.divf %1557, %1558 : vector<8x32xf32>
    %1560 = vector.extract_strided_slice %1541 {offsets = [0, 64], sizes = [8, 32], strides = [1, 1]} : vector<8x96xf32> to vector<8x32xf32>
    %1561 = vector.extract_strided_slice %1543 {offsets = [0, 64], sizes = [8, 32], strides = [1, 1]} : vector<8x96xf32> to vector<8x32xf32>
    %1562 = arith.addf %1561, %11 : vector<8x32xf32>
    %1563 = arith.mulf %1551, %1562 : vector<8x32xf32>
    %1564 = arith.addf %1560, %1563 : vector<8x32xf32>
    %1565 = math.tanh %1564 : vector<8x32xf32>
    %cst_443 = arith.constant 1.000000e+00 : f32
    %1566 = vector.broadcast %cst_443 : f32 to vector<8x32xf32>
    %1567 = arith.subf %1566, %1559 : vector<8x32xf32>
    %1568 = arith.mulf %1567, %1565 : vector<8x32xf32>
    %1569 = arith.mulf %1559, %1494 : vector<8x32xf32>
    %1570 = arith.addf %1568, %1569 : vector<8x32xf32>
    %1571 = arith.truncf %1570 : vector<8x32xf32> to vector<8x32xbf16>
    %c20_444 = arith.constant 20 : index
    %c0_445 = arith.constant 0 : index
    %c0_446 = arith.constant 0 : index
    %1572 = vector.load %arg12[%c20_444, %c0_445, %c0_446] : memref<24x8x32xbf16, #tpu.memory_space<vmem>>, vector<1x8x32xbf16>
    %1573 = vector.shape_cast %1572 : vector<1x8x32xbf16> to vector<8x32xbf16>
    %1574 = vector.shape_cast %1571 : vector<8x32xbf16> to vector<1x8x32xbf16>
    tpu.vector_store %arg12[%c20_444, %c0_445, %c0_446], %1574 {strides = array<i32>} : memref<24x8x32xbf16, #tpu.memory_space<vmem>>, vector<1x8x32xbf16>,
    %c3_447 = arith.constant 3 : index
    %c0_448 = arith.constant 0 : index
    %c0_449 = arith.constant 0 : index
    %1575 = vector.load %arg3[%c3_447, %c0_448, %c0_449] : memref<24x8x32xbf16, #tpu.memory_space<vmem>>, vector<1x8x32xbf16>
    %1576 = vector.shape_cast %1575 : vector<1x8x32xbf16> to vector<8x32xbf16>
    %cst_450 = arith.constant dense<0.000000e+00> : vector<8x96xf32>
    %1577 = tpu.matmul %1576, %4, %cst_450 {dimension_numbers = #tpu.dot_dimension_numbers<[1], [0], [0], [1], [0, 0, 1, 1], [], []>} : vector<8x32xbf16>, vector<32x96xbf16>, vector<8x96xf32> -> vector<8x96xf32>
    %1578 = vector.broadcast %8 : vector<1x96xf32> to vector<8x96xf32>
    %1579 = arith.addf %1577, %1578 : vector<8x96xf32>
    %1580 = arith.truncf %1532 : vector<8x32xf32> to vector<8x32xbf16>
    %cst_451 = arith.constant dense<0.000000e+00> : vector<8x96xf32>
    %1581 = tpu.matmul %1580, %6, %cst_451 {dimension_numbers = #tpu.dot_dimension_numbers<[1], [0], [0], [1], [0, 0, 1, 1], [], []>} : vector<8x32xbf16>, vector<32x96xbf16>, vector<8x96xf32> -> vector<8x96xf32>
    %1582 = vector.extract_strided_slice %1579 {offsets = [0, 0], sizes = [8, 32], strides = [1, 1]} : vector<8x96xf32> to vector<8x32xf32>
    %1583 = vector.extract_strided_slice %1581 {offsets = [0, 0], sizes = [8, 32], strides = [1, 1]} : vector<8x96xf32> to vector<8x32xf32>
    %1584 = arith.addf %1582, %1583 : vector<8x32xf32>
    %1585 = arith.negf %1584 : vector<8x32xf32>
    %1586 = math.exp %1585 : vector<8x32xf32>
    %cst_452 = arith.constant 1.000000e+00 : f32
    %1587 = vector.broadcast %cst_452 : f32 to vector<8x32xf32>
    %1588 = arith.addf %1587, %1586 : vector<8x32xf32>
    %1589 = arith.divf %1587, %1588 : vector<8x32xf32>
    %1590 = vector.extract_strided_slice %1579 {offsets = [0, 32], sizes = [8, 32], strides = [1, 1]} : vector<8x96xf32> to vector<8x32xf32>
    %1591 = vector.extract_strided_slice %1581 {offsets = [0, 32], sizes = [8, 32], strides = [1, 1]} : vector<8x96xf32> to vector<8x32xf32>
    %1592 = arith.addf %1590, %1591 : vector<8x32xf32>
    %1593 = arith.negf %1592 : vector<8x32xf32>
    %1594 = math.exp %1593 : vector<8x32xf32>
    %cst_453 = arith.constant 1.000000e+00 : f32
    %1595 = vector.broadcast %cst_453 : f32 to vector<8x32xf32>
    %1596 = arith.addf %1595, %1594 : vector<8x32xf32>
    %1597 = arith.divf %1595, %1596 : vector<8x32xf32>
    %1598 = vector.extract_strided_slice %1579 {offsets = [0, 64], sizes = [8, 32], strides = [1, 1]} : vector<8x96xf32> to vector<8x32xf32>
    %1599 = vector.extract_strided_slice %1581 {offsets = [0, 64], sizes = [8, 32], strides = [1, 1]} : vector<8x96xf32> to vector<8x32xf32>
    %1600 = arith.addf %1599, %14 : vector<8x32xf32>
    %1601 = arith.mulf %1589, %1600 : vector<8x32xf32>
    %1602 = arith.addf %1598, %1601 : vector<8x32xf32>
    %1603 = math.tanh %1602 : vector<8x32xf32>
    %cst_454 = arith.constant 1.000000e+00 : f32
    %1604 = vector.broadcast %cst_454 : f32 to vector<8x32xf32>
    %1605 = arith.subf %1604, %1597 : vector<8x32xf32>
    %1606 = arith.mulf %1605, %1603 : vector<8x32xf32>
    %1607 = arith.mulf %1597, %1532 : vector<8x32xf32>
    %1608 = arith.addf %1606, %1607 : vector<8x32xf32>
    %1609 = arith.truncf %1608 : vector<8x32xf32> to vector<8x32xbf16>
    %c3_455 = arith.constant 3 : index
    %c0_456 = arith.constant 0 : index
    %c0_457 = arith.constant 0 : index
    %1610 = vector.load %arg13[%c3_455, %c0_456, %c0_457] : memref<24x8x32xbf16, #tpu.memory_space<vmem>>, vector<1x8x32xbf16>
    %1611 = vector.shape_cast %1610 : vector<1x8x32xbf16> to vector<8x32xbf16>
    %1612 = vector.shape_cast %1609 : vector<8x32xbf16> to vector<1x8x32xbf16>
    tpu.vector_store %arg13[%c3_455, %c0_456, %c0_457], %1612 {strides = array<i32>} : memref<24x8x32xbf16, #tpu.memory_space<vmem>>, vector<1x8x32xbf16>,
    %c21_458 = arith.constant 21 : index
    %c0_459 = arith.constant 0 : index
    %c0_460 = arith.constant 0 : index
    %1613 = vector.load %arg2[%c21_458, %c0_459, %c0_460] : memref<24x8x32xbf16, #tpu.memory_space<vmem>>, vector<1x8x32xbf16>
    %1614 = vector.shape_cast %1613 : vector<1x8x32xbf16> to vector<8x32xbf16>
    %cst_461 = arith.constant dense<0.000000e+00> : vector<8x96xf32>
    %1615 = tpu.matmul %1614, %3, %cst_461 {dimension_numbers = #tpu.dot_dimension_numbers<[1], [0], [0], [1], [0, 0, 1, 1], [], []>} : vector<8x32xbf16>, vector<32x96xbf16>, vector<8x96xf32> -> vector<8x96xf32>
    %1616 = vector.broadcast %7 : vector<1x96xf32> to vector<8x96xf32>
    %1617 = arith.addf %1615, %1616 : vector<8x96xf32>
    %1618 = arith.truncf %1570 : vector<8x32xf32> to vector<8x32xbf16>
    %cst_462 = arith.constant dense<0.000000e+00> : vector<8x96xf32>
    %1619 = tpu.matmul %1618, %5, %cst_462 {dimension_numbers = #tpu.dot_dimension_numbers<[1], [0], [0], [1], [0, 0, 1, 1], [], []>} : vector<8x32xbf16>, vector<32x96xbf16>, vector<8x96xf32> -> vector<8x96xf32>
    %1620 = vector.extract_strided_slice %1617 {offsets = [0, 0], sizes = [8, 32], strides = [1, 1]} : vector<8x96xf32> to vector<8x32xf32>
    %1621 = vector.extract_strided_slice %1619 {offsets = [0, 0], sizes = [8, 32], strides = [1, 1]} : vector<8x96xf32> to vector<8x32xf32>
    %1622 = arith.addf %1620, %1621 : vector<8x32xf32>
    %1623 = arith.negf %1622 : vector<8x32xf32>
    %1624 = math.exp %1623 : vector<8x32xf32>
    %cst_463 = arith.constant 1.000000e+00 : f32
    %1625 = vector.broadcast %cst_463 : f32 to vector<8x32xf32>
    %1626 = arith.addf %1625, %1624 : vector<8x32xf32>
    %1627 = arith.divf %1625, %1626 : vector<8x32xf32>
    %1628 = vector.extract_strided_slice %1617 {offsets = [0, 32], sizes = [8, 32], strides = [1, 1]} : vector<8x96xf32> to vector<8x32xf32>
    %1629 = vector.extract_strided_slice %1619 {offsets = [0, 32], sizes = [8, 32], strides = [1, 1]} : vector<8x96xf32> to vector<8x32xf32>
    %1630 = arith.addf %1628, %1629 : vector<8x32xf32>
    %1631 = arith.negf %1630 : vector<8x32xf32>
    %1632 = math.exp %1631 : vector<8x32xf32>
    %cst_464 = arith.constant 1.000000e+00 : f32
    %1633 = vector.broadcast %cst_464 : f32 to vector<8x32xf32>
    %1634 = arith.addf %1633, %1632 : vector<8x32xf32>
    %1635 = arith.divf %1633, %1634 : vector<8x32xf32>
    %1636 = vector.extract_strided_slice %1617 {offsets = [0, 64], sizes = [8, 32], strides = [1, 1]} : vector<8x96xf32> to vector<8x32xf32>
    %1637 = vector.extract_strided_slice %1619 {offsets = [0, 64], sizes = [8, 32], strides = [1, 1]} : vector<8x96xf32> to vector<8x32xf32>
    %1638 = arith.addf %1637, %11 : vector<8x32xf32>
    %1639 = arith.mulf %1627, %1638 : vector<8x32xf32>
    %1640 = arith.addf %1636, %1639 : vector<8x32xf32>
    %1641 = math.tanh %1640 : vector<8x32xf32>
    %cst_465 = arith.constant 1.000000e+00 : f32
    %1642 = vector.broadcast %cst_465 : f32 to vector<8x32xf32>
    %1643 = arith.subf %1642, %1635 : vector<8x32xf32>
    %1644 = arith.mulf %1643, %1641 : vector<8x32xf32>
    %1645 = arith.mulf %1635, %1570 : vector<8x32xf32>
    %1646 = arith.addf %1644, %1645 : vector<8x32xf32>
    %1647 = arith.truncf %1646 : vector<8x32xf32> to vector<8x32xbf16>
    %c21_466 = arith.constant 21 : index
    %c0_467 = arith.constant 0 : index
    %c0_468 = arith.constant 0 : index
    %1648 = vector.load %arg12[%c21_466, %c0_467, %c0_468] : memref<24x8x32xbf16, #tpu.memory_space<vmem>>, vector<1x8x32xbf16>
    %1649 = vector.shape_cast %1648 : vector<1x8x32xbf16> to vector<8x32xbf16>
    %1650 = vector.shape_cast %1647 : vector<8x32xbf16> to vector<1x8x32xbf16>
    tpu.vector_store %arg12[%c21_466, %c0_467, %c0_468], %1650 {strides = array<i32>} : memref<24x8x32xbf16, #tpu.memory_space<vmem>>, vector<1x8x32xbf16>,
    %c2_469 = arith.constant 2 : index
    %c0_470 = arith.constant 0 : index
    %c0_471 = arith.constant 0 : index
    %1651 = vector.load %arg3[%c2_469, %c0_470, %c0_471] : memref<24x8x32xbf16, #tpu.memory_space<vmem>>, vector<1x8x32xbf16>
    %1652 = vector.shape_cast %1651 : vector<1x8x32xbf16> to vector<8x32xbf16>
    %cst_472 = arith.constant dense<0.000000e+00> : vector<8x96xf32>
    %1653 = tpu.matmul %1652, %4, %cst_472 {dimension_numbers = #tpu.dot_dimension_numbers<[1], [0], [0], [1], [0, 0, 1, 1], [], []>} : vector<8x32xbf16>, vector<32x96xbf16>, vector<8x96xf32> -> vector<8x96xf32>
    %1654 = vector.broadcast %8 : vector<1x96xf32> to vector<8x96xf32>
    %1655 = arith.addf %1653, %1654 : vector<8x96xf32>
    %1656 = arith.truncf %1608 : vector<8x32xf32> to vector<8x32xbf16>
    %cst_473 = arith.constant dense<0.000000e+00> : vector<8x96xf32>
    %1657 = tpu.matmul %1656, %6, %cst_473 {dimension_numbers = #tpu.dot_dimension_numbers<[1], [0], [0], [1], [0, 0, 1, 1], [], []>} : vector<8x32xbf16>, vector<32x96xbf16>, vector<8x96xf32> -> vector<8x96xf32>
    %1658 = vector.extract_strided_slice %1655 {offsets = [0, 0], sizes = [8, 32], strides = [1, 1]} : vector<8x96xf32> to vector<8x32xf32>
    %1659 = vector.extract_strided_slice %1657 {offsets = [0, 0], sizes = [8, 32], strides = [1, 1]} : vector<8x96xf32> to vector<8x32xf32>
    %1660 = arith.addf %1658, %1659 : vector<8x32xf32>
    %1661 = arith.negf %1660 : vector<8x32xf32>
    %1662 = math.exp %1661 : vector<8x32xf32>
    %cst_474 = arith.constant 1.000000e+00 : f32
    %1663 = vector.broadcast %cst_474 : f32 to vector<8x32xf32>
    %1664 = arith.addf %1663, %1662 : vector<8x32xf32>
    %1665 = arith.divf %1663, %1664 : vector<8x32xf32>
    %1666 = vector.extract_strided_slice %1655 {offsets = [0, 32], sizes = [8, 32], strides = [1, 1]} : vector<8x96xf32> to vector<8x32xf32>
    %1667 = vector.extract_strided_slice %1657 {offsets = [0, 32], sizes = [8, 32], strides = [1, 1]} : vector<8x96xf32> to vector<8x32xf32>
    %1668 = arith.addf %1666, %1667 : vector<8x32xf32>
    %1669 = arith.negf %1668 : vector<8x32xf32>
    %1670 = math.exp %1669 : vector<8x32xf32>
    %cst_475 = arith.constant 1.000000e+00 : f32
    %1671 = vector.broadcast %cst_475 : f32 to vector<8x32xf32>
    %1672 = arith.addf %1671, %1670 : vector<8x32xf32>
    %1673 = arith.divf %1671, %1672 : vector<8x32xf32>
    %1674 = vector.extract_strided_slice %1655 {offsets = [0, 64], sizes = [8, 32], strides = [1, 1]} : vector<8x96xf32> to vector<8x32xf32>
    %1675 = vector.extract_strided_slice %1657 {offsets = [0, 64], sizes = [8, 32], strides = [1, 1]} : vector<8x96xf32> to vector<8x32xf32>
    %1676 = arith.addf %1675, %14 : vector<8x32xf32>
    %1677 = arith.mulf %1665, %1676 : vector<8x32xf32>
    %1678 = arith.addf %1674, %1677 : vector<8x32xf32>
    %1679 = math.tanh %1678 : vector<8x32xf32>
    %cst_476 = arith.constant 1.000000e+00 : f32
    %1680 = vector.broadcast %cst_476 : f32 to vector<8x32xf32>
    %1681 = arith.subf %1680, %1673 : vector<8x32xf32>
    %1682 = arith.mulf %1681, %1679 : vector<8x32xf32>
    %1683 = arith.mulf %1673, %1608 : vector<8x32xf32>
    %1684 = arith.addf %1682, %1683 : vector<8x32xf32>
    %1685 = arith.truncf %1684 : vector<8x32xf32> to vector<8x32xbf16>
    %c2_477 = arith.constant 2 : index
    %c0_478 = arith.constant 0 : index
    %c0_479 = arith.constant 0 : index
    %1686 = vector.load %arg13[%c2_477, %c0_478, %c0_479] : memref<24x8x32xbf16, #tpu.memory_space<vmem>>, vector<1x8x32xbf16>
    %1687 = vector.shape_cast %1686 : vector<1x8x32xbf16> to vector<8x32xbf16>
    %1688 = vector.shape_cast %1685 : vector<8x32xbf16> to vector<1x8x32xbf16>
    tpu.vector_store %arg13[%c2_477, %c0_478, %c0_479], %1688 {strides = array<i32>} : memref<24x8x32xbf16, #tpu.memory_space<vmem>>, vector<1x8x32xbf16>,
    %c22_480 = arith.constant 22 : index
    %c0_481 = arith.constant 0 : index
    %c0_482 = arith.constant 0 : index
    %1689 = vector.load %arg2[%c22_480, %c0_481, %c0_482] : memref<24x8x32xbf16, #tpu.memory_space<vmem>>, vector<1x8x32xbf16>
    %1690 = vector.shape_cast %1689 : vector<1x8x32xbf16> to vector<8x32xbf16>
    %cst_483 = arith.constant dense<0.000000e+00> : vector<8x96xf32>
    %1691 = tpu.matmul %1690, %3, %cst_483 {dimension_numbers = #tpu.dot_dimension_numbers<[1], [0], [0], [1], [0, 0, 1, 1], [], []>} : vector<8x32xbf16>, vector<32x96xbf16>, vector<8x96xf32> -> vector<8x96xf32>
    %1692 = vector.broadcast %7 : vector<1x96xf32> to vector<8x96xf32>
    %1693 = arith.addf %1691, %1692 : vector<8x96xf32>
    %1694 = arith.truncf %1646 : vector<8x32xf32> to vector<8x32xbf16>
    %cst_484 = arith.constant dense<0.000000e+00> : vector<8x96xf32>
    %1695 = tpu.matmul %1694, %5, %cst_484 {dimension_numbers = #tpu.dot_dimension_numbers<[1], [0], [0], [1], [0, 0, 1, 1], [], []>} : vector<8x32xbf16>, vector<32x96xbf16>, vector<8x96xf32> -> vector<8x96xf32>
    %1696 = vector.extract_strided_slice %1693 {offsets = [0, 0], sizes = [8, 32], strides = [1, 1]} : vector<8x96xf32> to vector<8x32xf32>
    %1697 = vector.extract_strided_slice %1695 {offsets = [0, 0], sizes = [8, 32], strides = [1, 1]} : vector<8x96xf32> to vector<8x32xf32>
    %1698 = arith.addf %1696, %1697 : vector<8x32xf32>
    %1699 = arith.negf %1698 : vector<8x32xf32>
    %1700 = math.exp %1699 : vector<8x32xf32>
    %cst_485 = arith.constant 1.000000e+00 : f32
    %1701 = vector.broadcast %cst_485 : f32 to vector<8x32xf32>
    %1702 = arith.addf %1701, %1700 : vector<8x32xf32>
    %1703 = arith.divf %1701, %1702 : vector<8x32xf32>
    %1704 = vector.extract_strided_slice %1693 {offsets = [0, 32], sizes = [8, 32], strides = [1, 1]} : vector<8x96xf32> to vector<8x32xf32>
    %1705 = vector.extract_strided_slice %1695 {offsets = [0, 32], sizes = [8, 32], strides = [1, 1]} : vector<8x96xf32> to vector<8x32xf32>
    %1706 = arith.addf %1704, %1705 : vector<8x32xf32>
    %1707 = arith.negf %1706 : vector<8x32xf32>
    %1708 = math.exp %1707 : vector<8x32xf32>
    %cst_486 = arith.constant 1.000000e+00 : f32
    %1709 = vector.broadcast %cst_486 : f32 to vector<8x32xf32>
    %1710 = arith.addf %1709, %1708 : vector<8x32xf32>
    %1711 = arith.divf %1709, %1710 : vector<8x32xf32>
    %1712 = vector.extract_strided_slice %1693 {offsets = [0, 64], sizes = [8, 32], strides = [1, 1]} : vector<8x96xf32> to vector<8x32xf32>
    %1713 = vector.extract_strided_slice %1695 {offsets = [0, 64], sizes = [8, 32], strides = [1, 1]} : vector<8x96xf32> to vector<8x32xf32>
    %1714 = arith.addf %1713, %11 : vector<8x32xf32>
    %1715 = arith.mulf %1703, %1714 : vector<8x32xf32>
    %1716 = arith.addf %1712, %1715 : vector<8x32xf32>
    %1717 = math.tanh %1716 : vector<8x32xf32>
    %cst_487 = arith.constant 1.000000e+00 : f32
    %1718 = vector.broadcast %cst_487 : f32 to vector<8x32xf32>
    %1719 = arith.subf %1718, %1711 : vector<8x32xf32>
    %1720 = arith.mulf %1719, %1717 : vector<8x32xf32>
    %1721 = arith.mulf %1711, %1646 : vector<8x32xf32>
    %1722 = arith.addf %1720, %1721 : vector<8x32xf32>
    %1723 = arith.truncf %1722 : vector<8x32xf32> to vector<8x32xbf16>
    %c22_488 = arith.constant 22 : index
    %c0_489 = arith.constant 0 : index
    %c0_490 = arith.constant 0 : index
    %1724 = vector.load %arg12[%c22_488, %c0_489, %c0_490] : memref<24x8x32xbf16, #tpu.memory_space<vmem>>, vector<1x8x32xbf16>
    %1725 = vector.shape_cast %1724 : vector<1x8x32xbf16> to vector<8x32xbf16>
    %1726 = vector.shape_cast %1723 : vector<8x32xbf16> to vector<1x8x32xbf16>
    tpu.vector_store %arg12[%c22_488, %c0_489, %c0_490], %1726 {strides = array<i32>} : memref<24x8x32xbf16, #tpu.memory_space<vmem>>, vector<1x8x32xbf16>,
    %c1_491 = arith.constant 1 : index
    %c0_492 = arith.constant 0 : index
    %c0_493 = arith.constant 0 : index
    %1727 = vector.load %arg3[%c1_491, %c0_492, %c0_493] : memref<24x8x32xbf16, #tpu.memory_space<vmem>>, vector<1x8x32xbf16>
    %1728 = vector.shape_cast %1727 : vector<1x8x32xbf16> to vector<8x32xbf16>
    %cst_494 = arith.constant dense<0.000000e+00> : vector<8x96xf32>
    %1729 = tpu.matmul %1728, %4, %cst_494 {dimension_numbers = #tpu.dot_dimension_numbers<[1], [0], [0], [1], [0, 0, 1, 1], [], []>} : vector<8x32xbf16>, vector<32x96xbf16>, vector<8x96xf32> -> vector<8x96xf32>
    %1730 = vector.broadcast %8 : vector<1x96xf32> to vector<8x96xf32>
    %1731 = arith.addf %1729, %1730 : vector<8x96xf32>
    %1732 = arith.truncf %1684 : vector<8x32xf32> to vector<8x32xbf16>
    %cst_495 = arith.constant dense<0.000000e+00> : vector<8x96xf32>
    %1733 = tpu.matmul %1732, %6, %cst_495 {dimension_numbers = #tpu.dot_dimension_numbers<[1], [0], [0], [1], [0, 0, 1, 1], [], []>} : vector<8x32xbf16>, vector<32x96xbf16>, vector<8x96xf32> -> vector<8x96xf32>
    %1734 = vector.extract_strided_slice %1731 {offsets = [0, 0], sizes = [8, 32], strides = [1, 1]} : vector<8x96xf32> to vector<8x32xf32>
    %1735 = vector.extract_strided_slice %1733 {offsets = [0, 0], sizes = [8, 32], strides = [1, 1]} : vector<8x96xf32> to vector<8x32xf32>
    %1736 = arith.addf %1734, %1735 : vector<8x32xf32>
    %1737 = arith.negf %1736 : vector<8x32xf32>
    %1738 = math.exp %1737 : vector<8x32xf32>
    %cst_496 = arith.constant 1.000000e+00 : f32
    %1739 = vector.broadcast %cst_496 : f32 to vector<8x32xf32>
    %1740 = arith.addf %1739, %1738 : vector<8x32xf32>
    %1741 = arith.divf %1739, %1740 : vector<8x32xf32>
    %1742 = vector.extract_strided_slice %1731 {offsets = [0, 32], sizes = [8, 32], strides = [1, 1]} : vector<8x96xf32> to vector<8x32xf32>
    %1743 = vector.extract_strided_slice %1733 {offsets = [0, 32], sizes = [8, 32], strides = [1, 1]} : vector<8x96xf32> to vector<8x32xf32>
    %1744 = arith.addf %1742, %1743 : vector<8x32xf32>
    %1745 = arith.negf %1744 : vector<8x32xf32>
    %1746 = math.exp %1745 : vector<8x32xf32>
    %cst_497 = arith.constant 1.000000e+00 : f32
    %1747 = vector.broadcast %cst_497 : f32 to vector<8x32xf32>
    %1748 = arith.addf %1747, %1746 : vector<8x32xf32>
    %1749 = arith.divf %1747, %1748 : vector<8x32xf32>
    %1750 = vector.extract_strided_slice %1731 {offsets = [0, 64], sizes = [8, 32], strides = [1, 1]} : vector<8x96xf32> to vector<8x32xf32>
    %1751 = vector.extract_strided_slice %1733 {offsets = [0, 64], sizes = [8, 32], strides = [1, 1]} : vector<8x96xf32> to vector<8x32xf32>
    %1752 = arith.addf %1751, %14 : vector<8x32xf32>
    %1753 = arith.mulf %1741, %1752 : vector<8x32xf32>
    %1754 = arith.addf %1750, %1753 : vector<8x32xf32>
    %1755 = math.tanh %1754 : vector<8x32xf32>
    %cst_498 = arith.constant 1.000000e+00 : f32
    %1756 = vector.broadcast %cst_498 : f32 to vector<8x32xf32>
    %1757 = arith.subf %1756, %1749 : vector<8x32xf32>
    %1758 = arith.mulf %1757, %1755 : vector<8x32xf32>
    %1759 = arith.mulf %1749, %1684 : vector<8x32xf32>
    %1760 = arith.addf %1758, %1759 : vector<8x32xf32>
    %1761 = arith.truncf %1760 : vector<8x32xf32> to vector<8x32xbf16>
    %c1_499 = arith.constant 1 : index
    %c0_500 = arith.constant 0 : index
    %c0_501 = arith.constant 0 : index
    %1762 = vector.load %arg13[%c1_499, %c0_500, %c0_501] : memref<24x8x32xbf16, #tpu.memory_space<vmem>>, vector<1x8x32xbf16>
    %1763 = vector.shape_cast %1762 : vector<1x8x32xbf16> to vector<8x32xbf16>
    %1764 = vector.shape_cast %1761 : vector<8x32xbf16> to vector<1x8x32xbf16>
    tpu.vector_store %arg13[%c1_499, %c0_500, %c0_501], %1764 {strides = array<i32>} : memref<24x8x32xbf16, #tpu.memory_space<vmem>>, vector<1x8x32xbf16>,
    %c23_502 = arith.constant 23 : index
    %c0_503 = arith.constant 0 : index
    %c0_504 = arith.constant 0 : index
    %1765 = vector.load %arg2[%c23_502, %c0_503, %c0_504] : memref<24x8x32xbf16, #tpu.memory_space<vmem>>, vector<1x8x32xbf16>
    %1766 = vector.shape_cast %1765 : vector<1x8x32xbf16> to vector<8x32xbf16>
    %cst_505 = arith.constant dense<0.000000e+00> : vector<8x96xf32>
    %1767 = tpu.matmul %1766, %3, %cst_505 {dimension_numbers = #tpu.dot_dimension_numbers<[1], [0], [0], [1], [0, 0, 1, 1], [], []>} : vector<8x32xbf16>, vector<32x96xbf16>, vector<8x96xf32> -> vector<8x96xf32>
    %1768 = vector.broadcast %7 : vector<1x96xf32> to vector<8x96xf32>
    %1769 = arith.addf %1767, %1768 : vector<8x96xf32>
    %1770 = arith.truncf %1722 : vector<8x32xf32> to vector<8x32xbf16>
    %cst_506 = arith.constant dense<0.000000e+00> : vector<8x96xf32>
    %1771 = tpu.matmul %1770, %5, %cst_506 {dimension_numbers = #tpu.dot_dimension_numbers<[1], [0], [0], [1], [0, 0, 1, 1], [], []>} : vector<8x32xbf16>, vector<32x96xbf16>, vector<8x96xf32> -> vector<8x96xf32>
    %1772 = vector.extract_strided_slice %1769 {offsets = [0, 0], sizes = [8, 32], strides = [1, 1]} : vector<8x96xf32> to vector<8x32xf32>
    %1773 = vector.extract_strided_slice %1771 {offsets = [0, 0], sizes = [8, 32], strides = [1, 1]} : vector<8x96xf32> to vector<8x32xf32>
    %1774 = arith.addf %1772, %1773 : vector<8x32xf32>
    %1775 = arith.negf %1774 : vector<8x32xf32>
    %1776 = math.exp %1775 : vector<8x32xf32>
    %cst_507 = arith.constant 1.000000e+00 : f32
    %1777 = vector.broadcast %cst_507 : f32 to vector<8x32xf32>
    %1778 = arith.addf %1777, %1776 : vector<8x32xf32>
    %1779 = arith.divf %1777, %1778 : vector<8x32xf32>
    %1780 = vector.extract_strided_slice %1769 {offsets = [0, 32], sizes = [8, 32], strides = [1, 1]} : vector<8x96xf32> to vector<8x32xf32>
    %1781 = vector.extract_strided_slice %1771 {offsets = [0, 32], sizes = [8, 32], strides = [1, 1]} : vector<8x96xf32> to vector<8x32xf32>
    %1782 = arith.addf %1780, %1781 : vector<8x32xf32>
    %1783 = arith.negf %1782 : vector<8x32xf32>
    %1784 = math.exp %1783 : vector<8x32xf32>
    %cst_508 = arith.constant 1.000000e+00 : f32
    %1785 = vector.broadcast %cst_508 : f32 to vector<8x32xf32>
    %1786 = arith.addf %1785, %1784 : vector<8x32xf32>
    %1787 = arith.divf %1785, %1786 : vector<8x32xf32>
    %1788 = vector.extract_strided_slice %1769 {offsets = [0, 64], sizes = [8, 32], strides = [1, 1]} : vector<8x96xf32> to vector<8x32xf32>
    %1789 = vector.extract_strided_slice %1771 {offsets = [0, 64], sizes = [8, 32], strides = [1, 1]} : vector<8x96xf32> to vector<8x32xf32>
    %1790 = arith.addf %1789, %11 : vector<8x32xf32>
    %1791 = arith.mulf %1779, %1790 : vector<8x32xf32>
    %1792 = arith.addf %1788, %1791 : vector<8x32xf32>
    %1793 = math.tanh %1792 : vector<8x32xf32>
    %cst_509 = arith.constant 1.000000e+00 : f32
    %1794 = vector.broadcast %cst_509 : f32 to vector<8x32xf32>
    %1795 = arith.subf %1794, %1787 : vector<8x32xf32>
    %1796 = arith.mulf %1795, %1793 : vector<8x32xf32>
    %1797 = arith.mulf %1787, %1722 : vector<8x32xf32>
    %1798 = arith.addf %1796, %1797 : vector<8x32xf32>
    %1799 = arith.truncf %1798 : vector<8x32xf32> to vector<8x32xbf16>
    %c23_510 = arith.constant 23 : index
    %c0_511 = arith.constant 0 : index
    %c0_512 = arith.constant 0 : index
    %1800 = vector.load %arg12[%c23_510, %c0_511, %c0_512] : memref<24x8x32xbf16, #tpu.memory_space<vmem>>, vector<1x8x32xbf16>
    %1801 = vector.shape_cast %1800 : vector<1x8x32xbf16> to vector<8x32xbf16>
    %1802 = vector.shape_cast %1799 : vector<8x32xbf16> to vector<1x8x32xbf16>
    tpu.vector_store %arg12[%c23_510, %c0_511, %c0_512], %1802 {strides = array<i32>} : memref<24x8x32xbf16, #tpu.memory_space<vmem>>, vector<1x8x32xbf16>,
    %c0_513 = arith.constant 0 : index
    %c0_514 = arith.constant 0 : index
    %c0_515 = arith.constant 0 : index
    %1803 = vector.load %arg3[%c0_513, %c0_514, %c0_515] : memref<24x8x32xbf16, #tpu.memory_space<vmem>>, vector<1x8x32xbf16>
    %1804 = vector.shape_cast %1803 : vector<1x8x32xbf16> to vector<8x32xbf16>
    %cst_516 = arith.constant dense<0.000000e+00> : vector<8x96xf32>
    %1805 = tpu.matmul %1804, %4, %cst_516 {dimension_numbers = #tpu.dot_dimension_numbers<[1], [0], [0], [1], [0, 0, 1, 1], [], []>} : vector<8x32xbf16>, vector<32x96xbf16>, vector<8x96xf32> -> vector<8x96xf32>
    %1806 = vector.broadcast %8 : vector<1x96xf32> to vector<8x96xf32>
    %1807 = arith.addf %1805, %1806 : vector<8x96xf32>
    %1808 = arith.truncf %1760 : vector<8x32xf32> to vector<8x32xbf16>
    %cst_517 = arith.constant dense<0.000000e+00> : vector<8x96xf32>
    %1809 = tpu.matmul %1808, %6, %cst_517 {dimension_numbers = #tpu.dot_dimension_numbers<[1], [0], [0], [1], [0, 0, 1, 1], [], []>} : vector<8x32xbf16>, vector<32x96xbf16>, vector<8x96xf32> -> vector<8x96xf32>
    %1810 = vector.extract_strided_slice %1807 {offsets = [0, 0], sizes = [8, 32], strides = [1, 1]} : vector<8x96xf32> to vector<8x32xf32>
    %1811 = vector.extract_strided_slice %1809 {offsets = [0, 0], sizes = [8, 32], strides = [1, 1]} : vector<8x96xf32> to vector<8x32xf32>
    %1812 = arith.addf %1810, %1811 : vector<8x32xf32>
    %1813 = arith.negf %1812 : vector<8x32xf32>
    %1814 = math.exp %1813 : vector<8x32xf32>
    %cst_518 = arith.constant 1.000000e+00 : f32
    %1815 = vector.broadcast %cst_518 : f32 to vector<8x32xf32>
    %1816 = arith.addf %1815, %1814 : vector<8x32xf32>
    %1817 = arith.divf %1815, %1816 : vector<8x32xf32>
    %1818 = vector.extract_strided_slice %1807 {offsets = [0, 32], sizes = [8, 32], strides = [1, 1]} : vector<8x96xf32> to vector<8x32xf32>
    %1819 = vector.extract_strided_slice %1809 {offsets = [0, 32], sizes = [8, 32], strides = [1, 1]} : vector<8x96xf32> to vector<8x32xf32>
    %1820 = arith.addf %1818, %1819 : vector<8x32xf32>
    %1821 = arith.negf %1820 : vector<8x32xf32>
    %1822 = math.exp %1821 : vector<8x32xf32>
    %cst_519 = arith.constant 1.000000e+00 : f32
    %1823 = vector.broadcast %cst_519 : f32 to vector<8x32xf32>
    %1824 = arith.addf %1823, %1822 : vector<8x32xf32>
    %1825 = arith.divf %1823, %1824 : vector<8x32xf32>
    %1826 = vector.extract_strided_slice %1807 {offsets = [0, 64], sizes = [8, 32], strides = [1, 1]} : vector<8x96xf32> to vector<8x32xf32>
    %1827 = vector.extract_strided_slice %1809 {offsets = [0, 64], sizes = [8, 32], strides = [1, 1]} : vector<8x96xf32> to vector<8x32xf32>
    %1828 = arith.addf %1827, %14 : vector<8x32xf32>
    %1829 = arith.mulf %1817, %1828 : vector<8x32xf32>
    %1830 = arith.addf %1826, %1829 : vector<8x32xf32>
    %1831 = math.tanh %1830 : vector<8x32xf32>
    %cst_520 = arith.constant 1.000000e+00 : f32
    %1832 = vector.broadcast %cst_520 : f32 to vector<8x32xf32>
    %1833 = arith.subf %1832, %1825 : vector<8x32xf32>
    %1834 = arith.mulf %1833, %1831 : vector<8x32xf32>
    %1835 = arith.mulf %1825, %1760 : vector<8x32xf32>
    %1836 = arith.addf %1834, %1835 : vector<8x32xf32>
    %1837 = arith.truncf %1836 : vector<8x32xf32> to vector<8x32xbf16>
    %c0_521 = arith.constant 0 : index
    %c0_522 = arith.constant 0 : index
    %c0_523 = arith.constant 0 : index
    %1838 = vector.load %arg13[%c0_521, %c0_522, %c0_523] : memref<24x8x32xbf16, #tpu.memory_space<vmem>>, vector<1x8x32xbf16>
    %1839 = vector.shape_cast %1838 : vector<1x8x32xbf16> to vector<8x32xbf16>
    %1840 = vector.shape_cast %1837 : vector<8x32xbf16> to vector<1x8x32xbf16>
    tpu.vector_store %arg13[%c0_521, %c0_522, %c0_523], %1840 {strides = array<i32>} : memref<24x8x32xbf16, #tpu.memory_space<vmem>>, vector<1x8x32xbf16>,
    %c0_524 = arith.constant 0 : index
    %c0_525 = arith.constant 0 : index
    %1841 = vector.load %arg14[%c0_524, %c0_525] : memref<8x32xf32, #tpu.memory_space<vmem>>, vector<8x32xf32>
    tpu.vector_store %arg14[%c0_524, %c0_525], %1798 {strides = array<i32>} : memref<8x32xf32, #tpu.memory_space<vmem>>, vector<8x32xf32>,
    %c0_526 = arith.constant 0 : index
    %c0_527 = arith.constant 0 : index
    %1842 = vector.load %arg15[%c0_526, %c0_527] : memref<8x32xf32, #tpu.memory_space<vmem>>, vector<8x32xf32>
    tpu.vector_store %arg15[%c0_526, %c0_527], %1836 {strides = array<i32>} : memref<8x32xf32, #tpu.memory_space<vmem>>, vector<8x32xf32>,
    return
  }
  func.func @transform_0(%arg0: i32, %arg1: i32) -> (i32, i32, i32) {
    %c0_i32 = arith.constant 0 : i32
    %c0_i32_0 = arith.constant 0 : i32
    return %arg1, %arg0, %c0_i32 : i32, i32, i32
  }
  func.func @transform_1(%arg0: i32, %arg1: i32) -> (i32, i32, i32) {
    %c0_i32 = arith.constant 0 : i32
    %0 = arith.subi %c0_i32, %arg1 : i32
    %c0_i32_0 = arith.constant 0 : i32
    %c0_i32_1 = arith.constant 0 : i32
    return %0, %arg0, %c0_i32_0 : i32, i32, i32
  }
  func.func @transform_2(%arg0: i32, %arg1: i32) -> (i32, i32) {
    %c0_i32 = arith.constant 0 : i32
    %c0_i32_0 = arith.constant 0 : i32
    %c0_i32_1 = arith.constant 0 : i32
    return %c0_i32, %c0_i32_0 : i32, i32
  }
  func.func @transform_3(%arg0: i32, %arg1: i32) -> (i32, i32) {
    %c0_i32 = arith.constant 0 : i32
    %c0_i32_0 = arith.constant 0 : i32
    %c0_i32_1 = arith.constant 0 : i32
    return %c0_i32, %c0_i32_0 : i32, i32
  }
  func.func @transform_4(%arg0: i32, %arg1: i32) -> (i32, i32) {
    %c0_i32 = arith.constant 0 : i32
    %c0_i32_0 = arith.constant 0 : i32
    %c0_i32_1 = arith.constant 0 : i32
    return %c0_i32, %c0_i32_0 : i32, i32
  }
  func.func @transform_5(%arg0: i32, %arg1: i32) -> (i32, i32) {
    %c0_i32 = arith.constant 0 : i32
    %c0_i32_0 = arith.constant 0 : i32
    %c0_i32_1 = arith.constant 0 : i32
    return %c0_i32, %c0_i32_0 : i32, i32
  }
  func.func @transform_6(%arg0: i32, %arg1: i32) -> (i32, i32) {
    %c0_i32 = arith.constant 0 : i32
    %c0_i32_0 = arith.constant 0 : i32
    %c0_i32_1 = arith.constant 0 : i32
    return %c0_i32, %c0_i32_0 : i32, i32
  }
  func.func @transform_7(%arg0: i32, %arg1: i32) -> (i32, i32) {
    %c0_i32 = arith.constant 0 : i32
    %c0_i32_0 = arith.constant 0 : i32
    %c0_i32_1 = arith.constant 0 : i32
    return %c0_i32, %c0_i32_0 : i32, i32
  }
  func.func @transform_8(%arg0: i32, %arg1: i32) -> (i32, i32) {
    %c0_i32 = arith.constant 0 : i32
    %c0_i32_0 = arith.constant 0 : i32
    %c0_i32_1 = arith.constant 0 : i32
    return %c0_i32, %c0_i32_0 : i32, i32
  }
  func.func @transform_9(%arg0: i32, %arg1: i32) -> (i32, i32) {
    %c0_i32 = arith.constant 0 : i32
    %c0_i32_0 = arith.constant 0 : i32
    %c0_i32_1 = arith.constant 0 : i32
    return %c0_i32, %c0_i32_0 : i32, i32
  }
  func.func @transform_10(%arg0: i32, %arg1: i32) -> (i32, i32, i32) {
    %c0_i32 = arith.constant 0 : i32
    %c0_i32_0 = arith.constant 0 : i32
    return %arg1, %arg0, %c0_i32 : i32, i32, i32
  }
  func.func @transform_11(%arg0: i32, %arg1: i32) -> (i32, i32, i32) {
    %c0_i32 = arith.constant 0 : i32
    %0 = arith.subi %c0_i32, %arg1 : i32
    %c0_i32_0 = arith.constant 0 : i32
    %c0_i32_1 = arith.constant 0 : i32
    return %0, %arg0, %c0_i32_0 : i32, i32, i32
  }
}

</mosaic_0001>

<bundles_post_ra>
// kernel: tpu_custom_call.1
= control target key start
LH: loop header
LB: loop body
LE: loop exit
PB: predicated region body
PF: predicated region fallthrough
CT: control target
= control target key end

     0   :  { %6 = vsyncpa [#allocation3], 0  ;;  %s441_s0 = inlined_call_operand.hbm [shape: f32[8,128], index: 0, kind: input, shape index: {}]   ;;  %s442_s1 = inlined_call_operand.hbm [shape: f32[16,128], index: 1, kind: output, shape index: {}]  }
   0x1   :  { %7 = vsyncpa [#allocation4], 0 }
   0x2   :  { %9 = vsyncpa [#allocation4 + $0x1], 0  ;;  %s357_s6 = smov 0   ;;  %s359_s7 = smov 0  }
   0x3   :  { %s361_s8 = smov 0   ;;  %s363_s9 = smov 0  }
   0x4 LB: > { %s378_s10 = sadd.s32 4294967295, %s344_s9   ;;  %s188_s11 = sadd.s32 4294967294, %s344_s9   ;;  %s344_s9 = sphi %s363_s9, %s448_s9   ;;  %s340_s8 = sphi %s361_s8, %s447_s8   ;;  %s336_s7 = sphi %s359_s7, %s446_s7   ;;  %s332_s6 = sphi %s357_s6, %s445_s6  }
   0x5   : > { %s382_s12 = sadd.s32 1, %s344_s9   ;;  %s43_s13 = sadd.s32 1, %s340_s8 }
   0x6   : > { %s40_s14 = ssub.s32 %s344_s9, %s382_s12  ;;  %p53_p0 = scmp.ne.s32.totalorder %s340_s8, %s336_s7 }
   0x7   : > { %p41_p1 = scmp.eq.s32.totalorder %s40_s14, 0  ;;  %p54_p2 = scmp.eq.s32.totalorder %s378_s10, 1 }
   0x8   : > { %p59_p3 = scmp.ne.s32.totalorder %s336_s7, %s332_s6  ;;  %p60_p4 = scmp.eq.s32.totalorder %s188_s11, 1 }
   0x9   : > { %s393_s15 = scalar_select %p41_p1, %s340_s8, %s43_s13  }
   0xa   : > { %p395_p5 = por %p54_p2, %p53_p0  ;;  %p399_p6 = por %p60_p4, %p59_p3 }
   0xb   : > { %p189_p7 = scmp.ge.s32.totalorder %s344_s9, 1  ;;  %p67_p8 = scmp.lt.s32.totalorder %s344_s9, 3 }
   0xc   : > { %p212_p9 = scmp.eq.s32.totalorder %s378_s10, 0  ;;  %s79_s20 = sshll.u32 %s441_s0, 4  ;;  %s80_s20 = int_to_ptr.hbm [resolvable:$true] %s79_s20 }
   0xd   : > { %p68_p10 = pnand %p189_p7, %p67_p8  ;;  %s346_s21 = smov [#allocation2]  }
   0xe   : > { %s81_s22 = sshll.u32 %s346_s21, 4  ;;  %s82_s22 = int_to_ptr.vmem [resolvable:$true] %s81_s22 }
   0xf   : > { %p204_p11 = pneg %p68_p10  ;;  %94 = sbr.rel (%p68_p10) target bundleno = 37 (0x25), region = 24 }
  0x11   : > { %p205_p12 = pnand %p212_p9, %p204_p11 }
  0x13   : > { %207 = dma.hbm_to_vmem [thread:$0]  (!%p205_p12), %s80_s20, 128, %s82_s22, [#allocation3]  }
  0x14   : > { %323 = dma.done.wait (%p212_p9), [#allocation3], 128  }
  0x15   : > { %325 = vsyncadd (%p212_p9), [#allocation3], 4294967168  ;;  %s107_s23 = sand.u32 1, %s336_s7   ;;  %s195_s24 = sshll.u32 %s378_s10, 3  ;;  %v110_v0 = vld [vmem:[#allocation2] sm:$0xff] }
  0x16   : > { %s193_s25 = sshll.u32 %s107_s23, 3  ;;  %s124_s28 = scalar_lea.hbm %s442_s1, %s195_s24  ;;  %v111_v1 = vadd.f32 1.0, %v110_v0 }
  0x17   : > { %s109_s29 = scalar_lea.vmem [#allocation5], %s193_s25  ;;  %s128_s2 = sshll.u32 %s124_s28, 4  ;;  %s129_s2 = int_to_ptr.hbm [resolvable:$true] %s128_s2 }
  0x18   : > { %s126_s30 = sshll.u32 %s109_s29, 4  ;;  %112 = vst [vmem:[%s109_s29] sm:$0xff] %v111_v1  ;;  %s114_s3 = scalar_lea.sflag [#allocation4], %s107_s23  ;;  %s127_s30 = int_to_ptr.vmem [resolvable:$true] %s126_s30 }
  0x19   : > { %s292_s4 = sshra.s32 %s129_s2, 4  ;;  %s298_s13 = scalar_lea.hbm %s442_s1, 16  ;;  %s293_s4 = int_to_ptr.hbm [resolvable:$true] %s292_s4 }
  0x1a   : > { %s294_s5 = scalar_lea.hbm %s293_s4, 8  ;;  %p299_p2 = scmp.lt.s32.totalorder %s293_s4, %s442_s1 }
  0x1b   : > { %p295_p13 = scmp.ne.s32.totalorder %s293_s4, %s294_s5  ;;  %p300_p3 = scmp.lt.s32.totalorder %s298_s13, %s294_s5 }
  0x1d   : > { %p296_p0 = pnand %p295_p13, %p395_p5  ;;  %p301_p4 = por %p300_p3, %p299_p2 }
  0x1f   : > { %p297_p1 = pneg %p296_p0 }
  0x21   : > { %p302_p7 = pnand %p301_p4, %p297_p1 }
  0x23   : > { %305 = shalt.err (!%p302_p7)
}
  0x24   : > { %202 = dma.vmem_to_hbm [thread:$0]  (%p395_p5), %s127_s30, 128, %s129_s2, %s114_s3  }
  0x25 PF: > { %p214_p8 = scmp.ge.s32.totalorder %s344_s9, 2  ;;  %s140_s19 = sand.u32 1, %s332_s6  }
  0x26   : > { %s141_s20 = scalar_lea.sflag [#allocation4], %s140_s19 }
  0x27   : > { %p209_p9 = pnand %p214_p8, %p399_p6 }
  0x29   : > { %p210_p10 = pneg %p209_p9 }
  0x2b   : > { %327 = dma.done.wait (%p210_p10), %s141_s20, 128  }
  0x2c   : > { %329 = vsyncadd (%p210_p10), %s141_s20, 4294967168  ;;  %p12_p11 = scmp.ge.s32.totalorder %s382_s12, 4   ;;  %s445_s6 = smov %s336_s7 }
  0x2d   : > { %s446_s7 = smov %s340_s8  ;;  %s447_s8 = smov %s393_s15 }
  0x2e   : > { %s448_s9 = smov %s382_s12  ;;  %14 = sbr.rel (!%p12_p11) target bundleno = 4 (0x4), region = 61 }
  0x33   :  { %147 = vsyncpa [#allocation3], 1 }
  0x34   :  { %149 = vsyncpa [#allocation3 + $0x1], 1 }
  0x35   :  { %150 = vsyncpa [#allocation4], 1 }
  0x36   :  { %152 = vsyncpa [#allocation4 + $0x1], 1 }

// kernel: tpu_custom_call.1
= control target key start
LH: loop header
LB: loop body
LE: loop exit
PB: predicated region body
PF: predicated region fallthrough
CT: control target
= control target key end

     0   :  { %17 = vsyncpa [#allocation5], 0  ;;  %s6487_s0 = inlined_call_operand.hbm [shape: bf16[24,8,32], index: 0, kind: input, shape index: {}]   ;;  %s6488_s1 = inlined_call_operand.hbm [shape: bf16[24,8,32], index: 1, kind: input, shape index: {}]   ;;  %s6489_s2 = inlined_call_operand.hbm [shape: bf16[32,96], index: 2, kind: input, shape index: {}]   ;;  %s6490_s3 = inlined_call_operand.hbm [shape: bf16[32,96], index: 3, kind: input, shape index: {}]   ;;  %s6491_s4 = inlined_call_operand.hbm [shape: bf16[32,96], index: 4, kind: input, shape index: {}]   ;;  %s6492_s5 = inlined_call_operand.hbm [shape: bf16[32,96], index: 5, kind: input, shape index: {}]   ;;  %s6493_s6 = inlined_call_operand.vmem [shape: f32[1,96], index: 6, kind: input, shape index: {}]   ;;  %s6494_s7 = inlined_call_operand.vmem [shape: f32[1,96], index: 7, kind: input, shape index: {}]   ;;  %s6495_s8 = inlined_call_operand.vmem [shape: f32[1,32], index: 8, kind: input, shape index: {}]   ;;  %s6496_s9 = inlined_call_operand.vmem [shape: f32[1,32], index: 9, kind: input, shape index: {}]   ;;  %s6497_s10 = inlined_call_operand.hbm [shape: bf16[24,8,32], index: 10, kind: output, shape index: {0}]   ;;  %s6498_s11 = inlined_call_operand.hbm [shape: bf16[24,8,32], index: 11, kind: output, shape index: {1}]  }
   0x1   :  { %18 = vsyncpa [#allocation8], 0 }
   0x2   :  { %19 = vsyncpa [#allocation11], 0 }
   0x3   :  { %20 = vsyncpa [#allocation14], 0 }
   0x4   :  { %21 = vsyncpa [#allocation6], 0 }
   0x5   :  { %22 = vsyncpa [#allocation17], 0  ;;  %s44_s19 = sshll.u32 %s6488_s1, 4  ;;  %s5106_s20 = smov [#allocation7]   ;;  %s45_s19 = int_to_ptr.hbm [resolvable:$true] %s44_s19 }
   0x6   :  { %s46_s21 = sshll.u32 %s5106_s20, 4  ;;  %s70_s24 = sshll.u32 %s6490_s3, 4  ;;  %s47_s21 = int_to_ptr.vmem [resolvable:$true] %s46_s21  ;;  %s71_s24 = int_to_ptr.hbm [resolvable:$true] %s70_s24 }
   0x7   :  { %s5107_s25 = smov 64   ;;  %s5108_s26 = smov 4  }
   0x8   :  { %52 = dma.hbm_to_vmem [thread:$0]  %s45_s19, 1536, %s47_s21, [#allocation8], %s5107_s25, %s5107_s25, %s5108_s26  }
   0x9   :  { %s5109_s27 = smov [#allocation10]   ;;  %s27_s1 = sshll.u32 %s6487_s0, 4  ;;  %s28_s1 = int_to_ptr.hbm [resolvable:$true] %s27_s1 }
   0xa   :  { %s72_s28 = sshll.u32 %s5109_s27, 4  ;;  %s57_s13 = sshll.u32 %s6489_s2, 4  ;;  %s73_s28 = int_to_ptr.vmem [resolvable:$true] %s72_s28  ;;  %s58_s13 = int_to_ptr.hbm [resolvable:$true] %s57_s13 }
   0xb   :  { %78 = dma.hbm_to_vmem [thread:$0]  %s71_s24, 256, %s73_s28, [#allocation11], %s5107_s25, %s5107_s25, %s5108_s26  }
   0xc   :  { %s5110_s14 = smov [#allocation4]   ;;  %s5111_s16 = smov [#allocation9]  }
   0xd   :  { %s29_s15 = sshll.u32 %s5110_s14, 4  ;;  %s59_s0 = sshll.u32 %s5111_s16, 4  ;;  %s30_s15 = int_to_ptr.vmem [resolvable:$true] %s29_s15  ;;  %s60_s0 = int_to_ptr.vmem [resolvable:$true] %s59_s0 }
   0xe   :  { %35 = dma.hbm_to_vmem [thread:$0]  %s28_s1, 1536, %s30_s15, [#allocation5], %s5107_s25, %s5107_s25, %s5108_s26  }
   0xf   :  { %s83_s19 = sshll.u32 %s6491_s4, 4  ;;  %s96_s21 = sshll.u32 %s6492_s5, 4  ;;  %s84_s19 = int_to_ptr.hbm [resolvable:$true] %s83_s19  ;;  %s97_s21 = int_to_ptr.hbm [resolvable:$true] %s96_s21 }
  0x10   :  { %65 = dma.hbm_to_vmem [thread:$0]  %s58_s13, 256, %s60_s0, [#allocation8], %s5107_s25, %s5107_s25, %s5108_s26  }
  0x11   :  { %s5112_s22 = smov [#allocation12]   ;;  %s5113_s24 = smov [#allocation13]  }
  0x12   :  { %s85_s23 = sshll.u32 %s5112_s22, 4  ;;  %s98_s4 = sshll.u32 %s5113_s24, 4  ;;  %s86_s23 = int_to_ptr.vmem [resolvable:$true] %s85_s23  ;;  %s99_s4 = int_to_ptr.vmem [resolvable:$true] %s98_s4 }
  0x13   :  { %91 = dma.hbm_to_vmem [thread:$0]  %s84_s19, 256, %s86_s23, [#allocation11], %s5107_s25, %s5107_s25, %s5108_s26  }
  0x14   :  { %104 = dma.hbm_to_vmem [thread:$0]  %s97_s21, 256, %s99_s4, [#allocation14], %s5107_s25, %s5107_s25, %s5108_s26  }
  0x15   :  { %5094 = dma.done.wait [#allocation5], 1536  }
  0x16   :  { %5095 = vsyncadd [#allocation5], 4294965760 }
  0x17   :  { %5096 = dma.done.wait [#allocation8], 1792  }
  0x18   :  { %5097 = vsyncadd [#allocation8], 4294965504 }
  0x19   :  { %5098 = dma.done.wait [#allocation11], 512  }
  0x1a   :  { %5099 = vsyncadd [#allocation11], 4294966784 }
  0x1b   :  { %5100 = dma.done.wait [#allocation14], 256  }
  0x1c   :  { %5101 = vsyncadd [#allocation14], 4294967040  ;;  %vm146_vm0 = vcmask 261120   ;;  %v5114_v0 = vmov 0.0   ;;  %v5217_v1 = vld [vmem:[#allocation10 + $0x8] sm:$0xff]  ;;  %v5221_v3 = vld [vmem:[#allocation10] sm:$0xff] }
  0x1d   :  { %148 = vst.msk [vmem:[#allocation3] sm:$0xff] %vm146_vm0, %v5114_v0  ;;  %v5219_v2 = vld [vmem:[#allocation13 + $0x8] sm:$0xff]  ;;  %317 = vmatpush.bf16.msra.mxu2 %v5217_v1  ;;  %v5225_v4 = vld [vmem:[#allocation13] sm:$0xff]  ;;  %v5227_v6 = vld [vmem:[#allocation12 + $0x8] sm:$0xff]  ;;  %s5115_s28 = smov 32   ;;  %s5116_s12 = smov 96  }
  0x1e   :  { %147 = vst.msk [vmem:[#allocation2] sm:$0xff] %vm146_vm0, %v5114_v0  ;;  %346 = vmatpush.bf16.msra.mxu3 %v5219_v2  ;;  %v4570_v7 = vld [vmem:[%s6496_s9] ss:$0 sm:$0xff]  ;;  %230 = vmatpush.bf16.msra.mxu1 %v5227_v6  ;;  %v5234_v8 = vld [vmem:[#allocation12] sm:$0xff]  ;;  %v5238_v10 = vld [vmem:[#allocation9 + $0x8] sm:$0xff]  ;;  %s4331_s9 = sshll.u32 %s6497_s10, 4  ;;  %s4332_s9 = int_to_ptr.hbm [resolvable:$true] %s4331_s9 }
  0x1f   :  { %373 = vrot.lane.b32.xlu0 %v4570_v7, %s5107_s25  ;;  %v292_v12 = vld [vmem:[#allocation7 + $0x5c] sm:$0xf]  ;;  %v4571_v14 = vld [vmem:[%s6495_s8] ss:$0 sm:$0xff]  ;;  %201 = vmatpush.bf16.msra.mxu0 %v5238_v10  ;;  %v5251_v15 = vld [vmem:[#allocation9] sm:$0xff]  ;;  %s5118_s29 = smov [#allocation16]  }
  0x20   :  { %v175_v16 = vld [vmem:[#allocation4] sm:$0xf]  ;;  %v5287_v30 = vld [vmem:[%s6494_s7] ss:$0 sm:$0xff]  ;;  %s4346_s8 = sshll.u32 %s5118_s29, 4  ;;  %s4348_s3 = sshll.u32 %s6498_s11, 4  ;;  %s4347_s8 = int_to_ptr.vmem [resolvable:$true] %s4346_s8  ;;  %s4349_s3 = int_to_ptr.hbm [resolvable:$true] %s4348_s3 }
  0x21   :  { %318 = vmatpush.bf16.msra.mxu2 %v5221_v3  ;;  %v5293_v32 = vld [vmem:[%s6493_s6] ss:$0 sm:$0xff] }
  0x22   :  { %347 = vmatpush.bf16.msra.mxu3 %v5225_v4  ;;  %231 = vmatpush.bf16.msra.mxu1 %v5234_v8 }
  0x23   :  { %202 = vmatpush.bf16.msra.mxu0 %v5251_v15 }
  0x24   :  { %v174_v5 = vld [vmem:[#allocation3] sm:$0xff]  ;;  %4400 = vmatmul.msk.bf16.vlgmr.msra.gmra.mxu2 %vm146_vm0, %v292_v12 }
  0x25   :  { %395 = vrot.lane.b32.xlu2 %v174_v5, %s5115_s28  ;;  %v5236_v9 = vld [vmem:[#allocation2] sm:$0xff]  ;;  %v324_v11 = vpack.c.bf16 %v174_v5, %v174_v5  ;;  %503 = vmatpush.bf16.msrb.mxu2 %v5217_v1 }
  0x26   :  { %v208_v13 = vpack.c.bf16 %v5236_v9, %v5236_v9  ;;  %523 = vmatpush.bf16.msrb.mxu3 %v5219_v2  ;;  %438 = vmatpush.bf16.msrb.mxu1 %v5227_v6 }
  0x27   :  { %4409 = vmatmul.msk.bf16.vlgmr.msra.gmra.mxu3 %vm146_vm0, %v324_v11  ;;  %418 = vmatpush.bf16.msrb.mxu0 %v5238_v10 }
  0x28   :  { %4390 = vmatmul.msk.bf16.vlgmr.msra.gmra.mxu1 %vm146_vm0, %v208_v13  ;;  %4381 = vmatmul.msk.bf16.vlgmr.msra.gmra.mxu0 %vm146_vm0, %v175_v16 }
  0x29   :  { %504 = vmatpush.bf16.msrb.mxu2 %v5221_v3 }
  0x2a   :  { %524 = vmatpush.bf16.msrb.mxu3 %v5225_v4  ;;  %439 = vmatpush.bf16.msrb.mxu1 %v5234_v8 }
  0x2b   :  { %419 = vmatpush.bf16.msrb.mxu0 %v5251_v15 }
  0x2d   :  { %257 = vrot.lane.b32.xlu2 %v4571_v14, %s5107_s25  ;;  %673 = vmatpush.bf16.msra.mxu2 %v5217_v1 }
  0x2e   :  { %693 = vmatpush.bf16.msra.mxu3 %v5219_v2  ;;  %608 = vmatpush.bf16.msra.mxu1 %v5227_v6 }
  0x2f   :  { %588 = vmatpush.bf16.msra.mxu0 %v5238_v10 }
  0x31   :  { %674 = vmatpush.bf16.msra.mxu2 %v5221_v3 }
  0x32   :  { %694 = vmatpush.bf16.msra.mxu3 %v5225_v4  ;;  %609 = vmatpush.bf16.msra.mxu1 %v5234_v8 }
  0x33   :  { %589 = vmatpush.bf16.msra.mxu0 %v5251_v15 }
  0x7f   :  { %v5274_v17 = vpop.permute.xlu2 %395 }
  0x87   :  { %v5280_v24 = vpop.permute.xlu2 %257 }
  0x91   :  { %v5276_v19 = vpop.permute.xlu0 %373 }
  0xa5   :  { %v233_v18 = vpop.f32.mrf.mxu1  ;;  %v204_v23 = vpop.f32.mrf.mxu0 }
  0xa6   :  { %v260_v26 = vadd.f32 %v5280_v24, %v233_v18  ;;  %v205_v34 = vadd.f32 %v5293_v32, %v204_v23 }
  0xa7   :  { %v320_v20 = vpop.f32.mrf.mxu2 }
  0xa8   :  { %v321_v31 = vadd.f32 %v5287_v30, %v320_v20  ;;  %v237_v36 = vadd.f32 %v233_v18, %v205_v34  ;;  %v493_v18 = vld [vmem:[#allocation7 + $0x58] sm:$0xf] }
  0xa9   :  { %4414 = vmatmul.msk.bf16.vlgmr.msrb.gmra.mxu2 %vm146_vm0, %v493_v18 }
  0xaa   :  { %v349_v21 = vpop.f32.mrf.mxu3  ;;  %v4391_v37 = vmul.f32 -1.442695, %v237_v36  ;;  %843 = vmatpush.bf16.msrb.mxu2 %v5217_v1 }
  0xab   :  { %v376_v22 = vadd.f32 %v5276_v19, %v349_v21  ;;  %v353_v33 = vadd.f32 %v349_v21, %v321_v31 }
  0xad   :  { %378 = vrot.lane.b32.xlu0 %v376_v22, %s5107_s25  ;;  %v235_v25 = vpop.f32.mrf.mxu1  ;;  %v206_v29 = vpop.f32.mrf.mxu0  ;;  %v4410_v35 = vmul.f32 -1.442695, %v353_v33 }
  0xae   :  { %844 = vmatpush.bf16.msrb.mxu2 %v5221_v3  ;;  %v408_v29 = vld [vmem:[#allocation4 + $0x4] sm:$0xf] }
  0xaf   :  { %v322_v28 = vpop.f32.mrf.mxu2  ;;  %4574 = vpow2.f32 %v4410_v35  ;;  %4411 = vmatmul.msk.bf16.vlgmr.msrb.gmra.mxu0 %vm146_vm0, %v408_v29 }
  0xb0   :  { %4576 = vpow2.f32 %v4391_v37  ;;  %758 = vmatpush.bf16.msrb.mxu0 %v5238_v10 }
  0xb2   :  { %v351_v27 = vpop.f32.mrf.mxu3 }
  0xb4   :  { %759 = vmatpush.bf16.msrb.mxu0 %v5251_v15 }
  0xb5   :  { %262 = vrot.lane.b32.xlu0 %v260_v26, %s5107_s25  ;;  %v4575_v38 = vpop.eup %4574 }
  0xb6   :  { %v357_v39 = vadd.f32 1.0, %v4575_v38  ;;  %v4577_v40 = vpop.eup %4576 }
  0xb7   :  { %v241_v41 = vadd.f32 1.0, %v4577_v40 }
  0xb8   :  { %4578 = vrcp.f32 %v357_v39  ;;  %v369_v50 = vand.u32 2147483648, %v357_v39  ;;  %vm363_vm2 = vweird.f32 %v357_v39  ;;  %v367_v51 = vand.u32 2147483647, %v357_v39 }
  0xb9   :  { %4580 = vrcp.f32 %v241_v41  ;;  %vm247_vm4 = vweird.f32 %v241_v41  ;;  %v253_v55 = vand.u32 2147483648, %v241_v41  ;;  %v251_v57 = vand.u32 2147483647, %v241_v41 }
  0xba   :  { %v370_v54 = vor.u32 1.1754944e-38, %v369_v50  ;;  %vm368_vm6 = vcmp.eq.f32.partialorder %v367_v51, 8.507059e+37 }
  0xbb   :  { %v254_v61 = vor.u32 1.1754944e-38, %v253_v55  ;;  %vm252_vm8 = vcmp.eq.f32.partialorder %v251_v57, 8.507059e+37 }
  0xbe   :  { %v4579_v42 = vpop.eup %4578 }
  0xbf   :  { %v359_v43 = vmul.f32 %v4579_v42, %v357_v39  ;;  %v4581_v44 = vpop.eup %4580  ;;  %vm364_vm1 = vweird.f32 %v4579_v42 }
  0xc0   :  { %v243_v46 = vmul.f32 %v4581_v44, %v241_v41  ;;  %vm365_vm3 = vmor %vm363_vm2, %vm364_vm1  ;;  %vm248_vm5 = vweird.f32 %v4581_v44 }
  0xc1   :  { %v360_v45 = vsub.f32 1.0, %v359_v43  ;;  %vm249_vm7 = vmor %vm247_vm4, %vm248_vm5 }
  0xc2   :  { %v244_v48 = vsub.f32 1.0, %v243_v46 }
  0xc3   :  { %v361_v47 = vmul.f32 %v4579_v42, %v360_v45 }
  0xc4   :  { %v245_v52 = vmul.f32 %v4581_v44, %v244_v48 }
  0xc5   :  { %v362_v49 = vadd.f32 %v4579_v42, %v361_v47 }
  0xc6   :  { %v246_v56 = vadd.f32 %v4581_v44, %v245_v52 }
  0xc7   :  { %v366_v53 = vsel %vm365_vm3, %v4579_v42, %v362_v49 }
  0xc8   :  { %v371_v59 = vsel %vm368_vm6, %v370_v54, %v366_v53  ;;  %v250_v62 = vsel %vm249_vm7, %v4581_v44, %v246_v56 }
  0xc9   :  { %v255_v63 = vsel %vm252_vm8, %v254_v61, %v250_v62  ;;  %v388_v20 = vsub.f32 1.0, %v371_v59  ;;  %v398_v22 = vmul.f32 %v5274_v17, %v371_v59 }
  0xca   :  { %v272_v33 = vsub.f32 1.0, %v255_v63 }
 0x11f   :  { %v379_v58 = vpop.permute.xlu0 %378 }
 0x120   :  { %v381_v60 = vmul.f32 %v379_v58, %v371_v59 }
 0x122   :  { %383 = vrot.lane.b32.xlu1 %v381_v60, %s5107_s25 }
 0x127   :  { %v263_v0 = vpop.permute.xlu0 %262 }
 0x128   :  { %v265_v5 = vmul.f32 %v263_v0, %v255_v63 }
 0x12a   :  { %267 = vrot.lane.b32.xlu2 %v265_v5, %s5107_s25 }
 0x12c   :  { %v506_v40 = vpop.f32.mrf.mxu2  ;;  %v421_v43 = vpop.f32.mrf.mxu0 }
 0x12d   :  { %v507_v48 = vadd.f32 %v5287_v30, %v506_v40  ;;  %v663_v40 = vld [vmem:[#allocation7 + $0x54] sm:$0xf] }
 0x12e   :  { %4420 = vmatmul.msk.bf16.vlgmr.msra.gmra.mxu2 %vm146_vm0, %v663_v40 }
 0x12f   :  { %1013 = vmatpush.bf16.msra.mxu2 %v5217_v1 }
 0x133   :  { %1014 = vmatpush.bf16.msra.mxu2 %v5221_v3 }
 0x134   :  { %v508_v41 = vpop.f32.mrf.mxu2  ;;  %v423_v44 = vpop.f32.mrf.mxu0 }
 0x184   :  { %v268_v7 = vpop.permute.xlu2 %267 }
 0x185   :  { %v270_v11 = vadd.f32 %v268_v7, %v205_v34 }
 0x187   :  { %4582 = vtanh.f32 %v270_v11 }
 0x18d   :  { %v4583_v12 = vpop.eup %4582 }
 0x18e   :  { %274 = vrot.lane.b32.xlu0 %v4583_v12, %s5116_s12  ;;  %v422_v12 = vadd.f32 %v5293_v32, %v421_v43 }
 0x194   :  { %v384_v13 = vpop.permute.xlu1 %383 }
 0x195   :  { %v386_v14 = vadd.f32 %v384_v13, %v321_v31 }
 0x197   :  { %4584 = vtanh.f32 %v386_v14 }
 0x19d   :  { %v4585_v16 = vpop.eup %4584 }
 0x19e   :  { %390 = vrot.lane.b32.xlu1 %v4585_v16, %s5116_s12 }
 0x200   :  { %v275_v31 = vpop.permute.xlu0 %274 }
 0x201   :  { %v277_v35 = vmul.f32 %v275_v31, %v272_v33 }
 0x210   :  { %v391_v21 = vpop.permute.xlu1 %390 }
 0x211   :  { %v393_v23 = vmul.f32 %v391_v21, %v388_v20 }
 0x213   :  { %v5304_v25 = vadd.f32 %v398_v22, %v393_v23 }
 0x215   :  { %v5308_v26 = vpack.c.bf16 %v5304_v25, %v5304_v25 }
 0x217   :  { %v510_v27 = vunpack.c.l.b16 %v5308_v26 }
 0x219   :  { %v511_v28 = vpack.c.b16 %v510_v27, %v510_v27 }
 0x21b   :  { %512 = vrot.lane.b32.xlu1 %v511_v28, %s5116_s12 }
 0x223   :  { %279 = vrot.lane.b32.xlu1 %v5236_v9, %s5115_s28 }
 0x28d   :  { %v513_v17 = vpop.permute.xlu1 %512 }
 0x28e   :  { %4415 = vmatmul.msk.bf16.vlgmr.msrb.gmra.mxu3 %vm146_vm0, %v513_v17 }
 0x28f   :  { %863 = vmatpush.bf16.msrb.mxu3 %v5219_v2 }
 0x293   :  { %864 = vmatpush.bf16.msrb.mxu3 %v5225_v4 }
 0x295   :  { %v280_v34 = vpop.permute.xlu1 %279 }
 0x296   :  { %v282_v36 = vmul.f32 %v280_v34, %v255_v63 }
 0x298   :  { %v5320_v9 = vadd.f32 %v282_v36, %v277_v35 }
 0x29a   :  { %v5324_v37 = vpack.c.bf16 %v5320_v9, %v5320_v9 }
 0x29c   :  { %v425_v38 = vunpack.c.l.b16 %v5324_v37 }
 0x29e   :  { %v426_v39 = vpack.c.b16 %v425_v38, %v425_v38 }
 0x2a0   :  { %427 = vrot.lane.b32.xlu2 %v426_v39, %s5116_s12 }
 0x2fa   :  { %v428_v42 = vpop.permute.xlu2 %427 }
 0x2fb   :  { %4412 = vmatmul.msk.bf16.vlgmr.msrb.gmra.mxu1 %vm146_vm0, %v428_v42 }
 0x2fc   :  { %778 = vmatpush.bf16.msrb.mxu1 %v5227_v6 }
 0x300   :  { %779 = vmatpush.bf16.msrb.mxu1 %v5234_v8 }
 0x311   :  { %v526_v45 = vpop.f32.mrf.mxu3 }
 0x312   :  { %v550_v46 = vadd.f32 %v526_v45, %v5276_v19  ;;  %v530_v49 = vadd.f32 %v526_v45, %v507_v48 }
 0x314   :  { %552 = vrot.lane.b32.xlu0 %v550_v46, %s5107_s25  ;;  %v4416_v50 = vmul.f32 -1.442695, %v530_v49 }
 0x316   :  { %4586 = vpow2.f32 %v4416_v50 }
 0x319   :  { %v528_v47 = vpop.f32.mrf.mxu3 }
 0x31c   :  { %v4587_v51 = vpop.eup %4586 }
 0x31d   :  { %v534_v52 = vadd.f32 1.0, %v4587_v51 }
 0x31f   :  { %4588 = vrcp.f32 %v534_v52  ;;  %v546_v61 = vand.u32 2147483648, %v534_v52  ;;  %vm540_vm10 = vweird.f32 %v534_v52  ;;  %v544_v62 = vand.u32 2147483647, %v534_v52 }
 0x321   :  { %v547_v0 = vor.u32 1.1754944e-38, %v546_v61  ;;  %vm545_vm12 = vcmp.eq.f32.partialorder %v544_v62, 8.507059e+37 }
 0x325   :  { %v4589_v53 = vpop.eup %4588 }
 0x326   :  { %v536_v54 = vmul.f32 %v4589_v53, %v534_v52  ;;  %vm541_vm9 = vweird.f32 %v4589_v53  ;;  %v578_v52 = vld [vmem:[#allocation4 + $0x8] sm:$0xf] }
 0x327   :  { %vm542_vm11 = vmor %vm540_vm10, %vm541_vm9  ;;  %4417 = vmatmul.msk.bf16.vlgmr.msra.gmra.mxu0 %vm146_vm0, %v578_v52 }
 0x328   :  { %v537_v55 = vsub.f32 1.0, %v536_v54  ;;  %928 = vmatpush.bf16.msra.mxu0 %v5238_v10 }
 0x32a   :  { %v538_v58 = vmul.f32 %v4589_v53, %v537_v55 }
 0x32c   :  { %v539_v59 = vadd.f32 %v4589_v53, %v538_v58  ;;  %929 = vmatpush.bf16.msra.mxu0 %v5251_v15 }
 0x32e   :  { %v543_v63 = vsel %vm542_vm11, %v4589_v53, %v539_v59 }
 0x32f   :  { %v548_v7 = vsel %vm545_vm12, %v547_v0, %v543_v63 }
 0x330   :  { %v562_v41 = vsub.f32 1.0, %v548_v7  ;;  %v568_v43 = vmul.f32 %v548_v7, %v5304_v25  ;;  %v676_v25 = vpop.f32.mrf.mxu2 }
 0x338   :  { %v678_v54 = vpop.f32.mrf.mxu2 }
 0x378   :  { %v441_v56 = vpop.f32.mrf.mxu1 }
 0x379   :  { %v465_v57 = vadd.f32 %v441_v56, %v5280_v24  ;;  %v445_v13 = vadd.f32 %v441_v56, %v422_v12 }
 0x37b   :  { %467 = vrot.lane.b32.xlu0 %v465_v57, %s5107_s25  ;;  %v4413_v14 = vmul.f32 -1.442695, %v445_v13 }
 0x37d   :  { %4590 = vpow2.f32 %v4413_v14 }
 0x380   :  { %v443_v60 = vpop.f32.mrf.mxu1 }
 0x383   :  { %v4591_v16 = vpop.eup %4590 }
 0x384   :  { %v449_v18 = vadd.f32 1.0, %v4591_v16 }
 0x386   :  { %v553_v5 = vpop.permute.xlu0 %552  ;;  %4592 = vrcp.f32 %v449_v18  ;;  %v461_v31 = vand.u32 2147483648, %v449_v18  ;;  %vm455_vm14 = vweird.f32 %v449_v18  ;;  %v459_v33 = vand.u32 2147483647, %v449_v18 }
 0x387   :  { %v555_v11 = vmul.f32 %v553_v5, %v548_v7  ;;  %v677_v7 = vadd.f32 %v5287_v30, %v676_v25 }
 0x388   :  { %v462_v36 = vor.u32 1.1754944e-38, %v461_v31  ;;  %vm460_vm1 = vcmp.eq.f32.partialorder %v459_v33, 8.507059e+37 }
 0x389   :  { %557 = vrot.lane.b32.xlu1 %v555_v11, %s5107_s25 }
 0x38c   :  { %v4593_v20 = vpop.eup %4592 }
 0x38d   :  { %v451_v21 = vmul.f32 %v4593_v20, %v449_v18  ;;  %vm456_vm13 = vweird.f32 %v4593_v20 }
 0x38e   :  { %vm457_vm15 = vmor %vm455_vm14, %vm456_vm13 }
 0x38f   :  { %v452_v23 = vsub.f32 1.0, %v451_v21 }
 0x391   :  { %v453_v28 = vmul.f32 %v4593_v20, %v452_v23 }
 0x393   :  { %v454_v29 = vadd.f32 %v4593_v20, %v453_v28 }
 0x395   :  { %v458_v34 = vsel %vm457_vm15, %v4593_v20, %v454_v29 }
 0x396   :  { %v463_v38 = vsel %vm460_vm1, %v462_v36, %v458_v34 }
 0x397   :  { %v477_v55 = vsub.f32 1.0, %v463_v38  ;;  %v483_v57 = vmul.f32 %v463_v38, %v5320_v9 }
 0x3a4   :  { %v591_v16 = vpop.f32.mrf.mxu0 }
 0x3a5   :  { %v592_v40 = vadd.f32 %v5293_v32, %v591_v16 }
 0x3ac   :  { %v593_v20 = vpop.f32.mrf.mxu0 }
 0x3ad   :  { %v833_v20 = vld [vmem:[#allocation7 + $0x50] sm:$0xf] }
 0x3ae   :  { %4426 = vmatmul.msk.bf16.vlgmr.msrb.gmra.mxu2 %vm146_vm0, %v833_v20 }
 0x3af   :  { %1183 = vmatpush.bf16.msrb.mxu2 %v5217_v1 }
 0x3b3   :  { %1184 = vmatpush.bf16.msrb.mxu2 %v5221_v3 }
 0x3ed   :  { %v468_v35 = vpop.permute.xlu0 %467 }
 0x3ee   :  { %v470_v39 = vmul.f32 %v468_v35, %v463_v38 }
 0x3fb   :  { %v558_v22 = vpop.permute.xlu1 %557 }
 0x3fc   :  { %v560_v27 = vadd.f32 %v558_v22, %v507_v48 }
 0x3fe   :  { %4594 = vtanh.f32 %v560_v27 }
 0x404   :  { %v4595_v17 = vpop.eup %4594 }
 0x405   :  { %564 = vrot.lane.b32.xlu2 %v4595_v17, %s5116_s12 }
 0x40d   :  { %472 = vrot.lane.b32.xlu2 %v470_v39, %s5107_s25 }
 0x45f   :  { %v565_v42 = vpop.permute.xlu2 %564 }
 0x460   :  { %v567_v44 = vmul.f32 %v565_v42, %v562_v41 }
 0x462   :  { %v5344_v45 = vadd.f32 %v568_v43, %v567_v44 }
 0x464   :  { %v5348_v46 = vpack.c.bf16 %v5344_v45, %v5344_v45 }
 0x466   :  { %v680_v47 = vunpack.c.l.b16 %v5348_v46 }
 0x467   :  { %v473_v48 = vpop.permute.xlu2 %472 }
 0x468   :  { %v475_v49 = vadd.f32 %v473_v48, %v422_v12  ;;  %v681_v50 = vpack.c.b16 %v680_v47, %v680_v47 }
 0x46a   :  { %4596 = vtanh.f32 %v475_v49  ;;  %682 = vrot.lane.b32.xlu1 %v681_v50, %s5116_s12 }
 0x470   :  { %v4597_v51 = vpop.eup %4596 }
 0x471   :  { %479 = vrot.lane.b32.xlu0 %v4597_v51, %s5116_s12 }
 0x4dc   :  { %v683_v53 = vpop.permute.xlu1 %682 }
 0x4dd   :  { %4421 = vmatmul.msk.bf16.vlgmr.msra.gmra.mxu3 %vm146_vm0, %v683_v53 }
 0x4de   :  { %1033 = vmatpush.bf16.msra.mxu3 %v5219_v2 }
 0x4e2   :  { %1034 = vmatpush.bf16.msra.mxu3 %v5225_v4 }
 0x4e3   :  { %v480_v56 = vpop.permute.xlu0 %479 }
 0x4e4   :  { %v482_v58 = vmul.f32 %v480_v56, %v477_v55 }
 0x4e6   :  { %v5360_v59 = vadd.f32 %v483_v57, %v482_v58 }
 0x4e8   :  { %v5364_v60 = vpack.c.bf16 %v5360_v59, %v5360_v59 }
 0x4ea   :  { %v595_v61 = vunpack.c.l.b16 %v5364_v60 }
 0x4ec   :  { %v596_v62 = vpack.c.b16 %v595_v61, %v595_v61 }
 0x4ee   :  { %597 = vrot.lane.b32.xlu1 %v596_v62, %s5116_s12 }
 0x560   :  { %v696_v63 = vpop.f32.mrf.mxu3  ;;  %v598_v0 = vpop.permute.xlu1 %597 }
 0x561   :  { %4418 = vmatmul.msk.bf16.vlgmr.msra.gmra.mxu1 %vm146_vm0, %v598_v0  ;;  %v720_v5 = vadd.f32 %v696_v63, %v5276_v19  ;;  %v700_v11 = vadd.f32 %v696_v63, %v677_v7 }
 0x562   :  { %948 = vmatpush.bf16.msra.mxu1 %v5227_v6 }
 0x563   :  { %722 = vrot.lane.b32.xlu2 %v720_v5, %s5107_s25  ;;  %v4422_v12 = vmul.f32 -1.442695, %v700_v11 }
 0x565   :  { %4598 = vpow2.f32 %v4422_v12 }
 0x566   :  { %949 = vmatpush.bf16.msra.mxu1 %v5234_v8 }
 0x568   :  { %v698_v9 = vpop.f32.mrf.mxu3 }
 0x56b   :  { %v4599_v13 = vpop.eup %4598 }
 0x56c   :  { %v704_v14 = vadd.f32 1.0, %v4599_v13 }
 0x56e   :  { %4600 = vrcp.f32 %v704_v14  ;;  %v716_v28 = vand.u32 2147483648, %v704_v14  ;;  %vm710_vm3 = vweird.f32 %v704_v14  ;;  %v714_v29 = vand.u32 2147483647, %v704_v14 }
 0x570   :  { %v717_v31 = vor.u32 1.1754944e-38, %v716_v28  ;;  %vm715_vm5 = vcmp.eq.f32.partialorder %v714_v29, 8.507059e+37 }
 0x574   :  { %v4601_v18 = vpop.eup %4600 }
 0x575   :  { %v706_v21 = vmul.f32 %v4601_v18, %v704_v14  ;;  %vm711_vm2 = vweird.f32 %v4601_v18 }
 0x576   :  { %vm712_vm4 = vmor %vm710_vm3, %vm711_vm2 }
 0x577   :  { %v707_v22 = vsub.f32 1.0, %v706_v21 }
 0x579   :  { %v708_v23 = vmul.f32 %v4601_v18, %v707_v22 }
 0x57b   :  { %v709_v27 = vadd.f32 %v4601_v18, %v708_v23 }
 0x57d   :  { %v713_v17 = vsel %vm712_vm4, %v4601_v18, %v709_v27 }
 0x57e   :  { %v718_v34 = vsel %vm715_vm5, %v717_v31, %v713_v17 }
 0x57f   :  { %v732_v63 = vsub.f32 1.0, %v718_v34  ;;  %v738_v5 = vmul.f32 %v718_v34, %v5344_v45  ;;  %v748_v45 = vld [vmem:[#allocation4 + $0xc] sm:$0xf] }
 0x580   :  { %4423 = vmatmul.msk.bf16.vlgmr.msrb.gmra.mxu0 %vm146_vm0, %v748_v45 }
 0x581   :  { %1098 = vmatpush.bf16.msrb.mxu0 %v5238_v10 }
 0x585   :  { %1099 = vmatpush.bf16.msrb.mxu0 %v5251_v15 }
 0x5bd   :  { %v723_v33 = vpop.permute.xlu2 %722 }
 0x5be   :  { %v725_v35 = vmul.f32 %v723_v33, %v718_v34 }
 0x5c0   :  { %727 = vrot.lane.b32.xlu0 %v725_v35, %s5107_s25 }
 0x5de   :  { %v611_v36 = vpop.f32.mrf.mxu1 }
 0x5df   :  { %v635_v38 = vadd.f32 %v611_v36, %v5280_v24  ;;  %v615_v41 = vadd.f32 %v611_v36, %v592_v40 }
 0x5e1   :  { %637 = vrot.lane.b32.xlu2 %v635_v38, %s5107_s25  ;;  %v4419_v42 = vmul.f32 -1.442695, %v615_v41 }
 0x5e3   :  { %4602 = vpow2.f32 %v4419_v42 }
 0x5e6   :  { %v613_v39 = vpop.f32.mrf.mxu1 }
 0x5e9   :  { %v4603_v43 = vpop.eup %4602 }
 0x5ea   :  { %v619_v44 = vadd.f32 1.0, %v4603_v43 }
 0x5ec   :  { %4604 = vrcp.f32 %v619_v44  ;;  %v631_v54 = vand.u32 2147483648, %v619_v44  ;;  %vm625_vm7 = vweird.f32 %v619_v44  ;;  %v629_v55 = vand.u32 2147483647, %v619_v44 }
 0x5ee   :  { %v632_v58 = vor.u32 1.1754944e-38, %v631_v54  ;;  %vm630_vm9 = vcmp.eq.f32.partialorder %v629_v55, 8.507059e+37 }
 0x5f2   :  { %v4605_v47 = vpop.eup %4604 }
 0x5f3   :  { %v621_v48 = vmul.f32 %v4605_v47, %v619_v44  ;;  %vm626_vm6 = vweird.f32 %v4605_v47 }
 0x5f4   :  { %vm627_vm8 = vmor %vm625_vm7, %vm626_vm6 }
 0x5f5   :  { %v622_v50 = vsub.f32 1.0, %v621_v48 }
 0x5f7   :  { %v623_v52 = vmul.f32 %v4605_v47, %v622_v50 }
 0x5f9   :  { %v624_v25 = vadd.f32 %v4605_v47, %v623_v52 }
 0x5fb   :  { %v628_v56 = vsel %vm627_vm8, %v4605_v47, %v624_v25 }
 0x5fc   :  { %v633_v61 = vsel %vm630_vm9, %v632_v58, %v628_v56 }
 0x5fd   :  { %v647_v21 = vsub.f32 1.0, %v633_v61  ;;  %v653_v23 = vmul.f32 %v633_v61, %v5360_v59  ;;  %v846_v59 = vpop.f32.mrf.mxu2  ;;  %v761_v36 = vpop.f32.mrf.mxu0 }
 0x5fe   :  { %v847_v42 = vadd.f32 %v5287_v30, %v846_v59 }
 0x605   :  { %v848_v34 = vpop.f32.mrf.mxu2  ;;  %v763_v38 = vpop.f32.mrf.mxu0 }
 0x606   :  { %v1003_v38 = vld [vmem:[#allocation7 + $0x4c] sm:$0xf] }
 0x607   :  { %4432 = vmatmul.msk.bf16.vlgmr.msra.gmra.mxu2 %vm146_vm0, %v1003_v38 }
 0x608   :  { %1353 = vmatpush.bf16.msra.mxu2 %v5217_v1 }
 0x60c   :  { %1354 = vmatpush.bf16.msra.mxu2 %v5221_v3 }
 0x632   :  { %v728_v49 = vpop.permute.xlu0 %727 }
 0x633   :  { %v730_v51 = vadd.f32 %v728_v49, %v677_v7 }
 0x635   :  { %4606 = vtanh.f32 %v730_v51 }
 0x63b   :  { %v4607_v53 = vpop.eup %4606  ;;  %v638_v57 = vpop.permute.xlu2 %637 }
 0x63c   :  { %734 = vrot.lane.b32.xlu1 %v4607_v53, %s5116_s12  ;;  %v640_v62 = vmul.f32 %v638_v57, %v633_v61 }
 0x644   :  { %642 = vrot.lane.b32.xlu1 %v640_v62, %s5107_s25 }
 0x6ae   :  { %v735_v0 = vpop.permute.xlu1 %734 }
 0x6af   :  { %v737_v9 = vmul.f32 %v735_v0, %v732_v63 }
 0x6b1   :  { %v5381_v7 = vadd.f32 %v738_v5, %v737_v9  ;;  %v762_v5 = vadd.f32 %v5293_v32, %v761_v36 }
 0x6b3   :  { %v5385_v11 = vpack.c.bf16 %v5381_v7, %v5381_v7 }
 0x6b5   :  { %v850_v12 = vunpack.c.l.b16 %v5385_v11 }
 0x6b6   :  { %v643_v13 = vpop.permute.xlu1 %642 }
 0x6b7   :  { %v645_v14 = vadd.f32 %v643_v13, %v592_v40  ;;  %v851_v16 = vpack.c.b16 %v850_v12, %v850_v12 }
 0x6b9   :  { %4608 = vtanh.f32 %v645_v14  ;;  %852 = vrot.lane.b32.xlu0 %v851_v16, %s5116_s12 }
 0x6bf   :  { %v4609_v18 = vpop.eup %4608 }
 0x6c0   :  { %649 = vrot.lane.b32.xlu2 %v4609_v18, %s5116_s12 }
 0x71a   :  { %v650_v22 = vpop.permute.xlu2 %649 }
 0x71b   :  { %v652_v27 = vmul.f32 %v650_v22, %v647_v21 }
 0x71d   :  { %v5397_v28 = vadd.f32 %v653_v23, %v652_v27 }
 0x71f   :  { %v5401_v29 = vpack.c.bf16 %v5397_v28, %v5397_v28 }
 0x721   :  { %v765_v17 = vunpack.c.l.b16 %v5401_v29 }
 0x723   :  { %v766_v31 = vpack.c.b16 %v765_v17, %v765_v17 }
 0x725   :  { %767 = vrot.lane.b32.xlu0 %v766_v31, %s5116_s12 }
 0x72b   :  { %v853_v33 = vpop.permute.xlu0 %852 }
 0x72c   :  { %4427 = vmatmul.msk.bf16.vlgmr.msrb.gmra.mxu3 %vm146_vm0, %v853_v33 }
 0x72d   :  { %1203 = vmatpush.bf16.msrb.mxu3 %v5219_v2 }
 0x731   :  { %1204 = vmatpush.bf16.msrb.mxu3 %v5225_v4 }
 0x797   :  { %v768_v35 = vpop.permute.xlu0 %767 }
 0x798   :  { %4424 = vmatmul.msk.bf16.vlgmr.msrb.gmra.mxu1 %vm146_vm0, %v768_v35 }
 0x799   :  { %1118 = vmatpush.bf16.msrb.mxu1 %v5227_v6 }
 0x79d   :  { %1119 = vmatpush.bf16.msrb.mxu1 %v5234_v8 }
 0x7af   :  { %v866_v39 = vpop.f32.mrf.mxu3 }
 0x7b0   :  { %v890_v40 = vadd.f32 %v866_v39, %v5276_v19  ;;  %v870_v43 = vadd.f32 %v866_v39, %v847_v42 }
 0x7b2   :  { %892 = vrot.lane.b32.xlu1 %v890_v40, %s5107_s25  ;;  %v4428_v44 = vmul.f32 -1.442695, %v870_v43 }
 0x7b4   :  { %4610 = vpow2.f32 %v4428_v44 }
 0x7b7   :  { %v868_v41 = vpop.f32.mrf.mxu3 }
 0x7ba   :  { %v4611_v47 = vpop.eup %4610 }
 0x7bb   :  { %v874_v48 = vadd.f32 1.0, %v4611_v47 }
 0x7bd   :  { %4612 = vrcp.f32 %v874_v48  ;;  %v886_v56 = vand.u32 2147483648, %v874_v48  ;;  %vm880_vm11 = vweird.f32 %v874_v48  ;;  %v884_v57 = vand.u32 2147483647, %v874_v48 }
 0x7bf   :  { %v887_v61 = vor.u32 1.1754944e-38, %v886_v56  ;;  %vm885_vm13 = vcmp.eq.f32.partialorder %v884_v57, 8.507059e+37 }
 0x7c3   :  { %v4613_v49 = vpop.eup %4612 }
 0x7c4   :  { %v876_v50 = vmul.f32 %v4613_v49, %v874_v48  ;;  %vm881_vm10 = vweird.f32 %v4613_v49 }
 0x7c5   :  { %vm882_vm12 = vmor %vm880_vm11, %vm881_vm10 }
 0x7c6   :  { %v877_v52 = vsub.f32 1.0, %v876_v50 }
 0x7c8   :  { %v878_v53 = vmul.f32 %v4613_v49, %v877_v52 }
 0x7ca   :  { %v879_v55 = vadd.f32 %v4613_v49, %v878_v53 }
 0x7cc   :  { %v883_v58 = vsel %vm882_vm12, %v4613_v49, %v879_v55 }
 0x7cd   :  { %v888_v63 = vsel %vm885_vm13, %v887_v61, %v883_v58 }
 0x7ce   :  { %v902_v39 = vsub.f32 1.0, %v888_v63  ;;  %v908_v41 = vmul.f32 %v888_v63, %v5381_v7  ;;  %v918_v7 = vld [vmem:[#allocation4 + $0x10] sm:$0xf] }
 0x7cf   :  { %4429 = vmatmul.msk.bf16.vlgmr.msra.gmra.mxu0 %vm146_vm0, %v918_v7 }
 0x7d0   :  { %1268 = vmatpush.bf16.msra.mxu0 %v5238_v10 }
 0x7d4   :  { %1269 = vmatpush.bf16.msra.mxu0 %v5251_v15 }
 0x815   :  { %v781_v51 = vpop.f32.mrf.mxu1 }
 0x816   :  { %v805_v25 = vadd.f32 %v781_v51, %v5280_v24  ;;  %v785_v9 = vadd.f32 %v781_v51, %v762_v5  ;;  %v1016_v51 = vpop.f32.mrf.mxu2 }
 0x817   :  { %v1017_v61 = vadd.f32 %v5287_v30, %v1016_v51 }
 0x818   :  { %807 = vrot.lane.b32.xlu1 %v805_v25, %s5107_s25  ;;  %v4425_v12 = vmul.f32 -1.442695, %v785_v9 }
 0x81a   :  { %4614 = vpow2.f32 %v4425_v12 }
 0x81d   :  { %v783_v54 = vpop.f32.mrf.mxu1 }
 0x81e   :  { %v1018_v52 = vpop.f32.mrf.mxu2 }
 0x820   :  { %v4615_v13 = vpop.eup %4614 }
 0x821   :  { %v789_v14 = vadd.f32 1.0, %v4615_v13 }
 0x823   :  { %4616 = vrcp.f32 %v789_v14  ;;  %v801_v17 = vand.u32 2147483648, %v789_v14  ;;  %vm795_vm15 = vweird.f32 %v789_v14  ;;  %v799_v31 = vand.u32 2147483647, %v789_v14 }
 0x824   :  { %v893_v62 = vpop.permute.xlu1 %892 }
 0x825   :  { %v895_v0 = vmul.f32 %v893_v62, %v888_v63  ;;  %v802_v34 = vor.u32 1.1754944e-38, %v801_v17  ;;  %vm800_vm2 = vcmp.eq.f32.partialorder %v799_v31, 8.507059e+37 }
 0x827   :  { %897 = vrot.lane.b32.xlu2 %v895_v0, %s5107_s25 }
 0x829   :  { %v4617_v16 = vpop.eup %4616 }
 0x82a   :  { %v791_v18 = vmul.f32 %v4617_v16, %v789_v14  ;;  %vm796_vm14 = vweird.f32 %v4617_v16 }
 0x82b   :  { %vm797_vm1 = vmor %vm795_vm15, %vm796_vm14 }
 0x82c   :  { %v792_v45 = vsub.f32 1.0, %v791_v18 }
 0x82e   :  { %v793_v22 = vmul.f32 %v4617_v16, %v792_v45 }
 0x830   :  { %v794_v23 = vadd.f32 %v4617_v16, %v793_v22 }
 0x832   :  { %v798_v33 = vsel %vm797_vm1, %v4617_v16, %v794_v23 }
 0x833   :  { %v803_v35 = vsel %vm800_vm2, %v802_v34, %v798_v33 }
 0x834   :  { %v817_v25 = vsub.f32 1.0, %v803_v35  ;;  %v823_v54 = vmul.f32 %v803_v35, %v5397_v28 }
 0x84c   :  { %v931_v9 = vpop.f32.mrf.mxu0 }
 0x84d   :  { %v932_v33 = vadd.f32 %v5293_v32, %v931_v9  ;;  %v5481_v9 = vld [vmem:[#allocation9] sm:$0xff] }
 0x854   :  { %v933_v13 = vpop.f32.mrf.mxu0 }
 0x881   :  { %v898_v20 = vpop.permute.xlu2 %897 }
 0x882   :  { %v900_v21 = vadd.f32 %v898_v20, %v847_v42 }
 0x884   :  { %4618 = vtanh.f32 %v900_v21 }
 0x88a   :  { %v4619_v27 = vpop.eup %4618  ;;  %v808_v59 = vpop.permute.xlu1 %807 }
 0x88b   :  { %904 = vrot.lane.b32.xlu0 %v4619_v27, %s5116_s12  ;;  %v810_v36 = vmul.f32 %v808_v59, %v803_v35 }
 0x893   :  { %812 = vrot.lane.b32.xlu0 %v810_v36, %s5107_s25 }
 0x8fd   :  { %v905_v40 = vpop.permute.xlu0 %904 }
 0x8fe   :  { %v907_v42 = vmul.f32 %v905_v40, %v902_v39 }
 0x900   :  { %v5424_v43 = vadd.f32 %v908_v41, %v907_v42 }
 0x902   :  { %v5428_v44 = vpack.c.bf16 %v5424_v43, %v5424_v43 }
 0x904   :  { %v1020_v47 = vunpack.c.l.b16 %v5428_v44 }
 0x905   :  { %v813_v48 = vpop.permute.xlu0 %812 }
 0x906   :  { %v815_v49 = vadd.f32 %v813_v48, %v762_v5  ;;  %v1021_v50 = vpack.c.b16 %v1020_v47, %v1020_v47 }
 0x908   :  { %4620 = vtanh.f32 %v815_v49  ;;  %1022 = vrot.lane.b32.xlu2 %v1021_v50, %s5116_s12 }
 0x90e   :  { %v4621_v1 = vpop.eup %4620 }
 0x90f   :  { %819 = vrot.lane.b32.xlu1 %v4621_v1, %s5116_s12 }
 0x962   :  { %v1023_v3 = vpop.permute.xlu2 %1022 }
 0x963   :  { %4433 = vmatmul.msk.bf16.vlgmr.msra.gmra.mxu3 %vm146_vm0, %v1023_v3 }
 0x964   :  { %1373 = vmatpush.bf16.msra.mxu3 %v5219_v2 }
 0x968   :  { %1374 = vmatpush.bf16.msra.mxu3 %v5225_v4 }
 0x981   :  { %v820_v53 = vpop.permute.xlu1 %819 }
 0x982   :  { %v822_v55 = vmul.f32 %v820_v53, %v817_v25  ;;  %v1173_v25 = vld [vmem:[#allocation7 + $0x48] sm:$0xf]  ;;  %v5461_v53 = vld [vmem:[#allocation10 + $0x8] sm:$0xff] }
 0x983   :  { %4438 = vmatmul.msk.bf16.vlgmr.msrb.gmra.mxu2 %vm146_vm0, %v1173_v25 }
 0x984   :  { %v5440_v56 = vadd.f32 %v823_v54, %v822_v55  ;;  %1523 = vmatpush.bf16.msrb.mxu2 %v5461_v53  ;;  %v5464_v54 = vld [vmem:[#allocation10] sm:$0xff] }
 0x986   :  { %v5444_v2 = vpack.c.bf16 %v5440_v56, %v5440_v56 }
 0x988   :  { %v935_v4 = vunpack.c.l.b16 %v5444_v2  ;;  %1524 = vmatpush.bf16.msrb.mxu2 %v5464_v54 }
 0x98a   :  { %v936_v57 = vpack.c.b16 %v935_v4, %v935_v4 }
 0x98c   :  { %937 = vrot.lane.b32.xlu2 %v936_v57, %s5116_s12 }
 0x9e6   :  { %v1036_v10 = vpop.f32.mrf.mxu3  ;;  %v938_v15 = vpop.permute.xlu2 %937 }
 0x9e7   :  { %4430 = vmatmul.msk.bf16.vlgmr.msra.gmra.mxu1 %vm146_vm0, %v938_v15  ;;  %v1060_v58 = vadd.f32 %v1036_v10, %v5276_v19  ;;  %v1040_v62 = vadd.f32 %v1036_v10, %v1017_v61 }
 0x9e8   :  { %1288 = vmatpush.bf16.msra.mxu1 %v5227_v6 }
 0x9e9   :  { %1062 = vrot.lane.b32.xlu0 %v1060_v58, %s5107_s25  ;;  %v4434_v63 = vmul.f32 -1.442695, %v1040_v62 }
 0x9eb   :  { %4622 = vpow2.f32 %v4434_v63 }
 0x9ec   :  { %1289 = vmatpush.bf16.msra.mxu1 %v5234_v8 }
 0x9ee   :  { %v1038_v28 = vpop.f32.mrf.mxu3 }
 0x9f1   :  { %v4623_v0 = vpop.eup %4622 }
 0x9f2   :  { %v1044_v5 = vadd.f32 1.0, %v4623_v0 }
 0x9f4   :  { %4624 = vrcp.f32 %v1044_v5  ;;  %v1056_v20 = vand.u32 2147483648, %v1044_v5  ;;  %vm1050_vm4 = vweird.f32 %v1044_v5  ;;  %v1054_v8 = vand.u32 2147483647, %v1044_v5 }
 0x9f6   :  { %v1057_v30 = vor.u32 1.1754944e-38, %v1056_v20  ;;  %vm1055_vm6 = vcmp.eq.f32.partialorder %v1054_v8, 8.507059e+37 }
 0x9fa   :  { %v4625_v12 = vpop.eup %4624 }
 0x9fb   :  { %v1046_v14 = vmul.f32 %v4625_v12, %v1044_v5  ;;  %vm1051_vm3 = vweird.f32 %v4625_v12  ;;  %v1088_v5 = vld [vmem:[#allocation4 + $0x14] sm:$0xf] }
 0x9fc   :  { %vm1052_vm5 = vmor %vm1050_vm4, %vm1051_vm3  ;;  %4435 = vmatmul.msk.bf16.vlgmr.msrb.gmra.mxu0 %vm146_vm0, %v1088_v5 }
 0x9fd   :  { %v1047_v16 = vsub.f32 1.0, %v1046_v14 }
 0x9ff   :  { %v1048_v18 = vmul.f32 %v4625_v12, %v1047_v16  ;;  %v5485_v16 = vld [vmem:[#allocation13 + $0x8] sm:$0xff] }
 0xa01   :  { %v1049_v6 = vadd.f32 %v4625_v12, %v1048_v18 }
 0xa03   :  { %v1053_v45 = vsel %vm1052_vm5, %v4625_v12, %v1049_v6  ;;  %v5488_v6 = vld [vmem:[#allocation13] sm:$0xff] }
 0xa04   :  { %v1058_v22 = vsel %vm1055_vm6, %v1057_v30, %v1053_v45 }
 0xa05   :  { %v1072_v55 = vsub.f32 1.0, %v1058_v22  ;;  %v1078_v57 = vmul.f32 %v1058_v22, %v5424_v43  ;;  %v5478_v43 = vld [vmem:[#allocation9 + $0x8] sm:$0xff] }
 0xa06   :  { %1438 = vmatpush.bf16.msrb.mxu0 %v5478_v43  ;;  %v1186_v12 = vpop.f32.mrf.mxu2 }
 0xa0a   :  { %1439 = vmatpush.bf16.msrb.mxu0 %v5481_v9 }
 0xa0e   :  { %v1188_v14 = vpop.f32.mrf.mxu2 }
 0xa5b   :  { %v1063_v21 = vpop.permute.xlu0 %1062 }
 0xa5c   :  { %v1065_v23 = vmul.f32 %v1063_v21, %v1058_v22 }
 0xa5e   :  { %1067 = vrot.lane.b32.xlu1 %v1065_v23, %s5107_s25 }
 0xa64   :  { %v951_v27 = vpop.f32.mrf.mxu1 }
 0xa65   :  { %v975_v17 = vadd.f32 %v951_v27, %v5280_v24  ;;  %v955_v59 = vadd.f32 %v951_v27, %v932_v33 }
 0xa67   :  { %977 = vrot.lane.b32.xlu0 %v975_v17, %s5107_s25  ;;  %v4431_v34 = vmul.f32 -1.442695, %v955_v59 }
 0xa69   :  { %4626 = vpow2.f32 %v4431_v34  ;;  %v5512_v34 = vld [vmem:[%s6494_s7] ss:$0 sm:$0xff] }
 0xa6c   :  { %v953_v31 = vpop.f32.mrf.mxu1 }
 0xa6f   :  { %v4627_v35 = vpop.eup %4626 }
 0xa70   :  { %v959_v36 = vadd.f32 1.0, %v4627_v35  ;;  %v1187_v35 = vadd.f32 %v5512_v34, %v1186_v12 }
 0xa72   :  { %4628 = vrcp.f32 %v959_v36  ;;  %v971_v50 = vand.u32 2147483648, %v959_v36  ;;  %vm965_vm8 = vweird.f32 %v959_v36  ;;  %v969_v32 = vand.u32 2147483647, %v959_v36 }
 0xa74   :  { %v972_v7 = vor.u32 1.1754944e-38, %v971_v50  ;;  %vm970_vm10 = vcmp.eq.f32.partialorder %v969_v32, 8.507059e+37 }
 0xa78   :  { %v4629_v38 = vpop.eup %4628 }
 0xa79   :  { %v961_v39 = vmul.f32 %v4629_v38, %v959_v36  ;;  %vm966_vm7 = vweird.f32 %v4629_v38 }
 0xa7a   :  { %vm967_vm9 = vmor %vm965_vm8, %vm966_vm7 }
 0xa7b   :  { %v962_v41 = vsub.f32 1.0, %v961_v39 }
 0xa7d   :  { %v963_v47 = vmul.f32 %v4629_v38, %v962_v41  ;;  %v1101_v41 = vpop.f32.mrf.mxu0 }
 0xa7f   :  { %v964_v48 = vadd.f32 %v4629_v38, %v963_v47 }
 0xa81   :  { %v968_v1 = vsel %vm967_vm9, %v4629_v38, %v964_v48 }
 0xa82   :  { %v973_v51 = vsel %vm970_vm10, %v972_v7, %v968_v1 }
 0xa83   :  { %v987_v18 = vsub.f32 1.0, %v973_v51  ;;  %v993_v8 = vmul.f32 %v973_v51, %v5440_v56  ;;  %v5506_v56 = vld [vmem:[#allocation12] sm:$0xff] }
 0xa85   :  { %v1103_v47 = vpop.f32.mrf.mxu0 }
 0xad0   :  { %v1068_v40 = vpop.permute.xlu1 %1067 }
 0xad1   :  { %v1070_v42 = vadd.f32 %v1068_v40, %v1017_v61 }
 0xad3   :  { %4630 = vtanh.f32 %v1070_v42 }
 0xad9   :  { %v4631_v49 = vpop.eup %4630  ;;  %v978_v3 = vpop.permute.xlu0 %977 }
 0xada   :  { %1074 = vrot.lane.b32.xlu2 %v4631_v49, %s5116_s12  ;;  %v980_v52 = vmul.f32 %v978_v3, %v973_v51 }
 0xae2   :  { %982 = vrot.lane.b32.xlu2 %v980_v52, %s5107_s25 }
 0xb34   :  { %v1075_v4 = vpop.permute.xlu2 %1074 }
 0xb35   :  { %v1077_v10 = vmul.f32 %v1075_v4, %v1072_v55 }
 0xb37   :  { %v5468_v15 = vadd.f32 %v1078_v57, %v1077_v10 }
 0xb39   :  { %v5472_v58 = vpack.c.bf16 %v5468_v15, %v5468_v15 }
 0xb3b   :  { %v1190_v28 = vunpack.c.l.b16 %v5472_v58 }
 0xb3c   :  { %v983_v61 = vpop.permute.xlu2 %982 }
 0xb3d   :  { %v985_v62 = vadd.f32 %v983_v61, %v932_v33  ;;  %v1191_v63 = vpack.c.b16 %v1190_v28, %v1190_v28  ;;  %v5502_v33 = vld [vmem:[#allocation12 + $0x8] sm:$0xff]  ;;  %v5521_v28 = vld [vmem:[%s6493_s6] ss:$0 sm:$0xff] }
 0xb3e   :  { %v1102_v61 = vadd.f32 %v5521_v28, %v1101_v41 }
 0xb3f   :  { %4632 = vtanh.f32 %v985_v62  ;;  %1192 = vrot.lane.b32.xlu1 %v1191_v63, %s5116_s12 }
 0xb45   :  { %v4633_v0 = vpop.eup %4632 }
 0xb46   :  { %989 = vrot.lane.b32.xlu0 %v4633_v0, %s5116_s12 }
 0xbb1   :  { %v1193_v13 = vpop.permute.xlu1 %1192 }
 0xbb2   :  { %4439 = vmatmul.msk.bf16.vlgmr.msrb.gmra.mxu3 %vm146_vm0, %v1193_v13 }
 0xbb3   :  { %1543 = vmatpush.bf16.msrb.mxu3 %v5485_v16 }
 0xbb7   :  { %1544 = vmatpush.bf16.msrb.mxu3 %v5488_v6 }
 0xbb8   :  { %v990_v20 = vpop.permute.xlu0 %989 }
 0xbb9   :  { %v992_v45 = vmul.f32 %v990_v20, %v987_v18 }
 0xbbb   :  { %v5492_v30 = vadd.f32 %v993_v8, %v992_v45 }
 0xbbd   :  { %v5496_v21 = vpack.c.bf16 %v5492_v30, %v5492_v30 }
 0xbbf   :  { %v1105_v22 = vunpack.c.l.b16 %v5496_v21 }
 0xbc1   :  { %v1106_v23 = vpack.c.b16 %v1105_v22, %v1105_v22 }
 0xbc3   :  { %1107 = vrot.lane.b32.xlu1 %v1106_v23, %s5116_s12 }
 0xc35   :  { %v1206_v27 = vpop.f32.mrf.mxu3  ;;  %v1108_v17 = vpop.permute.xlu1 %1107 }
 0xc36   :  { %4436 = vmatmul.msk.bf16.vlgmr.msrb.gmra.mxu1 %vm146_vm0, %v1108_v17  ;;  %v1230_v31 = vadd.f32 %v1206_v27, %v5276_v19  ;;  %v1210_v36 = vadd.f32 %v1206_v27, %v1187_v35 }
 0xc37   :  { %1458 = vmatpush.bf16.msrb.mxu1 %v5502_v33 }
 0xc38   :  { %1232 = vrot.lane.b32.xlu2 %v1230_v31, %s5107_s25  ;;  %v4440_v38 = vmul.f32 -1.442695, %v1210_v36 }
 0xc3a   :  { %4634 = vpow2.f32 %v4440_v38 }
 0xc3b   :  { %1459 = vmatpush.bf16.msrb.mxu1 %v5506_v56 }
 0xc3d   :  { %v1208_v59 = vpop.f32.mrf.mxu3 }
 0xc40   :  { %v4635_v39 = vpop.eup %4634 }
 0xc41   :  { %v1214_v40 = vadd.f32 1.0, %v4635_v39 }
 0xc43   :  { %4636 = vrcp.f32 %v1214_v40  ;;  %v1226_v1 = vand.u32 2147483648, %v1214_v40  ;;  %vm1220_vm12 = vweird.f32 %v1214_v40  ;;  %v1224_v3 = vand.u32 2147483647, %v1214_v40 }
 0xc45   :  { %v1227_v51 = vor.u32 1.1754944e-38, %v1226_v1  ;;  %vm1225_vm14 = vcmp.eq.f32.partialorder %v1224_v3, 8.507059e+37  ;;  %v1343_v3 = vld [vmem:[#allocation7 + $0x44] sm:$0xf] }
 0xc46   :  { %4444 = vmatmul.msk.bf16.vlgmr.msra.gmra.mxu2 %vm146_vm0, %v1343_v3 }
 0xc47   :  { %1693 = vmatpush.bf16.msra.mxu2 %v5461_v53 }
 0xc49   :  { %v4637_v42 = vpop.eup %4636 }
 0xc4a   :  { %v1216_v48 = vmul.f32 %v4637_v42, %v1214_v40  ;;  %vm1221_vm11 = vweird.f32 %v4637_v42 }
 0xc4b   :  { %vm1222_vm13 = vmor %vm1220_vm12, %vm1221_vm11  ;;  %1694 = vmatpush.bf16.msra.mxu2 %v5464_v54 }
 0xc4c   :  { %v1217_v49 = vsub.f32 1.0, %v1216_v48 }
 0xc4e   :  { %v1218_v50 = vmul.f32 %v4637_v42, %v1217_v49 }
 0xc50   :  { %v1219_v32 = vadd.f32 %v4637_v42, %v1218_v50 }
 0xc52   :  { %v1223_v7 = vsel %vm1222_vm13, %v4637_v42, %v1219_v32 }
 0xc53   :  { %v1228_v25 = vsel %vm1225_vm14, %v1227_v51, %v1223_v7 }
 0xc54   :  { %v1248_v40 = vmul.f32 %v1228_v25, %v5468_v15  ;;  %v1258_v15 = vld [vmem:[#allocation4 + $0x18] sm:$0xf] }
 0xc55   :  { %4441 = vmatmul.msk.bf16.vlgmr.msra.gmra.mxu0 %vm146_vm0, %v1258_v15 }
 0xc56   :  { %1608 = vmatpush.bf16.msra.mxu0 %v5478_v43 }
 0xc5a   :  { %1609 = vmatpush.bf16.msra.mxu0 %v5481_v9 }
 0xc92   :  { %v1233_v52 = vpop.permute.xlu2 %1232 }
 0xc93   :  { %v1235_v55 = vmul.f32 %v1233_v52, %v1228_v25 }
 0xc95   :  { %1237 = vrot.lane.b32.xlu0 %v1235_v55, %s5107_s25 }
 0xcb3   :  { %v1121_v4 = vpop.f32.mrf.mxu1 }
 0xcb4   :  { %v1145_v57 = vadd.f32 %v1121_v4, %v5280_v24  ;;  %v1125_v62 = vadd.f32 %v1121_v4, %v1102_v61 }
 0xcb6   :  { %1147 = vrot.lane.b32.xlu2 %v1145_v57, %s5107_s25  ;;  %v4437_v63 = vmul.f32 -1.442695, %v1125_v62 }
 0xcb8   :  { %4638 = vpow2.f32 %v4437_v63 }
 0xcbb   :  { %v1123_v10 = vpop.f32.mrf.mxu1 }
 0xcbe   :  { %v4639_v0 = vpop.eup %4638 }
 0xcbf   :  { %v1129_v5 = vadd.f32 1.0, %v4639_v0 }
 0xcc1   :  { %4640 = vrcp.f32 %v1129_v5  ;;  %v1141_v23 = vand.u32 2147483648, %v1129_v5  ;;  %vm1135_vm1 = vweird.f32 %v1129_v5  ;;  %v1139_v27 = vand.u32 2147483647, %v1129_v5 }
 0xcc3   :  { %v1142_v59 = vor.u32 1.1754944e-38, %v1141_v23  ;;  %vm1140_vm3 = vcmp.eq.f32.partialorder %v1139_v27, 8.507059e+37 }
 0xcc7   :  { %v4641_v12 = vpop.eup %4640 }
 0xcc8   :  { %v1131_v13 = vmul.f32 %v4641_v12, %v1129_v5  ;;  %vm1136_vm15 = vweird.f32 %v4641_v12 }
 0xcc9   :  { %vm1137_vm2 = vmor %vm1135_vm1, %vm1136_vm15 }
 0xcca   :  { %v1132_v18 = vsub.f32 1.0, %v1131_v13 }
 0xccc   :  { %v1133_v8 = vmul.f32 %v4641_v12, %v1132_v18 }
 0xcce   :  { %v1134_v45 = vadd.f32 %v4641_v12, %v1133_v8 }
 0xcd0   :  { %v1138_v17 = vsel %vm1137_vm2, %v4641_v12, %v1134_v45 }
 0xcd1   :  { %v1143_v36 = vsel %vm1140_vm3, %v1142_v59, %v1138_v17 }
 0xcd2   :  { %v1157_v7 = vsub.f32 1.0, %v1143_v36  ;;  %v1163_v52 = vmul.f32 %v1143_v36, %v5492_v30  ;;  %v1356_v30 = vpop.f32.mrf.mxu2  ;;  %v1271_v0 = vpop.f32.mrf.mxu0 }
 0xcd3   :  { %v1357_v18 = vadd.f32 %v5512_v34, %v1356_v30 }
 0xcda   :  { %v1358_v62 = vpop.f32.mrf.mxu2  ;;  %v1273_v5 = vpop.f32.mrf.mxu0 }
 0xd07   :  { %v1238_v14 = vpop.permute.xlu0 %1237 }
 0xd08   :  { %v1240_v20 = vadd.f32 %v1238_v14, %v1187_v35  ;;  %v1242_v35 = vsub.f32 1.0, %v1228_v25 }
 0xd0a   :  { %4642 = vtanh.f32 %v1240_v20 }
 0xd10   :  { %v4643_v22 = vpop.eup %4642  ;;  %v1148_v31 = vpop.permute.xlu2 %1147 }
 0xd11   :  { %1244 = vrot.lane.b32.xlu1 %v4643_v22, %s5116_s12  ;;  %v1150_v38 = vmul.f32 %v1148_v31, %v1143_v36 }
 0xd19   :  { %1152 = vrot.lane.b32.xlu1 %v1150_v38, %s5107_s25 }
 0xd83   :  { %v1245_v39 = vpop.permute.xlu1 %1244 }
 0xd84   :  { %v1247_v41 = vmul.f32 %v1245_v39, %v1242_v35 }
 0xd86   :  { %v5527_v42 = vadd.f32 %v1248_v40, %v1247_v41 }
 0xd88   :  { %v5531_v47 = vpack.c.bf16 %v5527_v42, %v5527_v42 }
 0xd8a   :  { %v1360_v48 = vunpack.c.l.b16 %v5531_v47 }
 0xd8b   :  { %v1153_v49 = vpop.permute.xlu1 %1152 }
 0xd8c   :  { %v1155_v50 = vadd.f32 %v1153_v49, %v1102_v61  ;;  %v1361_v32 = vpack.c.b16 %v1360_v48, %v1360_v48 }
 0xd8e   :  { %4644 = vtanh.f32 %v1155_v50  ;;  %1362 = vrot.lane.b32.xlu0 %v1361_v32, %s5116_s12 }
 0xd94   :  { %v4645_v1 = vpop.eup %4644 }
 0xd95   :  { %1159 = vrot.lane.b32.xlu2 %v4645_v1, %s5116_s12  ;;  %v1272_v1 = vadd.f32 %v5521_v28, %v1271_v0 }
 0xdef   :  { %v1160_v51 = vpop.permute.xlu2 %1159 }
 0xdf0   :  { %v1162_v25 = vmul.f32 %v1160_v51, %v1157_v7 }
 0xdf2   :  { %v5543_v55 = vadd.f32 %v1163_v52, %v1162_v25 }
 0xdf4   :  { %v5547_v4 = vpack.c.bf16 %v5543_v55, %v5543_v55 }
 0xdf6   :  { %v1275_v57 = vunpack.c.l.b16 %v5547_v4 }
 0xdf8   :  { %v1276_v10 = vpack.c.b16 %v1275_v57, %v1275_v57 }
 0xdfa   :  { %1277 = vrot.lane.b32.xlu0 %v1276_v10, %s5116_s12 }
 0xe00   :  { %v1363_v61 = vpop.permute.xlu0 %1362 }
 0xe01   :  { %4445 = vmatmul.msk.bf16.vlgmr.msra.gmra.mxu3 %vm146_vm0, %v1363_v61 }
 0xe02   :  { %1713 = vmatpush.bf16.msra.mxu3 %v5485_v16 }
 0xe06   :  { %1714 = vmatpush.bf16.msra.mxu3 %v5488_v6 }
 0xe6c   :  { %v1278_v63 = vpop.permute.xlu0 %1277 }
 0xe6d   :  { %4442 = vmatmul.msk.bf16.vlgmr.msra.gmra.mxu1 %vm146_vm0, %v1278_v63 }
 0xe6e   :  { %1628 = vmatpush.bf16.msra.mxu1 %v5502_v33 }
 0xe72   :  { %1629 = vmatpush.bf16.msra.mxu1 %v5506_v56 }
 0xe84   :  { %v1376_v12 = vpop.f32.mrf.mxu3 }
 0xe85   :  { %v1400_v13 = vadd.f32 %v1376_v12, %v5276_v19  ;;  %v1380_v20 = vadd.f32 %v1376_v12, %v1357_v18 }
 0xe87   :  { %1402 = vrot.lane.b32.xlu1 %v1400_v13, %s5107_s25  ;;  %v4446_v8 = vmul.f32 -1.442695, %v1380_v20 }
 0xe89   :  { %4646 = vpow2.f32 %v4446_v8 }
 0xe8c   :  { %v1378_v14 = vpop.f32.mrf.mxu3 }
 0xe8f   :  { %v4647_v45 = vpop.eup %4646 }
 0xe90   :  { %v1384_v22 = vadd.f32 1.0, %v4647_v45 }
 0xe92   :  { %4648 = vrcp.f32 %v1384_v22  ;;  %v1396_v39 = vand.u32 2147483648, %v1384_v22  ;;  %vm1390_vm5 = vweird.f32 %v1384_v22  ;;  %v1394_v40 = vand.u32 2147483647, %v1384_v22 }
 0xe94   :  { %v1397_v48 = vor.u32 1.1754944e-38, %v1396_v39  ;;  %vm1395_vm7 = vcmp.eq.f32.partialorder %v1394_v40, 8.507059e+37 }
 0xe98   :  { %v4649_v23 = vpop.eup %4648 }
 0xe99   :  { %v1386_v27 = vmul.f32 %v4649_v23, %v1384_v22  ;;  %vm1391_vm4 = vweird.f32 %v4649_v23 }
 0xe9a   :  { %vm1392_vm6 = vmor %vm1390_vm5, %vm1391_vm4 }
 0xe9b   :  { %v1387_v31 = vsub.f32 1.0, %v1386_v27 }
 0xe9d   :  { %v1388_v36 = vmul.f32 %v4649_v23, %v1387_v31 }
 0xe9f   :  { %v1389_v35 = vadd.f32 %v4649_v23, %v1388_v36 }
 0xea1   :  { %v1393_v41 = vsel %vm1392_vm6, %v4649_v23, %v1389_v35 }
 0xea2   :  { %v1398_v50 = vsel %vm1395_vm7, %v1397_v48, %v1393_v41 }
 0xea3   :  { %v1412_v45 = vsub.f32 1.0, %v1398_v50  ;;  %v1418_v23 = vmul.f32 %v1398_v50, %v5527_v42  ;;  %v1428_v42 = vld [vmem:[#allocation4 + $0x1c] sm:$0xf] }
 0xea4   :  { %4447 = vmatmul.msk.bf16.vlgmr.msrb.gmra.mxu0 %vm146_vm0, %v1428_v42 }
 0xea5   :  { %1778 = vmatpush.bf16.msrb.mxu0 %v5478_v43 }
 0xea9   :  { %1779 = vmatpush.bf16.msrb.mxu0 %v5481_v9 }
 0xeea   :  { %v1291_v17 = vpop.f32.mrf.mxu1 }
 0xeeb   :  { %v1315_v59 = vadd.f32 %v1291_v17, %v5280_v24  ;;  %v1295_v3 = vadd.f32 %v1291_v17, %v1272_v1 }
 0xeed   :  { %1317 = vrot.lane.b32.xlu1 %v1315_v59, %s5107_s25  ;;  %v4443_v15 = vmul.f32 -1.442695, %v1295_v3 }
 0xeef   :  { %4650 = vpow2.f32 %v4443_v15 }
 0xef2   :  { %v1293_v38 = vpop.f32.mrf.mxu1 }
 0xef5   :  { %v4651_v7 = vpop.eup %4650 }
 0xef6   :  { %v1299_v51 = vadd.f32 1.0, %v4651_v7 }
 0xef8   :  { %4652 = vrcp.f32 %v1299_v51  ;;  %v1311_v5 = vand.u32 2147483648, %v1299_v51  ;;  %vm1305_vm9 = vweird.f32 %v1299_v51  ;;  %v1309_v0 = vand.u32 2147483647, %v1299_v51 }
 0xef9   :  { %v1403_v49 = vpop.permute.xlu1 %1402 }
 0xefa   :  { %v1405_v32 = vmul.f32 %v1403_v49, %v1398_v50  ;;  %v1312_v14 = vor.u32 1.1754944e-38, %v1311_v5  ;;  %vm1310_vm11 = vcmp.eq.f32.partialorder %v1309_v0, 8.507059e+37 }
 0xefc   :  { %1407 = vrot.lane.b32.xlu2 %v1405_v32, %s5107_s25 }
 0xefe   :  { %v4653_v52 = vpop.eup %4652 }
 0xeff   :  { %v1301_v25 = vmul.f32 %v4653_v52, %v1299_v51  ;;  %vm1306_vm8 = vweird.f32 %v4653_v52 }
 0xf00   :  { %vm1307_vm10 = vmor %vm1305_vm9, %vm1306_vm8 }
 0xf01   :  { %v1302_v10 = vsub.f32 1.0, %v1301_v25 }
 0xf03   :  { %v1303_v30 = vmul.f32 %v4653_v52, %v1302_v10 }
 0xf05   :  { %v1304_v62 = vadd.f32 %v4653_v52, %v1303_v30 }
 0xf07   :  { %v1308_v12 = vsel %vm1307_vm10, %v4653_v52, %v1304_v62 }
 0xf08   :  { %v1313_v20 = vsel %vm1310_vm11, %v1312_v14, %v1308_v12 }
 0xf09   :  { %v1327_v49 = vsub.f32 1.0, %v1313_v20  ;;  %v1333_v32 = vmul.f32 %v1313_v20, %v5543_v55 }
 0xf21   :  { %v1441_v5 = vpop.f32.mrf.mxu0 }
 0xf29   :  { %v1443_v12 = vpop.f32.mrf.mxu0 }
 0xf56   :  { %v1408_v57 = vpop.permute.xlu2 %1407 }
 0xf57   :  { %v1410_v61 = vadd.f32 %v1408_v57, %v1357_v18  ;;  %v1513_v18 = vld [vmem:[#allocation7 + $0x40] sm:$0xf] }
 0xf58   :  { %4450 = vmatmul.msk.bf16.vlgmr.msrb.gmra.mxu2 %vm146_vm0, %v1513_v18 }
 0xf59   :  { %4654 = vtanh.f32 %v1410_v61  ;;  %1863 = vmatpush.bf16.msrb.mxu2 %v5461_v53 }
 0xf5d   :  { %1864 = vmatpush.bf16.msrb.mxu2 %v5464_v54 }
 0xf5f   :  { %v4655_v63 = vpop.eup %4654  ;;  %v1318_v13 = vpop.permute.xlu1 %1317 }
 0xf60   :  { %1414 = vrot.lane.b32.xlu0 %v4655_v63, %s5116_s12  ;;  %v1320_v8 = vmul.f32 %v1318_v13, %v1313_v20 }
 0xf68   :  { %1322 = vrot.lane.b32.xlu0 %v1320_v8, %s5107_s25 }
 0xfd2   :  { %v1415_v22 = vpop.permute.xlu0 %1414 }
 0xfd3   :  { %v1417_v27 = vmul.f32 %v1415_v22, %v1412_v45 }
 0xfd5   :  { %v5570_v17 = vadd.f32 %v1418_v23, %v1417_v27 }
 0xfd7   :  { %v5574_v31 = vpack.c.bf16 %v5570_v17, %v5570_v17 }
 0xfd9   :  { %v1530_v59 = vunpack.c.l.b16 %v5574_v31 }
 0xfda   :  { %v1323_v36 = vpop.permute.xlu0 %1322 }
 0xfdb   :  { %v1325_v38 = vadd.f32 %v1323_v36, %v1272_v1  ;;  %v1531_v35 = vpack.c.b16 %v1530_v59, %v1530_v59  ;;  %v1526_v41 = vpop.f32.mrf.mxu2 }
 0xfdc   :  { %v1527_v10 = vadd.f32 %v5512_v34, %v1526_v41 }
 0xfdd   :  { %4656 = vtanh.f32 %v1325_v38  ;;  %1532 = vrot.lane.b32.xlu2 %v1531_v35, %s5116_s12 }
 0xfe3   :  { %v4657_v39 = vpop.eup %4656  ;;  %v1528_v48 = vpop.f32.mrf.mxu2 }
 0xfe4   :  { %1329 = vrot.lane.b32.xlu1 %v4657_v39, %s5116_s12 }
0x1037   :  { %v1533_v40 = vpop.permute.xlu2 %1532 }
0x1038   :  { %4451 = vmatmul.msk.bf16.vlgmr.msrb.gmra.mxu3 %vm146_vm0, %v1533_v40  ;;  %v1442_v40 = vadd.f32 %v5521_v28, %v1441_v5 }
0x1039   :  { %1883 = vmatpush.bf16.msrb.mxu3 %v5485_v16 }
0x103d   :  { %1884 = vmatpush.bf16.msrb.mxu3 %v5488_v6 }
0x1056   :  { %v1330_v50 = vpop.permute.xlu1 %1329 }
0x1057   :  { %v1332_v1 = vmul.f32 %v1330_v50, %v1327_v49 }
0x1059   :  { %v5586_v3 = vadd.f32 %v1333_v32, %v1332_v1 }
0x105b   :  { %v5590_v15 = vpack.c.bf16 %v5586_v3, %v5586_v3 }
0x105d   :  { %v1445_v7 = vunpack.c.l.b16 %v5590_v15 }
0x105f   :  { %v1446_v51 = vpack.c.b16 %v1445_v7, %v1445_v7 }
0x1061   :  { %1447 = vrot.lane.b32.xlu2 %v1446_v51, %s5116_s12 }
0x10bb   :  { %v1546_v52 = vpop.f32.mrf.mxu3  ;;  %v1448_v25 = vpop.permute.xlu2 %1447 }
0x10bc   :  { %4448 = vmatmul.msk.bf16.vlgmr.msrb.gmra.mxu1 %vm146_vm0, %v1448_v25  ;;  %v1570_v57 = vadd.f32 %v1546_v52, %v5276_v19  ;;  %v1550_v61 = vadd.f32 %v1546_v52, %v1527_v10 }
0x10bd   :  { %1798 = vmatpush.bf16.msrb.mxu1 %v5502_v33 }
0x10be   :  { %1572 = vrot.lane.b32.xlu0 %v1570_v57, %s5107_s25  ;;  %v4452_v30 = vmul.f32 -1.442695, %v1550_v61 }
0x10c0   :  { %4658 = vpow2.f32 %v4452_v30 }
0x10c1   :  { %1799 = vmatpush.bf16.msrb.mxu1 %v5506_v56 }
0x10c3   :  { %v1548_v55 = vpop.f32.mrf.mxu3 }
0x10c6   :  { %v4659_v62 = vpop.eup %4658 }
0x10c7   :  { %v1554_v63 = vadd.f32 1.0, %v4659_v62 }
0x10c9   :  { %4660 = vrcp.f32 %v1554_v63  ;;  %v1566_v18 = vand.u32 2147483648, %v1554_v63  ;;  %vm1560_vm13 = vweird.f32 %v1554_v63  ;;  %v1564_v45 = vand.u32 2147483647, %v1554_v63 }
0x10cb   :  { %v1567_v23 = vor.u32 1.1754944e-38, %v1566_v18  ;;  %vm1565_vm15 = vcmp.eq.f32.partialorder %v1564_v45, 8.507059e+37 }
0x10cf   :  { %v4661_v0 = vpop.eup %4660 }
0x10d0   :  { %v1556_v13 = vmul.f32 %v4661_v0, %v1554_v63  ;;  %vm1561_vm12 = vweird.f32 %v4661_v0 }
0x10d1   :  { %vm1562_vm14 = vmor %vm1560_vm13, %vm1561_vm12 }
0x10d2   :  { %v1557_v14 = vsub.f32 1.0, %v1556_v13 }
0x10d4   :  { %v1558_v20 = vmul.f32 %v4661_v0, %v1557_v14 }
0x10d6   :  { %v1559_v8 = vadd.f32 %v4661_v0, %v1558_v20 }
0x10d8   :  { %v1563_v22 = vsel %vm1562_vm14, %v4661_v0, %v1559_v8  ;;  %v1683_v8 = vld [vmem:[#allocation7 + $0x3c] sm:$0xf] }
0x10d9   :  { %v1568_v59 = vsel %vm1565_vm15, %v1567_v23, %v1563_v22  ;;  %4456 = vmatmul.msk.bf16.vlgmr.msra.gmra.mxu2 %vm146_vm0, %v1683_v8 }
0x10da   :  { %v1582_v12 = vsub.f32 1.0, %v1568_v59  ;;  %v1588_v13 = vmul.f32 %v1568_v59, %v5570_v17  ;;  %2033 = vmatpush.bf16.msra.mxu2 %v5461_v53 }
0x10de   :  { %2034 = vmatpush.bf16.msra.mxu2 %v5464_v54 }
0x1130   :  { %v1573_v27 = vpop.permute.xlu0 %1572 }
0x1131   :  { %v1575_v36 = vmul.f32 %v1573_v27, %v1568_v59 }
0x1133   :  { %1577 = vrot.lane.b32.xlu1 %v1575_v36, %s5107_s25 }
0x1139   :  { %v1461_v38 = vpop.f32.mrf.mxu1 }
0x113a   :  { %v1485_v35 = vadd.f32 %v1461_v38, %v5280_v24  ;;  %v1465_v42 = vadd.f32 %v1461_v38, %v1442_v40 }
0x113c   :  { %1487 = vrot.lane.b32.xlu0 %v1485_v35, %s5107_s25  ;;  %v4449_v41 = vmul.f32 -1.442695, %v1465_v42 }
0x113e   :  { %4662 = vpow2.f32 %v4449_v41 }
0x1141   :  { %v1463_v39 = vpop.f32.mrf.mxu1 }
0x1144   :  { %v4663_v48 = vpop.eup %4662 }
0x1145   :  { %v1469_v49 = vadd.f32 1.0, %v4663_v48 }
0x1147   :  { %4664 = vrcp.f32 %v1469_v49  ;;  %v1481_v57 = vand.u32 2147483648, %v1469_v49  ;;  %vm1475_vm2 = vweird.f32 %v1469_v49  ;;  %v1479_v55 = vand.u32 2147483647, %v1469_v49 }
0x1149   :  { %v1482_v30 = vor.u32 1.1754944e-38, %v1481_v57  ;;  %vm1480_vm4 = vcmp.eq.f32.partialorder %v1479_v55, 8.507059e+37 }
0x114d   :  { %v4665_v50 = vpop.eup %4664 }
0x114e   :  { %v1471_v32 = vmul.f32 %v4665_v50, %v1469_v49  ;;  %vm1476_vm1 = vweird.f32 %v4665_v50 }
0x114f   :  { %vm1477_vm3 = vmor %vm1475_vm2, %vm1476_vm1 }
0x1150   :  { %v1472_v1 = vsub.f32 1.0, %v1471_v32  ;;  %v1598_v32 = vld [vmem:[#allocation4 + $0x20] sm:$0xf] }
0x1151   :  { %4453 = vmatmul.msk.bf16.vlgmr.msra.gmra.mxu0 %vm146_vm0, %v1598_v32 }
0x1152   :  { %v1473_v7 = vmul.f32 %v4665_v50, %v1472_v1  ;;  %1948 = vmatpush.bf16.msra.mxu0 %v5478_v43 }
0x1154   :  { %v1474_v25 = vadd.f32 %v4665_v50, %v1473_v7 }
0x1156   :  { %v1478_v61 = vsel %vm1477_vm3, %v4665_v50, %v1474_v25  ;;  %1949 = vmatpush.bf16.msra.mxu0 %v5481_v9 }
0x1157   :  { %v1483_v5 = vsel %vm1480_vm4, %v1482_v30, %v1478_v61 }
0x1158   :  { %v1497_v35 = vsub.f32 1.0, %v1483_v5  ;;  %v1503_v42 = vmul.f32 %v1483_v5, %v5586_v3 }
0x115c   :  { %v1696_v36 = vpop.f32.mrf.mxu2 }
0x1164   :  { %v1698_v38 = vpop.f32.mrf.mxu2 }
0x11a5   :  { %v1578_v51 = vpop.permute.xlu1 %1577 }
0x11a6   :  { %v1580_v52 = vadd.f32 %v1578_v51, %v1527_v10  ;;  %v1697_v51 = vadd.f32 %v5512_v34, %v1696_v36 }
0x11a8   :  { %4666 = vtanh.f32 %v1580_v52 }
0x11ae   :  { %v4667_v62 = vpop.eup %4666  ;;  %v1488_v63 = vpop.permute.xlu0 %1487 }
0x11af   :  { %1584 = vrot.lane.b32.xlu2 %v4667_v62, %s5116_s12  ;;  %v1490_v0 = vmul.f32 %v1488_v63, %v1483_v5 }
0x11b1   :  { %1492 = vrot.lane.b32.xlu1 %v1490_v0, %s5107_s25 }
0x1209   :  { %v1585_v10 = vpop.permute.xlu2 %1584 }
0x120a   :  { %v1587_v14 = vmul.f32 %v1585_v10, %v1582_v12 }
0x120c   :  { %v5607_v20 = vadd.f32 %v1588_v13, %v1587_v14 }
0x120e   :  { %v5611_v18 = vpack.c.bf16 %v5607_v20, %v5607_v20 }
0x1210   :  { %v1700_v45 = vunpack.c.l.b16 %v5611_v18 }
0x1212   :  { %v1701_v22 = vpack.c.b16 %v1700_v45, %v1700_v45 }
0x1214   :  { %1702 = vrot.lane.b32.xlu2 %v1701_v22, %s5116_s12 }
0x1223   :  { %v1493_v17 = vpop.permute.xlu1 %1492 }
0x1224   :  { %v1495_v23 = vadd.f32 %v1493_v17, %v1442_v40  ;;  %v1611_v17 = vpop.f32.mrf.mxu0 }
0x1225   :  { %v1612_v38 = vadd.f32 %v5521_v28, %v1611_v17  ;;  %v1853_v17 = vld [vmem:[#allocation7 + $0x38] sm:$0xf] }
0x1226   :  { %4668 = vtanh.f32 %v1495_v23  ;;  %4462 = vmatmul.msk.bf16.vlgmr.msrb.gmra.mxu2 %vm146_vm0, %v1853_v17 }
0x1227   :  { %2203 = vmatpush.bf16.msrb.mxu2 %v5461_v53 }
0x122b   :  { %2204 = vmatpush.bf16.msrb.mxu2 %v5464_v54 }
0x122c   :  { %v4669_v27 = vpop.eup %4668  ;;  %v1613_v23 = vpop.f32.mrf.mxu0 }
0x122d   :  { %1499 = vrot.lane.b32.xlu0 %v4669_v27, %s5116_s12 }
0x126e   :  { %v1703_v59 = vpop.permute.xlu2 %1702 }
0x126f   :  { %4457 = vmatmul.msk.bf16.vlgmr.msra.gmra.mxu3 %vm146_vm0, %v1703_v59 }
0x1270   :  { %2053 = vmatpush.bf16.msra.mxu3 %v5485_v16 }
0x1274   :  { %2054 = vmatpush.bf16.msra.mxu3 %v5488_v6 }
0x129f   :  { %v1500_v39 = vpop.permute.xlu0 %1499 }
0x12a0   :  { %v1502_v41 = vmul.f32 %v1500_v39, %v1497_v35 }
0x12a2   :  { %v5623_v48 = vadd.f32 %v1503_v42, %v1502_v41 }
0x12a4   :  { %v5627_v40 = vpack.c.bf16 %v5623_v48, %v5623_v48 }
0x12a6   :  { %v1615_v49 = vunpack.c.l.b16 %v5627_v40 }
0x12a8   :  { %v1616_v50 = vpack.c.b16 %v1615_v49, %v1615_v49 }
0x12aa   :  { %1617 = vrot.lane.b32.xlu1 %v1616_v50, %s5116_s12 }
0x12f2   :  { %v1716_v3 = vpop.f32.mrf.mxu3 }
0x12f3   :  { %v1740_v1 = vadd.f32 %v1716_v3, %v5276_v19  ;;  %v1720_v25 = vadd.f32 %v1716_v3, %v1697_v51 }
0x12f5   :  { %1742 = vrot.lane.b32.xlu2 %v1740_v1, %s5107_s25  ;;  %v4458_v57 = vmul.f32 -1.442695, %v1720_v25 }
0x12f7   :  { %4670 = vpow2.f32 %v4458_v57 }
0x12fa   :  { %v1718_v7 = vpop.f32.mrf.mxu3 }
0x12fd   :  { %v4671_v55 = vpop.eup %4670 }
0x12fe   :  { %v1724_v61 = vadd.f32 1.0, %v4671_v55 }
0x1300   :  { %4672 = vrcp.f32 %v1724_v61  ;;  %v1736_v12 = vand.u32 2147483648, %v1724_v61  ;;  %vm1730_vm6 = vweird.f32 %v1724_v61  ;;  %v1734_v10 = vand.u32 2147483647, %v1724_v61 }
0x1302   :  { %v1737_v14 = vor.u32 1.1754944e-38, %v1736_v12  ;;  %vm1735_vm8 = vcmp.eq.f32.partialorder %v1734_v10, 8.507059e+37 }
0x1306   :  { %v4673_v30 = vpop.eup %4672 }
0x1307   :  { %v1726_v62 = vmul.f32 %v4673_v30, %v1724_v61  ;;  %vm1731_vm5 = vweird.f32 %v4673_v30 }
0x1308   :  { %vm1732_vm7 = vmor %vm1730_vm6, %vm1731_vm5 }
0x1309   :  { %v1727_v63 = vsub.f32 1.0, %v1726_v62 }
0x130b   :  { %v1728_v5 = vmul.f32 %v4673_v30, %v1727_v63 }
0x130d   :  { %v1729_v0 = vadd.f32 %v4673_v30, %v1728_v5 }
0x130f   :  { %v1733_v13 = vsel %vm1732_vm7, %v4673_v30, %v1729_v0 }
0x1310   :  { %v1738_v45 = vsel %vm1735_vm8, %v1737_v14, %v1733_v13 }
0x1311   :  { %v1752_v5 = vsub.f32 1.0, %v1738_v45  ;;  %v1758_v12 = vmul.f32 %v1738_v45, %v5607_v20 }
0x131c   :  { %v1618_v52 = vpop.permute.xlu1 %1617 }
0x131d   :  { %4454 = vmatmul.msk.bf16.vlgmr.msra.gmra.mxu1 %vm146_vm0, %v1618_v52 }
0x131e   :  { %1968 = vmatpush.bf16.msra.mxu1 %v5502_v33 }
0x1322   :  { %1969 = vmatpush.bf16.msra.mxu1 %v5506_v56 }
0x134f   :  { %v1743_v8 = vpop.permute.xlu2 %1742 }
0x1350   :  { %v1745_v22 = vmul.f32 %v1743_v8, %v1738_v45 }
0x1352   :  { %1747 = vrot.lane.b32.xlu0 %v1745_v22, %s5107_s25 }
0x139a   :  { %v1631_v27 = vpop.f32.mrf.mxu1 }
0x139b   :  { %v1655_v59 = vadd.f32 %v1631_v27, %v5280_v24  ;;  %v1635_v42 = vadd.f32 %v1631_v27, %v1612_v38 }
0x139d   :  { %1657 = vrot.lane.b32.xlu2 %v1655_v59, %s5107_s25  ;;  %v4455_v41 = vmul.f32 -1.442695, %v1635_v42 }
0x13a2   :  { %v1633_v36 = vpop.f32.mrf.mxu1 }
0x13c4   :  { %v1748_v35 = vpop.permute.xlu0 %1747 }
0x13c5   :  { %v1750_v39 = vadd.f32 %v1748_v35, %v1697_v51 }
0x13c7   :  { %4674 = vtanh.f32 %v1750_v39 }
0x13c8   :  { %4676 = vpow2.f32 %v4455_v41  ;;  %v1866_v41 = vpop.f32.mrf.mxu2 }
0x13cd   :  { %v4675_v49 = vpop.eup %4674 }
0x13ce   :  { %1754 = vrot.lane.b32.xlu1 %v4675_v49, %s5116_s12  ;;  %v4677_v50 = vpop.eup %4676  ;;  %v1768_v49 = vld [vmem:[#allocation4 + $0x24] sm:$0xf] }
0x13cf   :  { %v1639_v32 = vadd.f32 1.0, %v4677_v50  ;;  %4459 = vmatmul.msk.bf16.vlgmr.msrb.gmra.mxu0 %vm146_vm0, %v1768_v49 }
0x13d0   :  { %2118 = vmatpush.bf16.msrb.mxu0 %v5478_v43 }
0x13d1   :  { %4678 = vrcp.f32 %v1639_v32  ;;  %v1651_v57 = vand.u32 2147483648, %v1639_v32  ;;  %vm1645_vm10 = vweird.f32 %v1639_v32  ;;  %v1649_v55 = vand.u32 2147483647, %v1639_v32 }
0x13d3   :  { %v1652_v61 = vor.u32 1.1754944e-38, %v1651_v57  ;;  %vm1650_vm12 = vcmp.eq.f32.partialorder %v1649_v55, 8.507059e+37 }
0x13d4   :  { %2119 = vmatpush.bf16.msrb.mxu0 %v5481_v9 }
0x13d7   :  { %v4679_v3 = vpop.eup %4678 }
0x13d8   :  { %v1641_v1 = vmul.f32 %v4679_v3, %v1639_v32  ;;  %vm1646_vm9 = vweird.f32 %v4679_v3 }
0x13d9   :  { %vm1647_vm11 = vmor %vm1645_vm10, %vm1646_vm9 }
0x13da   :  { %v1642_v7 = vsub.f32 1.0, %v1641_v1 }
0x13dc   :  { %v1643_v52 = vmul.f32 %v4679_v3, %v1642_v7 }
0x13de   :  { %v1644_v25 = vadd.f32 %v4679_v3, %v1643_v52 }
0x13e0   :  { %v1648_v51 = vsel %vm1647_vm11, %v4679_v3, %v1644_v25  ;;  %v1867_v3 = vadd.f32 %v5512_v34, %v1866_v41 }
0x13e1   :  { %v1653_v62 = vsel %vm1650_vm12, %v1652_v61, %v1648_v51 }
0x13e2   :  { %v1667_v59 = vsub.f32 1.0, %v1653_v62  ;;  %v1673_v35 = vmul.f32 %v1653_v62, %v5623_v48 }
0x13f7   :  { %v1658_v30 = vpop.permute.xlu2 %1657 }
0x13f8   :  { %v1660_v63 = vmul.f32 %v1658_v30, %v1653_v62 }
0x13fa   :  { %1662 = vrot.lane.b32.xlu0 %v1660_v63, %s5107_s25 }
0x1440   :  { %v1755_v0 = vpop.permute.xlu1 %1754 }
0x1441   :  { %v1757_v10 = vmul.f32 %v1755_v0, %v1752_v5 }
0x1443   :  { %v5647_v13 = vadd.f32 %v1758_v12, %v1757_v10 }
0x1445   :  { %v5651_v14 = vpack.c.bf16 %v5647_v13, %v5647_v13 }
0x1447   :  { %v1870_v8 = vunpack.c.l.b16 %v5651_v14 }
0x1449   :  { %v1871_v22 = vpack.c.b16 %v1870_v8, %v1870_v8 }
0x144b   :  { %1872 = vrot.lane.b32.xlu1 %v1871_v22, %s5116_s12 }
0x144c   :  { %v1781_v55 = vpop.f32.mrf.mxu0 }
0x144d   :  { %v1782_v22 = vadd.f32 %v5521_v28, %v1781_v55 }
0x1454   :  { %v1783_v62 = vpop.f32.mrf.mxu0 }
0x146c   :  { %v1663_v20 = vpop.permute.xlu0 %1662 }
0x146d   :  { %v1665_v45 = vadd.f32 %v1663_v20, %v1612_v38 }
0x146f   :  { %4680 = vtanh.f32 %v1665_v45 }
0x1475   :  { %v4681_v23 = vpop.eup %4680 }
0x1476   :  { %1669 = vrot.lane.b32.xlu2 %v4681_v23, %s5116_s12 }
0x14bd   :  { %v1873_v27 = vpop.permute.xlu1 %1872 }
0x14be   :  { %4463 = vmatmul.msk.bf16.vlgmr.msrb.gmra.mxu3 %vm146_vm0, %v1873_v27 }
0x14bf   :  { %2223 = vmatpush.bf16.msrb.mxu3 %v5485_v16  ;;  %v1868_v16 = vpop.f32.mrf.mxu2 }
0x14c3   :  { %2224 = vmatpush.bf16.msrb.mxu3 %v5488_v6 }
0x14d0   :  { %v1670_v36 = vpop.permute.xlu2 %1669 }
0x14d1   :  { %v1672_v53 = vmul.f32 %v1670_v36, %v1667_v59 }
0x14d3   :  { %v5663_v39 = vadd.f32 %v1673_v35, %v1672_v53 }
0x14d5   :  { %v5667_v54 = vpack.c.bf16 %v5663_v39, %v5663_v39 }
0x14d7   :  { %v1785_v38 = vunpack.c.l.b16 %v5667_v54 }
0x14d9   :  { %v1786_v42 = vpack.c.b16 %v1785_v38, %v1785_v38 }
0x14db   :  { %1787 = vrot.lane.b32.xlu0 %v1786_v42, %s5116_s12 }
0x1541   :  { %v1886_v6 = vpop.f32.mrf.mxu3 }
0x1542   :  { %v1910_v48 = vadd.f32 %v1886_v6, %v5276_v19  ;;  %v1890_v1 = vadd.f32 %v1886_v6, %v1867_v3 }
0x1544   :  { %1912 = vrot.lane.b32.xlu1 %v1910_v48, %s5107_s25  ;;  %v4464_v7 = vmul.f32 -1.442695, %v1890_v1  ;;  %v5687_v1 = vld [vmem:[#allocation10 + $0x8] sm:$0xff] }
0x1546   :  { %4682 = vpow2.f32 %v4464_v7  ;;  %v5690_v7 = vld [vmem:[#allocation10] sm:$0xff] }
0x1549   :  { %v1888_v50 = vpop.f32.mrf.mxu3 }
0x154c   :  { %v4683_v43 = vpop.eup %4682 }
0x154d   :  { %v1788_v32 = vpop.permute.xlu0 %1787  ;;  %v1894_v9 = vadd.f32 1.0, %v4683_v43 }
0x154e   :  { %4460 = vmatmul.msk.bf16.vlgmr.msrb.gmra.mxu1 %vm146_vm0, %v1788_v32 }
0x154f   :  { %2138 = vmatpush.bf16.msrb.mxu1 %v5502_v33  ;;  %4684 = vrcp.f32 %v1894_v9  ;;  %v1906_v30 = vand.u32 2147483648, %v1894_v9  ;;  %vm1900_vm14 = vweird.f32 %v1894_v9  ;;  %v1904_v33 = vand.u32 2147483647, %v1894_v9 }
0x1551   :  { %v1907_v34 = vor.u32 1.1754944e-38, %v1906_v30  ;;  %vm1905_vm1 = vcmp.eq.f32.partialorder %v1904_v33, 8.507059e+37 }
0x1553   :  { %2139 = vmatpush.bf16.msrb.mxu1 %v5506_v56 }
0x1555   :  { %v4685_v52 = vpop.eup %4684 }
0x1556   :  { %v1896_v25 = vmul.f32 %v4685_v52, %v1894_v9  ;;  %vm1901_vm13 = vweird.f32 %v4685_v52 }
0x1557   :  { %vm1902_vm15 = vmor %vm1900_vm14, %vm1901_vm13 }
0x1558   :  { %v1897_v57 = vsub.f32 1.0, %v1896_v25 }
0x155a   :  { %v1898_v51 = vmul.f32 %v4685_v52, %v1897_v57 }
0x155c   :  { %v1899_v61 = vadd.f32 %v4685_v52, %v1898_v51 }
0x155e   :  { %v1903_v56 = vsel %vm1902_vm15, %v4685_v52, %v1899_v61 }
0x155f   :  { %v1908_v5 = vsel %vm1905_vm1, %v1907_v34, %v1903_v56  ;;  %v1938_v56 = vld [vmem:[#allocation4 + $0x28] sm:$0xf]  ;;  %v5707_v34 = vld [vmem:[#allocation9] sm:$0xff] }
0x1560   :  { %v1922_v43 = vsub.f32 1.0, %v1908_v5  ;;  %v1928_v52 = vmul.f32 %v1908_v5, %v5647_v13  ;;  %4465 = vmatmul.msk.bf16.vlgmr.msra.gmra.mxu0 %vm146_vm0, %v1938_v56  ;;  %v5704_v13 = vld [vmem:[#allocation9 + $0x8] sm:$0xff] }
0x1561   :  { %2288 = vmatpush.bf16.msra.mxu0 %v5704_v13 }
0x1565   :  { %2289 = vmatpush.bf16.msra.mxu0 %v5707_v34 }
0x15b6   :  { %v1913_v63 = vpop.permute.xlu1 %1912 }
0x15b7   :  { %v1915_v0 = vmul.f32 %v1913_v63, %v1908_v5  ;;  %v5711_v5 = vld [vmem:[#allocation13 + $0x8] sm:$0xff] }
0x15b9   :  { %1917 = vrot.lane.b32.xlu2 %v1915_v0, %s5107_s25  ;;  %v5714_v0 = vld [vmem:[#allocation13] sm:$0xff] }
0x15cb   :  { %v1801_v12 = vpop.f32.mrf.mxu1 }
0x15cc   :  { %v1825_v10 = vadd.f32 %v1801_v12, %v5280_v24  ;;  %v1805_v17 = vadd.f32 %v1801_v12, %v1782_v22 }
0x15ce   :  { %1827 = vrot.lane.b32.xlu0 %v1825_v10, %s5107_s25  ;;  %v4461_v20 = vmul.f32 -1.442695, %v1805_v17 }
0x15d3   :  { %v1803_v8 = vpop.f32.mrf.mxu1 }
0x1613   :  { %v1918_v45 = vpop.permute.xlu2 %1917 }
0x1614   :  { %v1920_v23 = vadd.f32 %v1918_v45, %v1867_v3  ;;  %v2023_v3 = vld [vmem:[#allocation7 + $0x34] sm:$0xf] }
0x1615   :  { %4468 = vmatmul.msk.bf16.vlgmr.msra.gmra.mxu2 %vm146_vm0, %v2023_v3 }
0x1616   :  { %4686 = vtanh.f32 %v1920_v23  ;;  %2373 = vmatpush.bf16.msra.mxu2 %v5687_v1 }
0x1617   :  { %4688 = vpow2.f32 %v4461_v20 }
0x161a   :  { %2374 = vmatpush.bf16.msra.mxu2 %v5690_v7 }
0x161c   :  { %v4687_v27 = vpop.eup %4686 }
0x161d   :  { %v4689_v59 = vpop.eup %4688  ;;  %1924 = vrot.lane.b32.xlu1 %v4687_v27, %s5116_s12 }
0x161e   :  { %v1809_v36 = vadd.f32 1.0, %v4689_v59 }
0x1620   :  { %4690 = vrcp.f32 %v1809_v36  ;;  %v1821_v16 = vand.u32 2147483648, %v1809_v36  ;;  %vm1815_vm3 = vweird.f32 %v1809_v36  ;;  %v1819_v28 = vand.u32 2147483647, %v1809_v36 }
0x1622   :  { %v1822_v6 = vor.u32 1.1754944e-38, %v1821_v16  ;;  %vm1820_vm5 = vcmp.eq.f32.partialorder %v1819_v28, 8.507059e+37  ;;  %v5738_v28 = vld [vmem:[%s6494_s7] ss:$0 sm:$0xff] }
0x1626   :  { %v4691_v35 = vpop.eup %4690 }
0x1627   :  { %v1811_v53 = vmul.f32 %v4691_v35, %v1809_v36  ;;  %vm1816_vm2 = vweird.f32 %v4691_v35 }
0x1628   :  { %vm1817_vm4 = vmor %vm1815_vm3, %vm1816_vm2 }
0x1629   :  { %v1812_v38 = vsub.f32 1.0, %v1811_v53  ;;  %v5730_v53 = vld [vmem:[#allocation12] sm:$0xff] }
0x162b   :  { %v1813_v42 = vmul.f32 %v4691_v35, %v1812_v38 }
0x162d   :  { %v1814_v41 = vadd.f32 %v4691_v35, %v1813_v42 }
0x162f   :  { %v1818_v49 = vsel %vm1817_vm4, %v4691_v35, %v1814_v41  ;;  %v5727_v35 = vld [vmem:[#allocation12 + $0x8] sm:$0xff] }
0x1630   :  { %v1823_v50 = vsel %vm1820_vm5, %v1822_v6, %v1818_v49 }
0x1631   :  { %v1837_v12 = vsub.f32 1.0, %v1823_v50  ;;  %v1843_v8 = vmul.f32 %v1823_v50, %v5663_v39  ;;  %v1951_v39 = vpop.f32.mrf.mxu0 }
0x1639   :  { %v1953_v38 = vpop.f32.mrf.mxu0 }
0x1640   :  { %v1828_v48 = vpop.permute.xlu0 %1827 }
0x1641   :  { %v1830_v32 = vmul.f32 %v1828_v48, %v1823_v50 }
0x1643   :  { %1832 = vrot.lane.b32.xlu2 %v1830_v32, %s5107_s25 }
0x168f   :  { %v1925_v9 = vpop.permute.xlu1 %1924 }
0x1690   :  { %v1927_v25 = vmul.f32 %v1925_v9, %v1922_v43 }
0x1692   :  { %v5694_v57 = vadd.f32 %v1928_v52, %v1927_v25 }
0x1694   :  { %v5698_v55 = vpack.c.bf16 %v5694_v57, %v5694_v57 }
0x1696   :  { %v2040_v51 = vunpack.c.l.b16 %v5698_v55 }
0x1698   :  { %v2041_v61 = vpack.c.b16 %v2040_v51, %v2040_v51  ;;  %v2036_v27 = vpop.f32.mrf.mxu2 }
0x1699   :  { %v2037_v49 = vadd.f32 %v5738_v28, %v2036_v27 }
0x169a   :  { %2042 = vrot.lane.b32.xlu0 %v2041_v61, %s5116_s12 }
0x169d   :  { %v1833_v30 = vpop.permute.xlu2 %1832 }
0x169e   :  { %v1835_v33 = vadd.f32 %v1833_v30, %v1782_v22 }
0x16a0   :  { %4692 = vtanh.f32 %v1835_v33  ;;  %v2038_v59 = vpop.f32.mrf.mxu2 }
0x16a6   :  { %v4693_v62 = vpop.eup %4692 }
0x16a7   :  { %1839 = vrot.lane.b32.xlu1 %v4693_v62, %s5116_s12 }
0x170c   :  { %v2043_v63 = vpop.permute.xlu0 %2042 }
0x170d   :  { %4469 = vmatmul.msk.bf16.vlgmr.msra.gmra.mxu3 %vm146_vm0, %v2043_v63 }
0x170e   :  { %2393 = vmatpush.bf16.msra.mxu3 %v5711_v5 }
0x1712   :  { %2394 = vmatpush.bf16.msra.mxu3 %v5714_v0 }
0x1719   :  { %v1840_v10 = vpop.permute.xlu1 %1839 }
0x171a   :  { %v1842_v22 = vmul.f32 %v1840_v10, %v1837_v12 }
0x171c   :  { %v5718_v17 = vadd.f32 %v1843_v8, %v1842_v22  ;;  %v5747_v22 = vld [vmem:[%s6493_s6] ss:$0 sm:$0xff] }
0x171e   :  { %v5722_v20 = vpack.c.bf16 %v5718_v17, %v5718_v17 }
0x1720   :  { %v1955_v45 = vunpack.c.l.b16 %v5722_v20 }
0x1722   :  { %v1956_v23 = vpack.c.b16 %v1955_v45, %v1955_v45  ;;  %v1952_v45 = vadd.f32 %v5747_v22, %v1951_v39 }
0x1724   :  { %1957 = vrot.lane.b32.xlu2 %v1956_v23, %s5116_s12 }
0x177e   :  { %v1958_v36 = vpop.permute.xlu2 %1957 }
0x177f   :  { %4466 = vmatmul.msk.bf16.vlgmr.msra.gmra.mxu1 %vm146_vm0, %v1958_v36 }
0x1780   :  { %2308 = vmatpush.bf16.msra.mxu1 %v5727_v35 }
0x1784   :  { %2309 = vmatpush.bf16.msra.mxu1 %v5730_v53 }
0x1790   :  { %v2056_v42 = vpop.f32.mrf.mxu3 }
0x1791   :  { %v2080_v41 = vadd.f32 %v2056_v42, %v5276_v19  ;;  %v2060_v6 = vadd.f32 %v2056_v42, %v2037_v49 }
0x1793   :  { %2082 = vrot.lane.b32.xlu0 %v2080_v41, %s5107_s25  ;;  %v4470_v48 = vmul.f32 -1.442695, %v2060_v6 }
0x1795   :  { %4694 = vpow2.f32 %v4470_v48 }
0x1798   :  { %v2058_v16 = vpop.f32.mrf.mxu3 }
0x179b   :  { %v4695_v50 = vpop.eup %4694 }
0x179c   :  { %v2064_v32 = vadd.f32 1.0, %v4695_v50 }
0x179e   :  { %4696 = vrcp.f32 %v2064_v32  ;;  %v2076_v30 = vand.u32 2147483648, %v2064_v32  ;;  %vm2070_vm7 = vweird.f32 %v2064_v32  ;;  %v2074_v33 = vand.u32 2147483647, %v2064_v32 }
0x17a0   :  { %v2077_v56 = vor.u32 1.1754944e-38, %v2076_v30  ;;  %vm2075_vm9 = vcmp.eq.f32.partialorder %v2074_v33, 8.507059e+37 }
0x17a4   :  { %v4697_v3 = vpop.eup %4696 }
0x17a5   :  { %v2066_v43 = vmul.f32 %v4697_v3, %v2064_v32  ;;  %vm2071_vm6 = vweird.f32 %v4697_v3 }
0x17a6   :  { %vm2072_vm8 = vmor %vm2070_vm7, %vm2071_vm6 }
0x17a7   :  { %v2067_v9 = vsub.f32 1.0, %v2066_v43 }
0x17a9   :  { %v2068_v52 = vmul.f32 %v4697_v3, %v2067_v9 }
0x17ab   :  { %v2069_v61 = vadd.f32 %v4697_v3, %v2068_v52 }
0x17ad   :  { %v2073_v62 = vsel %vm2072_vm8, %v4697_v3, %v2069_v61 }
0x17ae   :  { %v2078_v10 = vsel %vm2075_vm9, %v2077_v56, %v2073_v62 }
0x17af   :  { %v2092_v62 = vsub.f32 1.0, %v2078_v10 }
0x17fc   :  { %v1971_v25 = vpop.f32.mrf.mxu1 }
0x17fd   :  { %v1995_v51 = vadd.f32 %v1971_v25, %v5280_v24  ;;  %v1975_v23 = vadd.f32 %v1971_v25, %v1952_v45 }
0x17ff   :  { %1997 = vrot.lane.b32.xlu2 %v1995_v51, %s5107_s25  ;;  %v4467_v27 = vmul.f32 -1.442695, %v1975_v23 }
0x1801   :  { %4698 = vpow2.f32 %v4467_v27 }
0x1804   :  { %v1973_v63 = vpop.f32.mrf.mxu1 }
0x1805   :  { %v2083_v12 = vpop.permute.xlu0 %2082  ;;  %v2098_v63 = vmul.f32 %v2078_v10, %v5694_v57  ;;  %v2108_v57 = vld [vmem:[#allocation4 + $0x2c] sm:$0xf] }
0x1806   :  { %v2085_v8 = vmul.f32 %v2083_v12, %v2078_v10  ;;  %4471 = vmatmul.msk.bf16.vlgmr.msrb.gmra.mxu0 %vm146_vm0, %v2108_v57 }
0x1807   :  { %v4699_v59 = vpop.eup %4698  ;;  %2458 = vmatpush.bf16.msrb.mxu0 %v5704_v13 }
0x1808   :  { %2087 = vrot.lane.b32.xlu1 %v2085_v8, %s5107_s25  ;;  %v1979_v36 = vadd.f32 1.0, %v4699_v59 }
0x180a   :  { %4700 = vrcp.f32 %v1979_v36  ;;  %v1991_v48 = vand.u32 2147483648, %v1979_v36  ;;  %vm1985_vm11 = vweird.f32 %v1979_v36  ;;  %v1989_v50 = vand.u32 2147483647, %v1979_v36 }
0x180b   :  { %2459 = vmatpush.bf16.msrb.mxu0 %v5707_v34 }
0x180c   :  { %v1992_v3 = vor.u32 1.1754944e-38, %v1991_v48  ;;  %vm1990_vm13 = vcmp.eq.f32.partialorder %v1989_v50, 8.507059e+37 }
0x1810   :  { %v4701_v38 = vpop.eup %4700 }
0x1811   :  { %v1981_v42 = vmul.f32 %v4701_v38, %v1979_v36  ;;  %vm1986_vm10 = vweird.f32 %v4701_v38 }
0x1812   :  { %vm1987_vm12 = vmor %vm1985_vm11, %vm1986_vm10 }
0x1813   :  { %v1982_v41 = vsub.f32 1.0, %v1981_v42 }
0x1815   :  { %v1983_v16 = vmul.f32 %v4701_v38, %v1982_v41 }
0x1817   :  { %v1984_v6 = vadd.f32 %v4701_v38, %v1983_v16 }
0x1819   :  { %v1988_v32 = vsel %vm1987_vm12, %v4701_v38, %v1984_v6 }
0x181a   :  { %v1993_v43 = vsel %vm1990_vm13, %v1992_v3, %v1988_v32 }
0x181b   :  { %v2007_v10 = vsub.f32 1.0, %v1993_v43  ;;  %v2013_v36 = vmul.f32 %v1993_v43, %v5718_v17 }
0x1859   :  { %v1998_v39 = vpop.permute.xlu2 %1997 }
0x185a   :  { %v2000_v9 = vmul.f32 %v1998_v39, %v1993_v43 }
0x185c   :  { %2002 = vrot.lane.b32.xlu1 %v2000_v9, %s5107_s25 }
0x187a   :  { %v2088_v52 = vpop.permute.xlu1 %2087 }
0x187b   :  { %v2090_v25 = vadd.f32 %v2088_v52, %v2037_v49 }
0x187d   :  { %4702 = vtanh.f32 %v2090_v25 }
0x1883   :  { %v4703_v51 = vpop.eup %4702 }
0x1884   :  { %2094 = vrot.lane.b32.xlu0 %v4703_v51, %s5116_s12 }
0x18ce   :  { %v2003_v61 = vpop.permute.xlu1 %2002 }
0x18cf   :  { %v2005_v30 = vadd.f32 %v2003_v61, %v1952_v45  ;;  %v2193_v45 = vld [vmem:[#allocation7 + $0x30] sm:$0xf] }
0x18d0   :  { %4474 = vmatmul.msk.bf16.vlgmr.msrb.gmra.mxu2 %vm146_vm0, %v2193_v45 }
0x18d1   :  { %4704 = vtanh.f32 %v2005_v30  ;;  %2543 = vmatpush.bf16.msrb.mxu2 %v5687_v1  ;;  %v2121_v30 = vpop.f32.mrf.mxu0 }
0x18d5   :  { %2544 = vmatpush.bf16.msrb.mxu2 %v5690_v7 }
0x18d7   :  { %v4705_v33 = vpop.eup %4704 }
0x18d8   :  { %2009 = vrot.lane.b32.xlu0 %v4705_v33, %s5116_s12 }
0x18f6   :  { %v2095_v56 = vpop.permute.xlu0 %2094 }
0x18f7   :  { %v2097_v12 = vmul.f32 %v2095_v56, %v2092_v62  ;;  %v2123_v62 = vpop.f32.mrf.mxu0 }
0x18f9   :  { %v5754_v8 = vadd.f32 %v2098_v63, %v2097_v12 }
0x18fb   :  { %v5758_v49 = vpack.c.bf16 %v5754_v8, %v5754_v8 }
0x18fd   :  { %v2210_v23 = vunpack.c.l.b16 %v5758_v49 }
0x18ff   :  { %v2211_v27 = vpack.c.b16 %v2210_v23, %v2210_v23 }
0x1901   :  { %2212 = vrot.lane.b32.xlu2 %v2211_v27, %s5116_s12 }
0x194a   :  { %v2010_v59 = vpop.permute.xlu0 %2009 }
0x194b   :  { %v2012_v38 = vmul.f32 %v2010_v59, %v2007_v10 }
0x194d   :  { %v5769_v42 = vadd.f32 %v2013_v36, %v2012_v38 }
0x194f   :  { %v5773_v41 = vpack.c.bf16 %v5769_v42, %v5769_v42 }
0x1951   :  { %v2125_v16 = vunpack.c.l.b16 %v5773_v41 }
0x1953   :  { %v2126_v6 = vpack.c.b16 %v2125_v16, %v2125_v16  ;;  %v2206_v17 = vpop.f32.mrf.mxu2 }
0x1954   :  { %v2207_v9 = vadd.f32 %v5738_v28, %v2206_v17  ;;  %v2122_v17 = vadd.f32 %v5747_v22, %v2121_v30 }
0x1955   :  { %2127 = vrot.lane.b32.xlu1 %v2126_v6, %s5116_s12 }
0x195b   :  { %v2213_v48 = vpop.permute.xlu2 %2212  ;;  %v2208_v50 = vpop.f32.mrf.mxu2 }
0x195c   :  { %4475 = vmatmul.msk.bf16.vlgmr.msrb.gmra.mxu3 %vm146_vm0, %v2213_v48 }
0x195d   :  { %2563 = vmatpush.bf16.msrb.mxu3 %v5711_v5 }
0x1961   :  { %2564 = vmatpush.bf16.msrb.mxu3 %v5714_v0 }
0x19c7   :  { %v2128_v32 = vpop.permute.xlu1 %2127 }
0x19c8   :  { %4472 = vmatmul.msk.bf16.vlgmr.msrb.gmra.mxu1 %vm146_vm0, %v2128_v32 }
0x19c9   :  { %2478 = vmatpush.bf16.msrb.mxu1 %v5727_v35 }
0x19cd   :  { %2479 = vmatpush.bf16.msrb.mxu1 %v5730_v53 }
0x19df   :  { %v2226_v3 = vpop.f32.mrf.mxu3 }
0x19e0   :  { %v2250_v39 = vadd.f32 %v2226_v3, %v5276_v19  ;;  %v2230_v52 = vadd.f32 %v2226_v3, %v2207_v9 }
0x19e2   :  { %2252 = vrot.lane.b32.xlu2 %v2250_v39, %s5107_s25  ;;  %v4476_v25 = vmul.f32 -1.442695, %v2230_v52 }
0x19e4   :  { %4706 = vpow2.f32 %v4476_v25 }
0x19e7   :  { %v2228_v43 = vpop.f32.mrf.mxu3 }
0x19ea   :  { %v4707_v51 = vpop.eup %4706 }
0x19eb   :  { %v2234_v61 = vadd.f32 1.0, %v4707_v51 }
0x19ed   :  { %4708 = vrcp.f32 %v2234_v61  ;;  %v2246_v27 = vand.u32 2147483648, %v2234_v61  ;;  %vm2240_vm15 = vweird.f32 %v2234_v61  ;;  %v2244_v45 = vand.u32 2147483647, %v2234_v61 }
0x19ef   :  { %v2247_v10 = vor.u32 1.1754944e-38, %v2246_v27  ;;  %vm2245_vm2 = vcmp.eq.f32.partialorder %v2244_v45, 8.507059e+37 }
0x19f3   :  { %v4709_v33 = vpop.eup %4708 }
0x19f4   :  { %v2236_v56 = vmul.f32 %v4709_v33, %v2234_v61  ;;  %vm2241_vm14 = vweird.f32 %v4709_v33 }
0x19f5   :  { %vm2242_vm1 = vmor %vm2240_vm15, %vm2241_vm14 }
0x19f6   :  { %v2237_v63 = vsub.f32 1.0, %v2236_v56 }
0x19f8   :  { %v2238_v12 = vmul.f32 %v4709_v33, %v2237_v63 }
0x19fa   :  { %v2239_v23 = vadd.f32 %v4709_v33, %v2238_v12 }
0x19fc   :  { %v2243_v57 = vsel %vm2242_vm1, %v4709_v33, %v2239_v23 }
0x19fd   :  { %v2248_v36 = vsel %vm2245_vm2, %v2247_v10, %v2243_v57 }
0x19fe   :  { %v2262_v10 = vsub.f32 1.0, %v2248_v36 }
0x1a3c   :  { %v2253_v59 = vpop.permute.xlu2 %2252 }
0x1a3d   :  { %v2255_v38 = vmul.f32 %v2253_v59, %v2248_v36  ;;  %v2268_v59 = vmul.f32 %v2248_v36, %v5754_v8 }
0x1a3f   :  { %2257 = vrot.lane.b32.xlu0 %v2255_v38, %s5107_s25 }
0x1a45   :  { %v2141_v16 = vpop.f32.mrf.mxu1 }
0x1a46   :  { %v2165_v6 = vadd.f32 %v2141_v16, %v5280_v24  ;;  %v2145_v50 = vadd.f32 %v2141_v16, %v2122_v17 }
0x1a48   :  { %2167 = vrot.lane.b32.xlu1 %v2165_v6, %s5107_s25  ;;  %v4473_v32 = vmul.f32 -1.442695, %v2145_v50  ;;  %v2363_v6 = vld [vmem:[#allocation7 + $0x2c] sm:$0xf] }
0x1a49   :  { %4480 = vmatmul.msk.bf16.vlgmr.msra.gmra.mxu2 %vm146_vm0, %v2363_v6 }
0x1a4a   :  { %4710 = vpow2.f32 %v4473_v32  ;;  %2713 = vmatpush.bf16.msra.mxu2 %v5687_v1 }
0x1a4d   :  { %v2143_v48 = vpop.f32.mrf.mxu1 }
0x1a4e   :  { %2714 = vmatpush.bf16.msra.mxu2 %v5690_v7 }
0x1a50   :  { %v4711_v3 = vpop.eup %4710 }
0x1a51   :  { %v2149_v39 = vadd.f32 1.0, %v4711_v3 }
0x1a53   :  { %4712 = vrcp.f32 %v2149_v39  ;;  %v2161_v56 = vand.u32 2147483648, %v2149_v39  ;;  %vm2155_vm4 = vweird.f32 %v2149_v39  ;;  %v2159_v63 = vand.u32 2147483647, %v2149_v39 }
0x1a55   :  { %v2162_v12 = vor.u32 1.1754944e-38, %v2161_v56  ;;  %vm2160_vm6 = vcmp.eq.f32.partialorder %v2159_v63, 8.507059e+37 }
0x1a59   :  { %v4713_v43 = vpop.eup %4712 }
0x1a5a   :  { %v2151_v52 = vmul.f32 %v4713_v43, %v2149_v39  ;;  %vm2156_vm3 = vweird.f32 %v4713_v43  ;;  %v2278_v39 = vld [vmem:[#allocation4 + $0x30] sm:$0xf] }
0x1a5b   :  { %vm2157_vm5 = vmor %vm2155_vm4, %vm2156_vm3  ;;  %4477 = vmatmul.msk.bf16.vlgmr.msra.gmra.mxu0 %vm146_vm0, %v2278_v39 }
0x1a5c   :  { %v2152_v25 = vsub.f32 1.0, %v2151_v52  ;;  %2628 = vmatpush.bf16.msra.mxu0 %v5704_v13 }
0x1a5e   :  { %v2153_v51 = vmul.f32 %v4713_v43, %v2152_v25 }
0x1a60   :  { %v2154_v62 = vadd.f32 %v4713_v43, %v2153_v51  ;;  %2629 = vmatpush.bf16.msra.mxu0 %v5707_v34 }
0x1a62   :  { %v2158_v30 = vsel %vm2157_vm5, %v4713_v43, %v2154_v62 }
0x1a63   :  { %v2163_v45 = vsel %vm2160_vm6, %v2162_v12, %v2158_v30 }
0x1a64   :  { %v2177_v52 = vsub.f32 1.0, %v2163_v45  ;;  %v2183_v51 = vmul.f32 %v2163_v45, %v5769_v42 }
0x1ab1   :  { %v2258_v61 = vpop.permute.xlu0 %2257 }
0x1ab2   :  { %v2260_v33 = vadd.f32 %v2258_v61, %v2207_v9 }
0x1ab4   :  { %4714 = vtanh.f32 %v2260_v33 }
0x1aba   :  { %v4715_v23 = vpop.eup %4714  ;;  %v2168_v27 = vpop.permute.xlu1 %2167 }
0x1abb   :  { %2264 = vrot.lane.b32.xlu2 %v4715_v23, %s5116_s12  ;;  %v2170_v57 = vmul.f32 %v2168_v27, %v2163_v45 }
0x1abd   :  { %2172 = vrot.lane.b32.xlu0 %v2170_v57, %s5107_s25 }
0x1acc   :  { %v2376_v63 = vpop.f32.mrf.mxu2 }
0x1acd   :  { %v2377_v45 = vadd.f32 %v5738_v28, %v2376_v63 }
0x1ad4   :  { %v2378_v30 = vpop.f32.mrf.mxu2 }
0x1b15   :  { %v2265_v9 = vpop.permute.xlu2 %2264 }
0x1b16   :  { %v2267_v38 = vmul.f32 %v2265_v9, %v2262_v10 }
0x1b18   :  { %v5793_v16 = vadd.f32 %v2268_v59, %v2267_v38  ;;  %v2291_v38 = vpop.f32.mrf.mxu0 }
0x1b1a   :  { %v5797_v48 = vpack.c.bf16 %v5793_v16, %v5793_v16 }
0x1b1c   :  { %v2380_v50 = vunpack.c.l.b16 %v5797_v48 }
0x1b1e   :  { %v2381_v32 = vpack.c.b16 %v2380_v50, %v2380_v50 }
0x1b20   :  { %2382 = vrot.lane.b32.xlu1 %v2381_v32, %s5116_s12  ;;  %v2293_v6 = vpop.f32.mrf.mxu0 }
0x1b2f   :  { %v2173_v8 = vpop.permute.xlu0 %2172 }
0x1b30   :  { %v2175_v36 = vadd.f32 %v2173_v8, %v2122_v17 }
0x1b32   :  { %4716 = vtanh.f32 %v2175_v36 }
0x1b38   :  { %v4717_v3 = vpop.eup %4716 }
0x1b39   :  { %2179 = vrot.lane.b32.xlu2 %v4717_v3, %s5116_s12 }
0x1b92   :  { %v2383_v43 = vpop.permute.xlu1 %2382 }
0x1b93   :  { %4481 = vmatmul.msk.bf16.vlgmr.msra.gmra.mxu3 %vm146_vm0, %v2383_v43  ;;  %v2180_v25 = vpop.permute.xlu2 %2179 }
0x1b94   :  { %v2182_v61 = vmul.f32 %v2180_v25, %v2177_v52  ;;  %2733 = vmatpush.bf16.msra.mxu3 %v5711_v5 }
0x1b96   :  { %v5811_v17 = vadd.f32 %v2183_v51, %v2182_v61 }
0x1b98   :  { %v5815_v33 = vpack.c.bf16 %v5811_v17, %v5811_v17  ;;  %2734 = vmatpush.bf16.msra.mxu3 %v5714_v0 }
0x1b9a   :  { %v2295_v62 = vunpack.c.l.b16 %v5815_v33 }
0x1b9c   :  { %v2296_v56 = vpack.c.b16 %v2295_v62, %v2295_v62 }
0x1b9e   :  { %2297 = vrot.lane.b32.xlu0 %v2296_v56, %s5116_s12 }
0x1c10   :  { %v2298_v12 = vpop.permute.xlu0 %2297 }
0x1c11   :  { %4478 = vmatmul.msk.bf16.vlgmr.msra.gmra.mxu1 %vm146_vm0, %v2298_v12  ;;  %v2292_v12 = vadd.f32 %v5747_v22, %v2291_v38 }
0x1c12   :  { %2648 = vmatpush.bf16.msra.mxu1 %v5727_v35 }
0x1c16   :  { %v2396_v42 = vpop.f32.mrf.mxu3  ;;  %2649 = vmatpush.bf16.msra.mxu1 %v5730_v53 }
0x1c17   :  { %v2420_v23 = vadd.f32 %v2396_v42, %v5276_v19  ;;  %v2400_v57 = vadd.f32 %v2396_v42, %v2377_v45 }
0x1c19   :  { %2422 = vrot.lane.b32.xlu1 %v2420_v23, %s5107_s25  ;;  %v4482_v10 = vmul.f32 -1.442695, %v2400_v57 }
0x1c1b   :  { %4718 = vpow2.f32 %v4482_v10 }
0x1c1e   :  { %v2398_v27 = vpop.f32.mrf.mxu3 }
0x1c21   :  { %v4719_v9 = vpop.eup %4718 }
0x1c22   :  { %v2404_v59 = vadd.f32 1.0, %v4719_v9 }
0x1c24   :  { %4720 = vrcp.f32 %v2404_v59  ;;  %v2416_v39 = vand.u32 2147483648, %v2404_v59  ;;  %vm2410_vm8 = vweird.f32 %v2404_v59  ;;  %v2414_v43 = vand.u32 2147483647, %v2404_v59 }
0x1c26   :  { %v2417_v25 = vor.u32 1.1754944e-38, %v2416_v39  ;;  %vm2415_vm10 = vcmp.eq.f32.partialorder %v2414_v43, 8.507059e+37 }
0x1c2a   :  { %v4721_v50 = vpop.eup %4720 }
0x1c2b   :  { %v2406_v32 = vmul.f32 %v4721_v50, %v2404_v59  ;;  %vm2411_vm7 = vweird.f32 %v4721_v50 }
0x1c2c   :  { %vm2412_vm9 = vmor %vm2410_vm8, %vm2411_vm7 }
0x1c2d   :  { %v2407_v8 = vsub.f32 1.0, %v2406_v32 }
0x1c2f   :  { %v2408_v36 = vmul.f32 %v4721_v50, %v2407_v8 }
0x1c31   :  { %v2409_v3 = vadd.f32 %v4721_v50, %v2408_v36 }
0x1c33   :  { %v2413_v52 = vsel %vm2412_vm9, %v4721_v50, %v2409_v3 }
0x1c34   :  { %v2418_v61 = vsel %vm2415_vm10, %v2417_v25, %v2413_v52 }
0x1c8b   :  { %v2423_v51 = vpop.permute.xlu1 %2422 }
0x1c8c   :  { %v2425_v62 = vmul.f32 %v2423_v51, %v2418_v61 }
0x1c8e   :  { %2427 = vrot.lane.b32.xlu2 %v2425_v62, %s5107_s25  ;;  %v2311_v56 = vpop.f32.mrf.mxu1 }
0x1c8f   :  { %v2335_v63 = vadd.f32 %v2311_v56, %v5280_v24  ;;  %v2315_v42 = vadd.f32 %v2311_v56, %v2292_v12  ;;  %v2432_v56 = vsub.f32 1.0, %v2418_v61 }
0x1c91   :  { %2337 = vrot.lane.b32.xlu0 %v2335_v63, %s5107_s25  ;;  %v4479_v23 = vmul.f32 -1.442695, %v2315_v42 }
0x1c93   :  { %4722 = vpow2.f32 %v4479_v23 }
0x1c96   :  { %v2313_v30 = vpop.f32.mrf.mxu1 }
0x1c97   :  { %v2438_v30 = vmul.f32 %v2418_v61, %v5793_v16  ;;  %v2448_v16 = vld [vmem:[#allocation4 + $0x34] sm:$0xf] }
0x1c98   :  { %4483 = vmatmul.msk.bf16.vlgmr.msrb.gmra.mxu0 %vm146_vm0, %v2448_v16 }
0x1c99   :  { %v4723_v27 = vpop.eup %4722  ;;  %2798 = vmatpush.bf16.msrb.mxu0 %v5704_v13 }
0x1c9a   :  { %v2319_v57 = vadd.f32 1.0, %v4723_v27 }
0x1c9c   :  { %4724 = vrcp.f32 %v2319_v57  ;;  %v2331_v3 = vand.u32 2147483648, %v2319_v57  ;;  %vm2325_vm12 = vweird.f32 %v2319_v57  ;;  %v2329_v38 = vand.u32 2147483647, %v2319_v57 }
0x1c9d   :  { %2799 = vmatpush.bf16.msrb.mxu0 %v5707_v34 }
0x1c9e   :  { %v2332_v43 = vor.u32 1.1754944e-38, %v2331_v3  ;;  %vm2330_vm14 = vcmp.eq.f32.partialorder %v2329_v38, 8.507059e+37 }
0x1ca2   :  { %v4725_v59 = vpop.eup %4724 }
0x1ca3   :  { %v2321_v6 = vmul.f32 %v4725_v59, %v2319_v57  ;;  %vm2326_vm11 = vweird.f32 %v4725_v59 }
0x1ca4   :  { %vm2327_vm13 = vmor %vm2325_vm12, %vm2326_vm11 }
0x1ca5   :  { %v2322_v32 = vsub.f32 1.0, %v2321_v6 }
0x1ca7   :  { %v2323_v8 = vmul.f32 %v4725_v59, %v2322_v32 }
0x1ca9   :  { %v2324_v36 = vadd.f32 %v4725_v59, %v2323_v8 }
0x1cab   :  { %v2328_v39 = vsel %vm2327_vm13, %v4725_v59, %v2324_v36 }
0x1cac   :  { %v2333_v25 = vsel %vm2330_vm14, %v2332_v43, %v2328_v39 }
0x1cad   :  { %v2347_v61 = vsub.f32 1.0, %v2333_v25  ;;  %v2353_v6 = vmul.f32 %v2333_v25, %v5811_v17 }
0x1ce8   :  { %v2428_v10 = vpop.permute.xlu2 %2427 }
0x1ce9   :  { %v2430_v9 = vadd.f32 %v2428_v10, %v2377_v45 }
0x1ceb   :  { %4726 = vtanh.f32 %v2430_v9 }
0x1cf1   :  { %v4727_v50 = vpop.eup %4726 }
0x1cf2   :  { %2434 = vrot.lane.b32.xlu1 %v4727_v50, %s5116_s12 }
0x1d03   :  { %v2338_v52 = vpop.permute.xlu0 %2337 }
0x1d04   :  { %v2340_v45 = vmul.f32 %v2338_v52, %v2333_v25 }
0x1d06   :  { %2342 = vrot.lane.b32.xlu2 %v2340_v45, %s5107_s25 }
0x1d15   :  { %v2461_v52 = vpop.f32.mrf.mxu0 }
0x1d1d   :  { %v2463_v25 = vpop.f32.mrf.mxu0 }
0x1d60   :  { %v2343_v51 = vpop.permute.xlu2 %2342 }
0x1d61   :  { %v2345_v62 = vadd.f32 %v2343_v51, %v2292_v12  ;;  %v2533_v12 = vld [vmem:[#allocation7 + $0x28] sm:$0xf] }
0x1d62   :  { %4486 = vmatmul.msk.bf16.vlgmr.msrb.gmra.mxu2 %vm146_vm0, %v2533_v12 }
0x1d63   :  { %4728 = vtanh.f32 %v2345_v62  ;;  %2883 = vmatpush.bf16.msrb.mxu2 %v5687_v1 }
0x1d64   :  { %v2435_v63 = vpop.permute.xlu1 %2434 }
0x1d65   :  { %v2437_v42 = vmul.f32 %v2435_v63, %v2432_v56 }
0x1d67   :  { %v5833_v23 = vadd.f32 %v2438_v30, %v2437_v42  ;;  %2884 = vmatpush.bf16.msrb.mxu2 %v5690_v7 }
0x1d69   :  { %v4729_v27 = vpop.eup %4728  ;;  %v5837_v57 = vpack.c.bf16 %v5833_v23, %v5833_v23 }
0x1d6a   :  { %2349 = vrot.lane.b32.xlu1 %v4729_v27, %s5116_s12 }
0x1d6b   :  { %6508 = vst [vmem:[#allocation24_spill] sm:$0xff] %v5837_v57  ;;  %v2550_v10 = vunpack.c.l.b16 %v5837_v57 }
0x1d6d   :  { %v2551_v9 = vpack.c.b16 %v2550_v10, %v2550_v10 }
0x1d6f   :  { %2552 = vrot.lane.b32.xlu0 %v2551_v9, %s5116_s12 }
0x1ddc   :  { %v2350_v59 = vpop.permute.xlu1 %2349 }
0x1ddd   :  { %v2352_v50 = vmul.f32 %v2350_v59, %v2347_v61 }
0x1ddf   :  { %v5849_v32 = vadd.f32 %v2353_v6, %v2352_v50 }
0x1de1   :  { %v5853_v8 = vpack.c.bf16 %v5849_v32, %v5849_v32  ;;  %v2553_v36 = vpop.permute.xlu0 %2552 }
0x1de2   :  { %4487 = vmatmul.msk.bf16.vlgmr.msrb.gmra.mxu3 %vm146_vm0, %v2553_v36 }
0x1de3   :  { %v2465_v3 = vunpack.c.l.b16 %v5853_v8  ;;  %2903 = vmatpush.bf16.msrb.mxu3 %v5711_v5 }
0x1de5   :  { %v2466_v38 = vpack.c.b16 %v2465_v3, %v2465_v3  ;;  %v2546_v39 = vpop.f32.mrf.mxu2 }
0x1de6   :  { %v2547_v56 = vadd.f32 %v5738_v28, %v2546_v39 }
0x1de7   :  { %2467 = vrot.lane.b32.xlu2 %v2466_v38, %s5116_s12  ;;  %2904 = vmatpush.bf16.msrb.mxu3 %v5714_v0 }
0x1ded   :  { %v2548_v43 = vpop.f32.mrf.mxu2 }
0x1e41   :  { %v2468_v17 = vpop.permute.xlu2 %2467 }
0x1e42   :  { %4484 = vmatmul.msk.bf16.vlgmr.msrb.gmra.mxu1 %vm146_vm0, %v2468_v17 }
0x1e43   :  { %2818 = vmatpush.bf16.msrb.mxu1 %v5727_v35 }
0x1e47   :  { %2819 = vmatpush.bf16.msrb.mxu1 %v5730_v53 }
0x1e65   :  { %v2566_v45 = vpop.f32.mrf.mxu3 }
0x1e66   :  { %v2590_v51 = vadd.f32 %v2566_v45, %v5276_v19  ;;  %v2570_v63 = vadd.f32 %v2566_v45, %v2547_v56  ;;  %v2462_v45 = vadd.f32 %v5747_v22, %v2461_v52 }
0x1e68   :  { %2592 = vrot.lane.b32.xlu0 %v2590_v51, %s5107_s25  ;;  %v4488_v30 = vmul.f32 -1.442695, %v2570_v63 }
0x1e6a   :  { %4730 = vpow2.f32 %v4488_v30 }
0x1e6d   :  { %v2568_v62 = vpop.f32.mrf.mxu3 }
0x1e70   :  { %v4731_v42 = vpop.eup %4730 }
0x1e71   :  { %v2574_v27 = vadd.f32 1.0, %v4731_v42 }
0x1e73   :  { %4732 = vrcp.f32 %v2574_v27  ;;  %v2586_v36 = vand.u32 2147483648, %v2574_v27  ;;  %vm2580_vm1 = vweird.f32 %v2574_v27  ;;  %v2584_v3 = vand.u32 2147483647, %v2574_v27 }
0x1e75   :  { %v2587_v17 = vor.u32 1.1754944e-38, %v2586_v36  ;;  %vm2585_vm3 = vcmp.eq.f32.partialorder %v2584_v3, 8.507059e+37 }
0x1e79   :  { %v4733_v12 = vpop.eup %4732 }
0x1e7a   :  { %v2576_v61 = vmul.f32 %v4733_v12, %v2574_v27  ;;  %vm2581_vm15 = vweird.f32 %v4733_v12 }
0x1e7b   :  { %vm2582_vm2 = vmor %vm2580_vm1, %vm2581_vm15 }
0x1e7c   :  { %v2577_v59 = vsub.f32 1.0, %v2576_v61 }
0x1e7e   :  { %v2578_v6 = vmul.f32 %v4733_v12, %v2577_v59 }
0x1e80   :  { %v2579_v50 = vadd.f32 %v4733_v12, %v2578_v6 }
0x1e82   :  { %v2583_v38 = vsel %vm2582_vm2, %v4733_v12, %v2579_v50 }
0x1e83   :  { %v2588_v43 = vsel %vm2585_vm3, %v2587_v17, %v2583_v38 }
0x1ebf   :  { %v2481_v10 = vpop.f32.mrf.mxu1 }
0x1ec0   :  { %v2505_v9 = vadd.f32 %v2481_v10, %v5280_v24  ;;  %v2485_v51 = vadd.f32 %v2481_v10, %v2462_v45 }
0x1ec2   :  { %2507 = vrot.lane.b32.xlu2 %v2505_v9, %s5107_s25  ;;  %v4485_v62 = vmul.f32 -1.442695, %v2485_v51 }
0x1ec4   :  { %4734 = vpow2.f32 %v4485_v62  ;;  %v2602_v62 = vsub.f32 1.0, %v2588_v43 }
0x1ec7   :  { %v2483_v16 = vpop.f32.mrf.mxu1 }
0x1eca   :  { %v4735_v63 = vpop.eup %4734 }
0x1ecb   :  { %v2489_v30 = vadd.f32 1.0, %v4735_v63 }
0x1ecd   :  { %4736 = vrcp.f32 %v2489_v30  ;;  %v2501_v61 = vand.u32 2147483648, %v2489_v30  ;;  %vm2495_vm5 = vweird.f32 %v2489_v30  ;;  %v2499_v59 = vand.u32 2147483647, %v2489_v30 }
0x1ecf   :  { %v2502_v50 = vor.u32 1.1754944e-38, %v2501_v61  ;;  %vm2500_vm7 = vcmp.eq.f32.partialorder %v2499_v59, 8.507059e+37 }
0x1ed3   :  { %v4737_v42 = vpop.eup %4736 }
0x1ed4   :  { %v2491_v9 = vmul.f32 %v4737_v42, %v2489_v30  ;;  %vm2496_vm4 = vweird.f32 %v4737_v42  ;;  %v2608_v30 = vmul.f32 %v2588_v43, %v5833_v23 }
0x1ed5   :  { %vm2497_vm6 = vmor %vm2495_vm5, %vm2496_vm4 }
0x1ed6   :  { %v2492_v27 = vsub.f32 1.0, %v2491_v9 }
0x1ed8   :  { %v2493_v16 = vmul.f32 %v4737_v42, %v2492_v27 }
0x1eda   :  { %v2593_v39 = vpop.permute.xlu0 %2592  ;;  %v2494_v12 = vadd.f32 %v4737_v42, %v2493_v16 }
0x1edb   :  { %v2595_v25 = vmul.f32 %v2593_v39, %v2588_v43 }
0x1edc   :  { %v2498_v6 = vsel %vm2497_vm6, %v4737_v42, %v2494_v12 }
0x1edd   :  { %2597 = vrot.lane.b32.xlu1 %v2595_v25, %s5107_s25  ;;  %v2503_v10 = vsel %vm2500_vm7, %v2502_v50, %v2498_v6  ;;  %v2618_v6 = vld [vmem:[#allocation4 + $0x38] sm:$0xf] }
0x1ede   :  { %v2517_v23 = vsub.f32 1.0, %v2503_v10  ;;  %v2523_v12 = vmul.f32 %v2503_v10, %v5849_v32  ;;  %4489 = vmatmul.msk.bf16.vlgmr.msra.gmra.mxu0 %vm146_vm0, %v2618_v6 }
0x1edf   :  { %2968 = vmatpush.bf16.msra.mxu0 %v5704_v13 }
0x1ee3   :  { %2969 = vmatpush.bf16.msra.mxu0 %v5707_v34 }
0x1f1c   :  { %v2508_v52 = vpop.permute.xlu2 %2507 }
0x1f1d   :  { %v2510_v36 = vmul.f32 %v2508_v52, %v2503_v10 }
0x1f1f   :  { %2512 = vrot.lane.b32.xlu1 %v2510_v36, %s5107_s25 }
0x1f4f   :  { %v2598_v3 = vpop.permute.xlu1 %2597 }
0x1f50   :  { %v2600_v38 = vadd.f32 %v2598_v3, %v2547_v56 }
0x1f52   :  { %4738 = vtanh.f32 %v2600_v38 }
0x1f58   :  { %v4739_v17 = vpop.eup %4738 }
0x1f59   :  { %2604 = vrot.lane.b32.xlu0 %v4739_v17, %s5116_s12 }
0x1f5b   :  { %v2631_v13 = vpop.f32.mrf.mxu0 }
0x1f63   :  { %v2633_v34 = vpop.f32.mrf.mxu0 }
0x1f91   :  { %v2513_v39 = vpop.permute.xlu1 %2512 }
0x1f92   :  { %v2515_v25 = vadd.f32 %v2513_v39, %v2462_v45  ;;  %v2703_v45 = vld [vmem:[#allocation7 + $0x24] sm:$0xf] }
0x1f93   :  { %4492 = vmatmul.msk.bf16.vlgmr.msra.gmra.mxu2 %vm146_vm0, %v2703_v45 }
0x1f94   :  { %4740 = vtanh.f32 %v2515_v25  ;;  %3053 = vmatpush.bf16.msra.mxu2 %v5687_v1 }
0x1f98   :  { %3054 = vmatpush.bf16.msra.mxu2 %v5690_v7 }
0x1f9a   :  { %v4741_v51 = vpop.eup %4740 }
0x1f9b   :  { %2519 = vrot.lane.b32.xlu0 %v4741_v51, %s5116_s12 }
0x1fcb   :  { %v2605_v63 = vpop.permute.xlu0 %2604 }
0x1fcc   :  { %v2607_v42 = vmul.f32 %v2605_v63, %v2602_v62 }
0x1fce   :  { %v5874_v9 = vadd.f32 %v2608_v30, %v2607_v42 }
0x1fd0   :  { %v5878_v56 = vpack.c.bf16 %v5874_v9, %v5874_v9 }
0x1fd2   :  { %v2720_v27 = vunpack.c.l.b16 %v5878_v56 }
0x1fd4   :  { %v2721_v16 = vpack.c.b16 %v2720_v27, %v2720_v27 }
0x1fd6   :  { %2722 = vrot.lane.b32.xlu2 %v2721_v16, %s5116_s12 }
0x200d   :  { %v2520_v43 = vpop.permute.xlu0 %2519 }
0x200e   :  { %v2522_v61 = vmul.f32 %v2520_v43, %v2517_v23 }
0x2010   :  { %v5886_v59 = vadd.f32 %v2523_v12, %v2522_v61 }
0x2012   :  { %v5890_v50 = vpack.c.bf16 %v5886_v59, %v5886_v59 }
0x2014   :  { %v2635_v1 = vunpack.c.l.b16 %v5890_v50 }
0x2016   :  { %v2636_v52 = vpack.c.b16 %v2635_v1, %v2635_v1  ;;  %v2716_v32 = vpop.f32.mrf.mxu2  ;;  %v2632_v1 = vadd.f32 %v5747_v22, %v2631_v13 }
0x2018   :  { %2637 = vrot.lane.b32.xlu1 %v2636_v52, %s5116_s12 }
0x201e   :  { %v2718_v10 = vpop.f32.mrf.mxu2 }
0x2030   :  { %v2723_v7 = vpop.permute.xlu2 %2722 }
0x2031   :  { %4493 = vmatmul.msk.bf16.vlgmr.msra.gmra.mxu3 %vm146_vm0, %v2723_v7 }
0x2032   :  { %3073 = vmatpush.bf16.msra.mxu3 %v5711_v5  ;;  %v2717_v5 = vadd.f32 %v5738_v28, %v2716_v32 }
0x2036   :  { %3074 = vmatpush.bf16.msra.mxu3 %v5714_v0 }
0x208a   :  { %v2638_v36 = vpop.permute.xlu1 %2637 }
0x208b   :  { %4490 = vmatmul.msk.bf16.vlgmr.msra.gmra.mxu1 %vm146_vm0, %v2638_v36 }
0x208c   :  { %2988 = vmatpush.bf16.msra.mxu1 %v5727_v35 }
0x2090   :  { %2989 = vmatpush.bf16.msra.mxu1 %v5730_v53 }
0x20b4   :  { %v2736_v3 = vpop.f32.mrf.mxu3 }
0x20b5   :  { %v2760_v38 = vadd.f32 %v2736_v3, %v5276_v19  ;;  %v2740_v0 = vadd.f32 %v2736_v3, %v2717_v5 }
0x20b7   :  { %2762 = vrot.lane.b32.xlu2 %v2760_v38, %s5107_s25  ;;  %v4494_v39 = vmul.f32 -1.442695, %v2740_v0 }
0x20b9   :  { %4742 = vpow2.f32 %v4494_v39 }
0x20bc   :  { %v2738_v17 = vpop.f32.mrf.mxu3 }
0x20bf   :  { %v4743_v25 = vpop.eup %4742 }
0x20c0   :  { %v2744_v51 = vadd.f32 1.0, %v4743_v25 }
0x20c2   :  { %4744 = vrcp.f32 %v2744_v51  ;;  %v2756_v16 = vand.u32 2147483648, %v2744_v51  ;;  %vm2750_vm9 = vweird.f32 %v2744_v51  ;;  %v2754_v28 = vand.u32 2147483647, %v2744_v51 }
0x20c4   :  { %v2757_v23 = vor.u32 1.1754944e-38, %v2756_v16  ;;  %vm2755_vm11 = vcmp.eq.f32.partialorder %v2754_v28, 8.507059e+37 }
0x20c8   :  { %v4745_v62 = vpop.eup %4744 }
0x20c9   :  { %v2746_v35 = vmul.f32 %v4745_v62, %v2744_v51  ;;  %vm2751_vm8 = vweird.f32 %v4745_v62 }
0x20ca   :  { %vm2752_vm10 = vmor %vm2750_vm9, %vm2751_vm8 }
0x20cb   :  { %v2747_v63 = vsub.f32 1.0, %v2746_v35 }
0x20cd   :  { %v2748_v53 = vmul.f32 %v4745_v62, %v2747_v63 }
0x20cf   :  { %v2749_v27 = vadd.f32 %v4745_v62, %v2748_v53 }
0x20d1   :  { %v2753_v45 = vsel %vm2752_vm10, %v4745_v62, %v2749_v27 }
0x20d2   :  { %v2758_v61 = vsel %vm2755_vm11, %v2757_v23, %v2753_v45 }
0x20d3   :  { %v2778_v27 = vmul.f32 %v2758_v61, %v5874_v9  ;;  %v5923_v9 = vld [vmem:[#allocation10 + $0x8] sm:$0xff] }
0x2108   :  { %v2651_v30 = vpop.f32.mrf.mxu1 }
0x2109   :  { %v2675_v42 = vadd.f32 %v2651_v30, %v5280_v24  ;;  %v2655_v52 = vadd.f32 %v2651_v30, %v2632_v1  ;;  %v2772_v30 = vsub.f32 1.0, %v2758_v61 }
0x210b   :  { %2677 = vrot.lane.b32.xlu1 %v2675_v42, %s5107_s25  ;;  %v4491_v7 = vmul.f32 -1.442695, %v2655_v52  ;;  %v2873_v52 = vld [vmem:[#allocation7 + $0x20] sm:$0xf] }
0x210c   :  { %4498 = vmatmul.msk.bf16.vlgmr.msrb.gmra.mxu2 %vm146_vm0, %v2873_v52 }
0x210d   :  { %4746 = vpow2.f32 %v4491_v7  ;;  %3223 = vmatpush.bf16.msrb.mxu2 %v5923_v9  ;;  %v2788_v7 = vld [vmem:[#allocation4 + $0x3c] sm:$0xf] }
0x210e   :  { %4495 = vmatmul.msk.bf16.vlgmr.msrb.gmra.mxu0 %vm146_vm0, %v2788_v7 }
0x2110   :  { %v2653_v43 = vpop.f32.mrf.mxu1 }
0x2111   :  { %v2763_v12 = vpop.permute.xlu2 %2762 }
0x2112   :  { %v2765_v6 = vmul.f32 %v2763_v12, %v2758_v61  ;;  %v5926_v61 = vld [vmem:[#allocation10] sm:$0xff] }
0x2113   :  { %v4747_v32 = vpop.eup %4746  ;;  %3224 = vmatpush.bf16.msrb.mxu2 %v5926_v61 }
0x2114   :  { %2767 = vrot.lane.b32.xlu0 %v2765_v6, %s5107_s25  ;;  %v2659_v10 = vadd.f32 1.0, %v4747_v32  ;;  %v5933_v32 = vld [vmem:[#allocation9] sm:$0xff] }
0x2116   :  { %4748 = vrcp.f32 %v2659_v10  ;;  %v2671_v0 = vand.u32 2147483648, %v2659_v10  ;;  %vm2665_vm13 = vweird.f32 %v2659_v10  ;;  %v2669_v39 = vand.u32 2147483647, %v2659_v10 }
0x2118   :  { %v2672_v51 = vor.u32 1.1754944e-38, %v2671_v0  ;;  %vm2670_vm15 = vcmp.eq.f32.partialorder %v2669_v39, 8.507059e+37 }
0x211c   :  { %v4749_v36 = vpop.eup %4748 }
0x211d   :  { %v2661_v34 = vmul.f32 %v4749_v36, %v2659_v10  ;;  %vm2666_vm12 = vweird.f32 %v4749_v36 }
0x211e   :  { %vm2667_vm14 = vmor %vm2665_vm13, %vm2666_vm12 }
0x211f   :  { %v2662_v3 = vsub.f32 1.0, %v2661_v34 }
0x2121   :  { %v2663_v38 = vmul.f32 %v4749_v36, %v2662_v3 }
0x2123   :  { %v2664_v17 = vadd.f32 %v4749_v36, %v2663_v38 }
0x2125   :  { %v2668_v25 = vsel %vm2667_vm14, %v4749_v36, %v2664_v17 }
0x2126   :  { %v2673_v13 = vsel %vm2670_vm15, %v2672_v51, %v2668_v25  ;;  %v5946_v51 = vld [vmem:[#allocation13 + $0x8] sm:$0xff] }
0x2127   :  { %v2687_v10 = vsub.f32 1.0, %v2673_v13  ;;  %v2693_v34 = vmul.f32 %v2673_v13, %v5886_v59  ;;  %v5949_v59 = vld [vmem:[#allocation13] sm:$0xff] }
0x217d   :  { %v2678_v22 = vpop.permute.xlu1 %2677 }
0x217e   :  { %v2680_v62 = vmul.f32 %v2678_v22, %v2673_v13 }
0x2180   :  { %2682 = vrot.lane.b32.xlu0 %v2680_v62, %s5107_s25 }
0x2186   :  { %v2768_v35 = vpop.permute.xlu0 %2767 }
0x2187   :  { %v2770_v63 = vadd.f32 %v2768_v35, %v2717_v5  ;;  %v5953_v35 = vld [vmem:[#allocation12 + $0x8] sm:$0xff] }
0x2189   :  { %4750 = vtanh.f32 %v2770_v63 }
0x218b   :  { %v2801_v63 = vpop.f32.mrf.mxu0 }
0x218f   :  { %v4751_v53 = vpop.eup %4750  ;;  %v2886_v22 = vpop.f32.mrf.mxu2 }
0x2190   :  { %2774 = vrot.lane.b32.xlu2 %v4751_v53, %s5116_s12  ;;  %v5956_v53 = vld [vmem:[#allocation12] sm:$0xff] }
0x2197   :  { %v2888_v13 = vpop.f32.mrf.mxu2 }
0x21ea   :  { %v2775_v42 = vpop.permute.xlu2 %2774 }
0x21eb   :  { %v2777_v16 = vmul.f32 %v2775_v42, %v2772_v30  ;;  %v2803_v30 = vpop.f32.mrf.mxu0 }
0x21ed   :  { %v5913_v28 = vadd.f32 %v2778_v27, %v2777_v16 }
0x21ef   :  { %v5917_v45 = vpack.c.bf16 %v5913_v28, %v5913_v28 }
0x21f1   :  { %v2890_v23 = vunpack.c.l.b16 %v5917_v45 }
0x21f2   :  { %v2683_v43 = vpop.permute.xlu0 %2682 }
0x21f3   :  { %v2685_v12 = vadd.f32 %v2683_v43, %v2632_v1  ;;  %v2891_v5 = vpack.c.b16 %v2890_v23, %v2890_v23  ;;  %v5930_v1 = vld [vmem:[#allocation9 + $0x8] sm:$0xff]  ;;  %v5964_v23 = vld [vmem:[%s6494_s7] ss:$0 sm:$0xff] }
0x21f4   :  { %3138 = vmatpush.bf16.msrb.mxu0 %v5930_v1  ;;  %v2887_v43 = vadd.f32 %v5964_v23, %v2886_v22 }
0x21f5   :  { %4752 = vtanh.f32 %v2685_v12  ;;  %2892 = vrot.lane.b32.xlu1 %v2891_v5, %s5116_s12 }
0x21f8   :  { %3139 = vmatpush.bf16.msrb.mxu0 %v5933_v32 }
0x21fb   :  { %v4753_v6 = vpop.eup %4752 }
0x21fc   :  { %2689 = vrot.lane.b32.xlu2 %v4753_v6, %s5116_s12 }
0x2256   :  { %v2690_v36 = vpop.permute.xlu2 %2689 }
0x2257   :  { %v2692_v3 = vmul.f32 %v2690_v36, %v2687_v10 }
0x2259   :  { %v5937_v38 = vadd.f32 %v2693_v34, %v2692_v3 }
0x225b   :  { %v5941_v17 = vpack.c.bf16 %v5937_v38, %v5937_v38 }
0x225d   :  { %6509 = vst [vmem:[#allocation25_spill] sm:$0xff] %v5941_v17  ;;  %v2805_v0 = vunpack.c.l.b16 %v5941_v17 }
0x225f   :  { %v2806_v39 = vpack.c.b16 %v2805_v0, %v2805_v0 }
0x2261   :  { %2807 = vrot.lane.b32.xlu0 %v2806_v39, %s5116_s12 }
0x2267   :  { %v2893_v25 = vpop.permute.xlu1 %2892 }
0x2268   :  { %4499 = vmatmul.msk.bf16.vlgmr.msrb.gmra.mxu3 %vm146_vm0, %v2893_v25 }
0x2269   :  { %3243 = vmatpush.bf16.msrb.mxu3 %v5946_v51 }
0x226d   :  { %3244 = vmatpush.bf16.msrb.mxu3 %v5949_v59 }
0x22d3   :  { %v2808_v62 = vpop.permute.xlu0 %2807 }
0x22d4   :  { %4496 = vmatmul.msk.bf16.vlgmr.msrb.gmra.mxu1 %vm146_vm0, %v2808_v62 }
0x22d5   :  { %3158 = vmatpush.bf16.msrb.mxu1 %v5953_v35 }
0x22d9   :  { %3159 = vmatpush.bf16.msrb.mxu1 %v5956_v53 }
0x22eb   :  { %v2906_v42 = vpop.f32.mrf.mxu3 }
0x22ec   :  { %v2930_v27 = vadd.f32 %v2906_v42, %v5276_v19  ;;  %v2910_v12 = vadd.f32 %v2906_v42, %v2887_v43 }
0x22ee   :  { %2932 = vrot.lane.b32.xlu1 %v2930_v27, %s5107_s25  ;;  %v4500_v5 = vmul.f32 -1.442695, %v2910_v12  ;;  %v5973_v12 = vld [vmem:[%s6493_s6] ss:$0 sm:$0xff] }
0x22f0   :  { %4754 = vpow2.f32 %v4500_v5  ;;  %v2802_v5 = vadd.f32 %v5973_v12, %v2801_v63 }
0x22f3   :  { %v2908_v16 = vpop.f32.mrf.mxu3 }
0x22f6   :  { %v4755_v6 = vpop.eup %4754 }
0x22f7   :  { %v2914_v52 = vadd.f32 1.0, %v4755_v6 }
0x22f9   :  { %4756 = vrcp.f32 %v2914_v52  ;;  %v2926_v13 = vand.u32 2147483648, %v2914_v52  ;;  %vm2920_vm2 = vweird.f32 %v2914_v52  ;;  %v2924_v22 = vand.u32 2147483647, %v2914_v52 }
0x22fb   :  { %v2927_v30 = vor.u32 1.1754944e-38, %v2926_v13  ;;  %vm2925_vm4 = vcmp.eq.f32.partialorder %v2924_v22, 8.507059e+37 }
0x22ff   :  { %v4757_v7 = vpop.eup %4756 }
0x2300   :  { %v2916_v10 = vmul.f32 %v4757_v7, %v2914_v52  ;;  %vm2921_vm1 = vweird.f32 %v4757_v7 }
0x2301   :  { %vm2922_vm3 = vmor %vm2920_vm2, %vm2921_vm1 }
0x2302   :  { %v2917_v34 = vsub.f32 1.0, %v2916_v10 }
0x2304   :  { %v2918_v0 = vmul.f32 %v4757_v7, %v2917_v34 }
0x2306   :  { %v2919_v25 = vadd.f32 %v4757_v7, %v2918_v0 }
0x2308   :  { %v2923_v62 = vsel %vm2922_vm3, %v4757_v7, %v2919_v25 }
0x2309   :  { %v2928_v27 = vsel %vm2925_vm4, %v2927_v30, %v2923_v62 }
0x2351   :  { %v2821_v36 = vpop.f32.mrf.mxu1 }
0x2352   :  { %v2845_v3 = vadd.f32 %v2821_v36, %v5280_v24  ;;  %v2825_v6 = vadd.f32 %v2821_v36, %v2802_v5 }
0x2354   :  { %2847 = vrot.lane.b32.xlu0 %v2845_v3, %s5107_s25  ;;  %v4497_v10 = vmul.f32 -1.442695, %v2825_v6 }
0x2356   :  { %4758 = vpow2.f32 %v4497_v10 }
0x2359   :  { %v2823_v39 = vpop.f32.mrf.mxu1 }
0x235c   :  { %v4759_v52 = vpop.eup %4758 }
0x235d   :  { %v2829_v34 = vadd.f32 1.0, %v4759_v52  ;;  %v2942_v52 = vsub.f32 1.0, %v2928_v27 }
0x235f   :  { %4760 = vrcp.f32 %v2829_v34  ;;  %v2841_v62 = vand.u32 2147483648, %v2829_v34  ;;  %vm2835_vm6 = vweird.f32 %v2829_v34  ;;  %v2839_v30 = vand.u32 2147483647, %v2829_v34 }
0x2360   :  { %v2933_v42 = vpop.permute.xlu1 %2932 }
0x2361   :  { %v2935_v16 = vmul.f32 %v2933_v42, %v2928_v27  ;;  %v2842_v36 = vor.u32 1.1754944e-38, %v2841_v62  ;;  %vm2840_vm8 = vcmp.eq.f32.partialorder %v2839_v30, 8.507059e+37  ;;  %v2958_v30 = vld [vmem:[#allocation4 + $0x40] sm:$0xf] }
0x2362   :  { %4501 = vmatmul.msk.bf16.vlgmr.msra.gmra.mxu0 %vm146_vm0, %v2958_v30 }
0x2363   :  { %2937 = vrot.lane.b32.xlu2 %v2935_v16, %s5107_s25  ;;  %3308 = vmatpush.bf16.msra.mxu0 %v5930_v1 }
0x2365   :  { %v4761_v7 = vpop.eup %4760 }
0x2366   :  { %v2831_v3 = vmul.f32 %v4761_v7, %v2829_v34  ;;  %vm2836_vm5 = vweird.f32 %v4761_v7  ;;  %v3043_v34 = vld [vmem:[#allocation7 + $0x1c] sm:$0xf] }
0x2367   :  { %vm2837_vm7 = vmor %vm2835_vm6, %vm2836_vm5  ;;  %4504 = vmatmul.msk.bf16.vlgmr.msra.gmra.mxu2 %vm146_vm0, %v3043_v34  ;;  %3309 = vmatpush.bf16.msra.mxu0 %v5933_v32 }
0x2368   :  { %v2832_v0 = vsub.f32 1.0, %v2831_v3  ;;  %v2948_v3 = vmul.f32 %v2928_v27, %v5913_v28  ;;  %3393 = vmatpush.bf16.msra.mxu2 %v5923_v9 }
0x236a   :  { %v2833_v39 = vmul.f32 %v4761_v7, %v2832_v0 }
0x236c   :  { %v2834_v22 = vadd.f32 %v4761_v7, %v2833_v39  ;;  %3394 = vmatpush.bf16.msra.mxu2 %v5926_v61 }
0x236e   :  { %v2838_v63 = vsel %vm2837_vm7, %v4761_v7, %v2834_v22 }
0x236f   :  { %v2843_v6 = vsel %vm2840_vm8, %v2842_v36, %v2838_v63 }
0x2370   :  { %v2857_v63 = vsub.f32 1.0, %v2843_v6  ;;  %v2863_v36 = vmul.f32 %v2843_v6, %v5937_v38 }
0x23bd   :  { %v2938_v25 = vpop.permute.xlu2 %2937 }
0x23be   :  { %v2940_v13 = vadd.f32 %v2938_v25, %v2887_v43 }
0x23c0   :  { %4762 = vtanh.f32 %v2940_v13 }
0x23c6   :  { %v4763_v42 = vpop.eup %4762  ;;  %v2848_v16 = vpop.permute.xlu0 %2847 }
0x23c7   :  { %v2850_v10 = vmul.f32 %v2848_v16, %v2843_v6  ;;  %2944 = vrot.lane.b32.xlu2 %v4763_v42, %s5116_s12 }
0x23c9   :  { %2852 = vrot.lane.b32.xlu1 %v2850_v10, %s5107_s25 }
0x23df   :  { %v2971_v30 = vpop.f32.mrf.mxu0 }
0x2421   :  { %v2945_v43 = vpop.permute.xlu2 %2944 }
0x2422   :  { %v2947_v0 = vmul.f32 %v2945_v43, %v2942_v52 }
0x2424   :  { %v5979_v39 = vadd.f32 %v2948_v3, %v2947_v0  ;;  %v3056_v3 = vpop.f32.mrf.mxu2 }
0x2426   :  { %v5983_v7 = vpack.c.bf16 %v5979_v39, %v5979_v39 }
0x2428   :  { %6510 = vst [vmem:[#allocation26_spill] sm:$0xff] %v5983_v7  ;;  %v3060_v25 = vunpack.c.l.b16 %v5983_v7 }
0x242a   :  { %v3061_v13 = vpack.c.b16 %v3060_v25, %v3060_v25 }
0x242c   :  { %3062 = vrot.lane.b32.xlu1 %v3061_v13, %s5116_s12  ;;  %v3058_v0 = vpop.f32.mrf.mxu2  ;;  %v3057_v13 = vadd.f32 %v5964_v23, %v3056_v3 }
0x243b   :  { %v2853_v28 = vpop.permute.xlu1 %2852 }
0x243c   :  { %v2855_v27 = vadd.f32 %v2853_v28, %v2802_v5 }
0x243e   :  { %4764 = vtanh.f32 %v2855_v27 }
0x2444   :  { %v4765_v22 = vpop.eup %4764 }
0x2445   :  { %2859 = vrot.lane.b32.xlu0 %v4765_v22, %s5116_s12 }
0x249e   :  { %v3063_v62 = vpop.permute.xlu1 %3062 }
0x249f   :  { %4505 = vmatmul.msk.bf16.vlgmr.msra.gmra.mxu3 %vm146_vm0, %v3063_v62 }
0x24a0   :  { %3413 = vmatpush.bf16.msra.mxu3 %v5946_v51 }
0x24a4   :  { %3414 = vmatpush.bf16.msra.mxu3 %v5949_v59 }
0x24b7   :  { %v2860_v5 = vpop.permute.xlu0 %2859 }
0x24b8   :  { %v2862_v42 = vmul.f32 %v2860_v5, %v2857_v63  ;;  %v2973_v63 = vpop.f32.mrf.mxu0 }
0x24ba   :  { %v5998_v16 = vadd.f32 %v2863_v36, %v2862_v42 }
0x24bc   :  { %v6002_v10 = vpack.c.bf16 %v5998_v16, %v5998_v16 }
0x24be   :  { %v2975_v52 = vunpack.c.l.b16 %v6002_v10 }
0x24c0   :  { %v2976_v43 = vpack.c.b16 %v2975_v52, %v2975_v52 }
0x24c2   :  { %2977 = vrot.lane.b32.xlu2 %v2976_v43, %s5116_s12 }
0x251c   :  { %v2978_v34 = vpop.permute.xlu2 %2977 }
0x251d   :  { %4502 = vmatmul.msk.bf16.vlgmr.msra.gmra.mxu1 %vm146_vm0, %v2978_v34 }
0x251e   :  { %3328 = vmatpush.bf16.msra.mxu1 %v5953_v35 }
0x2522   :  { %v3076_v38 = vpop.f32.mrf.mxu3  ;;  %3329 = vmatpush.bf16.msra.mxu1 %v5956_v53 }
0x2523   :  { %v3100_v6 = vadd.f32 %v3076_v38, %v5276_v19  ;;  %v3080_v28 = vadd.f32 %v3076_v38, %v3057_v13 }
0x2525   :  { %3102 = vrot.lane.b32.xlu0 %v3100_v6, %s5107_s25  ;;  %v4506_v27 = vmul.f32 -1.442695, %v3080_v28 }
0x2527   :  { %4766 = vpow2.f32 %v4506_v27 }
0x252a   :  { %v3078_v25 = vpop.f32.mrf.mxu3 }
0x252d   :  { %v4767_v22 = vpop.eup %4766 }
0x252e   :  { %v3084_v62 = vadd.f32 1.0, %v4767_v22 }
0x2530   :  { %4768 = vrcp.f32 %v3084_v62  ;;  %v3096_v0 = vand.u32 2147483648, %v3084_v62  ;;  %vm3090_vm10 = vweird.f32 %v3084_v62  ;;  %v3094_v34 = vand.u32 2147483647, %v3084_v62 }
0x2532   :  { %v3097_v3 = vor.u32 1.1754944e-38, %v3096_v0  ;;  %vm3095_vm12 = vcmp.eq.f32.partialorder %v3094_v34, 8.507059e+37 }
0x2536   :  { %v4769_v5 = vpop.eup %4768 }
0x2537   :  { %v3086_v36 = vmul.f32 %v4769_v5, %v3084_v62  ;;  %vm3091_vm9 = vweird.f32 %v4769_v5 }
0x2538   :  { %vm3092_vm11 = vmor %vm3090_vm10, %vm3091_vm9 }
0x2539   :  { %v3087_v42 = vsub.f32 1.0, %v3086_v36  ;;  %v2972_v36 = vadd.f32 %v5973_v12, %v2971_v30 }
0x253b   :  { %v3088_v52 = vmul.f32 %v4769_v5, %v3087_v42 }
0x253d   :  { %v3089_v43 = vadd.f32 %v4769_v5, %v3088_v52 }
0x253f   :  { %v3093_v6 = vsel %vm3092_vm11, %v4769_v5, %v3089_v43 }
0x2540   :  { %v3098_v25 = vsel %vm3095_vm12, %v3097_v3, %v3093_v6 }
0x2597   :  { %v3103_v38 = vpop.permute.xlu0 %3102 }
0x2598   :  { %v3105_v28 = vmul.f32 %v3103_v38, %v3098_v25 }
0x259a   :  { %3107 = vrot.lane.b32.xlu1 %v3105_v28, %s5107_s25  ;;  %v2991_v27 = vpop.f32.mrf.mxu1 }
0x259b   :  { %v3015_v22 = vadd.f32 %v2991_v27, %v5280_v24  ;;  %v2995_v42 = vadd.f32 %v2991_v27, %v2972_v36 }
0x259d   :  { %3017 = vrot.lane.b32.xlu2 %v3015_v22, %s5107_s25  ;;  %v4503_v52 = vmul.f32 -1.442695, %v2995_v42 }
0x259f   :  { %4770 = vpow2.f32 %v4503_v52 }
0x25a2   :  { %v2993_v63 = vpop.f32.mrf.mxu1 }
0x25a5   :  { %v4771_v62 = vpop.eup %4770 }
0x25a6   :  { %v2999_v5 = vadd.f32 1.0, %v4771_v62 }
0x25a8   :  { %4772 = vrcp.f32 %v2999_v5  ;;  %v3011_v38 = vand.u32 2147483648, %v2999_v5  ;;  %vm3005_vm14 = vweird.f32 %v2999_v5  ;;  %v3009_v28 = vand.u32 2147483647, %v2999_v5 }
0x25aa   :  { %v3012_v63 = vor.u32 1.1754944e-38, %v3011_v38  ;;  %vm3010_vm1 = vcmp.eq.f32.partialorder %v3009_v28, 8.507059e+37 }
0x25ae   :  { %v4773_v43 = vpop.eup %4772 }
0x25af   :  { %v3001_v0 = vmul.f32 %v4773_v43, %v2999_v5  ;;  %vm3006_vm13 = vweird.f32 %v4773_v43  ;;  %v3112_v5 = vsub.f32 1.0, %v3098_v25 }
0x25b0   :  { %vm3007_vm15 = vmor %vm3005_vm14, %vm3006_vm13 }
0x25b1   :  { %v3002_v34 = vsub.f32 1.0, %v3001_v0 }
0x25b3   :  { %v3003_v6 = vmul.f32 %v4773_v43, %v3002_v34 }
0x25b5   :  { %v3004_v3 = vadd.f32 %v4773_v43, %v3003_v6 }
0x25b7   :  { %v3008_v22 = vsel %vm3007_vm15, %v4773_v43, %v3004_v3  ;;  %v3118_v3 = vmul.f32 %v3098_v25, %v5979_v39 }
0x25b8   :  { %v3013_v27 = vsel %vm3010_vm1, %v3012_v63, %v3008_v22 }
0x25b9   :  { %v3027_v39 = vsub.f32 1.0, %v3013_v27  ;;  %v3033_v63 = vmul.f32 %v3013_v27, %v5998_v16 }
0x25f7   :  { %v3018_v30 = vpop.permute.xlu2 %3017 }
0x25f8   :  { %v3020_v42 = vmul.f32 %v3018_v30, %v3013_v27 }
0x25fa   :  { %3022 = vrot.lane.b32.xlu0 %v3020_v42, %s5107_s25 }
0x260c   :  { %v3108_v52 = vpop.permute.xlu1 %3107 }
0x260d   :  { %v3110_v62 = vadd.f32 %v3108_v52, %v3057_v13 }
0x260f   :  { %4774 = vtanh.f32 %v3110_v62 }
0x2615   :  { %v4775_v7 = vpop.eup %4774 }
0x2616   :  { %3114 = vrot.lane.b32.xlu1 %v4775_v7, %s5116_s12 }
0x266c   :  { %v3023_v0 = vpop.permute.xlu0 %3022 }
0x266d   :  { %v3025_v34 = vadd.f32 %v3023_v0, %v2972_v36  ;;  %v3213_v36 = vld [vmem:[#allocation7 + $0x18] sm:$0xf] }
0x266e   :  { %4510 = vmatmul.msk.bf16.vlgmr.msrb.gmra.mxu2 %vm146_vm0, %v3213_v36 }
0x266f   :  { %4776 = vtanh.f32 %v3025_v34  ;;  %3563 = vmatpush.bf16.msrb.mxu2 %v5923_v9  ;;  %v3128_v34 = vld [vmem:[#allocation4 + $0x44] sm:$0xf] }
0x2670   :  { %4507 = vmatmul.msk.bf16.vlgmr.msrb.gmra.mxu0 %vm146_vm0, %v3128_v34 }
0x2671   :  { %3478 = vmatpush.bf16.msrb.mxu0 %v5930_v1 }
0x2673   :  { %3564 = vmatpush.bf16.msrb.mxu2 %v5926_v61 }
0x2675   :  { %v4777_v6 = vpop.eup %4776  ;;  %3479 = vmatpush.bf16.msrb.mxu0 %v5933_v32 }
0x2676   :  { %3029 = vrot.lane.b32.xlu2 %v4777_v6, %s5116_s12 }
0x2688   :  { %v3115_v43 = vpop.permute.xlu1 %3114 }
0x2689   :  { %v3117_v38 = vmul.f32 %v3115_v43, %v3112_v5 }
0x268b   :  { %v6020_v28 = vadd.f32 %v3118_v3, %v3117_v38 }
0x268d   :  { %v6024_v13 = vpack.c.bf16 %v6020_v28, %v6020_v28 }
0x268f   :  { %6511 = vst [vmem:[#allocation27_spill] sm:$0xff] %v6024_v13  ;;  %v3230_v22 = vunpack.c.l.b16 %v6024_v13 }
0x2691   :  { %v3231_v7 = vpack.c.b16 %v3230_v22, %v3230_v22 }
0x2693   :  { %3232 = vrot.lane.b32.xlu0 %v3231_v7, %s5116_s12 }
0x26d0   :  { %v3030_v25 = vpop.permute.xlu2 %3029 }
0x26d1   :  { %v3032_v30 = vmul.f32 %v3030_v25, %v3027_v39 }
0x26d3   :  { %v6032_v42 = vadd.f32 %v3033_v63, %v3032_v30 }
0x26d5   :  { %v6036_v52 = vpack.c.bf16 %v6032_v42, %v6032_v42 }
0x26d7   :  { %6512 = vst [vmem:[#allocation28_spill] sm:$0xff] %v6036_v52  ;;  %v3145_v62 = vunpack.c.l.b16 %v6036_v52 }
0x26d9   :  { %v3146_v0 = vpack.c.b16 %v3145_v62, %v3145_v62 }
0x26db   :  { %3147 = vrot.lane.b32.xlu1 %v3146_v0, %s5116_s12 }
0x26ed   :  { %v3141_v43 = vpop.f32.mrf.mxu0 }
0x26f1   :  { %v3226_v27 = vpop.f32.mrf.mxu2 }
0x26f2   :  { %v3227_v36 = vadd.f32 %v5964_v23, %v3226_v27 }
0x26f5   :  { %v3143_v3 = vpop.f32.mrf.mxu0 }
0x26f9   :  { %v3228_v6 = vpop.f32.mrf.mxu2 }
0x2705   :  { %v3233_v16 = vpop.permute.xlu0 %3232 }
0x2706   :  { %4511 = vmatmul.msk.bf16.vlgmr.msrb.gmra.mxu3 %vm146_vm0, %v3233_v16 }
0x2707   :  { %3583 = vmatpush.bf16.msrb.mxu3 %v5946_v51 }
0x270b   :  { %3584 = vmatpush.bf16.msrb.mxu3 %v5949_v59 }
0x274d   :  { %v3148_v5 = vpop.permute.xlu1 %3147 }
0x274e   :  { %4508 = vmatmul.msk.bf16.vlgmr.msrb.gmra.mxu1 %vm146_vm0, %v3148_v5 }
0x274f   :  { %3498 = vmatpush.bf16.msrb.mxu1 %v5953_v35 }
0x2753   :  { %3499 = vmatpush.bf16.msrb.mxu1 %v5956_v53 }
0x2789   :  { %v3246_v38 = vpop.f32.mrf.mxu3 }
0x278a   :  { %v3270_v22 = vadd.f32 %v3246_v38, %v5276_v19  ;;  %v3250_v39 = vadd.f32 %v3246_v38, %v3227_v36 }
0x278c   :  { %3272 = vrot.lane.b32.xlu2 %v3270_v22, %s5107_s25  ;;  %v4512_v25 = vmul.f32 -1.442695, %v3250_v39 }
0x278e   :  { %4778 = vpow2.f32 %v4512_v25 }
0x2791   :  { %v3248_v7 = vpop.f32.mrf.mxu3 }
0x2794   :  { %v4779_v63 = vpop.eup %4778 }
0x2795   :  { %v3254_v30 = vadd.f32 1.0, %v4779_v63 }
0x2797   :  { %4780 = vrcp.f32 %v3254_v30  ;;  %v3266_v7 = vand.u32 2147483648, %v3254_v30  ;;  %vm3260_vm3 = vweird.f32 %v3254_v30  ;;  %v3264_v27 = vand.u32 2147483647, %v3254_v30 }
0x2799   :  { %v3267_v39 = vor.u32 1.1754944e-38, %v3266_v7  ;;  %vm3265_vm5 = vcmp.eq.f32.partialorder %v3264_v27, 8.507059e+37 }
0x279d   :  { %v4781_v34 = vpop.eup %4780 }
0x279e   :  { %v3256_v6 = vmul.f32 %v4781_v34, %v3254_v30  ;;  %vm3261_vm2 = vweird.f32 %v4781_v34 }
0x279f   :  { %vm3262_vm4 = vmor %vm3260_vm3, %vm3261_vm2 }
0x27a0   :  { %v3257_v5 = vsub.f32 1.0, %v3256_v6 }
0x27a2   :  { %v3258_v3 = vmul.f32 %v4781_v34, %v3257_v5 }
0x27a4   :  { %v3259_v22 = vadd.f32 %v4781_v34, %v3258_v3 }
0x27a6   :  { %v3263_v38 = vsel %vm3262_vm4, %v4781_v34, %v3259_v22 }
0x27a7   :  { %v3268_v63 = vsel %vm3265_vm5, %v3267_v39, %v3263_v38 }
0x27cb   :  { %v3161_v62 = vpop.f32.mrf.mxu1 }
0x27cc   :  { %v3185_v0 = vadd.f32 %v3161_v62, %v5280_v24 }
0x27ce   :  { %3187 = vrot.lane.b32.xlu0 %v3185_v0, %s5107_s25  ;;  %v3142_v0 = vadd.f32 %v5973_v12, %v3141_v43 }
0x27d3   :  { %v3163_v16 = vpop.f32.mrf.mxu1 }
0x27d4   :  { %v3165_v16 = vadd.f32 %v3161_v62, %v3142_v0 }
0x27d6   :  { %v4509_v17 = vmul.f32 -1.442695, %v3165_v16 }
0x27d8   :  { %4782 = vpow2.f32 %v4509_v17 }
0x27de   :  { %v4783_v6 = vpop.eup %4782 }
0x27df   :  { %v3169_v5 = vadd.f32 1.0, %v4783_v6  ;;  %v3282_v6 = vsub.f32 1.0, %v3268_v63 }
0x27e1   :  { %4784 = vrcp.f32 %v3169_v5  ;;  %v3181_v22 = vand.u32 2147483648, %v3169_v5  ;;  %vm3175_vm7 = vweird.f32 %v3169_v5  ;;  %v3179_v7 = vand.u32 2147483647, %v3169_v5 }
0x27e3   :  { %vm3180_vm9 = vcmp.eq.f32.partialorder %v3179_v7, 8.507059e+37 }
0x27e6   :  { %v3273_v25 = vpop.permute.xlu2 %3272 }
0x27e7   :  { %v3275_v52 = vmul.f32 %v3273_v25, %v3268_v63  ;;  %v4785_v3 = vpop.eup %4784 }
0x27e8   :  { %v3171_v57 = vmul.f32 %v4785_v3, %v3169_v5  ;;  %vm3176_vm6 = vweird.f32 %v4785_v3 }
0x27e9   :  { %3277 = vrot.lane.b32.xlu1 %v3275_v52, %s5107_s25  ;;  %vm3177_vm8 = vmor %vm3175_vm7, %vm3176_vm6  ;;  %v3182_v52 = vor.u32 1.1754944e-38, %v3181_v22 }
0x27ea   :  { %v3172_v30 = vsub.f32 1.0, %v3171_v57 }
0x27ec   :  { %v3173_v13 = vmul.f32 %v4785_v3, %v3172_v30 }
0x27ee   :  { %v3174_v34 = vadd.f32 %v4785_v3, %v3173_v13 }
0x27f0   :  { %v3178_v27 = vsel %vm3177_vm8, %v4785_v3, %v3174_v34  ;;  %v3288_v3 = vmul.f32 %v3268_v63, %v6020_v28 }
0x27f1   :  { %v3183_v62 = vsel %vm3180_vm9, %v3182_v52, %v3178_v27 }
0x27f2   :  { %v3197_v28 = vsub.f32 1.0, %v3183_v62  ;;  %v3203_v27 = vmul.f32 %v3183_v62, %v6032_v42 }
0x2840   :  { %v3188_v43 = vpop.permute.xlu0 %3187 }
0x2841   :  { %v3190_v38 = vmul.f32 %v3188_v43, %v3183_v62 }
0x2843   :  { %3192 = vrot.lane.b32.xlu2 %v3190_v38, %s5107_s25  ;;  %v3298_v38 = vld [vmem:[#allocation4 + $0x48] sm:$0xf] }
0x2844   :  { %4513 = vmatmul.msk.bf16.vlgmr.msra.gmra.mxu0 %vm146_vm0, %v3298_v38 }
0x2845   :  { %3648 = vmatpush.bf16.msra.mxu0 %v5930_v1 }
0x2849   :  { %3649 = vmatpush.bf16.msra.mxu0 %v5933_v32 }
0x285b   :  { %v3278_v17 = vpop.permute.xlu1 %3277 }
0x285c   :  { %v3280_v39 = vadd.f32 %v3278_v17, %v3227_v36 }
0x285e   :  { %4786 = vtanh.f32 %v3280_v39 }
0x2864   :  { %v4787_v25 = vpop.eup %4786 }
0x2865   :  { %3284 = vrot.lane.b32.xlu0 %v4787_v25, %s5116_s12 }
0x289d   :  { %v3193_v57 = vpop.permute.xlu2 %3192 }
0x289e   :  { %v3195_v13 = vadd.f32 %v3193_v57, %v3142_v0  ;;  %v3383_v0 = vld [vmem:[#allocation7 + $0x14] sm:$0xf] }
0x289f   :  { %4516 = vmatmul.msk.bf16.vlgmr.msra.gmra.mxu2 %vm146_vm0, %v3383_v0 }
0x28a0   :  { %4788 = vtanh.f32 %v3195_v13  ;;  %3733 = vmatpush.bf16.msra.mxu2 %v5923_v9 }
0x28a4   :  { %3734 = vmatpush.bf16.msra.mxu2 %v5926_v61 }
0x28a6   :  { %v4789_v16 = vpop.eup %4788 }
0x28a7   :  { %3199 = vrot.lane.b32.xlu1 %v4789_v16, %s5116_s12 }
0x28c1   :  { %v3311_v16 = vpop.f32.mrf.mxu0 }
0x28d7   :  { %v3285_v5 = vpop.permute.xlu0 %3284 }
0x28d8   :  { %v3287_v30 = vmul.f32 %v3285_v5, %v3282_v6  ;;  %v3313_v6 = vpop.f32.mrf.mxu0 }
0x28da   :  { %v6060_v34 = vadd.f32 %v3288_v3, %v3287_v30 }
0x28dc   :  { %v6064_v36 = vpack.c.bf16 %v6060_v34, %v6060_v34 }
0x28de   :  { %6513 = vst [vmem:[#allocation29_spill] sm:$0xff] %v6064_v36  ;;  %v3400_v22 = vunpack.c.l.b16 %v6064_v36 }
0x28e0   :  { %v3401_v7 = vpack.c.b16 %v3400_v22, %v3400_v22 }
0x28e2   :  { %3402 = vrot.lane.b32.xlu2 %v3401_v7, %s5116_s12 }
0x2919   :  { %v3200_v63 = vpop.permute.xlu1 %3199 }
0x291a   :  { %v3202_v52 = vmul.f32 %v3200_v63, %v3197_v28 }
0x291c   :  { %v6072_v43 = vadd.f32 %v3203_v27, %v3202_v52 }
0x291e   :  { %v6076_v17 = vpack.c.bf16 %v6072_v43, %v6072_v43 }
0x2920   :  { %6514 = vst [vmem:[#allocation30_spill] sm:$0xff] %v6076_v17  ;;  %v3315_v39 = vunpack.c.l.b16 %v6076_v17 }
0x2922   :  { %v3316_v25 = vpack.c.b16 %v3315_v39, %v3315_v39  ;;  %v3396_v62 = vpop.f32.mrf.mxu2 }
0x2923   :  { %v3397_v22 = vadd.f32 %v5964_v23, %v3396_v62 }
0x2924   :  { %3317 = vrot.lane.b32.xlu0 %v3316_v25, %s5116_s12 }
0x292a   :  { %v3398_v57 = vpop.f32.mrf.mxu2 }
0x293c   :  { %v3403_v42 = vpop.permute.xlu2 %3402 }
0x293d   :  { %4517 = vmatmul.msk.bf16.vlgmr.msra.gmra.mxu3 %vm146_vm0, %v3403_v42 }
0x293e   :  { %3753 = vmatpush.bf16.msra.mxu3 %v5946_v51 }
0x2942   :  { %3754 = vmatpush.bf16.msra.mxu3 %v5949_v59 }
0x2996   :  { %v3318_v13 = vpop.permute.xlu0 %3317 }
0x2997   :  { %4514 = vmatmul.msk.bf16.vlgmr.msra.gmra.mxu1 %vm146_vm0, %v3318_v13 }
0x2998   :  { %3668 = vmatpush.bf16.msra.mxu1 %v5953_v35 }
0x299c   :  { %3669 = vmatpush.bf16.msra.mxu1 %v5956_v53 }
0x29c0   :  { %v3416_v5 = vpop.f32.mrf.mxu3 }
0x29c1   :  { %v3440_v3 = vadd.f32 %v3416_v5, %v5276_v19  ;;  %v3420_v7 = vadd.f32 %v3416_v5, %v3397_v22 }
0x29c3   :  { %3442 = vrot.lane.b32.xlu1 %v3440_v3, %s5107_s25  ;;  %v4518_v0 = vmul.f32 -1.442695, %v3420_v7 }
0x29c5   :  { %4790 = vpow2.f32 %v4518_v0 }
0x29c8   :  { %v3418_v30 = vpop.f32.mrf.mxu3 }
0x29cb   :  { %v4791_v28 = vpop.eup %4790 }
0x29cc   :  { %v3424_v27 = vadd.f32 1.0, %v4791_v28  ;;  %v3312_v28 = vadd.f32 %v5973_v12, %v3311_v16 }
0x29ce   :  { %4792 = vrcp.f32 %v3424_v27  ;;  %v3436_v6 = vand.u32 2147483648, %v3424_v27  ;;  %vm3430_vm11 = vweird.f32 %v3424_v27  ;;  %v3434_v62 = vand.u32 2147483647, %v3424_v27 }
0x29d0   :  { %v3437_v3 = vor.u32 1.1754944e-38, %v3436_v6  ;;  %vm3435_vm13 = vcmp.eq.f32.partialorder %v3434_v62, 8.507059e+37 }
0x29d4   :  { %v4793_v39 = vpop.eup %4792 }
0x29d5   :  { %v3426_v25 = vmul.f32 %v4793_v39, %v3424_v27  ;;  %vm3431_vm10 = vweird.f32 %v4793_v39 }
0x29d6   :  { %vm3432_vm12 = vmor %vm3430_vm11, %vm3431_vm10 }
0x29d7   :  { %v3427_v42 = vsub.f32 1.0, %v3426_v25 }
0x29d9   :  { %v3428_v57 = vmul.f32 %v4793_v39, %v3427_v42 }
0x29db   :  { %v3429_v13 = vadd.f32 %v4793_v39, %v3428_v57 }
0x29dd   :  { %v3433_v5 = vsel %vm3432_vm12, %v4793_v39, %v3429_v13 }
0x29de   :  { %v3438_v7 = vsel %vm3435_vm13, %v3437_v3, %v3433_v5 }
0x2a14   :  { %v3331_v63 = vpop.f32.mrf.mxu1 }
0x2a15   :  { %v3355_v52 = vadd.f32 %v3331_v63, %v5280_v24 }
0x2a17   :  { %3357 = vrot.lane.b32.xlu2 %v3355_v52, %s5107_s25  ;;  %v3335_v52 = vadd.f32 %v3331_v63, %v3312_v28 }
0x2a1c   :  { %v3333_v38 = vpop.f32.mrf.mxu1 }
0x2a1d   :  { %v4515_v38 = vmul.f32 -1.442695, %v3335_v52 }
0x2a1f   :  { %4794 = vpow2.f32 %v4515_v38 }
0x2a25   :  { %v4795_v25 = vpop.eup %4794 }
0x2a26   :  { %v3339_v42 = vadd.f32 1.0, %v4795_v25  ;;  %v3452_v25 = vsub.f32 1.0, %v3438_v7 }
0x2a28   :  { %4796 = vrcp.f32 %v3339_v42  ;;  %v3351_v13 = vand.u32 2147483648, %v3339_v42  ;;  %vm3345_vm15 = vweird.f32 %v3339_v42  ;;  %v3349_v6 = vand.u32 2147483647, %v3339_v42 }
0x2a2a   :  { %v3352_v5 = vor.u32 1.1754944e-38, %v3351_v13  ;;  %vm3350_vm2 = vcmp.eq.f32.partialorder %v3349_v6, 8.507059e+37 }
0x2a2e   :  { %v4797_v57 = vpop.eup %4796 }
0x2a2f   :  { %v3341_v36 = vmul.f32 %v4797_v57, %v3339_v42  ;;  %vm3346_vm14 = vweird.f32 %v4797_v57 }
0x2a30   :  { %vm3347_vm1 = vmor %vm3345_vm15, %vm3346_vm14 }
0x2a31   :  { %v3342_v27 = vsub.f32 1.0, %v3341_v36 }
0x2a33   :  { %v3343_v17 = vmul.f32 %v4797_v57, %v3342_v27 }
0x2a35   :  { %v3443_v30 = vpop.permute.xlu1 %3442  ;;  %v3344_v39 = vadd.f32 %v4797_v57, %v3343_v17 }
0x2a36   :  { %v3445_v0 = vmul.f32 %v3443_v30, %v3438_v7 }
0x2a37   :  { %v3348_v62 = vsel %vm3347_vm1, %v4797_v57, %v3344_v39  ;;  %v3458_v57 = vmul.f32 %v3438_v7, %v6060_v34 }
0x2a38   :  { %3447 = vrot.lane.b32.xlu0 %v3445_v0, %s5107_s25  ;;  %v3353_v63 = vsel %vm3350_vm2, %v3352_v5, %v3348_v62 }
0x2a39   :  { %v3367_v34 = vsub.f32 1.0, %v3353_v63  ;;  %v3373_v62 = vmul.f32 %v3353_v63, %v6072_v43 }
0x2a71   :  { %v3358_v16 = vpop.permute.xlu2 %3357 }
0x2a72   :  { %v3360_v3 = vmul.f32 %v3358_v16, %v3353_v63 }
0x2a74   :  { %3362 = vrot.lane.b32.xlu1 %v3360_v3, %s5107_s25 }
0x2aaa   :  { %v3448_v30 = vpop.permute.xlu0 %3447 }
0x2aab   :  { %v3450_v0 = vadd.f32 %v3448_v30, %v3397_v22 }
0x2aad   :  { %4798 = vtanh.f32 %v3450_v0 }
0x2ab3   :  { %v4799_v52 = vpop.eup %4798 }
0x2ab4   :  { %3454 = vrot.lane.b32.xlu2 %v4799_v52, %s5116_s12  ;;  %v3468_v52 = vld [vmem:[#allocation4 + $0x4c] sm:$0xf] }
0x2ab5   :  { %4519 = vmatmul.msk.bf16.vlgmr.msrb.gmra.mxu0 %vm146_vm0, %v3468_v52 }
0x2ab6   :  { %3818 = vmatpush.bf16.msrb.mxu0 %v5930_v1 }
0x2aba   :  { %3819 = vmatpush.bf16.msrb.mxu0 %v5933_v32 }
0x2ae6   :  { %v3363_v36 = vpop.permute.xlu1 %3362 }
0x2ae7   :  { %v3365_v17 = vadd.f32 %v3363_v36, %v3312_v28  ;;  %v3553_v28 = vld [vmem:[#allocation7 + $0x10] sm:$0xf] }
0x2ae8   :  { %4522 = vmatmul.msk.bf16.vlgmr.msrb.gmra.mxu2 %vm146_vm0, %v3553_v28 }
0x2ae9   :  { %4800 = vtanh.f32 %v3365_v17  ;;  %3903 = vmatpush.bf16.msrb.mxu2 %v5923_v9 }
0x2aed   :  { %3904 = vmatpush.bf16.msrb.mxu2 %v5926_v61 }
0x2aef   :  { %v4801_v38 = vpop.eup %4800 }
0x2af0   :  { %3369 = vrot.lane.b32.xlu0 %v4801_v38, %s5116_s12 }
0x2b0e   :  { %v3455_v42 = vpop.permute.xlu2 %3454 }
0x2b0f   :  { %v3457_v27 = vmul.f32 %v3455_v42, %v3452_v25 }
0x2b11   :  { %v6100_v39 = vadd.f32 %v3458_v57, %v3457_v27 }
0x2b13   :  { %v6104_v22 = vpack.c.bf16 %v6100_v39, %v6100_v39 }
0x2b15   :  { %6515 = vst [vmem:[#allocation31_spill] sm:$0xff] %v6104_v22  ;;  %v3570_v13 = vunpack.c.l.b16 %v6104_v22 }
0x2b17   :  { %v3571_v6 = vpack.c.b16 %v3570_v13, %v3570_v13 }
0x2b19   :  { %3572 = vrot.lane.b32.xlu1 %v3571_v6, %s5116_s12 }
0x2b32   :  { %v3481_v36 = vpop.f32.mrf.mxu0 }
0x2b3a   :  { %v3483_v1 = vpop.f32.mrf.mxu0 }
0x2b62   :  { %v3370_v7 = vpop.permute.xlu0 %3369 }
0x2b63   :  { %v3372_v5 = vmul.f32 %v3370_v7, %v3367_v34 }
0x2b65   :  { %v6112_v16 = vadd.f32 %v3373_v62, %v3372_v5 }
0x2b67   :  { %v6116_v3 = vpack.c.bf16 %v6112_v16, %v6112_v16 }
0x2b69   :  { %v3485_v30 = vunpack.c.l.b16 %v6116_v3 }
0x2b6b   :  { %v3486_v0 = vpack.c.b16 %v3485_v30, %v3485_v30  ;;  %v3566_v43 = vpop.f32.mrf.mxu2 }
0x2b6d   :  { %3487 = vrot.lane.b32.xlu2 %v3486_v0, %s5116_s12 }
0x2b73   :  { %v3568_v63 = vpop.f32.mrf.mxu2 }
0x2b8b   :  { %v3573_v9 = vpop.permute.xlu1 %3572 }
0x2b8c   :  { %4523 = vmatmul.msk.bf16.vlgmr.msrb.gmra.mxu3 %vm146_vm0, %v3573_v9  ;;  %v3482_v9 = vadd.f32 %v5973_v12, %v3481_v36 }
0x2b8d   :  { %3923 = vmatpush.bf16.msrb.mxu3 %v5946_v51 }
0x2b91   :  { %3924 = vmatpush.bf16.msrb.mxu3 %v5949_v59 }
0x2bc7   :  { %v3488_v61 = vpop.permute.xlu2 %3487 }
0x2bc8   :  { %4520 = vmatmul.msk.bf16.vlgmr.msrb.gmra.mxu1 %vm146_vm0, %v3488_v61 }
0x2bc9   :  { %3838 = vmatpush.bf16.msrb.mxu1 %v5953_v35  ;;  %v3567_v35 = vadd.f32 %v5964_v23, %v3566_v43 }
0x2bcd   :  { %3839 = vmatpush.bf16.msrb.mxu1 %v5956_v53 }
0x2c0f   :  { %v3586_v17 = vpop.f32.mrf.mxu3 }
0x2c10   :  { %v3610_v32 = vadd.f32 %v3586_v17, %v5276_v19  ;;  %v3590_v42 = vadd.f32 %v3586_v17, %v3567_v35 }
0x2c12   :  { %3612 = vrot.lane.b32.xlu0 %v3610_v32, %s5107_s25  ;;  %v4524_v53 = vmul.f32 -1.442695, %v3590_v42 }
0x2c14   :  { %4802 = vpow2.f32 %v4524_v53 }
0x2c17   :  { %v3588_v38 = vpop.f32.mrf.mxu3 }
0x2c1a   :  { %v4803_v57 = vpop.eup %4802 }
0x2c1b   :  { %v3594_v27 = vadd.f32 1.0, %v4803_v57 }
0x2c1d   :  { %4804 = vrcp.f32 %v3594_v27  ;;  %v3606_v62 = vand.u32 2147483648, %v3594_v27  ;;  %vm3600_vm4 = vweird.f32 %v3594_v27  ;;  %v3604_v5 = vand.u32 2147483647, %v3594_v27 }
0x2c1f   :  { %v3607_v0 = vor.u32 1.1754944e-38, %v3606_v62  ;;  %vm3605_vm6 = vcmp.eq.f32.partialorder %v3604_v5, 8.507059e+37 }
0x2c23   :  { %v4805_v13 = vpop.eup %4804 }
0x2c24   :  { %v3596_v6 = vmul.f32 %v4805_v13, %v3594_v27  ;;  %vm3601_vm3 = vweird.f32 %v4805_v13 }
0x2c25   :  { %vm3602_vm5 = vmor %vm3600_vm4, %vm3601_vm3 }
0x2c26   :  { %v3597_v28 = vsub.f32 1.0, %v3596_v6 }
0x2c28   :  { %v3598_v34 = vmul.f32 %v4805_v13, %v3597_v28 }
0x2c2a   :  { %v3599_v7 = vadd.f32 %v4805_v13, %v3598_v34 }
0x2c2c   :  { %v3603_v30 = vsel %vm3602_vm5, %v4805_v13, %v3599_v7 }
0x2c2d   :  { %v3608_v52 = vsel %vm3605_vm6, %v3607_v0, %v3603_v30 }
0x2c2e   :  { %v3622_v30 = vsub.f32 1.0, %v3608_v52 }
0x2c45   :  { %v3501_v51 = vpop.f32.mrf.mxu1 }
0x2c46   :  { %v3525_v59 = vadd.f32 %v3501_v51, %v5280_v24  ;;  %v3505_v43 = vadd.f32 %v3501_v51, %v3482_v9 }
0x2c48   :  { %3527 = vrot.lane.b32.xlu1 %v3525_v59, %s5107_s25  ;;  %v4521_v63 = vmul.f32 -1.442695, %v3505_v43 }
0x2c4a   :  { %4806 = vpow2.f32 %v4521_v63 }
0x2c4d   :  { %v3503_v25 = vpop.f32.mrf.mxu1 }
0x2c50   :  { %v4807_v1 = vpop.eup %4806 }
0x2c51   :  { %v3509_v17 = vadd.f32 1.0, %v4807_v1 }
0x2c53   :  { %4808 = vrcp.f32 %v3509_v17  ;;  %v3521_v53 = vand.u32 2147483648, %v3509_v17  ;;  %vm3515_vm8 = vweird.f32 %v3509_v17  ;;  %v3519_v57 = vand.u32 2147483647, %v3509_v17 }
0x2c55   :  { %v3522_v36 = vor.u32 1.1754944e-38, %v3521_v53  ;;  %vm3520_vm10 = vcmp.eq.f32.partialorder %v3519_v57, 8.507059e+37 }
0x2c59   :  { %v4809_v32 = vpop.eup %4808 }
0x2c5a   :  { %v3511_v38 = vmul.f32 %v4809_v32, %v3509_v17  ;;  %vm3516_vm7 = vweird.f32 %v4809_v32  ;;  %v6149_v17 = vld [vmem:[#allocation10 + $0x8] sm:$0xff] }
0x2c5b   :  { %vm3517_vm9 = vmor %vm3515_vm8, %vm3516_vm7 }
0x2c5c   :  { %v3512_v59 = vsub.f32 1.0, %v3511_v38 }
0x2c5e   :  { %v3513_v25 = vmul.f32 %v4809_v32, %v3512_v59 }
0x2c60   :  { %v3514_v42 = vadd.f32 %v4809_v32, %v3513_v25 }
0x2c62   :  { %v3518_v12 = vsel %vm3517_vm9, %v4809_v32, %v3514_v42 }
0x2c63   :  { %v3523_v51 = vsel %vm3520_vm10, %v3522_v36, %v3518_v12  ;;  %v3638_v12 = vld [vmem:[#allocation4 + $0x50] sm:$0xf]  ;;  %v6165_v36 = vld [vmem:[#allocation9 + $0x8] sm:$0xff] }
0x2c64   :  { %v3543_v38 = vmul.f32 %v3523_v51, %v6112_v16  ;;  %4525 = vmatmul.msk.bf16.vlgmr.msra.gmra.mxu0 %vm146_vm0, %v3638_v12  ;;  %v6168_v16 = vld [vmem:[#allocation9] sm:$0xff] }
0x2c65   :  { %3988 = vmatpush.bf16.msra.mxu0 %v6165_v36 }
0x2c69   :  { %3989 = vmatpush.bf16.msra.mxu0 %v6168_v16 }
0x2c84   :  { %v3613_v23 = vpop.permute.xlu0 %3612 }
0x2c85   :  { %v3615_v61 = vmul.f32 %v3613_v23, %v3608_v52  ;;  %v3628_v23 = vmul.f32 %v3608_v52, %v6100_v39  ;;  %v6152_v39 = vld [vmem:[#allocation10] sm:$0xff]  ;;  %v3537_v52 = vsub.f32 1.0, %v3523_v51 }
0x2c87   :  { %3617 = vrot.lane.b32.xlu2 %v3615_v61, %s5107_s25 }
0x2cba   :  { %v3528_v27 = vpop.permute.xlu1 %3527 }
0x2cbb   :  { %v3530_v13 = vmul.f32 %v3528_v27, %v3523_v51  ;;  %v6172_v51 = vld [vmem:[#allocation13 + $0x8] sm:$0xff] }
0x2cbd   :  { %3532 = vrot.lane.b32.xlu0 %v3530_v13, %s5107_s25  ;;  %v6175_v13 = vld [vmem:[#allocation13] sm:$0xff] }
0x2ce1   :  { %v3618_v6 = vpop.permute.xlu2 %3617 }
0x2ce2   :  { %v3620_v28 = vadd.f32 %v3618_v6, %v3567_v35 }
0x2ce4   :  { %4810 = vtanh.f32 %v3620_v28 }
0x2cea   :  { %v4811_v34 = vpop.eup %4810 }
0x2ceb   :  { %3624 = vrot.lane.b32.xlu1 %v4811_v34, %s5116_s12 }
0x2d2f   :  { %v3533_v7 = vpop.permute.xlu0 %3532 }
0x2d30   :  { %v3535_v62 = vadd.f32 %v3533_v7, %v3482_v9  ;;  %v3723_v9 = vld [vmem:[#allocation7 + $0xc] sm:$0xf] }
0x2d31   :  { %4528 = vmatmul.msk.bf16.vlgmr.msra.gmra.mxu2 %vm146_vm0, %v3723_v9  ;;  %v6179_v7 = vld [vmem:[#allocation12 + $0x8] sm:$0xff] }
0x2d32   :  { %4812 = vtanh.f32 %v3535_v62  ;;  %4073 = vmatpush.bf16.msra.mxu2 %v6149_v17  ;;  %v6182_v62 = vld [vmem:[#allocation12] sm:$0xff] }
0x2d36   :  { %4074 = vmatpush.bf16.msra.mxu2 %v6152_v39 }
0x2d38   :  { %v4813_v5 = vpop.eup %4812 }
0x2d39   :  { %3539 = vrot.lane.b32.xlu2 %v4813_v5, %s5116_s12  ;;  %v3651_v5 = vpop.f32.mrf.mxu0 }
0x2d5d   :  { %v3625_v0 = vpop.permute.xlu1 %3624 }
0x2d5e   :  { %v3627_v61 = vmul.f32 %v3625_v0, %v3622_v30  ;;  %v3653_v30 = vpop.f32.mrf.mxu0 }
0x2d60   :  { %v6140_v43 = vadd.f32 %v3628_v23, %v3627_v61 }
0x2d62   :  { %v6144_v35 = vpack.c.bf16 %v6140_v43, %v6140_v43 }
0x2d64   :  { %v3740_v63 = vunpack.c.l.b16 %v6144_v35 }
0x2d66   :  { %v3741_v1 = vpack.c.b16 %v3740_v63, %v3740_v63  ;;  %v6190_v63 = vld [vmem:[%s6494_s7] ss:$0 sm:$0xff] }
0x2d68   :  { %3742 = vrot.lane.b32.xlu0 %v3741_v1, %s5116_s12 }
0x2d93   :  { %v3540_v32 = vpop.permute.xlu2 %3539 }
0x2d94   :  { %v3542_v59 = vmul.f32 %v3540_v32, %v3537_v52 }
0x2d96   :  { %v6156_v25 = vadd.f32 %v3543_v38, %v3542_v59 }
0x2d98   :  { %v6160_v42 = vpack.c.bf16 %v6156_v25, %v6156_v25 }
0x2d9a   :  { %6516 = vst [vmem:[#allocation32_spill] sm:$0xff] %v6160_v42  ;;  %v3655_v53 = vunpack.c.l.b16 %v6160_v42 }
0x2d9c   :  { %v3656_v57 = vpack.c.b16 %v3655_v53, %v3655_v53 }
0x2d9e   :  { %3657 = vrot.lane.b32.xlu1 %v3656_v57, %s5116_s12 }
0x2db4   :  { %v3736_v6 = vpop.f32.mrf.mxu2 }
0x2db5   :  { %v3737_v1 = vadd.f32 %v6190_v63, %v3736_v6 }
0x2dbc   :  { %v3738_v28 = vpop.f32.mrf.mxu2 }
0x2dda   :  { %v3743_v27 = vpop.permute.xlu0 %3742 }
0x2ddb   :  { %4529 = vmatmul.msk.bf16.vlgmr.msra.gmra.mxu3 %vm146_vm0, %v3743_v27 }
0x2ddc   :  { %4093 = vmatpush.bf16.msra.mxu3 %v6172_v51 }
0x2de0   :  { %4094 = vmatpush.bf16.msra.mxu3 %v6175_v13 }
0x2e10   :  { %v3658_v34 = vpop.permute.xlu1 %3657 }
0x2e11   :  { %4526 = vmatmul.msk.bf16.vlgmr.msra.gmra.mxu1 %vm146_vm0, %v3658_v34 }
0x2e12   :  { %4008 = vmatpush.bf16.msra.mxu1 %v6179_v7 }
0x2e16   :  { %4009 = vmatpush.bf16.msra.mxu1 %v6182_v62 }
0x2e5e   :  { %v3756_v0 = vpop.f32.mrf.mxu3 }
0x2e5f   :  { %v3780_v23 = vadd.f32 %v3756_v0, %v5276_v19  ;;  %v3760_v9 = vadd.f32 %v3756_v0, %v3737_v1 }
0x2e61   :  { %3782 = vrot.lane.b32.xlu2 %v3780_v23, %s5107_s25  ;;  %v4530_v52 = vmul.f32 -1.442695, %v3760_v9 }
0x2e63   :  { %4814 = vpow2.f32 %v4530_v52 }
0x2e66   :  { %v3758_v61 = vpop.f32.mrf.mxu3 }
0x2e69   :  { %v4815_v53 = vpop.eup %4814 }
0x2e6a   :  { %v3764_v57 = vadd.f32 1.0, %v4815_v53 }
0x2e6c   :  { %4816 = vrcp.f32 %v3764_v57  ;;  %v3776_v23 = vand.u32 2147483648, %v3764_v57  ;;  %vm3770_vm12 = vweird.f32 %v3764_v57  ;;  %v3774_v6 = vand.u32 2147483647, %v3764_v57 }
0x2e6e   :  { %v3777_v61 = vor.u32 1.1754944e-38, %v3776_v23  ;;  %vm3775_vm14 = vcmp.eq.f32.partialorder %v3774_v6, 8.507059e+37 }
0x2e72   :  { %v4817_v12 = vpop.eup %4816 }
0x2e73   :  { %v3766_v27 = vmul.f32 %v4817_v12, %v3764_v57  ;;  %vm3771_vm11 = vweird.f32 %v4817_v12 }
0x2e74   :  { %vm3772_vm13 = vmor %vm3770_vm12, %vm3771_vm11 }
0x2e75   :  { %v3767_v28 = vsub.f32 1.0, %v3766_v27 }
0x2e77   :  { %v3768_v34 = vmul.f32 %v4817_v12, %v3767_v28 }
0x2e79   :  { %v3769_v30 = vadd.f32 %v4817_v12, %v3768_v34 }
0x2e7b   :  { %v3773_v0 = vsel %vm3772_vm13, %v4817_v12, %v3769_v30 }
0x2e8e   :  { %v3671_v32 = vpop.f32.mrf.mxu1 }
0x2e8f   :  { %v3695_v38 = vadd.f32 %v3671_v32, %v5280_v24 }
0x2e91   :  { %3697 = vrot.lane.b32.xlu0 %v3695_v38, %s5107_s25  ;;  %v3778_v38 = vsel %vm3775_vm14, %v3777_v61, %v3773_v0 }
0x2e96   :  { %v3673_v59 = vpop.f32.mrf.mxu1 }
0x2e97   :  { %v6199_v59 = vld [vmem:[%s6493_s6] ss:$0 sm:$0xff]  ;;  %s5117_s6 = smov [#allocation15]  }
0x2e98   :  { %v3652_v53 = vadd.f32 %v6199_v59, %v3651_v5  ;;  %s4329_s5 = sshll.u32 %s5117_s6, 4  ;;  %s4330_s5 = int_to_ptr.vmem [resolvable:$true] %s4329_s5 }
0x2e9a   :  { %v3675_v27 = vadd.f32 %v3671_v32, %v3652_v53 }
0x2e9c   :  { %v4527_v28 = vmul.f32 -1.442695, %v3675_v27 }
0x2e9e   :  { %4818 = vpow2.f32 %v4527_v28 }
0x2ea4   :  { %v4819_v57 = vpop.eup %4818 }
0x2ea5   :  { %v3679_v34 = vadd.f32 1.0, %v4819_v57 }
0x2ea7   :  { %4820 = vrcp.f32 %v3679_v34  ;;  %v3691_v61 = vand.u32 2147483648, %v3679_v34  ;;  %vm3685_vm1 = vweird.f32 %v3679_v34 }
0x2ea9   :  { %v3692_v42 = vor.u32 1.1754944e-38, %v3691_v61 }
0x2ead   :  { %v4821_v12 = vpop.eup %4820 }
0x2eae   :  { %v3681_v30 = vmul.f32 %v4821_v12, %v3679_v34  ;;  %vm3686_vm15 = vweird.f32 %v4821_v12 }
0x2eaf   :  { %vm3687_vm2 = vmor %vm3685_vm1, %vm3686_vm15 }
0x2eb0   :  { %v3682_v23 = vsub.f32 1.0, %v3681_v30 }
0x2eb2   :  { %v3683_v6 = vmul.f32 %v4821_v12, %v3682_v23 }
0x2eb4   :  { %v3684_v0 = vadd.f32 %v4821_v12, %v3683_v6 }
0x2ebb   :  { %v3783_v9 = vpop.permute.xlu2 %3782 }
0x2ebc   :  { %v3785_v52 = vmul.f32 %v3783_v9, %v3778_v38  ;;  %v3689_v9 = vand.u32 2147483647, %v3679_v34  ;;  %v3792_v34 = vsub.f32 1.0, %v3778_v38 }
0x2ebe   :  { %3787 = vrot.lane.b32.xlu1 %v3785_v52, %s5107_s25  ;;  %v3688_v52 = vsel %vm3687_vm2, %v4821_v12, %v3684_v0  ;;  %vm3690_vm3 = vcmp.eq.f32.partialorder %v3689_v9, 8.507059e+37  ;;  %v3798_v0 = vmul.f32 %v3778_v38, %v6140_v43 }
0x2ebf   :  { %v3693_v32 = vsel %vm3690_vm3, %v3692_v42, %v3688_v52 }
0x2ec0   :  { %v3707_v43 = vsub.f32 1.0, %v3693_v32  ;;  %v3713_v52 = vmul.f32 %v3693_v32, %v6156_v25 }
0x2f03   :  { %v3698_v5 = vpop.permute.xlu0 %3697 }
0x2f04   :  { %v3700_v27 = vmul.f32 %v3698_v5, %v3693_v32 }
0x2f06   :  { %3702 = vrot.lane.b32.xlu2 %v3700_v27, %s5107_s25 }
0x2f30   :  { %v3788_v28 = vpop.permute.xlu1 %3787 }
0x2f31   :  { %v3790_v57 = vadd.f32 %v3788_v28, %v3737_v1 }
0x2f33   :  { %4822 = vtanh.f32 %v3790_v57 }
0x2f39   :  { %v4823_v22 = vpop.eup %4822 }
0x2f3a   :  { %3794 = vrot.lane.b32.xlu0 %v4823_v22, %s5116_s12 }
0x2f60   :  { %v3703_v30 = vpop.permute.xlu2 %3702 }
0x2f61   :  { %v3705_v23 = vadd.f32 %v3703_v30, %v3652_v53  ;;  %v3893_v53 = vld [vmem:[#allocation7 + $0x8] sm:$0xf] }
0x2f62   :  { %4534 = vmatmul.msk.bf16.vlgmr.msrb.gmra.mxu2 %vm146_vm0, %v3893_v53 }
0x2f63   :  { %4824 = vtanh.f32 %v3705_v23  ;;  %4242 = vmatpush.bf16.msrb.mxu2 %v6149_v17  ;;  %v3808_v23 = vld [vmem:[#allocation4 + $0x54] sm:$0xf] }
0x2f64   :  { %4531 = vmatmul.msk.bf16.vlgmr.msrb.gmra.mxu0 %vm146_vm0, %v3808_v23 }
0x2f65   :  { %4158 = vmatpush.bf16.msrb.mxu0 %v6165_v36 }
0x2f67   :  { %4243 = vmatpush.bf16.msrb.mxu2 %v6152_v39 }
0x2f69   :  { %v4825_v6 = vpop.eup %4824  ;;  %4159 = vmatpush.bf16.msrb.mxu0 %v6168_v16 }
0x2f6a   :  { %3709 = vrot.lane.b32.xlu1 %v4825_v6, %s5116_s12 }
0x2fac   :  { %v3795_v12 = vpop.permute.xlu0 %3794 }
0x2fad   :  { %v3797_v42 = vmul.f32 %v3795_v12, %v3792_v34 }
0x2faf   :  { %v6206_v61 = vadd.f32 %v3798_v0, %v3797_v42 }
0x2fb1   :  { %v6210_v1 = vpack.c.bf16 %v6206_v61, %v6206_v61 }
0x2fb3   :  { %v3910_v9 = vunpack.c.l.b16 %v6210_v1 }
0x2fb5   :  { %v3911_v22 = vpack.c.b16 %v3910_v9, %v3910_v9 }
0x2fb7   :  { %3912 = vrot.lane.b32.xlu2 %v3911_v22, %s5116_s12 }
0x2fdc   :  { %v3710_v38 = vpop.permute.xlu1 %3709 }
0x2fdd   :  { %v3712_v5 = vmul.f32 %v3710_v38, %v3707_v43 }
0x2fdf   :  { %v6218_v27 = vadd.f32 %v3713_v52, %v3712_v5 }
0x2fe1   :  { %v6222_v28 = vpack.c.bf16 %v6218_v27, %v6218_v27  ;;  %v3821_v6 = vpop.f32.mrf.mxu0 }
0x2fe2   :  { %v3822_v52 = vadd.f32 %v6199_v59, %v3821_v6 }
0x2fe3   :  { %v3825_v57 = vunpack.c.l.b16 %v6222_v28 }
0x2fe5   :  { %v3826_v30 = vpack.c.b16 %v3825_v57, %v3825_v57  ;;  %v3906_v39 = vpop.f32.mrf.mxu2 }
0x2fe7   :  { %3827 = vrot.lane.b32.xlu0 %v3826_v30, %s5116_s12 }
0x2fe9   :  { %v3823_v36 = vpop.f32.mrf.mxu0 }
0x2fed   :  { %v3908_v25 = vpop.f32.mrf.mxu2 }
0x3011   :  { %v3913_v17 = vpop.permute.xlu2 %3912 }
0x3012   :  { %4535 = vmatmul.msk.bf16.vlgmr.msrb.gmra.mxu3 %vm146_vm0, %v3913_v17 }
0x3013   :  { %4262 = vmatpush.bf16.msrb.mxu3 %v6172_v51  ;;  %v3907_v51 = vadd.f32 %v6190_v63, %v3906_v39 }
0x3017   :  { %4263 = vmatpush.bf16.msrb.mxu3 %v6175_v13 }
0x3059   :  { %v3828_v32 = vpop.permute.xlu0 %3827 }
0x305a   :  { %4532 = vmatmul.msk.bf16.vlgmr.msrb.gmra.mxu1 %vm146_vm0, %v3828_v32 }
0x305b   :  { %4178 = vmatpush.bf16.msrb.mxu1 %v6179_v7 }
0x305f   :  { %4179 = vmatpush.bf16.msrb.mxu1 %v6182_v62 }
0x3095   :  { %v3926_v34 = vpop.f32.mrf.mxu3 }
0x3096   :  { %v3950_v16 = vadd.f32 %v3926_v34, %v5276_v19  ;;  %v3930_v42 = vadd.f32 %v3926_v34, %v3907_v51 }
0x3098   :  { %3952 = vrot.lane.b32.xlu1 %v3950_v16, %s5107_s25  ;;  %v4536_v9 = vmul.f32 -1.442695, %v3930_v42 }
0x309a   :  { %4826 = vpow2.f32 %v4536_v9 }
0x309d   :  { %v3928_v12 = vpop.f32.mrf.mxu3 }
0x30a0   :  { %v4827_v62 = vpop.eup %4826 }
0x30a1   :  { %v3934_v22 = vadd.f32 1.0, %v4827_v62 }
0x30a3   :  { %4828 = vrcp.f32 %v3934_v22  ;;  %v3946_v23 = vand.u32 2147483648, %v3934_v22  ;;  %vm3940_vm5 = vweird.f32 %v3934_v22  ;;  %v3944_v17 = vand.u32 2147483647, %v3934_v22 }
0x30a5   :  { %v3947_v32 = vor.u32 1.1754944e-38, %v3946_v23  ;;  %vm3945_vm7 = vcmp.eq.f32.partialorder %v3944_v17, 8.507059e+37 }
0x30a9   :  { %v4829_v53 = vpop.eup %4828 }
0x30aa   :  { %v3936_v43 = vmul.f32 %v4829_v53, %v3934_v22  ;;  %vm3941_vm4 = vweird.f32 %v4829_v53 }
0x30ab   :  { %vm3942_vm6 = vmor %vm3940_vm5, %vm3941_vm4  ;;  %vm289_vm5 = vcmask 257024  }
0x30ac   :  { %v3937_v38 = vsub.f32 1.0, %v3936_v43 }
0x30ae   :  { %v3938_v5 = vmul.f32 %v4829_v53, %v3937_v38 }
0x30b0   :  { %v3939_v30 = vadd.f32 %v4829_v53, %v3938_v5 }
0x30b2   :  { %v3943_v25 = vsel %vm3942_vm6, %v4829_v53, %v3939_v30 }
0x30b3   :  { %v3948_v34 = vsel %vm3945_vm7, %v3947_v32, %v3943_v25 }
0x30d7   :  { %v3841_v13 = vpop.f32.mrf.mxu1 }
0x30d8   :  { %v3865_v0 = vadd.f32 %v3841_v13, %v5280_v24  ;;  %v3845_v57 = vadd.f32 %v3841_v13, %v3822_v52 }
0x30da   :  { %3867 = vrot.lane.b32.xlu2 %v3865_v0, %s5107_s25  ;;  %v4533_v39 = vmul.f32 -1.442695, %v3845_v57 }
0x30dc   :  { %4830 = vpow2.f32 %v4533_v39 }
0x30df   :  { %v3843_v7 = vpop.f32.mrf.mxu1 }
0x30e2   :  { %v4831_v12 = vpop.eup %4830 }
0x30e3   :  { %v3849_v6 = vadd.f32 1.0, %v4831_v12  ;;  %v3968_v12 = vmul.f32 %v3948_v34, %v6206_v61 }
0x30e5   :  { %4832 = vrcp.f32 %v3849_v6  ;;  %v3861_v62 = vand.u32 2147483648, %v3849_v6  ;;  %vm3855_vm9 = vweird.f32 %v3849_v6  ;;  %v3859_v22 = vand.u32 2147483647, %v3849_v6 }
0x30e7   :  { %v3862_v43 = vor.u32 1.1754944e-38, %v3861_v62  ;;  %vm3860_vm11 = vcmp.eq.f32.partialorder %v3859_v22, 8.507059e+37 }
0x30eb   :  { %v4833_v13 = vpop.eup %4832 }
0x30ec   :  { %v3851_v0 = vmul.f32 %v4833_v13, %v3849_v6  ;;  %vm3856_vm8 = vweird.f32 %v4833_v13 }
0x30ed   :  { %vm3857_vm10 = vmor %vm3855_vm9, %vm3856_vm8 }
0x30ee   :  { %v3852_v42 = vsub.f32 1.0, %v3851_v0 }
0x30f0   :  { %v3853_v9 = vmul.f32 %v4833_v13, %v3852_v42 }
0x30f2   :  { %v3854_v7 = vadd.f32 %v4833_v13, %v3853_v9 }
0x30f4   :  { %v3858_v53 = vsel %vm3857_vm10, %v4833_v13, %v3854_v7 }
0x30f5   :  { %v3863_v5 = vsel %vm3860_vm11, %v3862_v43, %v3858_v53 }
0x30f6   :  { %v3877_v9 = vsub.f32 1.0, %v3863_v5  ;;  %v3883_v62 = vmul.f32 %v3863_v5, %v6218_v27 }
0x310a   :  { %v3953_v36 = vpop.permute.xlu1 %3952 }
0x310b   :  { %v3955_v16 = vmul.f32 %v3953_v36, %v3948_v34  ;;  %v3962_v36 = vsub.f32 1.0, %v3948_v34 }
0x310d   :  { %3957 = vrot.lane.b32.xlu0 %v3955_v16, %s5107_s25 }
0x3134   :  { %v3868_v38 = vpop.permute.xlu2 %3867 }
0x3135   :  { %v3870_v57 = vmul.f32 %v3868_v38, %v3863_v5  ;;  %v3978_v38 = vld [vmem:[#allocation4 + $0x58] sm:$0xf] }
0x3136   :  { %4537 = vmatmul.msk.bf16.vlgmr.msra.gmra.mxu0 %vm146_vm0, %v3978_v38 }
0x3137   :  { %3872 = vrot.lane.b32.xlu1 %v3870_v57, %s5107_s25 }
0x317f   :  { %v3958_v30 = vpop.permute.xlu0 %3957 }
0x3180   :  { %v3960_v23 = vadd.f32 %v3958_v30, %v3907_v51 }
0x3182   :  { %4834 = vtanh.f32 %v3960_v23 }
0x3188   :  { %v4835_v17 = vpop.eup %4834 }
0x3189   :  { %3964 = vrot.lane.b32.xlu2 %v4835_v17, %s5116_s12 }
0x31a9   :  { %v3873_v39 = vpop.permute.xlu1 %3872 }
0x31aa   :  { %v3875_v25 = vadd.f32 %v3873_v39, %v3822_v52  ;;  %v4063_v52 = vld [vmem:[#allocation7 + $0x4] sm:$0xf] }
0x31ab   :  { %4540 = vmatmul.msk.bf16.vlgmr.msra.gmra.mxu2 %vm146_vm0, %v4063_v52 }
0x31ac   :  { %4836 = vtanh.f32 %v3875_v25 }
0x31b2   :  { %v4837_v32 = vpop.eup %4836 }
0x31b3   :  { %3879 = vrot.lane.b32.xlu0 %v4837_v32, %s5116_s12  ;;  %v3991_v23 = vpop.f32.mrf.mxu0 }
0x31bb   :  { %v3993_v17 = vpop.f32.mrf.mxu0 }
0x31e3   :  { %v3965_v16 = vpop.permute.xlu2 %3964 }
0x31e4   :  { %v3967_v6 = vmul.f32 %v3965_v16, %v3962_v36 }
0x31e6   :  { %v6246_v13 = vadd.f32 %v3968_v12, %v3967_v6 }
0x31e8   :  { %v6250_v51 = vpack.c.bf16 %v6246_v13, %v6246_v13 }
0x31ea   :  { %v4080_v0 = vunpack.c.l.b16 %v6250_v51 }
0x31ec   :  { %v4081_v42 = vpack.c.b16 %v4080_v0, %v4080_v0 }
0x31ee   :  { %4082 = vrot.lane.b32.xlu1 %v4081_v42, %s5116_s12 }
0x3225   :  { %v3880_v7 = vpop.permute.xlu0 %3879 }
0x3226   :  { %v3882_v61 = vmul.f32 %v3880_v7, %v3877_v9 }
0x3228   :  { %v6256_v34 = vadd.f32 %v3883_v62, %v3882_v61  ;;  %v3992_v61 = vadd.f32 %v6199_v59, %v3991_v23 }
0x322a   :  { %v6260_v22 = vpack.c.bf16 %v6256_v34, %v6256_v34 }
0x322c   :  { %v3995_v53 = vunpack.c.l.b16 %v6260_v22 }
0x322e   :  { %v3996_v43 = vpack.c.b16 %v3995_v53, %v3995_v53  ;;  %v4076_v27 = vpop.f32.mrf.mxu2 }
0x322f   :  { %v4077_v6 = vadd.f32 %v6190_v63, %v4076_v27 }
0x3230   :  { %3997 = vrot.lane.b32.xlu2 %v3996_v43, %s5116_s12 }
0x3236   :  { %v4078_v5 = vpop.f32.mrf.mxu2 }
0x3260   :  { %v4083_v57 = vpop.permute.xlu1 %4082 }
0x3261   :  { %4541 = vmatmul.msk.bf16.vlgmr.msra.gmra.mxu3 %vm146_vm0, %v4083_v57 }
0x328a   :  { %v3998_v30 = vpop.permute.xlu2 %3997 }
0x328b   :  { %4538 = vmatmul.msk.bf16.vlgmr.msra.gmra.mxu1 %vm146_vm0, %v3998_v30 }
0x32e4   :  { %v4096_v39 = vpop.f32.mrf.mxu3 }
0x32e5   :  { %v4120_v25 = vadd.f32 %v4096_v39, %v5276_v19  ;;  %v4100_v0 = vadd.f32 %v4096_v39, %v4077_v6 }
0x32e7   :  { %4122 = vrot.lane.b32.xlu0 %v4120_v25, %s5107_s25  ;;  %v4542_v42 = vmul.f32 -1.442695, %v4100_v0 }
0x32e9   :  { %4838 = vpow2.f32 %v4542_v42 }
0x32ec   :  { %v4098_v32 = vpop.f32.mrf.mxu3 }
0x32ef   :  { %v4839_v52 = vpop.eup %4838 }
0x32f0   :  { %v4104_v9 = vadd.f32 1.0, %v4839_v52 }
0x32f2   :  { %4840 = vrcp.f32 %v4104_v9  ;;  %v4116_v5 = vand.u32 2147483648, %v4104_v9  ;;  %vm4110_vm13 = vweird.f32 %v4104_v9  ;;  %v4114_v27 = vand.u32 2147483647, %v4104_v9 }
0x32f4   :  { %v4117_v39 = vor.u32 1.1754944e-38, %v4116_v5  ;;  %vm4115_vm15 = vcmp.eq.f32.partialorder %v4114_v27, 8.507059e+37 }
0x32f8   :  { %v4841_v7 = vpop.eup %4840 }
0x32f9   :  { %v4106_v62 = vmul.f32 %v4841_v7, %v4104_v9  ;;  %vm4111_vm12 = vweird.f32 %v4841_v7 }
0x32fa   :  { %vm4112_vm14 = vmor %vm4110_vm13, %vm4111_vm12 }
0x32fb   :  { %v4107_v53 = vsub.f32 1.0, %v4106_v62 }
0x32fd   :  { %v4108_v38 = vmul.f32 %v4841_v7, %v4107_v53 }
0x32ff   :  { %v4109_v30 = vadd.f32 %v4841_v7, %v4108_v38 }
0x3301   :  { %v4113_v17 = vsel %vm4112_vm14, %v4841_v7, %v4109_v30 }
0x3302   :  { %v4118_v32 = vsel %vm4115_vm15, %v4117_v39, %v4113_v17 }
0x3308   :  { %v4011_v36 = vpop.f32.mrf.mxu1 }
0x3309   :  { %v4035_v16 = vadd.f32 %v4011_v36, %v5280_v24  ;;  %v4015_v43 = vadd.f32 %v4011_v36, %v3992_v61 }
0x330b   :  { %4037 = vrot.lane.b32.xlu1 %v4035_v16, %s5107_s25  ;;  %v4539_v57 = vmul.f32 -1.442695, %v4015_v43 }
0x330d   :  { %4842 = vpow2.f32 %v4539_v57 }
0x3310   :  { %v4013_v12 = vpop.f32.mrf.mxu1 }
0x3313   :  { %v4843_v16 = vpop.eup %4842 }
0x3314   :  { %v4019_v23 = vadd.f32 1.0, %v4843_v16 }
0x3316   :  { %4844 = vrcp.f32 %v4019_v23  ;;  %v4031_v53 = vand.u32 2147483648, %v4019_v23  ;;  %vm4025_vm2 = vweird.f32 %v4019_v23  ;;  %v4029_v9 = vand.u32 2147483647, %v4019_v23 }
0x3318   :  { %v4032_v43 = vor.u32 1.1754944e-38, %v4031_v53  ;;  %vm4030_vm4 = vcmp.eq.f32.partialorder %v4029_v9, 8.507059e+37 }
0x331c   :  { %v4845_v36 = vpop.eup %4844 }
0x331d   :  { %v4021_v0 = vmul.f32 %v4845_v36, %v4019_v23  ;;  %vm4026_vm1 = vweird.f32 %v4845_v36 }
0x331e   :  { %vm4027_vm3 = vmor %vm4025_vm2, %vm4026_vm1 }
0x331f   :  { %v4022_v42 = vsub.f32 1.0, %v4021_v0 }
0x3321   :  { %v4023_v52 = vmul.f32 %v4845_v36, %v4022_v42 }
0x3323   :  { %v4024_v62 = vadd.f32 %v4845_v36, %v4023_v52 }
0x3325   :  { %v4028_v7 = vsel %vm4027_vm3, %v4845_v36, %v4024_v62  ;;  %v4138_v36 = vmul.f32 %v4118_v32, %v6246_v13 }
0x3326   :  { %v4033_v57 = vsel %vm4030_vm4, %v4032_v43, %v4028_v7 }
0x3327   :  { %v4053_v53 = vmul.f32 %v4033_v57, %v6256_v34 }
0x3359   :  { %v4123_v25 = vpop.permute.xlu0 %4122 }
0x335a   :  { %v4125_v12 = vmul.f32 %v4123_v25, %v4118_v32 }
0x335c   :  { %4127 = vrot.lane.b32.xlu2 %v4125_v12, %s5107_s25  ;;  %v4132_v12 = vsub.f32 1.0, %v4118_v32 }
0x337d   :  { %v4038_v38 = vpop.permute.xlu1 %4037 }
0x337e   :  { %v4040_v30 = vmul.f32 %v4038_v38, %v4033_v57 }
0x3380   :  { %4042 = vrot.lane.b32.xlu0 %v4040_v30, %s5107_s25 }
0x33b6   :  { %v4128_v5 = vpop.permute.xlu2 %4127 }
0x33b7   :  { %v4130_v27 = vadd.f32 %v4128_v5, %v4077_v6 }
0x33b9   :  { %4846 = vtanh.f32 %v4130_v27 }
0x33bf   :  { %v4847_v17 = vpop.eup %4846 }
0x33c0   :  { %4134 = vrot.lane.b32.xlu1 %v4847_v17, %s5116_s12 }
0x33f2   :  { %v4043_v39 = vpop.permute.xlu0 %4042 }
0x33f3   :  { %v4045_v25 = vadd.f32 %v4043_v39, %v3992_v61 }
0x33f5   :  { %4848 = vtanh.f32 %v4045_v25 }
0x33fb   :  { %v4849_v16 = vpop.eup %4848 }
0x33fc   :  { %4049 = vrot.lane.b32.xlu2 %v4849_v16, %s5116_s12 }
0x3404   :  { %402 = vrot.lane.b32.xlu2 %v5308_v26, %s5116_s12  ;;  %v4047_v26 = vsub.f32 1.0, %v4033_v57 }
0x3432   :  { %v4135_v23 = vpop.permute.xlu1 %4134 }
0x3433   :  { %v4137_v0 = vmul.f32 %v4135_v23, %v4132_v12 }
0x3435   :  { %v6280_v42 = vadd.f32 %v4138_v36, %v4137_v0 }
0x3437   :  { %v6284_v6 = vpack.c.bf16 %v6280_v42, %v6280_v42 }
0x3439   :  { %v4249_v61 = vunpack.c.l.b16 %v6284_v6 }
0x343b   :  { %v4250_v52 = vpack.c.b16 %v4249_v61, %v4249_v61 }
0x343d   :  { %4251 = vrot.lane.b32.xlu0 %v4250_v52, %s5116_s12 }
0x3445   :  { %487 = vrot.lane.b32.xlu0 %v5364_v60, %s5116_s12  ;;  %v4232_v60 = vld [vmem:[#allocation7] sm:$0xf] }
0x3446   :  { %4546 = vmatmul.msk.bf16.vlgmr.msrb.gmra.mxu2 %vm146_vm0, %v4232_v60 }
0x3456   :  { %v4050_v62 = vpop.permute.xlu2 %4049 }
0x3457   :  { %v4052_v13 = vmul.f32 %v4050_v62, %v4047_v26 }
0x3459   :  { %v6291_v32 = vadd.f32 %v4053_v53, %v4052_v13 }
0x345b   :  { %v6295_v9 = vpack.c.bf16 %v6291_v32, %v6291_v32 }
0x345d   :  { %v4165_v7 = vunpack.c.l.b16 %v6295_v9 }
0x345e   :  { %v403_v43 = vpop.permute.xlu2 %402 }
0x345f   :  { %v4166_v38 = vpack.c.b16 %v4165_v7, %v4165_v7  ;;  %406 = vst.msk [vmem:[#allocation16 + $0x5c] sm:$0xf] %vm289_vm5, %v403_v43 }
0x3461   :  { %4167 = vrot.lane.b32.xlu1 %v4166_v38, %s5116_s12 }
0x3469   :  { %286 = vrot.lane.b32.xlu1 %v5324_v37, %s5116_s12  ;;  %v4148_v37 = vld [vmem:[#allocation4 + $0x5c] sm:$0xf] }
0x346a   :  { %4543 = vmatmul.msk.bf16.vlgmr.msrb.gmra.mxu0 %vm146_vm0, %v4148_v37 }
0x3471   :  { %572 = vrot.lane.b32.xlu1 %v5348_v46, %s5116_s12 }
0x3479   :  { %827 = vrot.lane.b32.xlu1 %v5444_v2, %s5116_s12 }
0x3481   :  { %1082 = vrot.lane.b32.xlu1 %v5472_v58, %s5116_s12 }
0x3489   :  { %1167 = vrot.lane.b32.xlu1 %v5547_v4, %s5116_s12 }
0x3491   :  { %1422 = vrot.lane.b32.xlu1 %v5574_v31, %s5116_s12 }
0x3499   :  { %1677 = vrot.lane.b32.xlu1 %v5667_v54, %s5116_s12 }
0x34a1   :  { %1932 = vrot.lane.b32.xlu1 %v5698_v55, %s5116_s12 }
0x34a9   :  { %2187 = vrot.lane.b32.xlu1 %v5815_v33, %s5116_s12 }
0x34af   :  { %v4252_v46 = vpop.permute.xlu0 %4251 }
0x34b0   :  { %4547 = vmatmul.msk.bf16.vlgmr.msrb.gmra.mxu3 %vm146_vm0, %v4252_v46 }
0x34b1   :  { %2527 = vrot.lane.b32.xlu1 %v5890_v50, %s5116_s12 }
0x34b7   :  { %v488_v2 = vpop.permute.xlu0 %487 }
0x34b8   :  { %491 = vst.msk [vmem:[#allocation15 + $0x4] sm:$0xf] %vm289_vm5, %v488_v2 }
0x34b9   :  { %2782 = vrot.lane.b32.xlu1 %v5917_v45, %s5116_s12 }
0x34c9   :  { %v4245_v34 = vpop.f32.mrf.mxu2 }
0x34d1   :  { %v4247_v30 = vpop.f32.mrf.mxu2 }
0x34d3   :  { %v4168_v58 = vpop.permute.xlu1 %4167 }
0x34d4   :  { %4544 = vmatmul.msk.bf16.vlgmr.msrb.gmra.mxu1 %vm146_vm0, %v4168_v58 }
0x34db   :  { %v287_v4 = vpop.permute.xlu1 %286 }
0x34dc   :  { %290 = vst.msk [vmem:[#allocation15] sm:$0xf] %vm289_vm5, %v287_v4 }
0x34e3   :  { %v573_v31 = vpop.permute.xlu1 %572 }
0x34e4   :  { %576 = vst.msk [vmem:[#allocation16 + $0x58] sm:$0xf] %vm289_vm5, %v573_v31 }
0x34e7   :  { %v4161_v39 = vpop.f32.mrf.mxu0 }
0x34eb   :  { %v828_v54 = vpop.permute.xlu1 %827 }
0x34ec   :  { %831 = vst.msk [vmem:[#allocation15 + $0xc] sm:$0xf] %vm289_vm5, %v828_v54 }
0x34ef   :  { %v4163_v12 = vpop.f32.mrf.mxu0 }
0x34f3   :  { %v1083_v55 = vpop.permute.xlu1 %1082 }
0x34f4   :  { %1086 = vst.msk [vmem:[#allocation16 + $0x4c] sm:$0xf] %vm289_vm5, %v1083_v55 }
0x34fb   :  { %v1168_v33 = vpop.permute.xlu1 %1167 }
0x34fc   :  { %1171 = vst.msk [vmem:[#allocation15 + $0x14] sm:$0xf] %vm289_vm5, %v1168_v33 }
0x3503   :  { %v1423_v50 = vpop.permute.xlu1 %1422 }
0x3504   :  { %1426 = vst.msk [vmem:[#allocation16 + $0x44] sm:$0xf] %vm289_vm5, %v1423_v50 }
0x350b   :  { %v1678_v45 = vpop.permute.xlu1 %1677 }
0x350c   :  { %1681 = vst.msk [vmem:[#allocation15 + $0x20] sm:$0xf] %vm289_vm5, %v1678_v45 }
0x3513   :  { %v1933_v57 = vpop.permute.xlu1 %1932 }
0x3514   :  { %1936 = vst.msk [vmem:[#allocation16 + $0x38] sm:$0xf] %vm289_vm5, %v1933_v57 }
0x351b   :  { %v2188_v5 = vpop.permute.xlu1 %2187 }
0x351c   :  { %2191 = vst.msk [vmem:[#allocation15 + $0x2c] sm:$0xf] %vm289_vm5, %v2188_v5 }
0x3523   :  { %v2528_v27 = vpop.permute.xlu1 %2527 }
0x3524   :  { %2531 = vst.msk [vmem:[#allocation15 + $0x34] sm:$0xf] %vm289_vm5, %v2528_v27 }
0x352b   :  { %v2783_v17 = vpop.permute.xlu1 %2782 }
0x352c   :  { %2786 = vst.msk [vmem:[#allocation16 + $0x24] sm:$0xf] %vm289_vm5, %v2783_v17 }
0x3533   :  { %v4265_v25 = vpop.f32.mrf.mxu3 }
0x3534   :  { %v4289_v16 = vadd.f32 %v4265_v25, %v5276_v19 }
0x3536   :  { %4291 = vrot.lane.b32.xlu0 %v4289_v16, %s5107_s25 }
0x353b   :  { %v4267_v23 = vpop.f32.mrf.mxu3 }
0x353e   :  { %742 = vrot.lane.b32.xlu0 %v5385_v11, %s5116_s12  ;;  %v6355_v11 = vadd.f32 %v6190_v63, %v4245_v34 }
0x3546   :  { %997 = vrot.lane.b32.xlu0 %v5496_v21, %s5116_s12  ;;  %v4269_v21 = vadd.f32 %v4265_v25, %v6355_v11 }
0x354e   :  { %1337 = vrot.lane.b32.xlu0 %v5590_v15, %s5116_s12  ;;  %v6359_v15 = vadd.f32 %v6199_v59, %v4161_v39 }
0x3551   :  { %v4181_v36 = vpop.f32.mrf.mxu1 }
0x3552   :  { %v4205_v0 = vadd.f32 %v4181_v36, %v5280_v24  ;;  %v4548_v24 = vmul.f32 -1.442695, %v4269_v21  ;;  %v4185_v61 = vadd.f32 %v4181_v36, %v6359_v15  ;;  %v6520_v36 = vld [vmem:[#allocation26_spill] sm:$0xff]  ;;  %v6523_v21 = vld [vmem:[#allocation29_spill] sm:$0xff] }
0x3554   :  { %4207 = vrot.lane.b32.xlu2 %v4205_v0, %s5107_s25  ;;  %4850 = vpow2.f32 %v4548_v24  ;;  %v6521_v0 = vld [vmem:[#allocation28_spill] sm:$0xff]  ;;  %v6524_v24 = vld [vmem:[#allocation31_spill] sm:$0xff] }
0x3556   :  { %1592 = vrot.lane.b32.xlu0 %v5611_v18, %s5116_s12  ;;  %v4545_v18 = vmul.f32 -1.442695, %v4185_v61  ;;  %v6525_v61 = vld [vmem:[#allocation32_spill] sm:$0xff] }
0x3558   :  { %4852 = vpow2.f32 %v4545_v18 }
0x3559   :  { %v4183_v19 = vpop.f32.mrf.mxu1 }
0x355a   :  { %v4851_v52 = vpop.eup %4850 }
0x355b   :  { %v4273_v26 = vadd.f32 1.0, %v4851_v52 }
0x355c   :  { %657 = vrot.lane.b32.xlu2 %v5401_v29, %s5116_s12 }
0x355d   :  { %4854 = vrcp.f32 %v4273_v26  ;;  %v4285_v60 = vand.u32 2147483648, %v4273_v26  ;;  %vm4279_vm7 = vweird.f32 %v4273_v26  ;;  %v4283_v37 = vand.u32 2147483647, %v4273_v26 }
0x355e   :  { %v4853_v29 = vpop.eup %4852 }
0x355f   :  { %v4189_v62 = vadd.f32 1.0, %v4853_v29  ;;  %v4286_v58 = vor.u32 1.1754944e-38, %v4285_v60  ;;  %vm4284_vm9 = vcmp.eq.f32.partialorder %v4283_v37, 8.507059e+37 }
0x3561   :  { %4856 = vrcp.f32 %v4189_v62  ;;  %v4201_v55 = vand.u32 2147483648, %v4189_v62  ;;  %vm4195_vm11 = vweird.f32 %v4189_v62  ;;  %v4199_v50 = vand.u32 2147483647, %v4189_v62 }
0x3563   :  { %v4202_v34 = vor.u32 1.1754944e-38, %v4201_v55  ;;  %vm4200_vm13 = vcmp.eq.f32.partialorder %v4199_v50, 8.507059e+37 }
0x3564   :  { %912 = vrot.lane.b32.xlu2 %v5428_v44, %s5116_s12  ;;  %v4855_v44 = vpop.eup %4854 }
0x3565   :  { %v4275_v63 = vmul.f32 %v4855_v44, %v4273_v26  ;;  %vm4280_vm6 = vweird.f32 %v4855_v44 }
0x3566   :  { %vm4281_vm8 = vmor %vm4279_vm7, %vm4280_vm6 }
0x3567   :  { %v4857_v53 = vpop.eup %4856  ;;  %v4276_v13 = vsub.f32 1.0, %v4275_v63 }
0x3568   :  { %v4191_v7 = vmul.f32 %v4857_v53, %v4189_v62  ;;  %vm4196_vm10 = vweird.f32 %v4857_v53 }
0x3569   :  { %v4277_v43 = vmul.f32 %v4855_v44, %v4276_v13  ;;  %vm4197_vm12 = vmor %vm4195_vm11, %vm4196_vm10 }
0x356a   :  { %v4192_v59 = vsub.f32 1.0, %v4191_v7 }
0x356b   :  { %v4278_v38 = vadd.f32 %v4855_v44, %v4277_v43 }
0x356c   :  { %v4193_v46 = vmul.f32 %v4857_v53, %v4192_v59 }
0x356d   :  { %v4282_v2 = vsel %vm4281_vm8, %v4855_v44, %v4278_v38 }
0x356e   :  { %v4194_v4 = vadd.f32 %v4857_v53, %v4193_v46  ;;  %v6362_v31 = vsel %vm4284_vm9, %v4286_v58, %v4282_v2 }
0x356f   :  { %v4301_v59 = vsub.f32 1.0, %v6362_v31  ;;  %v4307_v60 = vmul.f32 %v6362_v31, %v6280_v42 }
0x3570   :  { %v4198_v45 = vsel %vm4197_vm12, %v4857_v53, %v4194_v4 }
0x3571   :  { %v6366_v30 = vsel %vm4200_vm13, %v4202_v34, %v4198_v45 }
0x35a8   :  { %v4292_v54 = vpop.permute.xlu0 %4291 }
0x35a9   :  { %v4294_v33 = vmul.f32 %v4292_v54, %v6362_v31 }
0x35ab   :  { %4296 = vrot.lane.b32.xlu0 %v4294_v33, %s5107_s25 }
0x35ae   :  { %v4208_v57 = vpop.permute.xlu2 %4207 }
0x35af   :  { %v4210_v5 = vmul.f32 %v4208_v57, %v6366_v30 }
0x35b0   :  { %v743_v27 = vpop.permute.xlu0 %742 }
0x35b1   :  { %746 = vst.msk [vmem:[#allocation16 + $0x54] sm:$0xf] %vm289_vm5, %v743_v27  ;;  %4212 = vrot.lane.b32.xlu2 %v4210_v5, %s5107_s25 }
0x35b3   :  { %1847 = vrot.lane.b32.xlu0 %v5722_v20, %s5116_s12 }
0x35b6   :  { %v658_v17 = vpop.permute.xlu2 %657 }
0x35b7   :  { %661 = vst.msk [vmem:[#allocation15 + $0x8] sm:$0xf] %vm289_vm5, %v658_v17 }
0x35b8   :  { %v998_v39 = vpop.permute.xlu0 %997 }
0x35b9   :  { %1001 = vst.msk [vmem:[#allocation15 + $0x10] sm:$0xf] %vm289_vm5, %v998_v39  ;;  %1252 = vrot.lane.b32.xlu2 %v5531_v47, %s5116_s12  ;;  %v6517_v47 = vld [vmem:[#allocation27_spill] sm:$0xff] }
0x35bb   :  { %2102 = vrot.lane.b32.xlu0 %v5758_v49, %s5116_s12 }
0x35be   :  { %v913_v25 = vpop.permute.xlu2 %912 }
0x35bf   :  { %916 = vst.msk [vmem:[#allocation16 + $0x50] sm:$0xf] %vm289_vm5, %v913_v25 }
0x35c0   :  { %v1338_v16 = vpop.permute.xlu0 %1337 }
0x35c1   :  { %1341 = vst.msk [vmem:[#allocation15 + $0x18] sm:$0xf] %vm289_vm5, %v1338_v16  ;;  %1507 = vrot.lane.b32.xlu2 %v5627_v40, %s5116_s12 }
0x35c8   :  { %v1593_v20 = vpop.permute.xlu0 %1592 }
0x35c9   :  { %1596 = vst.msk [vmem:[#allocation16 + $0x40] sm:$0xf] %vm289_vm5, %v1593_v20  ;;  %1762 = vrot.lane.b32.xlu2 %v5651_v14, %s5116_s12 }
0x35d1   :  { %2017 = vrot.lane.b32.xlu2 %v5773_v41, %s5116_s12 }
0x35d9   :  { %2272 = vrot.lane.b32.xlu2 %v5797_v48, %s5116_s12 }
0x35e1   :  { %2357 = vrot.lane.b32.xlu2 %v5853_v8, %s5116_s12 }
0x35e9   :  { %2612 = vrot.lane.b32.xlu2 %v5878_v56, %s5116_s12  ;;  %v6518_v56 = vld [vmem:[#allocation24_spill] sm:$0xff] }
0x35f1   :  { %2867 = vrot.lane.b32.xlu2 %v6002_v10, %s5116_s12 }
0x35f9   :  { %3122 = vrot.lane.b32.xlu2 %v6517_v47, %s5116_s12 }
0x3601   :  { %3377 = vrot.lane.b32.xlu2 %v6116_v3, %s5116_s12 }
0x3609   :  { %3632 = vrot.lane.b32.xlu2 %v6144_v35, %s5116_s12 }
0x360b   :  { %v4213_v40 = vpop.permute.xlu2 %4212 }
0x360c   :  { %v4215_v14 = vadd.f32 %v4213_v40, %v6359_v15 }
0x360e   :  { %4858 = vtanh.f32 %v4215_v14 }
0x3611   :  { %3887 = vrot.lane.b32.xlu2 %v6260_v22, %s5116_s12  ;;  %v6519_v22 = vld [vmem:[#allocation25_spill] sm:$0xff] }
0x3613   :  { %v1253_v49 = vpop.permute.xlu2 %1252 }
0x3614   :  { %v4859_v41 = vpop.eup %4858  ;;  %1256 = vst.msk [vmem:[#allocation16 + $0x48] sm:$0xf] %vm289_vm5, %v1253_v49 }
0x3615   :  { %4219 = vrot.lane.b32.xlu0 %v4859_v41, %s5116_s12 }
0x3619   :  { %4142 = vrot.lane.b32.xlu2 %v6284_v6, %s5116_s12 }
0x361b   :  { %v1508_v48 = vpop.permute.xlu2 %1507 }
0x361c   :  { %1511 = vst.msk [vmem:[#allocation15 + $0x1c] sm:$0xf] %vm289_vm5, %v1508_v48 }
0x361d   :  { %v4297_v8 = vpop.permute.xlu0 %4296  ;;  %2442 = vrot.lane.b32.xlu0 %v6518_v56, %s5116_s12 }
0x361e   :  { %v4299_v10 = vadd.f32 %v4297_v8, %v6355_v11  ;;  %v6522_v11 = vld [vmem:[#allocation30_spill] sm:$0xff] }
0x3620   :  { %4860 = vtanh.f32 %v4299_v10 }
0x3623   :  { %v1763_v3 = vpop.permute.xlu2 %1762 }
0x3624   :  { %1766 = vst.msk [vmem:[#allocation16 + $0x3c] sm:$0xf] %vm289_vm5, %v1763_v3 }
0x3625   :  { %v1848_v35 = vpop.permute.xlu0 %1847  ;;  %2697 = vrot.lane.b32.xlu0 %v6519_v22, %s5116_s12 }
0x3626   :  { %v4861_v12 = vpop.eup %4860  ;;  %1851 = vst.msk [vmem:[#allocation15 + $0x24] sm:$0xf] %vm289_vm5, %v1848_v35 }
0x3627   :  { %4303 = vrot.lane.b32.xlu1 %v4861_v12, %s5116_s12 }
0x362b   :  { %v2018_v6 = vpop.permute.xlu2 %2017 }
0x362c   :  { %2021 = vst.msk [vmem:[#allocation15 + $0x28] sm:$0xf] %vm289_vm5, %v2018_v6 }
0x362d   :  { %v2103_v23 = vpop.permute.xlu0 %2102  ;;  %2952 = vrot.lane.b32.xlu0 %v6520_v36, %s5116_s12 }
0x362e   :  { %2106 = vst.msk [vmem:[#allocation16 + $0x34] sm:$0xf] %vm289_vm5, %v2103_v23 }
0x362f   :  { %3037 = vrot.lane.b32.xlu1 %v6521_v0, %s5116_s12 }
0x3633   :  { %v2273_v19 = vpop.permute.xlu2 %2272 }
0x3634   :  { %2276 = vst.msk [vmem:[#allocation16 + $0x30] sm:$0xf] %vm289_vm5, %v2273_v19 }
0x3635   :  { %3207 = vrot.lane.b32.xlu0 %v6522_v11, %s5116_s12 }
0x3637   :  { %3292 = vrot.lane.b32.xlu1 %v6523_v21, %s5116_s12 }
0x363b   :  { %v2358_v15 = vpop.permute.xlu2 %2357 }
0x363c   :  { %2361 = vst.msk [vmem:[#allocation15 + $0x30] sm:$0xf] %vm289_vm5, %v2358_v15 }
0x363d   :  { %3462 = vrot.lane.b32.xlu0 %v6524_v24, %s5116_s12 }
0x363f   :  { %3547 = vrot.lane.b32.xlu1 %v6525_v61, %s5116_s12 }
0x3643   :  { %v2613_v18 = vpop.permute.xlu2 %2612 }
0x3644   :  { %2616 = vst.msk [vmem:[#allocation16 + $0x28] sm:$0xf] %vm289_vm5, %v2613_v18 }
0x3645   :  { %3717 = vrot.lane.b32.xlu0 %v6222_v28, %s5116_s12 }
0x3647   :  { %3802 = vrot.lane.b32.xlu1 %v6210_v1, %s5116_s12 }
0x364b   :  { %v2868_v52 = vpop.permute.xlu2 %2867 }
0x364c   :  { %2871 = vst.msk [vmem:[#allocation15 + $0x3c] sm:$0xf] %vm289_vm5, %v2868_v52 }
0x364d   :  { %3972 = vrot.lane.b32.xlu0 %v6250_v51, %s5116_s12  ;;  %v4217_v51 = vsub.f32 1.0, %v6366_v30 }
0x364f   :  { %4057 = vrot.lane.b32.xlu1 %v6295_v9, %s5116_s12  ;;  %v4223_v9 = vmul.f32 %v6366_v30, %v6291_v32 }
0x3653   :  { %v3123_v26 = vpop.permute.xlu2 %3122 }
0x3654   :  { %3126 = vst.msk [vmem:[#allocation16 + $0x1c] sm:$0xf] %vm289_vm5, %v3123_v26 }
0x365b   :  { %v3378_v29 = vpop.permute.xlu2 %3377 }
0x365c   :  { %3381 = vst.msk [vmem:[#allocation15 + $0x48] sm:$0xf] %vm289_vm5, %v3378_v29 }
0x3663   :  { %v3633_v62 = vpop.permute.xlu2 %3632 }
0x3664   :  { %3636 = vst.msk [vmem:[#allocation16 + $0x10] sm:$0xf] %vm289_vm5, %v3633_v62 }
0x366b   :  { %v3888_v28 = vpop.permute.xlu2 %3887 }
0x366c   :  { %3891 = vst.msk [vmem:[#allocation15 + $0x54] sm:$0xf] %vm289_vm5, %v3888_v28 }
0x3673   :  { %v4143_v1 = vpop.permute.xlu2 %4142 }
0x3674   :  { %4146 = vst.msk [vmem:[#allocation16 + $0x4] sm:$0xf] %vm289_vm5, %v4143_v1 }
0x3687   :  { %v4220_v44 = vpop.permute.xlu0 %4219 }
0x3688   :  { %v4222_v63 = vmul.f32 %v4220_v44, %v4217_v51 }
0x368a   :  { %v4224_v53 = vadd.f32 %v4223_v9, %v4222_v63 }
0x368c   :  { %v4225_v13 = vpack.c.bf16 %v4224_v53, %v4224_v53  ;;  %4316 = vrot.lane.b32.xlu2 %v4224_v53, %s5116_s12 }
0x368e   :  { %4227 = vrot.lane.b32.xlu0 %v4225_v13, %s5116_s12 }
0x368f   :  { %v2443_v7 = vpop.permute.xlu0 %2442 }
0x3690   :  { %2446 = vst.msk [vmem:[#allocation16 + $0x2c] sm:$0xf] %vm289_vm5, %v2443_v7 }
0x3697   :  { %v2698_v43 = vpop.permute.xlu0 %2697 }
0x3698   :  { %2701 = vst.msk [vmem:[#allocation15 + $0x38] sm:$0xf] %vm289_vm5, %v2698_v43 }
0x3699   :  { %v4304_v38 = vpop.permute.xlu1 %4303 }
0x369a   :  { %v4306_v32 = vmul.f32 %v4304_v38, %v4301_v59 }
0x369c   :  { %v4308_v37 = vadd.f32 %v4307_v60, %v4306_v32 }
0x369e   :  { %v4309_v46 = vpack.c.bf16 %v4308_v37, %v4308_v37  ;;  %4321 = vrot.lane.b32.xlu0 %v4308_v37, %s5116_s12 }
0x369f   :  { %v2953_v2 = vpop.permute.xlu0 %2952 }
0x36a0   :  { %2956 = vst.msk [vmem:[#allocation16 + $0x20] sm:$0xf] %vm289_vm5, %v2953_v2  ;;  %4311 = vrot.lane.b32.xlu1 %v4309_v46, %s5116_s12 }
0x36a1   :  { %v3038_v58 = vpop.permute.xlu1 %3037 }
0x36a2   :  { %3041 = vst.msk [vmem:[#allocation15 + $0x40] sm:$0xf] %vm289_vm5, %v3038_v58 }
0x36a7   :  { %v3208_v4 = vpop.permute.xlu0 %3207 }
0x36a8   :  { %3211 = vst.msk [vmem:[#allocation15 + $0x44] sm:$0xf] %vm289_vm5, %v3208_v4 }
0x36a9   :  { %v3293_v54 = vpop.permute.xlu1 %3292 }
0x36aa   :  { %3296 = vst.msk [vmem:[#allocation16 + $0x18] sm:$0xf] %vm289_vm5, %v3293_v54 }
0x36af   :  { %v3463_v42 = vpop.permute.xlu0 %3462 }
0x36b0   :  { %3466 = vst.msk [vmem:[#allocation16 + $0x14] sm:$0xf] %vm289_vm5, %v3463_v42 }
0x36b1   :  { %v3548_v31 = vpop.permute.xlu1 %3547 }
0x36b2   :  { %3551 = vst.msk [vmem:[#allocation15 + $0x4c] sm:$0xf] %vm289_vm5, %v3548_v31 }
0x36b7   :  { %v3718_v55 = vpop.permute.xlu0 %3717 }
0x36b8   :  { %3721 = vst.msk [vmem:[#allocation15 + $0x50] sm:$0xf] %vm289_vm5, %v3718_v55 }
0x36b9   :  { %v3803_v33 = vpop.permute.xlu1 %3802 }
0x36ba   :  { %3806 = vst.msk [vmem:[#allocation16 + $0xc] sm:$0xf] %vm289_vm5, %v3803_v33 }
0x36bf   :  { %v3973_v50 = vpop.permute.xlu0 %3972 }
0x36c0   :  { %3976 = vst.msk [vmem:[#allocation16 + $0x8] sm:$0xf] %vm289_vm5, %v3973_v50 }
0x36c1   :  { %v4058_v45 = vpop.permute.xlu1 %4057 }
0x36c2   :  { %4061 = vst.msk [vmem:[#allocation15 + $0x58] sm:$0xf] %vm289_vm5, %v4058_v45 }
0x36e6   :  { %v4317_v34 = vpop.permute.xlu2 %4316 }
0x36e7   :  { %4319 = vst.msk [vmem:[#allocation2] sm:$0xff] %vm146_vm0, %v4317_v34 }
0x3700   :  { %v4228_v57 = vpop.permute.xlu0 %4227 }
0x3701   :  { %4231 = vst.msk [vmem:[#allocation15 + $0x5c] sm:$0xf] %vm289_vm5, %v4228_v57 }
0x3702   :  { %4337 = dma.vmem_to_hbm [thread:$0]  %s4330_s5, 1536, %s4332_s9, [#allocation6], %s5107_s25, %s5107_s25, %s5108_s26  }
0x3710   :  { %v4322_v30 = vpop.permute.xlu0 %4321 }
0x3711   :  { %4324 = vst.msk [vmem:[#allocation3] sm:$0xff] %vm146_vm0, %v4322_v30 }
0x3712   :  { %v4312_v5 = vpop.permute.xlu1 %4311 }
0x3713   :  { %4314 = vst.msk [vmem:[#allocation16] sm:$0xf] %vm289_vm5, %v4312_v5 }
0x3714   :  { %4354 = dma.vmem_to_hbm [thread:$0]  %s4347_s8, 1536, %s4349_s3, [#allocation17], %s5107_s25, %s5107_s25, %s5108_s26  }
0x3715   :  { %5102 = dma.done.wait [#allocation6], 1536  }
0x3716   :  { %5103 = vsyncadd [#allocation6], 4294965760 }
0x3717   :  { %5104 = dma.done.wait [#allocation17], 1536  }
0x3718   :  { %5105 = vsyncadd [#allocation17], 4294965760 }
0x3719   :  { %4363 = vsyncpa [#allocation5], 1 }
0x371a   :  { %4364 = vsyncpa [#allocation8], 1 }
0x371b   :  { %4365 = vsyncpa [#allocation11], 1 }
0x371c   :  { %4366 = vsyncpa [#allocation14], 1 }
0x371d   :  { %4367 = vsyncpa [#allocation6], 1 }
0x371e   :  { %4368 = vsyncpa [#allocation17], 1 }

</bundles_post_ra>
